<compile_context>
chip_gen: v7x
topology: tpu7x:2x2x1
jax: 0.10.0
libtpu: 0.0.40
codegen_flags: <defaults>
</compile_context>

<pallas_src>
import jax
import jax.numpy as jnp
from jax.experimental import pallas as pl
from jax.experimental.pallas import tpu as pltpu


MXU_DTYPE = jnp.bfloat16   # matmul operand dtype (accumulation stays f32)
_BN_EPS = 1e-5


# ----------------------------------------------------------------------------
# Fused dense-block kernel (all layers, one image per grid step)
# ----------------------------------------------------------------------------
def _make_dense_block_kernel(num_layers, c0, growth, H, W):
    def kernel(*refs):
        x_ref = refs[0]
        layer_refs = refs[1:1 + 5 * num_layers]
        o_ref = refs[1 + 5 * num_layers]
        feats = refs[2 + 5 * num_layers]          # (H, W, C_total) f32 VMEM
        acc = refs[3 + 5 * num_layers]            # (H+2, W+2, G) f32 VMEM

        # Seed the feature buffer with the block input.
        feats[:, :, 0:c0] = x_ref[0]

        for i in range(num_layers):
            s1, b1, w1, b2, w2 = layer_refs[5 * i:5 * i + 5]
            cin = c0 + i * growth

            # bn1 + relu1 on the concatenated features (read in place from VMEM).
            a = jnp.maximum(feats[:, :, 0:cin] * s1[...] + b1[...], 0.0)

            # 1x1 conv (bn2 scale folded into w1), then shift2 + relu2.
            z = jax.lax.dot_general(
                a.astype(MXU_DTYPE), w1[...],
                dimension_numbers=(((2,), (0,)), ((), ())),
                preferred_element_type=jnp.float32)            # (H, W, Cmid)
            bott = jnp.maximum(z + b2[...], 0.0).astype(MXU_DTYPE)

            # 3x3 "same" conv: fixed (unshifted) reads of `bott`, shifted
            # accumulation writes into a padded VMEM accumulator; out-of-range
            # contributions land in the ring and are discarded.
            acc[...] = jnp.zeros_like(acc)
            for ky in range(3):
                for kx in range(3):
                    contrib = jax.lax.dot_general(              # (H, W, G) f32
                        bott, w2[ky, kx],
                        dimension_numbers=(((2,), (0,)), ((), ())),
                        preferred_element_type=jnp.float32)
                    acc[2 - ky:2 - ky + H, 2 - kx:2 - kx + W, :] += contrib

            # "Concatenation": write the new features into their channel slice.
            feats[:, :, cin:cin + growth] = acc[1:H + 1, 1:W + 1, :]

        o_ref[0] = feats[...].astype(o_ref.dtype)

    return kernel


def _vmem_limit_bytes(H, W, c0, num_layers, cmid, growth):
    f32 = 4
    mxu = jnp.dtype(MXU_DTYPE).itemsize
    c_total = c0 + num_layers * growth
    io = 2 * H * W * (c0 + c_total) * f32                       # double-buffered tiles
    wts = 0
    for i in range(num_layers):
        cin = c0 + i * growth
        wts += cin * cmid * mxu + 9 * cmid * growth * mxu + (2 * cin + cmid) * f32
    scratch = H * W * c_total * f32 + (H + 2) * (W + 2) * growth * f32
    live = H * W * (c_total + 2 * cmid) * f32                   # a / z / bott headroom
    est = io + 2 * wts + scratch + live
    # >= 32 MiB (raises v5e's 16 MiB scoped default), <= 48 MiB (headroom on
    # v7x's 64 MiB VMEM), and always >= 4x the analytic estimate.
    return int(min(48 * 2**20, max(32 * 2**20, 4 * est)))


# ----------------------------------------------------------------------------
# Parameter construction (deterministic, synthetic)
# ----------------------------------------------------------------------------
def _bn_scale_shift(key, c):
    k1, k2, k3, k4 = jax.random.split(key, 4)
    gamma = 1.0 + 0.1 * jax.random.normal(k1, (c,), jnp.float32)
    beta = 0.1 * jax.random.normal(k2, (c,), jnp.float32)
    mean = 0.1 * jax.random.normal(k3, (c,), jnp.float32)
    var = 1.0 + 0.1 * jnp.abs(jax.random.normal(k4, (c,), jnp.float32))
    scale = gamma / jnp.sqrt(var + _BN_EPS)
    shift = beta - mean * scale
    return scale.reshape(1, c), shift.reshape(1, c)


def make_dense_block_params(key, num_layers, num_input_features, bn_size, growth_rate):
    params = []
    for i in range(num_layers):
        cin = num_input_features + i * growth_rate
        cmid = bn_size * growth_rate
        key, k_bn1, k_w1, k_bn2, k_w2 = jax.random.split(key, 5)
        scale1, shift1 = _bn_scale_shift(k_bn1, cin)
        w1 = jax.random.normal(k_w1, (cin, cmid), jnp.float32) * (2.0 / cin) ** 0.5
        scale2, shift2 = _bn_scale_shift(k_bn2, cmid)
        w2 = jax.random.normal(k_w2, (3, 3, cmid, growth_rate), jnp.float32) * (
            2.0 / (9 * cmid)) ** 0.5
        params.append(dict(scale1=scale1, shift1=shift1, w1=w1,
                           scale2=scale2, shift2=shift2, w2=w2))
    return params


# ----------------------------------------------------------------------------
# Dense block forward (Pallas) and a pure-JAX f32 reference
# ----------------------------------------------------------------------------
def dense_block_forward(x_nchw, params):
    x = jnp.transpose(x_nchw, (0, 2, 3, 1))                     # NCHW -> NHWC
    N, H, W, c0 = x.shape
    num_layers = len(params)
    cmid = params[0]["w1"].shape[1]
    growth = params[0]["w2"].shape[-1]
    c_total = c0 + num_layers * growth

    flat_inputs = [x]
    in_specs = [pl.BlockSpec((1, H, W, c0), lambda n: (n, 0, 0, 0))]
    for p in params:
        cin = p["w1"].shape[0]
        # Fold bn2's scale into the 1x1 weight; cast MXU operands once here.
        w1_folded = (p["w1"] * p["scale2"]).astype(MXU_DTYPE)
        w2 = p["w2"].astype(MXU_DTYPE)
        flat_inputs += [p["scale1"], p["shift1"], w1_folded, p["shift2"], w2]
        in_specs += [
            pl.BlockSpec((1, cin), lambda n: (0, 0)),
            pl.BlockSpec((1, cin), lambda n: (0, 0)),
            pl.BlockSpec((cin, cmid), lambda n: (0, 0)),
            pl.BlockSpec((1, cmid), lambda n: (0, 0)),
            pl.BlockSpec((3, 3, cmid, growth), lambda n: (0, 0, 0, 0)),
        ]

    out = pl.pallas_call(
        _make_dense_block_kernel(num_layers, c0, growth, H, W),
        out_shape=jax.ShapeDtypeStruct((N, H, W, c_total), x.dtype),
        grid_spec=pltpu.PrefetchScalarGridSpec(
            num_scalar_prefetch=0,
            grid=(N,),
            in_specs=in_specs,
            out_specs=pl.BlockSpec((1, H, W, c_total), lambda n: (n, 0, 0, 0)),
            scratch_shapes=[
                pltpu.VMEM((H, W, c_total), jnp.float32),        # feature buffer
                pltpu.VMEM((H + 2, W + 2, growth), jnp.float32),  # conv accumulator
            ],
        ),
        compiler_params=pltpu.CompilerParams(
            dimension_semantics=("parallel",),
            vmem_limit_bytes=_vmem_limit_bytes(H, W, c0, num_layers, cmid, growth),
        ),
    )(*flat_inputs)
    return jnp.transpose(out, (0, 3, 1, 2))                     # NHWC -> NCHW


def dense_block_reference(x_nchw, params):
    x = jnp.transpose(x_nchw, (0, 2, 3, 1))
    feats = [x]
    for p in params:
        cat = jnp.concatenate(feats, axis=-1)
        a = jnp.maximum(cat * p["scale1"] + p["shift1"], 0.0)
        b = jnp.einsum("nhwc,co->nhwo", a, p["w1"])
        a2 = jnp.maximum(b * p["scale2"] + p["shift2"], 0.0)
        new = jax.lax.conv_general_dilated(
            a2, p["w2"], window_strides=(1, 1), padding="SAME",
            dimension_numbers=("NHWC", "HWIO", "NHWC"))
        feats.append(new)
    out = jnp.concatenate(feats, axis=-1)
    return jnp.transpose(out, (0, 3, 1, 2))


# ----------------------------------------------------------------------------
if __name__ == "__main__":
    num_layers = 3
    num_input_features = 4
    bn_size = 2
    growth_rate = 4
    drop_rate = 0.0   # identity dropout -> nothing to model in-kernel

    key = jax.random.PRNGKey(0)
    k_x, k_p = jax.random.split(key)
    x = jax.random.normal(k_x, (2, num_input_features, 16, 16), jnp.float32)  # NCHW
    params = make_dense_block_params(k_p, num_layers, num_input_features,
                                     bn_size, growth_rate)

    out = jax.block_until_ready(dense_block_forward(x, params))
    ref = jax.block_until_ready(dense_block_reference(x, params))

    expected_c = num_input_features + num_layers * growth_rate
    assert out.shape == (2, expected_c, 16, 16), out.shape
    # Tolerance accounts for bf16 MXU operands vs the f32 reference.
    assert jnp.allclose(out, ref, rtol=5e-2, atol=1e-1), float(
        jnp.max(jnp.abs(out - ref)))
    print("KERNEL_OK")
</pallas_src>

<mosaic_0001>
module attributes {stable_mosaic.version = 11 : i64} {
  func.func @kernel(%arg0: i32, %arg1: memref<1x16x16x4xf32, #tpu.memory_space<vmem>>, %arg2: memref<1x4xf32, #tpu.memory_space<vmem>>, %arg3: memref<1x4xf32, #tpu.memory_space<vmem>>, %arg4: memref<4x8xbf16, #tpu.memory_space<vmem>>, %arg5: memref<1x8xf32, #tpu.memory_space<vmem>>, %arg6: memref<3x3x8x4xbf16, #tpu.memory_space<vmem>>, %arg7: memref<1x8xf32, #tpu.memory_space<vmem>>, %arg8: memref<1x8xf32, #tpu.memory_space<vmem>>, %arg9: memref<8x8xbf16, #tpu.memory_space<vmem>>, %arg10: memref<1x8xf32, #tpu.memory_space<vmem>>, %arg11: memref<3x3x8x4xbf16, #tpu.memory_space<vmem>>, %arg12: memref<1x12xf32, #tpu.memory_space<vmem>>, %arg13: memref<1x12xf32, #tpu.memory_space<vmem>>, %arg14: memref<12x8xbf16, #tpu.memory_space<vmem>>, %arg15: memref<1x8xf32, #tpu.memory_space<vmem>>, %arg16: memref<3x3x8x4xbf16, #tpu.memory_space<vmem>>, %arg17: memref<1x16x16x16xf32, #tpu.memory_space<vmem>>, %arg18: memref<16x16x16xf32, #tpu.memory_space<vmem>>, %arg19: memref<18x18x4xf32, #tpu.memory_space<vmem>>) attributes {dimension_semantics = [#tpu.dimension_semantics<parallel>], iteration_bounds = array<i64: 2>, scalar_prefetch = 0 : i64, scratch_operands = 2 : i64, tpu.core_type = #tpu.core_type<tc>, window_params = [{transform_indices = @transform_0, window_bounds = array<i64: 1, 16, 16, 4>}, {pipeline_mode = #tpu.pipeline_mode<synchronous>, transform_indices = @transform_1, window_bounds = array<i64: 1, 4>}, {pipeline_mode = #tpu.pipeline_mode<synchronous>, transform_indices = @transform_2, window_bounds = array<i64: 1, 4>}, {pipeline_mode = #tpu.pipeline_mode<synchronous>, transform_indices = @transform_3, window_bounds = array<i64: 4, 8>}, {pipeline_mode = #tpu.pipeline_mode<synchronous>, transform_indices = @transform_4, window_bounds = array<i64: 1, 8>}, {pipeline_mode = #tpu.pipeline_mode<synchronous>, transform_indices = @transform_5, window_bounds = array<i64: 3, 3, 8, 4>}, {pipeline_mode = #tpu.pipeline_mode<synchronous>, transform_indices = @transform_6, window_bounds = array<i64: 1, 8>}, {pipeline_mode = #tpu.pipeline_mode<synchronous>, transform_indices = @transform_7, window_bounds = array<i64: 1, 8>}, {pipeline_mode = #tpu.pipeline_mode<synchronous>, transform_indices = @transform_8, window_bounds = array<i64: 8, 8>}, {pipeline_mode = #tpu.pipeline_mode<synchronous>, transform_indices = @transform_9, window_bounds = array<i64: 1, 8>}, {pipeline_mode = #tpu.pipeline_mode<synchronous>, transform_indices = @transform_10, window_bounds = array<i64: 3, 3, 8, 4>}, {pipeline_mode = #tpu.pipeline_mode<synchronous>, transform_indices = @transform_11, window_bounds = array<i64: 1, 12>}, {pipeline_mode = #tpu.pipeline_mode<synchronous>, transform_indices = @transform_12, window_bounds = array<i64: 1, 12>}, {pipeline_mode = #tpu.pipeline_mode<synchronous>, transform_indices = @transform_13, window_bounds = array<i64: 12, 8>}, {pipeline_mode = #tpu.pipeline_mode<synchronous>, transform_indices = @transform_14, window_bounds = array<i64: 1, 8>}, {pipeline_mode = #tpu.pipeline_mode<synchronous>, transform_indices = @transform_15, window_bounds = array<i64: 3, 3, 8, 4>}, {transform_indices = @transform_16, window_bounds = array<i64: 1, 16, 16, 16>}]} {
    %c0 = arith.constant 0 : index
    %c0_0 = arith.constant 0 : index
    %c0_1 = arith.constant 0 : index
    %c0_2 = arith.constant 0 : index
    %0 = vector.load %arg1[%c0, %c0_0, %c0_1, %c0_2] : memref<1x16x16x4xf32, #tpu.memory_space<vmem>>, vector<1x16x16x4xf32>
    %1 = vector.shape_cast %0 : vector<1x16x16x4xf32> to vector<16x16x4xf32>
    %c0_3 = arith.constant 0 : index
    %c0_4 = arith.constant 0 : index
    %c0_5 = arith.constant 0 : index
    %2 = vector.load %arg18[%c0_3, %c0_4, %c0_5] : memref<16x16x16xf32, #tpu.memory_space<vmem>>, vector<16x16x4xf32>
    tpu.vector_store %arg18[%c0_3, %c0_4, %c0_5], %1 {strides = array<i32>} : memref<16x16x16xf32, #tpu.memory_space<vmem>>, vector<16x16x4xf32>,
    %c0_6 = arith.constant 0 : index
    %c0_7 = arith.constant 0 : index
    %c0_8 = arith.constant 0 : index
    %3 = vector.load %arg18[%c0_6, %c0_7, %c0_8] : memref<16x16x16xf32, #tpu.memory_space<vmem>>, vector<16x16x4xf32>
    %c0_9 = arith.constant 0 : index
    %c0_10 = arith.constant 0 : index
    %4 = vector.load %arg2[%c0_9, %c0_10] : memref<1x4xf32, #tpu.memory_space<vmem>>, vector<1x4xf32>
    %5 = vector.shape_cast %4 : vector<1x4xf32> to vector<1x1x4xf32>
    %6 = vector.broadcast %5 : vector<1x1x4xf32> to vector<16x16x4xf32>
    %7 = arith.mulf %3, %6 : vector<16x16x4xf32>
    %c0_11 = arith.constant 0 : index
    %c0_12 = arith.constant 0 : index
    %8 = vector.load %arg3[%c0_11, %c0_12] : memref<1x4xf32, #tpu.memory_space<vmem>>, vector<1x4xf32>
    %9 = vector.shape_cast %8 : vector<1x4xf32> to vector<1x1x4xf32>
    %10 = vector.broadcast %9 : vector<1x1x4xf32> to vector<16x16x4xf32>
    %11 = arith.addf %7, %10 : vector<16x16x4xf32>
    %cst = arith.constant 0.000000e+00 : f32
    %12 = vector.broadcast %cst : f32 to vector<16x16x4xf32>
    %13 = arith.maximumf %11, %12 : vector<16x16x4xf32>
    %14 = arith.truncf %13 : vector<16x16x4xf32> to vector<16x16x4xbf16>
    %c0_13 = arith.constant 0 : index
    %c0_14 = arith.constant 0 : index
    %15 = vector.load %arg4[%c0_13, %c0_14] : memref<4x8xbf16, #tpu.memory_space<vmem>>, vector<4x8xbf16>
    %cst_15 = arith.constant dense<0.000000e+00> : vector<16x16x8xf32>
    %16 = tpu.matmul %14, %15, %cst_15 {dimension_numbers = #tpu.dot_dimension_numbers<[2], [0], [0, 1], [1], [0, 0, 0, 1, 1, 1], [], []>} : vector<16x16x4xbf16>, vector<4x8xbf16>, vector<16x16x8xf32> -> vector<16x16x8xf32>
    %c0_16 = arith.constant 0 : index
    %c0_17 = arith.constant 0 : index
    %17 = vector.load %arg5[%c0_16, %c0_17] : memref<1x8xf32, #tpu.memory_space<vmem>>, vector<1x8xf32>
    %18 = vector.shape_cast %17 : vector<1x8xf32> to vector<1x1x8xf32>
    %19 = vector.broadcast %18 : vector<1x1x8xf32> to vector<16x16x8xf32>
    %20 = arith.addf %16, %19 : vector<16x16x8xf32>
    %cst_18 = arith.constant 0.000000e+00 : f32
    %21 = vector.broadcast %cst_18 : f32 to vector<16x16x8xf32>
    %22 = arith.maximumf %20, %21 : vector<16x16x8xf32>
    %23 = arith.truncf %22 : vector<16x16x8xf32> to vector<16x16x8xbf16>
    %cst_19 = arith.constant 0.000000e+00 : f32
    %24 = vector.broadcast %cst_19 : f32 to vector<18x18x4xf32>
    %c0_20 = arith.constant 0 : index
    %c0_21 = arith.constant 0 : index
    %c0_22 = arith.constant 0 : index
    %25 = vector.load %arg19[%c0_20, %c0_21, %c0_22] : memref<18x18x4xf32, #tpu.memory_space<vmem>>, vector<18x18x4xf32>
    tpu.vector_store %arg19[%c0_20, %c0_21, %c0_22], %24 {strides = array<i32>} : memref<18x18x4xf32, #tpu.memory_space<vmem>>, vector<18x18x4xf32>,
    %c0_23 = arith.constant 0 : index
    %c0_24 = arith.constant 0 : index
    %c0_25 = arith.constant 0 : index
    %c0_26 = arith.constant 0 : index
    %26 = vector.load %arg6[%c0_23, %c0_24, %c0_25, %c0_26] : memref<3x3x8x4xbf16, #tpu.memory_space<vmem>>, vector<1x1x8x4xbf16>
    %27 = vector.shape_cast %26 : vector<1x1x8x4xbf16> to vector<8x4xbf16>
    %cst_27 = arith.constant dense<0.000000e+00> : vector<16x16x4xf32>
    %28 = tpu.matmul %23, %27, %cst_27 {dimension_numbers = #tpu.dot_dimension_numbers<[2], [0], [0, 1], [1], [0, 0, 0, 1, 1, 1], [], []>} : vector<16x16x8xbf16>, vector<8x4xbf16>, vector<16x16x4xf32> -> vector<16x16x4xf32>
    %c2 = arith.constant 2 : index
    %c2_28 = arith.constant 2 : index
    %c0_29 = arith.constant 0 : index
    %29 = vector.load %arg19[%c2, %c2_28, %c0_29] : memref<18x18x4xf32, #tpu.memory_space<vmem>>, vector<16x16x4xf32>
    %30 = arith.addf %29, %28 : vector<16x16x4xf32>
    %c2_30 = arith.constant 2 : index
    %c2_31 = arith.constant 2 : index
    %c0_32 = arith.constant 0 : index
    %31 = vector.load %arg19[%c2_30, %c2_31, %c0_32] : memref<18x18x4xf32, #tpu.memory_space<vmem>>, vector<16x16x4xf32>
    tpu.vector_store %arg19[%c2_30, %c2_31, %c0_32], %30 {strides = array<i32>} : memref<18x18x4xf32, #tpu.memory_space<vmem>>, vector<16x16x4xf32>,
    %c0_33 = arith.constant 0 : index
    %c1 = arith.constant 1 : index
    %c0_34 = arith.constant 0 : index
    %c0_35 = arith.constant 0 : index
    %32 = vector.load %arg6[%c0_33, %c1, %c0_34, %c0_35] : memref<3x3x8x4xbf16, #tpu.memory_space<vmem>>, vector<1x1x8x4xbf16>
    %33 = vector.shape_cast %32 : vector<1x1x8x4xbf16> to vector<8x4xbf16>
    %cst_36 = arith.constant dense<0.000000e+00> : vector<16x16x4xf32>
    %34 = tpu.matmul %23, %33, %cst_36 {dimension_numbers = #tpu.dot_dimension_numbers<[2], [0], [0, 1], [1], [0, 0, 0, 1, 1, 1], [], []>} : vector<16x16x8xbf16>, vector<8x4xbf16>, vector<16x16x4xf32> -> vector<16x16x4xf32>
    %c2_37 = arith.constant 2 : index
    %c1_38 = arith.constant 1 : index
    %c0_39 = arith.constant 0 : index
    %35 = vector.load %arg19[%c2_37, %c1_38, %c0_39] : memref<18x18x4xf32, #tpu.memory_space<vmem>>, vector<16x16x4xf32>
    %36 = arith.addf %35, %34 : vector<16x16x4xf32>
    %c2_40 = arith.constant 2 : index
    %c1_41 = arith.constant 1 : index
    %c0_42 = arith.constant 0 : index
    %37 = vector.load %arg19[%c2_40, %c1_41, %c0_42] : memref<18x18x4xf32, #tpu.memory_space<vmem>>, vector<16x16x4xf32>
    tpu.vector_store %arg19[%c2_40, %c1_41, %c0_42], %36 {strides = array<i32>} : memref<18x18x4xf32, #tpu.memory_space<vmem>>, vector<16x16x4xf32>,
    %c0_43 = arith.constant 0 : index
    %c2_44 = arith.constant 2 : index
    %c0_45 = arith.constant 0 : index
    %c0_46 = arith.constant 0 : index
    %38 = vector.load %arg6[%c0_43, %c2_44, %c0_45, %c0_46] : memref<3x3x8x4xbf16, #tpu.memory_space<vmem>>, vector<1x1x8x4xbf16>
    %39 = vector.shape_cast %38 : vector<1x1x8x4xbf16> to vector<8x4xbf16>
    %cst_47 = arith.constant dense<0.000000e+00> : vector<16x16x4xf32>
    %40 = tpu.matmul %23, %39, %cst_47 {dimension_numbers = #tpu.dot_dimension_numbers<[2], [0], [0, 1], [1], [0, 0, 0, 1, 1, 1], [], []>} : vector<16x16x8xbf16>, vector<8x4xbf16>, vector<16x16x4xf32> -> vector<16x16x4xf32>
    %c2_48 = arith.constant 2 : index
    %c0_49 = arith.constant 0 : index
    %c0_50 = arith.constant 0 : index
    %41 = vector.load %arg19[%c2_48, %c0_49, %c0_50] : memref<18x18x4xf32, #tpu.memory_space<vmem>>, vector<16x16x4xf32>
    %42 = arith.addf %41, %40 : vector<16x16x4xf32>
    %c2_51 = arith.constant 2 : index
    %c0_52 = arith.constant 0 : index
    %c0_53 = arith.constant 0 : index
    %43 = vector.load %arg19[%c2_51, %c0_52, %c0_53] : memref<18x18x4xf32, #tpu.memory_space<vmem>>, vector<16x16x4xf32>
    tpu.vector_store %arg19[%c2_51, %c0_52, %c0_53], %42 {strides = array<i32>} : memref<18x18x4xf32, #tpu.memory_space<vmem>>, vector<16x16x4xf32>,
    %c1_54 = arith.constant 1 : index
    %c0_55 = arith.constant 0 : index
    %c0_56 = arith.constant 0 : index
    %c0_57 = arith.constant 0 : index
    %44 = vector.load %arg6[%c1_54, %c0_55, %c0_56, %c0_57] : memref<3x3x8x4xbf16, #tpu.memory_space<vmem>>, vector<1x1x8x4xbf16>
    %45 = vector.shape_cast %44 : vector<1x1x8x4xbf16> to vector<8x4xbf16>
    %cst_58 = arith.constant dense<0.000000e+00> : vector<16x16x4xf32>
    %46 = tpu.matmul %23, %45, %cst_58 {dimension_numbers = #tpu.dot_dimension_numbers<[2], [0], [0, 1], [1], [0, 0, 0, 1, 1, 1], [], []>} : vector<16x16x8xbf16>, vector<8x4xbf16>, vector<16x16x4xf32> -> vector<16x16x4xf32>
    %c1_59 = arith.constant 1 : index
    %c2_60 = arith.constant 2 : index
    %c0_61 = arith.constant 0 : index
    %47 = vector.load %arg19[%c1_59, %c2_60, %c0_61] : memref<18x18x4xf32, #tpu.memory_space<vmem>>, vector<16x16x4xf32>
    %48 = arith.addf %47, %46 : vector<16x16x4xf32>
    %c1_62 = arith.constant 1 : index
    %c2_63 = arith.constant 2 : index
    %c0_64 = arith.constant 0 : index
    %49 = vector.load %arg19[%c1_62, %c2_63, %c0_64] : memref<18x18x4xf32, #tpu.memory_space<vmem>>, vector<16x16x4xf32>
    tpu.vector_store %arg19[%c1_62, %c2_63, %c0_64], %48 {strides = array<i32>} : memref<18x18x4xf32, #tpu.memory_space<vmem>>, vector<16x16x4xf32>,
    %c1_65 = arith.constant 1 : index
    %c1_66 = arith.constant 1 : index
    %c0_67 = arith.constant 0 : index
    %c0_68 = arith.constant 0 : index
    %50 = vector.load %arg6[%c1_65, %c1_66, %c0_67, %c0_68] : memref<3x3x8x4xbf16, #tpu.memory_space<vmem>>, vector<1x1x8x4xbf16>
    %51 = vector.shape_cast %50 : vector<1x1x8x4xbf16> to vector<8x4xbf16>
    %cst_69 = arith.constant dense<0.000000e+00> : vector<16x16x4xf32>
    %52 = tpu.matmul %23, %51, %cst_69 {dimension_numbers = #tpu.dot_dimension_numbers<[2], [0], [0, 1], [1], [0, 0, 0, 1, 1, 1], [], []>} : vector<16x16x8xbf16>, vector<8x4xbf16>, vector<16x16x4xf32> -> vector<16x16x4xf32>
    %c1_70 = arith.constant 1 : index
    %c1_71 = arith.constant 1 : index
    %c0_72 = arith.constant 0 : index
    %53 = vector.load %arg19[%c1_70, %c1_71, %c0_72] : memref<18x18x4xf32, #tpu.memory_space<vmem>>, vector<16x16x4xf32>
    %54 = arith.addf %53, %52 : vector<16x16x4xf32>
    %c1_73 = arith.constant 1 : index
    %c1_74 = arith.constant 1 : index
    %c0_75 = arith.constant 0 : index
    %55 = vector.load %arg19[%c1_73, %c1_74, %c0_75] : memref<18x18x4xf32, #tpu.memory_space<vmem>>, vector<16x16x4xf32>
    tpu.vector_store %arg19[%c1_73, %c1_74, %c0_75], %54 {strides = array<i32>} : memref<18x18x4xf32, #tpu.memory_space<vmem>>, vector<16x16x4xf32>,
    %c1_76 = arith.constant 1 : index
    %c2_77 = arith.constant 2 : index
    %c0_78 = arith.constant 0 : index
    %c0_79 = arith.constant 0 : index
    %56 = vector.load %arg6[%c1_76, %c2_77, %c0_78, %c0_79] : memref<3x3x8x4xbf16, #tpu.memory_space<vmem>>, vector<1x1x8x4xbf16>
    %57 = vector.shape_cast %56 : vector<1x1x8x4xbf16> to vector<8x4xbf16>
    %cst_80 = arith.constant dense<0.000000e+00> : vector<16x16x4xf32>
    %58 = tpu.matmul %23, %57, %cst_80 {dimension_numbers = #tpu.dot_dimension_numbers<[2], [0], [0, 1], [1], [0, 0, 0, 1, 1, 1], [], []>} : vector<16x16x8xbf16>, vector<8x4xbf16>, vector<16x16x4xf32> -> vector<16x16x4xf32>
    %c1_81 = arith.constant 1 : index
    %c0_82 = arith.constant 0 : index
    %c0_83 = arith.constant 0 : index
    %59 = vector.load %arg19[%c1_81, %c0_82, %c0_83] : memref<18x18x4xf32, #tpu.memory_space<vmem>>, vector<16x16x4xf32>
    %60 = arith.addf %59, %58 : vector<16x16x4xf32>
    %c1_84 = arith.constant 1 : index
    %c0_85 = arith.constant 0 : index
    %c0_86 = arith.constant 0 : index
    %61 = vector.load %arg19[%c1_84, %c0_85, %c0_86] : memref<18x18x4xf32, #tpu.memory_space<vmem>>, vector<16x16x4xf32>
    tpu.vector_store %arg19[%c1_84, %c0_85, %c0_86], %60 {strides = array<i32>} : memref<18x18x4xf32, #tpu.memory_space<vmem>>, vector<16x16x4xf32>,
    %c2_87 = arith.constant 2 : index
    %c0_88 = arith.constant 0 : index
    %c0_89 = arith.constant 0 : index
    %c0_90 = arith.constant 0 : index
    %62 = vector.load %arg6[%c2_87, %c0_88, %c0_89, %c0_90] : memref<3x3x8x4xbf16, #tpu.memory_space<vmem>>, vector<1x1x8x4xbf16>
    %63 = vector.shape_cast %62 : vector<1x1x8x4xbf16> to vector<8x4xbf16>
    %cst_91 = arith.constant dense<0.000000e+00> : vector<16x16x4xf32>
    %64 = tpu.matmul %23, %63, %cst_91 {dimension_numbers = #tpu.dot_dimension_numbers<[2], [0], [0, 1], [1], [0, 0, 0, 1, 1, 1], [], []>} : vector<16x16x8xbf16>, vector<8x4xbf16>, vector<16x16x4xf32> -> vector<16x16x4xf32>
    %c0_92 = arith.constant 0 : index
    %c2_93 = arith.constant 2 : index
    %c0_94 = arith.constant 0 : index
    %65 = vector.load %arg19[%c0_92, %c2_93, %c0_94] : memref<18x18x4xf32, #tpu.memory_space<vmem>>, vector<16x16x4xf32>
    %66 = arith.addf %65, %64 : vector<16x16x4xf32>
    %c0_95 = arith.constant 0 : index
    %c2_96 = arith.constant 2 : index
    %c0_97 = arith.constant 0 : index
    %67 = vector.load %arg19[%c0_95, %c2_96, %c0_97] : memref<18x18x4xf32, #tpu.memory_space<vmem>>, vector<16x16x4xf32>
    tpu.vector_store %arg19[%c0_95, %c2_96, %c0_97], %66 {strides = array<i32>} : memref<18x18x4xf32, #tpu.memory_space<vmem>>, vector<16x16x4xf32>,
    %c2_98 = arith.constant 2 : index
    %c1_99 = arith.constant 1 : index
    %c0_100 = arith.constant 0 : index
    %c0_101 = arith.constant 0 : index
    %68 = vector.load %arg6[%c2_98, %c1_99, %c0_100, %c0_101] : memref<3x3x8x4xbf16, #tpu.memory_space<vmem>>, vector<1x1x8x4xbf16>
    %69 = vector.shape_cast %68 : vector<1x1x8x4xbf16> to vector<8x4xbf16>
    %cst_102 = arith.constant dense<0.000000e+00> : vector<16x16x4xf32>
    %70 = tpu.matmul %23, %69, %cst_102 {dimension_numbers = #tpu.dot_dimension_numbers<[2], [0], [0, 1], [1], [0, 0, 0, 1, 1, 1], [], []>} : vector<16x16x8xbf16>, vector<8x4xbf16>, vector<16x16x4xf32> -> vector<16x16x4xf32>
    %c0_103 = arith.constant 0 : index
    %c1_104 = arith.constant 1 : index
    %c0_105 = arith.constant 0 : index
    %71 = vector.load %arg19[%c0_103, %c1_104, %c0_105] : memref<18x18x4xf32, #tpu.memory_space<vmem>>, vector<16x16x4xf32>
    %72 = arith.addf %71, %70 : vector<16x16x4xf32>
    %c0_106 = arith.constant 0 : index
    %c1_107 = arith.constant 1 : index
    %c0_108 = arith.constant 0 : index
    %73 = vector.load %arg19[%c0_106, %c1_107, %c0_108] : memref<18x18x4xf32, #tpu.memory_space<vmem>>, vector<16x16x4xf32>
    tpu.vector_store %arg19[%c0_106, %c1_107, %c0_108], %72 {strides = array<i32>} : memref<18x18x4xf32, #tpu.memory_space<vmem>>, vector<16x16x4xf32>,
    %c2_109 = arith.constant 2 : index
    %c2_110 = arith.constant 2 : index
    %c0_111 = arith.constant 0 : index
    %c0_112 = arith.constant 0 : index
    %74 = vector.load %arg6[%c2_109, %c2_110, %c0_111, %c0_112] : memref<3x3x8x4xbf16, #tpu.memory_space<vmem>>, vector<1x1x8x4xbf16>
    %75 = vector.shape_cast %74 : vector<1x1x8x4xbf16> to vector<8x4xbf16>
    %cst_113 = arith.constant dense<0.000000e+00> : vector<16x16x4xf32>
    %76 = tpu.matmul %23, %75, %cst_113 {dimension_numbers = #tpu.dot_dimension_numbers<[2], [0], [0, 1], [1], [0, 0, 0, 1, 1, 1], [], []>} : vector<16x16x8xbf16>, vector<8x4xbf16>, vector<16x16x4xf32> -> vector<16x16x4xf32>
    %c0_114 = arith.constant 0 : index
    %c0_115 = arith.constant 0 : index
    %c0_116 = arith.constant 0 : index
    %77 = vector.load %arg19[%c0_114, %c0_115, %c0_116] : memref<18x18x4xf32, #tpu.memory_space<vmem>>, vector<16x16x4xf32>
    %78 = arith.addf %77, %76 : vector<16x16x4xf32>
    %c0_117 = arith.constant 0 : index
    %c0_118 = arith.constant 0 : index
    %c0_119 = arith.constant 0 : index
    %79 = vector.load %arg19[%c0_117, %c0_118, %c0_119] : memref<18x18x4xf32, #tpu.memory_space<vmem>>, vector<16x16x4xf32>
    tpu.vector_store %arg19[%c0_117, %c0_118, %c0_119], %78 {strides = array<i32>} : memref<18x18x4xf32, #tpu.memory_space<vmem>>, vector<16x16x4xf32>,
    %c1_120 = arith.constant 1 : index
    %c1_121 = arith.constant 1 : index
    %c0_122 = arith.constant 0 : index
    %80 = vector.load %arg19[%c1_120, %c1_121, %c0_122] : memref<18x18x4xf32, #tpu.memory_space<vmem>>, vector<16x16x4xf32>
    %c0_123 = arith.constant 0 : index
    %c0_124 = arith.constant 0 : index
    %c4 = arith.constant 4 : index
    %81 = vector.load %arg18[%c0_123, %c0_124, %c4] : memref<16x16x16xf32, #tpu.memory_space<vmem>>, vector<16x16x4xf32>
    tpu.vector_store %arg18[%c0_123, %c0_124, %c4], %80 {strides = array<i32>} : memref<16x16x16xf32, #tpu.memory_space<vmem>>, vector<16x16x4xf32>,
    %c0_125 = arith.constant 0 : index
    %c0_126 = arith.constant 0 : index
    %c0_127 = arith.constant 0 : index
    %82 = vector.load %arg18[%c0_125, %c0_126, %c0_127] : memref<16x16x16xf32, #tpu.memory_space<vmem>>, vector<16x16x8xf32>
    %c0_128 = arith.constant 0 : index
    %c0_129 = arith.constant 0 : index
    %83 = vector.load %arg7[%c0_128, %c0_129] : memref<1x8xf32, #tpu.memory_space<vmem>>, vector<1x8xf32>
    %84 = vector.shape_cast %83 : vector<1x8xf32> to vector<1x1x8xf32>
    %85 = vector.broadcast %84 : vector<1x1x8xf32> to vector<16x16x8xf32>
    %86 = arith.mulf %82, %85 : vector<16x16x8xf32>
    %c0_130 = arith.constant 0 : index
    %c0_131 = arith.constant 0 : index
    %87 = vector.load %arg8[%c0_130, %c0_131] : memref<1x8xf32, #tpu.memory_space<vmem>>, vector<1x8xf32>
    %88 = vector.shape_cast %87 : vector<1x8xf32> to vector<1x1x8xf32>
    %89 = vector.broadcast %88 : vector<1x1x8xf32> to vector<16x16x8xf32>
    %90 = arith.addf %86, %89 : vector<16x16x8xf32>
    %cst_132 = arith.constant 0.000000e+00 : f32
    %91 = vector.broadcast %cst_132 : f32 to vector<16x16x8xf32>
    %92 = arith.maximumf %90, %91 : vector<16x16x8xf32>
    %93 = arith.truncf %92 : vector<16x16x8xf32> to vector<16x16x8xbf16>
    %c0_133 = arith.constant 0 : index
    %c0_134 = arith.constant 0 : index
    %94 = vector.load %arg9[%c0_133, %c0_134] : memref<8x8xbf16, #tpu.memory_space<vmem>>, vector<8x8xbf16>
    %cst_135 = arith.constant dense<0.000000e+00> : vector<16x16x8xf32>
    %95 = tpu.matmul %93, %94, %cst_135 {dimension_numbers = #tpu.dot_dimension_numbers<[2], [0], [0, 1], [1], [0, 0, 0, 1, 1, 1], [], []>} : vector<16x16x8xbf16>, vector<8x8xbf16>, vector<16x16x8xf32> -> vector<16x16x8xf32>
    %c0_136 = arith.constant 0 : index
    %c0_137 = arith.constant 0 : index
    %96 = vector.load %arg10[%c0_136, %c0_137] : memref<1x8xf32, #tpu.memory_space<vmem>>, vector<1x8xf32>
    %97 = vector.shape_cast %96 : vector<1x8xf32> to vector<1x1x8xf32>
    %98 = vector.broadcast %97 : vector<1x1x8xf32> to vector<16x16x8xf32>
    %99 = arith.addf %95, %98 : vector<16x16x8xf32>
    %cst_138 = arith.constant 0.000000e+00 : f32
    %100 = vector.broadcast %cst_138 : f32 to vector<16x16x8xf32>
    %101 = arith.maximumf %99, %100 : vector<16x16x8xf32>
    %102 = arith.truncf %101 : vector<16x16x8xf32> to vector<16x16x8xbf16>
    %cst_139 = arith.constant 0.000000e+00 : f32
    %103 = vector.broadcast %cst_139 : f32 to vector<18x18x4xf32>
    %c0_140 = arith.constant 0 : index
    %c0_141 = arith.constant 0 : index
    %c0_142 = arith.constant 0 : index
    %104 = vector.load %arg19[%c0_140, %c0_141, %c0_142] : memref<18x18x4xf32, #tpu.memory_space<vmem>>, vector<18x18x4xf32>
    tpu.vector_store %arg19[%c0_140, %c0_141, %c0_142], %103 {strides = array<i32>} : memref<18x18x4xf32, #tpu.memory_space<vmem>>, vector<18x18x4xf32>,
    %c0_143 = arith.constant 0 : index
    %c0_144 = arith.constant 0 : index
    %c0_145 = arith.constant 0 : index
    %c0_146 = arith.constant 0 : index
    %105 = vector.load %arg11[%c0_143, %c0_144, %c0_145, %c0_146] : memref<3x3x8x4xbf16, #tpu.memory_space<vmem>>, vector<1x1x8x4xbf16>
    %106 = vector.shape_cast %105 : vector<1x1x8x4xbf16> to vector<8x4xbf16>
    %cst_147 = arith.constant dense<0.000000e+00> : vector<16x16x4xf32>
    %107 = tpu.matmul %102, %106, %cst_147 {dimension_numbers = #tpu.dot_dimension_numbers<[2], [0], [0, 1], [1], [0, 0, 0, 1, 1, 1], [], []>} : vector<16x16x8xbf16>, vector<8x4xbf16>, vector<16x16x4xf32> -> vector<16x16x4xf32>
    %c2_148 = arith.constant 2 : index
    %c2_149 = arith.constant 2 : index
    %c0_150 = arith.constant 0 : index
    %108 = vector.load %arg19[%c2_148, %c2_149, %c0_150] : memref<18x18x4xf32, #tpu.memory_space<vmem>>, vector<16x16x4xf32>
    %109 = arith.addf %108, %107 : vector<16x16x4xf32>
    %c2_151 = arith.constant 2 : index
    %c2_152 = arith.constant 2 : index
    %c0_153 = arith.constant 0 : index
    %110 = vector.load %arg19[%c2_151, %c2_152, %c0_153] : memref<18x18x4xf32, #tpu.memory_space<vmem>>, vector<16x16x4xf32>
    tpu.vector_store %arg19[%c2_151, %c2_152, %c0_153], %109 {strides = array<i32>} : memref<18x18x4xf32, #tpu.memory_space<vmem>>, vector<16x16x4xf32>,
    %c0_154 = arith.constant 0 : index
    %c1_155 = arith.constant 1 : index
    %c0_156 = arith.constant 0 : index
    %c0_157 = arith.constant 0 : index
    %111 = vector.load %arg11[%c0_154, %c1_155, %c0_156, %c0_157] : memref<3x3x8x4xbf16, #tpu.memory_space<vmem>>, vector<1x1x8x4xbf16>
    %112 = vector.shape_cast %111 : vector<1x1x8x4xbf16> to vector<8x4xbf16>
    %cst_158 = arith.constant dense<0.000000e+00> : vector<16x16x4xf32>
    %113 = tpu.matmul %102, %112, %cst_158 {dimension_numbers = #tpu.dot_dimension_numbers<[2], [0], [0, 1], [1], [0, 0, 0, 1, 1, 1], [], []>} : vector<16x16x8xbf16>, vector<8x4xbf16>, vector<16x16x4xf32> -> vector<16x16x4xf32>
    %c2_159 = arith.constant 2 : index
    %c1_160 = arith.constant 1 : index
    %c0_161 = arith.constant 0 : index
    %114 = vector.load %arg19[%c2_159, %c1_160, %c0_161] : memref<18x18x4xf32, #tpu.memory_space<vmem>>, vector<16x16x4xf32>
    %115 = arith.addf %114, %113 : vector<16x16x4xf32>
    %c2_162 = arith.constant 2 : index
    %c1_163 = arith.constant 1 : index
    %c0_164 = arith.constant 0 : index
    %116 = vector.load %arg19[%c2_162, %c1_163, %c0_164] : memref<18x18x4xf32, #tpu.memory_space<vmem>>, vector<16x16x4xf32>
    tpu.vector_store %arg19[%c2_162, %c1_163, %c0_164], %115 {strides = array<i32>} : memref<18x18x4xf32, #tpu.memory_space<vmem>>, vector<16x16x4xf32>,
    %c0_165 = arith.constant 0 : index
    %c2_166 = arith.constant 2 : index
    %c0_167 = arith.constant 0 : index
    %c0_168 = arith.constant 0 : index
    %117 = vector.load %arg11[%c0_165, %c2_166, %c0_167, %c0_168] : memref<3x3x8x4xbf16, #tpu.memory_space<vmem>>, vector<1x1x8x4xbf16>
    %118 = vector.shape_cast %117 : vector<1x1x8x4xbf16> to vector<8x4xbf16>
    %cst_169 = arith.constant dense<0.000000e+00> : vector<16x16x4xf32>
    %119 = tpu.matmul %102, %118, %cst_169 {dimension_numbers = #tpu.dot_dimension_numbers<[2], [0], [0, 1], [1], [0, 0, 0, 1, 1, 1], [], []>} : vector<16x16x8xbf16>, vector<8x4xbf16>, vector<16x16x4xf32> -> vector<16x16x4xf32>
    %c2_170 = arith.constant 2 : index
    %c0_171 = arith.constant 0 : index
    %c0_172 = arith.constant 0 : index
    %120 = vector.load %arg19[%c2_170, %c0_171, %c0_172] : memref<18x18x4xf32, #tpu.memory_space<vmem>>, vector<16x16x4xf32>
    %121 = arith.addf %120, %119 : vector<16x16x4xf32>
    %c2_173 = arith.constant 2 : index
    %c0_174 = arith.constant 0 : index
    %c0_175 = arith.constant 0 : index
    %122 = vector.load %arg19[%c2_173, %c0_174, %c0_175] : memref<18x18x4xf32, #tpu.memory_space<vmem>>, vector<16x16x4xf32>
    tpu.vector_store %arg19[%c2_173, %c0_174, %c0_175], %121 {strides = array<i32>} : memref<18x18x4xf32, #tpu.memory_space<vmem>>, vector<16x16x4xf32>,
    %c1_176 = arith.constant 1 : index
    %c0_177 = arith.constant 0 : index
    %c0_178 = arith.constant 0 : index
    %c0_179 = arith.constant 0 : index
    %123 = vector.load %arg11[%c1_176, %c0_177, %c0_178, %c0_179] : memref<3x3x8x4xbf16, #tpu.memory_space<vmem>>, vector<1x1x8x4xbf16>
    %124 = vector.shape_cast %123 : vector<1x1x8x4xbf16> to vector<8x4xbf16>
    %cst_180 = arith.constant dense<0.000000e+00> : vector<16x16x4xf32>
    %125 = tpu.matmul %102, %124, %cst_180 {dimension_numbers = #tpu.dot_dimension_numbers<[2], [0], [0, 1], [1], [0, 0, 0, 1, 1, 1], [], []>} : vector<16x16x8xbf16>, vector<8x4xbf16>, vector<16x16x4xf32> -> vector<16x16x4xf32>
    %c1_181 = arith.constant 1 : index
    %c2_182 = arith.constant 2 : index
    %c0_183 = arith.constant 0 : index
    %126 = vector.load %arg19[%c1_181, %c2_182, %c0_183] : memref<18x18x4xf32, #tpu.memory_space<vmem>>, vector<16x16x4xf32>
    %127 = arith.addf %126, %125 : vector<16x16x4xf32>
    %c1_184 = arith.constant 1 : index
    %c2_185 = arith.constant 2 : index
    %c0_186 = arith.constant 0 : index
    %128 = vector.load %arg19[%c1_184, %c2_185, %c0_186] : memref<18x18x4xf32, #tpu.memory_space<vmem>>, vector<16x16x4xf32>
    tpu.vector_store %arg19[%c1_184, %c2_185, %c0_186], %127 {strides = array<i32>} : memref<18x18x4xf32, #tpu.memory_space<vmem>>, vector<16x16x4xf32>,
    %c1_187 = arith.constant 1 : index
    %c1_188 = arith.constant 1 : index
    %c0_189 = arith.constant 0 : index
    %c0_190 = arith.constant 0 : index
    %129 = vector.load %arg11[%c1_187, %c1_188, %c0_189, %c0_190] : memref<3x3x8x4xbf16, #tpu.memory_space<vmem>>, vector<1x1x8x4xbf16>
    %130 = vector.shape_cast %129 : vector<1x1x8x4xbf16> to vector<8x4xbf16>
    %cst_191 = arith.constant dense<0.000000e+00> : vector<16x16x4xf32>
    %131 = tpu.matmul %102, %130, %cst_191 {dimension_numbers = #tpu.dot_dimension_numbers<[2], [0], [0, 1], [1], [0, 0, 0, 1, 1, 1], [], []>} : vector<16x16x8xbf16>, vector<8x4xbf16>, vector<16x16x4xf32> -> vector<16x16x4xf32>
    %c1_192 = arith.constant 1 : index
    %c1_193 = arith.constant 1 : index
    %c0_194 = arith.constant 0 : index
    %132 = vector.load %arg19[%c1_192, %c1_193, %c0_194] : memref<18x18x4xf32, #tpu.memory_space<vmem>>, vector<16x16x4xf32>
    %133 = arith.addf %132, %131 : vector<16x16x4xf32>
    %c1_195 = arith.constant 1 : index
    %c1_196 = arith.constant 1 : index
    %c0_197 = arith.constant 0 : index
    %134 = vector.load %arg19[%c1_195, %c1_196, %c0_197] : memref<18x18x4xf32, #tpu.memory_space<vmem>>, vector<16x16x4xf32>
    tpu.vector_store %arg19[%c1_195, %c1_196, %c0_197], %133 {strides = array<i32>} : memref<18x18x4xf32, #tpu.memory_space<vmem>>, vector<16x16x4xf32>,
    %c1_198 = arith.constant 1 : index
    %c2_199 = arith.constant 2 : index
    %c0_200 = arith.constant 0 : index
    %c0_201 = arith.constant 0 : index
    %135 = vector.load %arg11[%c1_198, %c2_199, %c0_200, %c0_201] : memref<3x3x8x4xbf16, #tpu.memory_space<vmem>>, vector<1x1x8x4xbf16>
    %136 = vector.shape_cast %135 : vector<1x1x8x4xbf16> to vector<8x4xbf16>
    %cst_202 = arith.constant dense<0.000000e+00> : vector<16x16x4xf32>
    %137 = tpu.matmul %102, %136, %cst_202 {dimension_numbers = #tpu.dot_dimension_numbers<[2], [0], [0, 1], [1], [0, 0, 0, 1, 1, 1], [], []>} : vector<16x16x8xbf16>, vector<8x4xbf16>, vector<16x16x4xf32> -> vector<16x16x4xf32>
    %c1_203 = arith.constant 1 : index
    %c0_204 = arith.constant 0 : index
    %c0_205 = arith.constant 0 : index
    %138 = vector.load %arg19[%c1_203, %c0_204, %c0_205] : memref<18x18x4xf32, #tpu.memory_space<vmem>>, vector<16x16x4xf32>
    %139 = arith.addf %138, %137 : vector<16x16x4xf32>
    %c1_206 = arith.constant 1 : index
    %c0_207 = arith.constant 0 : index
    %c0_208 = arith.constant 0 : index
    %140 = vector.load %arg19[%c1_206, %c0_207, %c0_208] : memref<18x18x4xf32, #tpu.memory_space<vmem>>, vector<16x16x4xf32>
    tpu.vector_store %arg19[%c1_206, %c0_207, %c0_208], %139 {strides = array<i32>} : memref<18x18x4xf32, #tpu.memory_space<vmem>>, vector<16x16x4xf32>,
    %c2_209 = arith.constant 2 : index
    %c0_210 = arith.constant 0 : index
    %c0_211 = arith.constant 0 : index
    %c0_212 = arith.constant 0 : index
    %141 = vector.load %arg11[%c2_209, %c0_210, %c0_211, %c0_212] : memref<3x3x8x4xbf16, #tpu.memory_space<vmem>>, vector<1x1x8x4xbf16>
    %142 = vector.shape_cast %141 : vector<1x1x8x4xbf16> to vector<8x4xbf16>
    %cst_213 = arith.constant dense<0.000000e+00> : vector<16x16x4xf32>
    %143 = tpu.matmul %102, %142, %cst_213 {dimension_numbers = #tpu.dot_dimension_numbers<[2], [0], [0, 1], [1], [0, 0, 0, 1, 1, 1], [], []>} : vector<16x16x8xbf16>, vector<8x4xbf16>, vector<16x16x4xf32> -> vector<16x16x4xf32>
    %c0_214 = arith.constant 0 : index
    %c2_215 = arith.constant 2 : index
    %c0_216 = arith.constant 0 : index
    %144 = vector.load %arg19[%c0_214, %c2_215, %c0_216] : memref<18x18x4xf32, #tpu.memory_space<vmem>>, vector<16x16x4xf32>
    %145 = arith.addf %144, %143 : vector<16x16x4xf32>
    %c0_217 = arith.constant 0 : index
    %c2_218 = arith.constant 2 : index
    %c0_219 = arith.constant 0 : index
    %146 = vector.load %arg19[%c0_217, %c2_218, %c0_219] : memref<18x18x4xf32, #tpu.memory_space<vmem>>, vector<16x16x4xf32>
    tpu.vector_store %arg19[%c0_217, %c2_218, %c0_219], %145 {strides = array<i32>} : memref<18x18x4xf32, #tpu.memory_space<vmem>>, vector<16x16x4xf32>,
    %c2_220 = arith.constant 2 : index
    %c1_221 = arith.constant 1 : index
    %c0_222 = arith.constant 0 : index
    %c0_223 = arith.constant 0 : index
    %147 = vector.load %arg11[%c2_220, %c1_221, %c0_222, %c0_223] : memref<3x3x8x4xbf16, #tpu.memory_space<vmem>>, vector<1x1x8x4xbf16>
    %148 = vector.shape_cast %147 : vector<1x1x8x4xbf16> to vector<8x4xbf16>
    %cst_224 = arith.constant dense<0.000000e+00> : vector<16x16x4xf32>
    %149 = tpu.matmul %102, %148, %cst_224 {dimension_numbers = #tpu.dot_dimension_numbers<[2], [0], [0, 1], [1], [0, 0, 0, 1, 1, 1], [], []>} : vector<16x16x8xbf16>, vector<8x4xbf16>, vector<16x16x4xf32> -> vector<16x16x4xf32>
    %c0_225 = arith.constant 0 : index
    %c1_226 = arith.constant 1 : index
    %c0_227 = arith.constant 0 : index
    %150 = vector.load %arg19[%c0_225, %c1_226, %c0_227] : memref<18x18x4xf32, #tpu.memory_space<vmem>>, vector<16x16x4xf32>
    %151 = arith.addf %150, %149 : vector<16x16x4xf32>
    %c0_228 = arith.constant 0 : index
    %c1_229 = arith.constant 1 : index
    %c0_230 = arith.constant 0 : index
    %152 = vector.load %arg19[%c0_228, %c1_229, %c0_230] : memref<18x18x4xf32, #tpu.memory_space<vmem>>, vector<16x16x4xf32>
    tpu.vector_store %arg19[%c0_228, %c1_229, %c0_230], %151 {strides = array<i32>} : memref<18x18x4xf32, #tpu.memory_space<vmem>>, vector<16x16x4xf32>,
    %c2_231 = arith.constant 2 : index
    %c2_232 = arith.constant 2 : index
    %c0_233 = arith.constant 0 : index
    %c0_234 = arith.constant 0 : index
    %153 = vector.load %arg11[%c2_231, %c2_232, %c0_233, %c0_234] : memref<3x3x8x4xbf16, #tpu.memory_space<vmem>>, vector<1x1x8x4xbf16>
    %154 = vector.shape_cast %153 : vector<1x1x8x4xbf16> to vector<8x4xbf16>
    %cst_235 = arith.constant dense<0.000000e+00> : vector<16x16x4xf32>
    %155 = tpu.matmul %102, %154, %cst_235 {dimension_numbers = #tpu.dot_dimension_numbers<[2], [0], [0, 1], [1], [0, 0, 0, 1, 1, 1], [], []>} : vector<16x16x8xbf16>, vector<8x4xbf16>, vector<16x16x4xf32> -> vector<16x16x4xf32>
    %c0_236 = arith.constant 0 : index
    %c0_237 = arith.constant 0 : index
    %c0_238 = arith.constant 0 : index
    %156 = vector.load %arg19[%c0_236, %c0_237, %c0_238] : memref<18x18x4xf32, #tpu.memory_space<vmem>>, vector<16x16x4xf32>
    %157 = arith.addf %156, %155 : vector<16x16x4xf32>
    %c0_239 = arith.constant 0 : index
    %c0_240 = arith.constant 0 : index
    %c0_241 = arith.constant 0 : index
    %158 = vector.load %arg19[%c0_239, %c0_240, %c0_241] : memref<18x18x4xf32, #tpu.memory_space<vmem>>, vector<16x16x4xf32>
    tpu.vector_store %arg19[%c0_239, %c0_240, %c0_241], %157 {strides = array<i32>} : memref<18x18x4xf32, #tpu.memory_space<vmem>>, vector<16x16x4xf32>,
    %c1_242 = arith.constant 1 : index
    %c1_243 = arith.constant 1 : index
    %c0_244 = arith.constant 0 : index
    %159 = vector.load %arg19[%c1_242, %c1_243, %c0_244] : memref<18x18x4xf32, #tpu.memory_space<vmem>>, vector<16x16x4xf32>
    %c0_245 = arith.constant 0 : index
    %c0_246 = arith.constant 0 : index
    %c8 = arith.constant 8 : index
    %160 = vector.load %arg18[%c0_245, %c0_246, %c8] : memref<16x16x16xf32, #tpu.memory_space<vmem>>, vector<16x16x4xf32>
    tpu.vector_store %arg18[%c0_245, %c0_246, %c8], %159 {strides = array<i32>} : memref<16x16x16xf32, #tpu.memory_space<vmem>>, vector<16x16x4xf32>,
    %c0_247 = arith.constant 0 : index
    %c0_248 = arith.constant 0 : index
    %c0_249 = arith.constant 0 : index
    %161 = vector.load %arg18[%c0_247, %c0_248, %c0_249] : memref<16x16x16xf32, #tpu.memory_space<vmem>>, vector<16x16x12xf32>
    %c0_250 = arith.constant 0 : index
    %c0_251 = arith.constant 0 : index
    %162 = vector.load %arg12[%c0_250, %c0_251] : memref<1x12xf32, #tpu.memory_space<vmem>>, vector<1x12xf32>
    %163 = vector.shape_cast %162 : vector<1x12xf32> to vector<1x1x12xf32>
    %164 = vector.broadcast %163 : vector<1x1x12xf32> to vector<16x16x12xf32>
    %165 = arith.mulf %161, %164 : vector<16x16x12xf32>
    %c0_252 = arith.constant 0 : index
    %c0_253 = arith.constant 0 : index
    %166 = vector.load %arg13[%c0_252, %c0_253] : memref<1x12xf32, #tpu.memory_space<vmem>>, vector<1x12xf32>
    %167 = vector.shape_cast %166 : vector<1x12xf32> to vector<1x1x12xf32>
    %168 = vector.broadcast %167 : vector<1x1x12xf32> to vector<16x16x12xf32>
    %169 = arith.addf %165, %168 : vector<16x16x12xf32>
    %cst_254 = arith.constant 0.000000e+00 : f32
    %170 = vector.broadcast %cst_254 : f32 to vector<16x16x12xf32>
    %171 = arith.maximumf %169, %170 : vector<16x16x12xf32>
    %172 = arith.truncf %171 : vector<16x16x12xf32> to vector<16x16x12xbf16>
    %c0_255 = arith.constant 0 : index
    %c0_256 = arith.constant 0 : index
    %173 = vector.load %arg14[%c0_255, %c0_256] : memref<12x8xbf16, #tpu.memory_space<vmem>>, vector<12x8xbf16>
    %cst_257 = arith.constant dense<0.000000e+00> : vector<16x16x8xf32>
    %174 = tpu.matmul %172, %173, %cst_257 {dimension_numbers = #tpu.dot_dimension_numbers<[2], [0], [0, 1], [1], [0, 0, 0, 1, 1, 1], [], []>} : vector<16x16x12xbf16>, vector<12x8xbf16>, vector<16x16x8xf32> -> vector<16x16x8xf32>
    %c0_258 = arith.constant 0 : index
    %c0_259 = arith.constant 0 : index
    %175 = vector.load %arg15[%c0_258, %c0_259] : memref<1x8xf32, #tpu.memory_space<vmem>>, vector<1x8xf32>
    %176 = vector.shape_cast %175 : vector<1x8xf32> to vector<1x1x8xf32>
    %177 = vector.broadcast %176 : vector<1x1x8xf32> to vector<16x16x8xf32>
    %178 = arith.addf %174, %177 : vector<16x16x8xf32>
    %cst_260 = arith.constant 0.000000e+00 : f32
    %179 = vector.broadcast %cst_260 : f32 to vector<16x16x8xf32>
    %180 = arith.maximumf %178, %179 : vector<16x16x8xf32>
    %181 = arith.truncf %180 : vector<16x16x8xf32> to vector<16x16x8xbf16>
    %cst_261 = arith.constant 0.000000e+00 : f32
    %182 = vector.broadcast %cst_261 : f32 to vector<18x18x4xf32>
    %c0_262 = arith.constant 0 : index
    %c0_263 = arith.constant 0 : index
    %c0_264 = arith.constant 0 : index
    %183 = vector.load %arg19[%c0_262, %c0_263, %c0_264] : memref<18x18x4xf32, #tpu.memory_space<vmem>>, vector<18x18x4xf32>
    tpu.vector_store %arg19[%c0_262, %c0_263, %c0_264], %182 {strides = array<i32>} : memref<18x18x4xf32, #tpu.memory_space<vmem>>, vector<18x18x4xf32>,
    %c0_265 = arith.constant 0 : index
    %c0_266 = arith.constant 0 : index
    %c0_267 = arith.constant 0 : index
    %c0_268 = arith.constant 0 : index
    %184 = vector.load %arg16[%c0_265, %c0_266, %c0_267, %c0_268] : memref<3x3x8x4xbf16, #tpu.memory_space<vmem>>, vector<1x1x8x4xbf16>
    %185 = vector.shape_cast %184 : vector<1x1x8x4xbf16> to vector<8x4xbf16>
    %cst_269 = arith.constant dense<0.000000e+00> : vector<16x16x4xf32>
    %186 = tpu.matmul %181, %185, %cst_269 {dimension_numbers = #tpu.dot_dimension_numbers<[2], [0], [0, 1], [1], [0, 0, 0, 1, 1, 1], [], []>} : vector<16x16x8xbf16>, vector<8x4xbf16>, vector<16x16x4xf32> -> vector<16x16x4xf32>
    %c2_270 = arith.constant 2 : index
    %c2_271 = arith.constant 2 : index
    %c0_272 = arith.constant 0 : index
    %187 = vector.load %arg19[%c2_270, %c2_271, %c0_272] : memref<18x18x4xf32, #tpu.memory_space<vmem>>, vector<16x16x4xf32>
    %188 = arith.addf %187, %186 : vector<16x16x4xf32>
    %c2_273 = arith.constant 2 : index
    %c2_274 = arith.constant 2 : index
    %c0_275 = arith.constant 0 : index
    %189 = vector.load %arg19[%c2_273, %c2_274, %c0_275] : memref<18x18x4xf32, #tpu.memory_space<vmem>>, vector<16x16x4xf32>
    tpu.vector_store %arg19[%c2_273, %c2_274, %c0_275], %188 {strides = array<i32>} : memref<18x18x4xf32, #tpu.memory_space<vmem>>, vector<16x16x4xf32>,
    %c0_276 = arith.constant 0 : index
    %c1_277 = arith.constant 1 : index
    %c0_278 = arith.constant 0 : index
    %c0_279 = arith.constant 0 : index
    %190 = vector.load %arg16[%c0_276, %c1_277, %c0_278, %c0_279] : memref<3x3x8x4xbf16, #tpu.memory_space<vmem>>, vector<1x1x8x4xbf16>
    %191 = vector.shape_cast %190 : vector<1x1x8x4xbf16> to vector<8x4xbf16>
    %cst_280 = arith.constant dense<0.000000e+00> : vector<16x16x4xf32>
    %192 = tpu.matmul %181, %191, %cst_280 {dimension_numbers = #tpu.dot_dimension_numbers<[2], [0], [0, 1], [1], [0, 0, 0, 1, 1, 1], [], []>} : vector<16x16x8xbf16>, vector<8x4xbf16>, vector<16x16x4xf32> -> vector<16x16x4xf32>
    %c2_281 = arith.constant 2 : index
    %c1_282 = arith.constant 1 : index
    %c0_283 = arith.constant 0 : index
    %193 = vector.load %arg19[%c2_281, %c1_282, %c0_283] : memref<18x18x4xf32, #tpu.memory_space<vmem>>, vector<16x16x4xf32>
    %194 = arith.addf %193, %192 : vector<16x16x4xf32>
    %c2_284 = arith.constant 2 : index
    %c1_285 = arith.constant 1 : index
    %c0_286 = arith.constant 0 : index
    %195 = vector.load %arg19[%c2_284, %c1_285, %c0_286] : memref<18x18x4xf32, #tpu.memory_space<vmem>>, vector<16x16x4xf32>
    tpu.vector_store %arg19[%c2_284, %c1_285, %c0_286], %194 {strides = array<i32>} : memref<18x18x4xf32, #tpu.memory_space<vmem>>, vector<16x16x4xf32>,
    %c0_287 = arith.constant 0 : index
    %c2_288 = arith.constant 2 : index
    %c0_289 = arith.constant 0 : index
    %c0_290 = arith.constant 0 : index
    %196 = vector.load %arg16[%c0_287, %c2_288, %c0_289, %c0_290] : memref<3x3x8x4xbf16, #tpu.memory_space<vmem>>, vector<1x1x8x4xbf16>
    %197 = vector.shape_cast %196 : vector<1x1x8x4xbf16> to vector<8x4xbf16>
    %cst_291 = arith.constant dense<0.000000e+00> : vector<16x16x4xf32>
    %198 = tpu.matmul %181, %197, %cst_291 {dimension_numbers = #tpu.dot_dimension_numbers<[2], [0], [0, 1], [1], [0, 0, 0, 1, 1, 1], [], []>} : vector<16x16x8xbf16>, vector<8x4xbf16>, vector<16x16x4xf32> -> vector<16x16x4xf32>
    %c2_292 = arith.constant 2 : index
    %c0_293 = arith.constant 0 : index
    %c0_294 = arith.constant 0 : index
    %199 = vector.load %arg19[%c2_292, %c0_293, %c0_294] : memref<18x18x4xf32, #tpu.memory_space<vmem>>, vector<16x16x4xf32>
    %200 = arith.addf %199, %198 : vector<16x16x4xf32>
    %c2_295 = arith.constant 2 : index
    %c0_296 = arith.constant 0 : index
    %c0_297 = arith.constant 0 : index
    %201 = vector.load %arg19[%c2_295, %c0_296, %c0_297] : memref<18x18x4xf32, #tpu.memory_space<vmem>>, vector<16x16x4xf32>
    tpu.vector_store %arg19[%c2_295, %c0_296, %c0_297], %200 {strides = array<i32>} : memref<18x18x4xf32, #tpu.memory_space<vmem>>, vector<16x16x4xf32>,
    %c1_298 = arith.constant 1 : index
    %c0_299 = arith.constant 0 : index
    %c0_300 = arith.constant 0 : index
    %c0_301 = arith.constant 0 : index
    %202 = vector.load %arg16[%c1_298, %c0_299, %c0_300, %c0_301] : memref<3x3x8x4xbf16, #tpu.memory_space<vmem>>, vector<1x1x8x4xbf16>
    %203 = vector.shape_cast %202 : vector<1x1x8x4xbf16> to vector<8x4xbf16>
    %cst_302 = arith.constant dense<0.000000e+00> : vector<16x16x4xf32>
    %204 = tpu.matmul %181, %203, %cst_302 {dimension_numbers = #tpu.dot_dimension_numbers<[2], [0], [0, 1], [1], [0, 0, 0, 1, 1, 1], [], []>} : vector<16x16x8xbf16>, vector<8x4xbf16>, vector<16x16x4xf32> -> vector<16x16x4xf32>
    %c1_303 = arith.constant 1 : index
    %c2_304 = arith.constant 2 : index
    %c0_305 = arith.constant 0 : index
    %205 = vector.load %arg19[%c1_303, %c2_304, %c0_305] : memref<18x18x4xf32, #tpu.memory_space<vmem>>, vector<16x16x4xf32>
    %206 = arith.addf %205, %204 : vector<16x16x4xf32>
    %c1_306 = arith.constant 1 : index
    %c2_307 = arith.constant 2 : index
    %c0_308 = arith.constant 0 : index
    %207 = vector.load %arg19[%c1_306, %c2_307, %c0_308] : memref<18x18x4xf32, #tpu.memory_space<vmem>>, vector<16x16x4xf32>
    tpu.vector_store %arg19[%c1_306, %c2_307, %c0_308], %206 {strides = array<i32>} : memref<18x18x4xf32, #tpu.memory_space<vmem>>, vector<16x16x4xf32>,
    %c1_309 = arith.constant 1 : index
    %c1_310 = arith.constant 1 : index
    %c0_311 = arith.constant 0 : index
    %c0_312 = arith.constant 0 : index
    %208 = vector.load %arg16[%c1_309, %c1_310, %c0_311, %c0_312] : memref<3x3x8x4xbf16, #tpu.memory_space<vmem>>, vector<1x1x8x4xbf16>
    %209 = vector.shape_cast %208 : vector<1x1x8x4xbf16> to vector<8x4xbf16>
    %cst_313 = arith.constant dense<0.000000e+00> : vector<16x16x4xf32>
    %210 = tpu.matmul %181, %209, %cst_313 {dimension_numbers = #tpu.dot_dimension_numbers<[2], [0], [0, 1], [1], [0, 0, 0, 1, 1, 1], [], []>} : vector<16x16x8xbf16>, vector<8x4xbf16>, vector<16x16x4xf32> -> vector<16x16x4xf32>
    %c1_314 = arith.constant 1 : index
    %c1_315 = arith.constant 1 : index
    %c0_316 = arith.constant 0 : index
    %211 = vector.load %arg19[%c1_314, %c1_315, %c0_316] : memref<18x18x4xf32, #tpu.memory_space<vmem>>, vector<16x16x4xf32>
    %212 = arith.addf %211, %210 : vector<16x16x4xf32>
    %c1_317 = arith.constant 1 : index
    %c1_318 = arith.constant 1 : index
    %c0_319 = arith.constant 0 : index
    %213 = vector.load %arg19[%c1_317, %c1_318, %c0_319] : memref<18x18x4xf32, #tpu.memory_space<vmem>>, vector<16x16x4xf32>
    tpu.vector_store %arg19[%c1_317, %c1_318, %c0_319], %212 {strides = array<i32>} : memref<18x18x4xf32, #tpu.memory_space<vmem>>, vector<16x16x4xf32>,
    %c1_320 = arith.constant 1 : index
    %c2_321 = arith.constant 2 : index
    %c0_322 = arith.constant 0 : index
    %c0_323 = arith.constant 0 : index
    %214 = vector.load %arg16[%c1_320, %c2_321, %c0_322, %c0_323] : memref<3x3x8x4xbf16, #tpu.memory_space<vmem>>, vector<1x1x8x4xbf16>
    %215 = vector.shape_cast %214 : vector<1x1x8x4xbf16> to vector<8x4xbf16>
    %cst_324 = arith.constant dense<0.000000e+00> : vector<16x16x4xf32>
    %216 = tpu.matmul %181, %215, %cst_324 {dimension_numbers = #tpu.dot_dimension_numbers<[2], [0], [0, 1], [1], [0, 0, 0, 1, 1, 1], [], []>} : vector<16x16x8xbf16>, vector<8x4xbf16>, vector<16x16x4xf32> -> vector<16x16x4xf32>
    %c1_325 = arith.constant 1 : index
    %c0_326 = arith.constant 0 : index
    %c0_327 = arith.constant 0 : index
    %217 = vector.load %arg19[%c1_325, %c0_326, %c0_327] : memref<18x18x4xf32, #tpu.memory_space<vmem>>, vector<16x16x4xf32>
    %218 = arith.addf %217, %216 : vector<16x16x4xf32>
    %c1_328 = arith.constant 1 : index
    %c0_329 = arith.constant 0 : index
    %c0_330 = arith.constant 0 : index
    %219 = vector.load %arg19[%c1_328, %c0_329, %c0_330] : memref<18x18x4xf32, #tpu.memory_space<vmem>>, vector<16x16x4xf32>
    tpu.vector_store %arg19[%c1_328, %c0_329, %c0_330], %218 {strides = array<i32>} : memref<18x18x4xf32, #tpu.memory_space<vmem>>, vector<16x16x4xf32>,
    %c2_331 = arith.constant 2 : index
    %c0_332 = arith.constant 0 : index
    %c0_333 = arith.constant 0 : index
    %c0_334 = arith.constant 0 : index
    %220 = vector.load %arg16[%c2_331, %c0_332, %c0_333, %c0_334] : memref<3x3x8x4xbf16, #tpu.memory_space<vmem>>, vector<1x1x8x4xbf16>
    %221 = vector.shape_cast %220 : vector<1x1x8x4xbf16> to vector<8x4xbf16>
    %cst_335 = arith.constant dense<0.000000e+00> : vector<16x16x4xf32>
    %222 = tpu.matmul %181, %221, %cst_335 {dimension_numbers = #tpu.dot_dimension_numbers<[2], [0], [0, 1], [1], [0, 0, 0, 1, 1, 1], [], []>} : vector<16x16x8xbf16>, vector<8x4xbf16>, vector<16x16x4xf32> -> vector<16x16x4xf32>
    %c0_336 = arith.constant 0 : index
    %c2_337 = arith.constant 2 : index
    %c0_338 = arith.constant 0 : index
    %223 = vector.load %arg19[%c0_336, %c2_337, %c0_338] : memref<18x18x4xf32, #tpu.memory_space<vmem>>, vector<16x16x4xf32>
    %224 = arith.addf %223, %222 : vector<16x16x4xf32>
    %c0_339 = arith.constant 0 : index
    %c2_340 = arith.constant 2 : index
    %c0_341 = arith.constant 0 : index
    %225 = vector.load %arg19[%c0_339, %c2_340, %c0_341] : memref<18x18x4xf32, #tpu.memory_space<vmem>>, vector<16x16x4xf32>
    tpu.vector_store %arg19[%c0_339, %c2_340, %c0_341], %224 {strides = array<i32>} : memref<18x18x4xf32, #tpu.memory_space<vmem>>, vector<16x16x4xf32>,
    %c2_342 = arith.constant 2 : index
    %c1_343 = arith.constant 1 : index
    %c0_344 = arith.constant 0 : index
    %c0_345 = arith.constant 0 : index
    %226 = vector.load %arg16[%c2_342, %c1_343, %c0_344, %c0_345] : memref<3x3x8x4xbf16, #tpu.memory_space<vmem>>, vector<1x1x8x4xbf16>
    %227 = vector.shape_cast %226 : vector<1x1x8x4xbf16> to vector<8x4xbf16>
    %cst_346 = arith.constant dense<0.000000e+00> : vector<16x16x4xf32>
    %228 = tpu.matmul %181, %227, %cst_346 {dimension_numbers = #tpu.dot_dimension_numbers<[2], [0], [0, 1], [1], [0, 0, 0, 1, 1, 1], [], []>} : vector<16x16x8xbf16>, vector<8x4xbf16>, vector<16x16x4xf32> -> vector<16x16x4xf32>
    %c0_347 = arith.constant 0 : index
    %c1_348 = arith.constant 1 : index
    %c0_349 = arith.constant 0 : index
    %229 = vector.load %arg19[%c0_347, %c1_348, %c0_349] : memref<18x18x4xf32, #tpu.memory_space<vmem>>, vector<16x16x4xf32>
    %230 = arith.addf %229, %228 : vector<16x16x4xf32>
    %c0_350 = arith.constant 0 : index
    %c1_351 = arith.constant 1 : index
    %c0_352 = arith.constant 0 : index
    %231 = vector.load %arg19[%c0_350, %c1_351, %c0_352] : memref<18x18x4xf32, #tpu.memory_space<vmem>>, vector<16x16x4xf32>
    tpu.vector_store %arg19[%c0_350, %c1_351, %c0_352], %230 {strides = array<i32>} : memref<18x18x4xf32, #tpu.memory_space<vmem>>, vector<16x16x4xf32>,
    %c2_353 = arith.constant 2 : index
    %c2_354 = arith.constant 2 : index
    %c0_355 = arith.constant 0 : index
    %c0_356 = arith.constant 0 : index
    %232 = vector.load %arg16[%c2_353, %c2_354, %c0_355, %c0_356] : memref<3x3x8x4xbf16, #tpu.memory_space<vmem>>, vector<1x1x8x4xbf16>
    %233 = vector.shape_cast %232 : vector<1x1x8x4xbf16> to vector<8x4xbf16>
    %cst_357 = arith.constant dense<0.000000e+00> : vector<16x16x4xf32>
    %234 = tpu.matmul %181, %233, %cst_357 {dimension_numbers = #tpu.dot_dimension_numbers<[2], [0], [0, 1], [1], [0, 0, 0, 1, 1, 1], [], []>} : vector<16x16x8xbf16>, vector<8x4xbf16>, vector<16x16x4xf32> -> vector<16x16x4xf32>
    %c0_358 = arith.constant 0 : index
    %c0_359 = arith.constant 0 : index
    %c0_360 = arith.constant 0 : index
    %235 = vector.load %arg19[%c0_358, %c0_359, %c0_360] : memref<18x18x4xf32, #tpu.memory_space<vmem>>, vector<16x16x4xf32>
    %236 = arith.addf %235, %234 : vector<16x16x4xf32>
    %c0_361 = arith.constant 0 : index
    %c0_362 = arith.constant 0 : index
    %c0_363 = arith.constant 0 : index
    %237 = vector.load %arg19[%c0_361, %c0_362, %c0_363] : memref<18x18x4xf32, #tpu.memory_space<vmem>>, vector<16x16x4xf32>
    tpu.vector_store %arg19[%c0_361, %c0_362, %c0_363], %236 {strides = array<i32>} : memref<18x18x4xf32, #tpu.memory_space<vmem>>, vector<16x16x4xf32>,
    %c1_364 = arith.constant 1 : index
    %c1_365 = arith.constant 1 : index
    %c0_366 = arith.constant 0 : index
    %238 = vector.load %arg19[%c1_364, %c1_365, %c0_366] : memref<18x18x4xf32, #tpu.memory_space<vmem>>, vector<16x16x4xf32>
    %c0_367 = arith.constant 0 : index
    %c0_368 = arith.constant 0 : index
    %c12 = arith.constant 12 : index
    %239 = vector.load %arg18[%c0_367, %c0_368, %c12] : memref<16x16x16xf32, #tpu.memory_space<vmem>>, vector<16x16x4xf32>
    tpu.vector_store %arg18[%c0_367, %c0_368, %c12], %238 {strides = array<i32>} : memref<16x16x16xf32, #tpu.memory_space<vmem>>, vector<16x16x4xf32>,
    %c0_369 = arith.constant 0 : index
    %c0_370 = arith.constant 0 : index
    %c0_371 = arith.constant 0 : index
    %240 = vector.load %arg18[%c0_369, %c0_370, %c0_371] : memref<16x16x16xf32, #tpu.memory_space<vmem>>, vector<16x16x16xf32>
    %c0_372 = arith.constant 0 : index
    %c0_373 = arith.constant 0 : index
    %c0_374 = arith.constant 0 : index
    %c0_375 = arith.constant 0 : index
    %241 = vector.load %arg17[%c0_372, %c0_373, %c0_374, %c0_375] : memref<1x16x16x16xf32, #tpu.memory_space<vmem>>, vector<1x16x16x16xf32>
    %242 = vector.shape_cast %241 : vector<1x16x16x16xf32> to vector<16x16x16xf32>
    %243 = vector.shape_cast %240 : vector<16x16x16xf32> to vector<1x16x16x16xf32>
    tpu.vector_store %arg17[%c0_372, %c0_373, %c0_374, %c0_375], %243 {strides = array<i32>} : memref<1x16x16x16xf32, #tpu.memory_space<vmem>>, vector<1x16x16x16xf32>,
    return
  }
  func.func @transform_0(%arg0: i32) -> (i32, i32, i32, i32) {
    %c0_i32 = arith.constant 0 : i32
    %c0_i32_0 = arith.constant 0 : i32
    %c0_i32_1 = arith.constant 0 : i32
    %c0_i32_2 = arith.constant 0 : i32
    return %arg0, %c0_i32, %c0_i32_0, %c0_i32_1 : i32, i32, i32, i32
  }
  func.func @transform_1(%arg0: i32) -> (i32, i32) {
    %c0_i32 = arith.constant 0 : i32
    %c0_i32_0 = arith.constant 0 : i32
    %c0_i32_1 = arith.constant 0 : i32
    return %c0_i32, %c0_i32_0 : i32, i32
  }
  func.func @transform_2(%arg0: i32) -> (i32, i32) {
    %c0_i32 = arith.constant 0 : i32
    %c0_i32_0 = arith.constant 0 : i32
    %c0_i32_1 = arith.constant 0 : i32
    return %c0_i32, %c0_i32_0 : i32, i32
  }
  func.func @transform_3(%arg0: i32) -> (i32, i32) {
    %c0_i32 = arith.constant 0 : i32
    %c0_i32_0 = arith.constant 0 : i32
    %c0_i32_1 = arith.constant 0 : i32
    return %c0_i32, %c0_i32_0 : i32, i32
  }
  func.func @transform_4(%arg0: i32) -> (i32, i32) {
    %c0_i32 = arith.constant 0 : i32
    %c0_i32_0 = arith.constant 0 : i32
    %c0_i32_1 = arith.constant 0 : i32
    return %c0_i32, %c0_i32_0 : i32, i32
  }
  func.func @transform_5(%arg0: i32) -> (i32, i32, i32, i32) {
    %c0_i32 = arith.constant 0 : i32
    %c0_i32_0 = arith.constant 0 : i32
    %c0_i32_1 = arith.constant 0 : i32
    %c0_i32_2 = arith.constant 0 : i32
    %c0_i32_3 = arith.constant 0 : i32
    return %c0_i32, %c0_i32_0, %c0_i32_1, %c0_i32_2 : i32, i32, i32, i32
  }
  func.func @transform_6(%arg0: i32) -> (i32, i32) {
    %c0_i32 = arith.constant 0 : i32
    %c0_i32_0 = arith.constant 0 : i32
    %c0_i32_1 = arith.constant 0 : i32
    return %c0_i32, %c0_i32_0 : i32, i32
  }
  func.func @transform_7(%arg0: i32) -> (i32, i32) {
    %c0_i32 = arith.constant 0 : i32
    %c0_i32_0 = arith.constant 0 : i32
    %c0_i32_1 = arith.constant 0 : i32
    return %c0_i32, %c0_i32_0 : i32, i32
  }
  func.func @transform_8(%arg0: i32) -> (i32, i32) {
    %c0_i32 = arith.constant 0 : i32
    %c0_i32_0 = arith.constant 0 : i32
    %c0_i32_1 = arith.constant 0 : i32
    return %c0_i32, %c0_i32_0 : i32, i32
  }
  func.func @transform_9(%arg0: i32) -> (i32, i32) {
    %c0_i32 = arith.constant 0 : i32
    %c0_i32_0 = arith.constant 0 : i32
    %c0_i32_1 = arith.constant 0 : i32
    return %c0_i32, %c0_i32_0 : i32, i32
  }
  func.func @transform_10(%arg0: i32) -> (i32, i32, i32, i32) {
    %c0_i32 = arith.constant 0 : i32
    %c0_i32_0 = arith.constant 0 : i32
    %c0_i32_1 = arith.constant 0 : i32
    %c0_i32_2 = arith.constant 0 : i32
    %c0_i32_3 = arith.constant 0 : i32
    return %c0_i32, %c0_i32_0, %c0_i32_1, %c0_i32_2 : i32, i32, i32, i32
  }
  func.func @transform_11(%arg0: i32) -> (i32, i32) {
    %c0_i32 = arith.constant 0 : i32
    %c0_i32_0 = arith.constant 0 : i32
    %c0_i32_1 = arith.constant 0 : i32
    return %c0_i32, %c0_i32_0 : i32, i32
  }
  func.func @transform_12(%arg0: i32) -> (i32, i32) {
    %c0_i32 = arith.constant 0 : i32
    %c0_i32_0 = arith.constant 0 : i32
    %c0_i32_1 = arith.constant 0 : i32
    return %c0_i32, %c0_i32_0 : i32, i32
  }
  func.func @transform_13(%arg0: i32) -> (i32, i32) {
    %c0_i32 = arith.constant 0 : i32
    %c0_i32_0 = arith.constant 0 : i32
    %c0_i32_1 = arith.constant 0 : i32
    return %c0_i32, %c0_i32_0 : i32, i32
  }
  func.func @transform_14(%arg0: i32) -> (i32, i32) {
    %c0_i32 = arith.constant 0 : i32
    %c0_i32_0 = arith.constant 0 : i32
    %c0_i32_1 = arith.constant 0 : i32
    return %c0_i32, %c0_i32_0 : i32, i32
  }
  func.func @transform_15(%arg0: i32) -> (i32, i32, i32, i32) {
    %c0_i32 = arith.constant 0 : i32
    %c0_i32_0 = arith.constant 0 : i32
    %c0_i32_1 = arith.constant 0 : i32
    %c0_i32_2 = arith.constant 0 : i32
    %c0_i32_3 = arith.constant 0 : i32
    return %c0_i32, %c0_i32_0, %c0_i32_1, %c0_i32_2 : i32, i32, i32, i32
  }
  func.func @transform_16(%arg0: i32) -> (i32, i32, i32, i32) {
    %c0_i32 = arith.constant 0 : i32
    %c0_i32_0 = arith.constant 0 : i32
    %c0_i32_1 = arith.constant 0 : i32
    %c0_i32_2 = arith.constant 0 : i32
    return %arg0, %c0_i32, %c0_i32_0, %c0_i32_1 : i32, i32, i32, i32
  }
}

</mosaic_0001>

<bundles_post_ra>
// kernel: tpu_custom_call.1
= control target key start
LH: loop header
LB: loop body
LE: loop exit
PB: predicated region body
PF: predicated region fallthrough
CT: control target
= control target key end

     0   :  { %s15424_s0 = inlined_call_operand.vmem [shape: f32[2,16,16,4], index: 0, kind: input, shape index: {}]   ;;  %s15425_s1 = inlined_call_operand.vmem [shape: f32[1,4], index: 1, kind: input, shape index: {}]   ;;  %s15426_s2 = inlined_call_operand.vmem [shape: f32[1,4], index: 2, kind: input, shape index: {}]   ;;  %s15427_s3 = inlined_call_operand.vmem [shape: bf16[4,8], index: 3, kind: input, shape index: {}]   ;;  %s15428_s4 = inlined_call_operand.vmem [shape: f32[1,8], index: 4, kind: input, shape index: {}]   ;;  %s15429_s5 = inlined_call_operand.vmem [shape: bf16[3,3,8,4], index: 5, kind: input, shape index: {}]   ;;  %s15430_s6 = inlined_call_operand.vmem [shape: f32[1,8], index: 6, kind: input, shape index: {}]   ;;  %s15431_s7 = inlined_call_operand.vmem [shape: f32[1,8], index: 7, kind: input, shape index: {}]   ;;  %s15432_s8 = inlined_call_operand.vmem [shape: bf16[8,8], index: 8, kind: input, shape index: {}]   ;;  %s15433_s9 = inlined_call_operand.vmem [shape: f32[1,8], index: 9, kind: input, shape index: {}]   ;;  %s15434_s10 = inlined_call_operand.vmem [shape: bf16[3,3,8,4], index: 10, kind: input, shape index: {}]   ;;  %s15435_s11 = inlined_call_operand.vmem [shape: f32[1,12], index: 11, kind: input, shape index: {}]   ;;  %s15436_s12 = inlined_call_operand.vmem [shape: f32[1,12], index: 12, kind: input, shape index: {}]   ;;  %s15437_s13 = inlined_call_operand.vmem [shape: bf16[12,8], index: 13, kind: input, shape index: {}]   ;;  %s15438_s14 = inlined_call_operand.vmem [shape: f32[1,8], index: 14, kind: input, shape index: {}]   ;;  %s15439_s15 = inlined_call_operand.vmem [shape: bf16[3,3,8,4], index: 15, kind: input, shape index: {}]   ;;  %s15440_s16 = inlined_call_operand.hbm [shape: f32[2,16,16,16], index: 16, kind: output, shape index: {}]  }
   0x1   :  { %15443 = sst [smem:[#allocation9_spill]] %s15424_s0 }
   0x2   :  { %15444 = sst [smem:[#allocation10_spill]] %s15425_s1 }
   0x3   :  { %15445 = sst [smem:[#allocation11_spill]] %s15426_s2 }
   0x4   :  { %21 = vsyncpa [#allocation5], 0 }
   0x5   :  { %23 = vsyncpa [#allocation5 + $0x1], 0  ;;  %s12263_s21 = smov 0   ;;  %s12265_s22 = smov 0  }
   0x6   :  { %s12267_s23 = smov 0   ;;  %s12269_s24 = smov 0  }
   0x7 LB: > { %15446 = sst [smem:[#allocation7_spill]] %s12166_s23  ;;  %s12284_s25 = sadd.s32 4294967295, %s12170_s24   ;;  %s12170_s24 = sphi %s12269_s24, %s15458_s24   ;;  %s12166_s23 = sphi %s12267_s23, %s15455_s23   ;;  %s12162_s22 = sphi %s12265_s22, %s15457_s22   ;;  %s12158_s21 = sphi %s12263_s21, %s15456_s21  }
   0x8   : > { %s9975_s26 = sadd.s32 4294967294, %s12170_s24   ;;  %s12288_s27 = sadd.s32 1, %s12170_s24  }
   0x9   : > { %s377_s28 = sadd.s32 1, %s12166_s23  ;;  %s374_s29 = ssub.s32 %s12170_s24, %s12288_s27 }
   0xa   : > { %p387_p0 = scmp.ne.s32.totalorder %s12166_s23, %s12162_s22  ;;  %p375_p1 = scmp.eq.s32.totalorder %s374_s29, 0 }
   0xb   : > { %p388_p2 = scmp.eq.s32.totalorder %s12284_s25, 1  ;;  %p393_p3 = scmp.ne.s32.totalorder %s12162_s22, %s12158_s21 }
   0xc   : > { %p394_p4 = scmp.eq.s32.totalorder %s9975_s26, 1  ;;  %p9978_p7 = scmp.ge.s32.totalorder %s12170_s24, 1 }
   0xd   : > { %s12299_s30 = scalar_select %p375_p1, %s12166_s23, %s377_s28  }
   0xe   : > { %p12301_p5 = por %p388_p2, %p387_p0  ;;  %p12305_p6 = por %p394_p4, %p393_p3 }
   0xf   : > { %15447 = sst [smem:[#allocation8_spill]] %s12299_s30  ;;  %p465_p8 = scmp.lt.s32.totalorder %s12170_s24, 3 }
  0x11   : > { %p466_p9 = pnand %p9978_p7, %p465_p8 }
  0x12   : > { %v744_v0 = vld [vmem:[%s15427_s3] sm:$0x3] (!%p466_p9)  ;;  %vm800_vm0 = vcmask (!%p466_p9), 1041408   ;;  %p515_p10 = scmp.lt.s32.totalorder (!%p466_p9), %s12284_s25, 1  ;;  %vm553_vm1 = vcmask (!%p466_p9), 31744   ;;  %s15450_s30 = sld [smem:[#allocation9_spill]] (!%p466_p9) }
  0x13   : > { %469 = sbr.rel (%p466_p9) target bundleno = 2647 (0xa57), region = 84  ;;  %12033 = vmatprep.subr.msk.bf16.mxu0 (!%p466_p9), %vm800_vm0, %v744_v0  ;;  %v802_v1 = vsel (!%p466_p9), %vm800_vm0, %v744_v0, 0  ;;  %s15451_s1 = sld [smem:[#allocation10_spill]] (!%p466_p9)  ;;  %vm1118_vm2 = vcmask (!%p466_p9), 1043456   ;;  %vm1069_vm3 = vcmask (!%p466_p9), 64512   ;;  %vm1015_vm4 = vcmask (!%p466_p9), 25600  }
  0x14   : > { %11014 = vmatpush3.bf16.msra.mxu0 (!%p466_p9), %v802_v1  ;;  %s15452_s2 = sld [smem:[#allocation11_spill]] (!%p466_p9)  ;;  %s12173_s19 = smov (!%p466_p9), 4   ;;  %vm3637_vm5 = vcmask (!%p466_p9), 64544   ;;  %vm6969_vm6 = vcmask (!%p466_p9), 1045504   ;;  %vm6715_vm7 = vcmask (!%p466_p9), 97344   ;;  %vm6920_vm8 = vcmask (!%p466_p9), 97280  }
  0x15   : > { %s12175_s18 = smov (!%p466_p9), 12   ;;  %vm9801_vm9 = vcmask (!%p466_p9), 130144   ;;  %vm9866_vm10 = vcmask (!%p466_p9), 130048   ;;  %s10502_s28 = sshll.u32 (!%p466_p9), %s12284_s25, 12 }
  0x19   : > { %v12345_v14 = vld [vmem:[%s15451_s1] ss:$0 sm:$0xff] (!%p466_p9) }
  0x1a   : > { %s516_s20 = scalar_select %p515_p10, %s12284_s25, 1  ;;  %v12362_v21 = vld [vmem:[%s15452_s2] ss:$0 sm:$0xff] }
  0x1c   : > { %s10501_s26 = sshll.u32 %s516_s20, 8 }
  0x1d   : > { %s12319_s23 = scalar_lea.vmem %s15450_s30, %s10501_s26  ;;  %s15442_s26 = smov 8  }
  0x1e   : > { %v521_v2 = vld [vmem:[%s12319_s23] sm:$0xff]  ;;  %v522_v3 = vld [vmem:[%s12319_s23 + $0x8] sm:$0xff]  ;;  %v523_v4 = vld [vmem:[%s12319_s23 + $0x10] sm:$0xff] }
  0x1f   : > { %554 = vst.msk [vmem:[#allocation2] sm:$0xff] %vm553_vm1, %v521_v2  ;;  %555 = vst.msk [vmem:[#allocation2 + $0x8] sm:$0xff] %vm553_vm1, %v522_v3  ;;  %v524_v5 = vld [vmem:[%s12319_s23 + $0x18] sm:$0xff]  ;;  %v525_v6 = vld [vmem:[%s12319_s23 + $0x20] sm:$0xff] }
  0x20   : > { %556 = vst.msk [vmem:[#allocation2 + $0x10] sm:$0xff] %vm553_vm1, %v523_v4  ;;  %v526_v7 = vld [vmem:[%s12319_s23 + $0x28] sm:$0xff]  ;;  %557 = vst.msk [vmem:[#allocation2 + $0x18] sm:$0xff] %vm553_vm1, %v524_v5  ;;  %v527_v8 = vld [vmem:[%s12319_s23 + $0x30] sm:$0xff] }
  0x21   : > { %558 = vst.msk [vmem:[#allocation2 + $0x20] sm:$0xff] %vm553_vm1, %v525_v6  ;;  %559 = vst.msk [vmem:[#allocation2 + $0x28] sm:$0xff] %vm553_vm1, %v526_v7  ;;  %v528_v9 = vld [vmem:[%s12319_s23 + $0x38] sm:$0xff]  ;;  %v529_v10 = vld [vmem:[%s12319_s23 + $0x40] sm:$0xff] }
  0x22   : > { %560 = vst.msk [vmem:[#allocation2 + $0x30] sm:$0xff] %vm553_vm1, %v527_v8  ;;  %561 = vst.msk [vmem:[#allocation2 + $0x38] sm:$0xff] %vm553_vm1, %v528_v9  ;;  %v530_v11 = vld [vmem:[%s12319_s23 + $0x48] sm:$0xff]  ;;  %v531_v12 = vld [vmem:[%s12319_s23 + $0x50] sm:$0xff] }
  0x23   : > { %562 = vst.msk [vmem:[#allocation2 + $0x40] sm:$0xff] %vm553_vm1, %v529_v10  ;;  %v532_v13 = vld [vmem:[%s12319_s23 + $0x58] sm:$0xff]  ;;  %563 = vst.msk [vmem:[#allocation2 + $0x48] sm:$0xff] %vm553_vm1, %v530_v11  ;;  %v533_v15 = vld [vmem:[%s12319_s23 + $0x60] sm:$0xff] }
  0x24   : > { %564 = vst.msk [vmem:[#allocation2 + $0x50] sm:$0xff] %vm553_vm1, %v531_v12  ;;  %565 = vst.msk [vmem:[#allocation2 + $0x58] sm:$0xff] %vm553_vm1, %v532_v13  ;;  %v534_v16 = vld [vmem:[%s12319_s23 + $0x68] sm:$0xff]  ;;  %v535_v17 = vld [vmem:[%s12319_s23 + $0x70] sm:$0xff] }
  0x25   : > { %566 = vst.msk [vmem:[#allocation2 + $0x60] sm:$0xff] %vm553_vm1, %v533_v15  ;;  %567 = vst.msk [vmem:[#allocation2 + $0x68] sm:$0xff] %vm553_vm1, %v534_v16  ;;  %v536_v18 = vld [vmem:[%s12319_s23 + $0x78] sm:$0xff]  ;;  %v537_v19 = vld [vmem:[%s12319_s23 + $0x80] sm:$0xff] }
  0x26   : > { %568 = vst.msk [vmem:[#allocation2 + $0x70] sm:$0xff] %vm553_vm1, %v535_v17  ;;  %v538_v20 = vld [vmem:[%s12319_s23 + $0x88] sm:$0xff]  ;;  %569 = vst.msk [vmem:[#allocation2 + $0x78] sm:$0xff] %vm553_vm1, %v536_v18  ;;  %v539_v22 = vld [vmem:[%s12319_s23 + $0x90] sm:$0xff] }
  0x27   : > { %570 = vst.msk [vmem:[#allocation2 + $0x80] sm:$0xff] %vm553_vm1, %v537_v19  ;;  %571 = vst.msk [vmem:[#allocation2 + $0x88] sm:$0xff] %vm553_vm1, %v538_v20  ;;  %v540_v23 = vld [vmem:[%s12319_s23 + $0x98] sm:$0xff]  ;;  %v541_v24 = vld [vmem:[%s12319_s23 + $0xa0] sm:$0xff] }
  0x28   : > { %572 = vst.msk [vmem:[#allocation2 + $0x90] sm:$0xff] %vm553_vm1, %v539_v22  ;;  %573 = vst.msk [vmem:[#allocation2 + $0x98] sm:$0xff] %vm553_vm1, %v540_v23  ;;  %v542_v25 = vld [vmem:[%s12319_s23 + $0xa8] sm:$0xff]  ;;  %v543_v26 = vld [vmem:[%s12319_s23 + $0xb0] sm:$0xff] }
  0x29   : > { %574 = vst.msk [vmem:[#allocation2 + $0xa0] sm:$0xff] %vm553_vm1, %v541_v24  ;;  %v544_v27 = vld [vmem:[%s12319_s23 + $0xb8] sm:$0xff]  ;;  %v586_v28 = vld [vmem:[#allocation2] sm:$0xff]  ;;  %v587_v29 = vld [vmem:[#allocation2 + $0x8] sm:$0xff] }
  0x2a   : > { %v588_v30 = vld [vmem:[#allocation2 + $0x10] sm:$0xff]  ;;  %575 = vst.msk [vmem:[#allocation2 + $0xa8] sm:$0xff] %vm553_vm1, %v542_v25  ;;  %576 = vst.msk [vmem:[#allocation2 + $0xb0] sm:$0xff] %vm553_vm1, %v543_v26  ;;  %v625_v31 = vmul.f32 %v12345_v14, %v586_v28  ;;  %v626_v32 = vmul.f32 %v12345_v14, %v587_v29  ;;  %v589_v33 = vld [vmem:[#allocation2 + $0x18] sm:$0xff] }
  0x2b   : > { %577 = vst.msk [vmem:[#allocation2 + $0xb8] sm:$0xff] %vm553_vm1, %v544_v27  ;;  %v627_v34 = vmul.f32 %v12345_v14, %v588_v30  ;;  %v590_v35 = vld [vmem:[#allocation2 + $0x20] sm:$0xff]  ;;  %v591_v36 = vld [vmem:[#allocation2 + $0x28] sm:$0xff]  ;;  %v628_v37 = vmul.f32 %v12345_v14, %v589_v33  ;;  %v592_v40 = vld [vmem:[#allocation2 + $0x30] sm:$0xff] }
  0x2c   : > { %v629_v38 = vmul.f32 %v12345_v14, %v590_v35  ;;  %v630_v39 = vmul.f32 %v12345_v14, %v591_v36  ;;  %v593_v41 = vld [vmem:[#allocation2 + $0x38] sm:$0xff]  ;;  %v664_v42 = vadd.f32 %v12362_v21, %v625_v31  ;;  %v665_v43 = vadd.f32 %v12362_v21, %v626_v32  ;;  %v594_v50 = vld [vmem:[#allocation2 + $0x40] sm:$0xff]  ;;  %v595_v51 = vld [vmem:[#allocation2 + $0x48] sm:$0xff] }
  0x2d   : > { %v666_v44 = vadd.f32 %v12362_v21, %v627_v34  ;;  %v631_v45 = vmul.f32 %v12345_v14, %v592_v40  ;;  %v667_v46 = vadd.f32 %v12362_v21, %v628_v37  ;;  %v632_v49 = vmul.f32 %v12345_v14, %v593_v41  ;;  %v596_v60 = vld [vmem:[#allocation2 + $0x50] sm:$0xff]  ;;  %v597_v0 = vld [vmem:[#allocation2 + $0x58] sm:$0xff]  ;;  %v598_v1 = vld [vmem:[#allocation2 + $0x60] sm:$0xff] }
  0x2e   : > { %v668_v47 = vadd.f32 %v12362_v21, %v629_v38  ;;  %v669_v48 = vadd.f32 %v12362_v21, %v630_v39  ;;  %v696_v52 = vmax.f32 %v664_v42, 0.0  ;;  %v697_v53 = vmax.f32 %v665_v43, 0.0  ;;  %v599_v2 = vld [vmem:[#allocation2 + $0x68] sm:$0xff]  ;;  %v545_v5 = vld [vmem:[%s12319_s23 + $0xc0] sm:$0xff]  ;;  %v547_v7 = vld [vmem:[%s12319_s23 + $0xd0] sm:$0xff] }
  0x2f   : > { %v698_v54 = vmax.f32 %v666_v44, 0.0  ;;  %v670_v55 = vadd.f32 %v12362_v21, %v631_v45  ;;  %v699_v56 = vmax.f32 %v667_v46, 0.0  ;;  %v671_v59 = vadd.f32 %v12362_v21, %v632_v49  ;;  %v546_v6 = vld [vmem:[%s12319_s23 + $0xc8] sm:$0xff]  ;;  %578 = vst.msk [vmem:[#allocation2 + $0xc0] sm:$0xff] %vm553_vm1, %v545_v5  ;;  %v548_v10 = vld [vmem:[%s12319_s23 + $0xd8] sm:$0xff]  ;;  %580 = vst.msk [vmem:[#allocation2 + $0xd0] sm:$0xff] %vm553_vm1, %v547_v7 }
  0x30   : > { %v700_v57 = vmax.f32 %v668_v47, 0.0  ;;  %v701_v58 = vmax.f32 %v669_v48, 0.0  ;;  %v728_v61 = vpack.c.bf16 %v697_v53, %v696_v52  ;;  %v633_v62 = vmul.f32 %v12345_v14, %v594_v50  ;;  %579 = vst.msk [vmem:[#allocation2 + $0xc8] sm:$0xff] %vm553_vm1, %v546_v6  ;;  %v549_v11 = vld [vmem:[%s12319_s23 + $0xe0] sm:$0xff]  ;;  %v550_v12 = vld [vmem:[%s12319_s23 + $0xe8] sm:$0xff]  ;;  %581 = vst.msk [vmem:[#allocation2 + $0xd8] sm:$0xff] %vm553_vm1, %v548_v10 }
  0x31   : > { %v634_v63 = vmul.f32 %v12345_v14, %v595_v51  ;;  %v729_v3 = vpack.c.bf16 %v699_v56, %v698_v54  ;;  %v702_v13 = vmax.f32 %v670_v55, 0.0  ;;  %v703_v15 = vmax.f32 %v671_v59, 0.0  ;;  %582 = vst.msk [vmem:[#allocation2 + $0xe0] sm:$0xff] %vm553_vm1, %v549_v11  ;;  %583 = vst.msk [vmem:[#allocation2 + $0xe8] sm:$0xff] %vm553_vm1, %v550_v12  ;;  %v551_v18 = vld [vmem:[%s12319_s23 + $0xf0] sm:$0xff]  ;;  %v552_v19 = vld [vmem:[%s12319_s23 + $0xf8] sm:$0xff] }
  0x32   : > { %v730_v4 = vpack.c.bf16 %v701_v58, %v700_v57  ;;  %11015 = vmatprep.mubr.msk.bf16.mxu0 %vm553_vm1, %v728_v61  ;;  %v672_v8 = vadd.f32 %v12362_v21, %v633_v62  ;;  %v635_v16 = vmul.f32 %v12345_v14, %v596_v60  ;;  %v636_v17 = vmul.f32 %v12345_v14, %v597_v0  ;;  %v600_v31 = vld [vmem:[#allocation2 + $0x70] sm:$0xff]  ;;  %v601_v32 = vld [vmem:[#allocation2 + $0x78] sm:$0xff]  ;;  %v602_v33 = vld [vmem:[#allocation2 + $0x80] sm:$0xff] }
  0x33   : > { %v673_v9 = vadd.f32 %v12362_v21, %v634_v63  ;;  %11016 = vmatmul.mubr.msk.bf16.vlgmr.msra.gmra.mrb[0].mxu0 %vm553_vm1, %v729_v3  ;;  %v637_v23 = vmul.f32 %v12345_v14, %v598_v1  ;;  %v638_v24 = vmul.f32 %v12345_v14, %v599_v2  ;;  %584 = vst.msk [vmem:[#allocation2 + $0xf0] sm:$0xff] %vm553_vm1, %v551_v18  ;;  %585 = vst.msk [vmem:[#allocation2 + $0xf8] sm:$0xff] %vm553_vm1, %v552_v19  ;;  %v603_v34 = vld [vmem:[#allocation2 + $0x88] sm:$0xff]  ;;  %v604_v49 = vld [vmem:[#allocation2 + $0x90] sm:$0xff] }
  0x34   : > { %11019 = vmatprep.mubr.msk.bf16.mxu0 %vm553_vm1, %v730_v4  ;;  %v704_v20 = vmax.f32 %v672_v8, 0.0  ;;  %v731_v25 = vpack.c.bf16 %v703_v15, %v702_v13  ;;  %v674_v26 = vadd.f32 %v12362_v21, %v635_v16  ;;  %v675_v27 = vadd.f32 %v12362_v21, %v636_v17  ;;  %v605_v50 = vld [vmem:[#allocation2 + $0x98] sm:$0xff]  ;;  %v606_v51 = vld [vmem:[#allocation2 + $0xa0] sm:$0xff]  ;;  %v607_v52 = vld [vmem:[#allocation2 + $0xa8] sm:$0xff] }
  0x35   : > { %v705_v22 = vmax.f32 %v673_v9, 0.0  ;;  %v676_v29 = vadd.f32 %v12362_v21, %v637_v23  ;;  %v677_v30 = vadd.f32 %v12362_v21, %v638_v24  ;;  %v639_v37 = vmul.f32 %v12345_v14, %v600_v31  ;;  %v608_v3 = vld [vmem:[#allocation2 + $0xb0] sm:$0xff]  ;;  %v609_v4 = vld [vmem:[#allocation2 + $0xb8] sm:$0xff] }
  0x36   : > { %v706_v35 = vmax.f32 %v674_v26, 0.0  ;;  %v707_v36 = vmax.f32 %v675_v27, 0.0  ;;  %v640_v38 = vmul.f32 %v12345_v14, %v601_v32  ;;  %v641_v41 = vmul.f32 %v12345_v14, %v602_v33  ;;  %v610_v5 = vld [vmem:[#allocation2 + $0xc0] sm:$0xff]  ;;  %v612_v23 = vld [vmem:[#allocation2 + $0xd0] sm:$0xff] }
  0x37   : > { %v732_v28 = vpack.c.bf16 %v705_v22, %v704_v20  ;;  %v708_v39 = vmax.f32 %v676_v29, 0.0  ;;  %v709_v40 = vmax.f32 %v677_v30, 0.0  ;;  %v642_v42 = vmul.f32 %v12345_v14, %v603_v34  ;;  %v611_v6 = vld [vmem:[#allocation2 + $0xc8] sm:$0xff]  ;;  %v613_v24 = vld [vmem:[#allocation2 + $0xd8] sm:$0xff] }
  0x38   : > { %v733_v43 = vpack.c.bf16 %v707_v36, %v706_v35  ;;  %v678_v44 = vadd.f32 %v12362_v21, %v639_v37  ;;  %v679_v45 = vadd.f32 %v12362_v21, %v640_v38  ;;  %v680_v47 = vadd.f32 %v12362_v21, %v641_v41  ;;  %v615_v26 = vld [vmem:[#allocation2 + $0xe8] sm:$0xff] }
  0x39   : > { %v734_v46 = vpack.c.bf16 %v709_v40, %v708_v39  ;;  %v681_v48 = vadd.f32 %v12362_v21, %v642_v42  ;;  %v643_v55 = vmul.f32 %v12345_v14, %v604_v49  ;;  %v644_v56 = vmul.f32 %v12345_v14, %v605_v50 }
  0x3a   : > { %v710_v53 = vmax.f32 %v678_v44, 0.0  ;;  %v711_v54 = vmax.f32 %v679_v45, 0.0  ;;  %v712_v57 = vmax.f32 %v680_v47, 0.0  ;;  %v645_v59 = vmul.f32 %v12345_v14, %v606_v51  ;;  %v616_v41 = vld [vmem:[#allocation2 + $0xf0] sm:$0xff]  ;;  %v617_v42 = vld [vmem:[#allocation2 + $0xf8] sm:$0xff] }
  0x3b   : > { %11020 = vmatmul.mubr.msk.bf16.gmra.mrb[4].mxu0 %vm553_vm1, %v731_v25  ;;  %v713_v58 = vmax.f32 %v681_v48, 0.0  ;;  %v646_v60 = vmul.f32 %v12345_v14, %v607_v52  ;;  %v682_v62 = vadd.f32 %v12362_v21, %v643_v55  ;;  %v683_v63 = vadd.f32 %v12362_v21, %v644_v56  ;;  %v614_v25 = vld [vmem:[#allocation2 + $0xe0] sm:$0xff] }
  0x3c   : > { %11023 = vmatprep.mubr.msk.bf16.mxu0 %vm553_vm1, %v732_v28  ;;  %v735_v61 = vpack.c.bf16 %v711_v54, %v710_v53  ;;  %v684_v1 = vadd.f32 %v12362_v21, %v645_v59  ;;  %v647_v9 = vmul.f32 %v12345_v14, %v608_v3  ;;  %v648_v10 = vmul.f32 %v12345_v14, %v609_v4  ;;  %v10051_v59 = vld [vmem:[%s15429_s5 + $0xc] sm:$0xf] }
  0x3d   : > { %v736_v0 = vpack.c.bf16 %v713_v58, %v712_v57  ;;  %v685_v2 = vadd.f32 %v12362_v21, %v646_v60  ;;  %v714_v7 = vmax.f32 %v682_v62, 0.0  ;;  %v715_v8 = vmax.f32 %v683_v63, 0.0  ;;  %v10034_v58 = vld [vmem:[%s15429_s5 + $0x8] sm:$0xf]  ;;  %v12496_v60 = vld [vmem:[%s15428_s4] ss:$0 sm:$0xff] }
  0x3e   : > { %v716_v11 = vmax.f32 %v684_v1, 0.0  ;;  %v649_v13 = vmul.f32 %v12345_v14, %v610_v5  ;;  %v650_v15 = vmul.f32 %v12345_v14, %v611_v6  ;;  %v686_v17 = vadd.f32 %v12362_v21, %v647_v9 }
  0x3f   : > { %v717_v12 = vmax.f32 %v685_v2, 0.0  ;;  %v737_v16 = vpack.c.bf16 %v715_v8, %v714_v7  ;;  %v687_v18 = vadd.f32 %v12362_v21, %v648_v10  ;;  %v651_v29 = vmul.f32 %v12345_v14, %v612_v23 }
  0x40   : > { %v688_v20 = vadd.f32 %v12362_v21, %v649_v13  ;;  %v689_v22 = vadd.f32 %v12362_v21, %v650_v15  ;;  %v718_v27 = vmax.f32 %v686_v17, 0.0  ;;  %v652_v30 = vmul.f32 %v12345_v14, %v613_v24 }
  0x41   : > { %v738_v19 = vpack.c.bf16 %v717_v12, %v716_v11  ;;  %v719_v28 = vmax.f32 %v687_v18, 0.0  ;;  %v653_v33 = vmul.f32 %v12345_v14, %v614_v25  ;;  %v654_v34 = vmul.f32 %v12345_v14, %v615_v26 }
  0x42   : > { %v720_v31 = vmax.f32 %v688_v20, 0.0  ;;  %v721_v32 = vmax.f32 %v689_v22, 0.0  ;;  %v690_v36 = vadd.f32 %v12362_v21, %v651_v29  ;;  %v691_v37 = vadd.f32 %v12362_v21, %v652_v30  ;;  %v12522_v20 = vld [vmem:[%s15429_s5 + $0x14] sm:$0xf] }
  0x43   : > { %11024 = vmatmul.mubr.msk.bf16.gmra.mrb[8].mxu0 %vm553_vm1, %v733_v43  ;;  %v739_v35 = vpack.c.bf16 %v719_v28, %v718_v27  ;;  %v692_v39 = vadd.f32 %v12362_v21, %v653_v33  ;;  %v693_v40 = vadd.f32 %v12362_v21, %v654_v34  ;;  %v655_v45 = vmul.f32 %v12345_v14, %v616_v41 }
  0x44   : > { %11027 = vmatprep.mubr.msk.bf16.mxu0 %vm553_vm1, %v734_v46  ;;  %v740_v38 = vpack.c.bf16 %v721_v32, %v720_v31  ;;  %v722_v43 = vmax.f32 %v690_v36, 0.0  ;;  %v723_v44 = vmax.f32 %v691_v37, 0.0  ;;  %v656_v46 = vmul.f32 %v12345_v14, %v617_v42  ;;  %v10017_v14 = vld [vmem:[%s15429_s5 + $0x4] sm:$0xf] }
  0x45   : > { %v724_v47 = vmax.f32 %v692_v39, 0.0  ;;  %v725_v48 = vmax.f32 %v693_v40, 0.0  ;;  %v694_v50 = vadd.f32 %v12362_v21, %v655_v45  ;;  %12035 = vmatprep.subr.msk.bf16.mxu0 %vm1118_vm2, %v10017_v14  ;;  %v1383_v56 = vsel %vm1118_vm2, %v10017_v14, 0 }
  0x46   : > { %v741_v49 = vpack.c.bf16 %v723_v44, %v722_v43  ;;  %v695_v51 = vadd.f32 %v12362_v21, %v656_v46  ;;  %11082 = vmatpush3.bf16.msra.mxu0 %v1383_v56  ;;  %v1068_v21 = vld [vmem:[%s15429_s5] sm:$0xf]  ;;  %v1645_v15 = vsel %vm1118_vm2, %v10034_v58, 0 }
  0x47   : > { %v742_v52 = vpack.c.bf16 %v725_v48, %v724_v47  ;;  %v726_v53 = vmax.f32 %v694_v50, 0.0  ;;  %12034 = vmatprep.subr.msk.bf16.mxu1 %vm1118_vm2, %v1068_v21  ;;  %v1120_v57 = vsel %vm1118_vm2, %v1068_v21, 0  ;;  %12037 = vmatprep.subr.msk.bf16.mxu0 %vm1118_vm2, %v10051_v59 }
  0x48   : > { %v727_v54 = vmax.f32 %v695_v51, 0.0  ;;  %11048 = vmatpush3.bf16.msra.mxu1 %v1120_v57 }
  0x49   : > { %12036 = vmatprep.subr.msk.bf16.mxu1 %vm1118_vm2, %v10034_v58 }
  0x4a   : > { %v743_v55 = vpack.c.bf16 %v727_v54, %v726_v53 }
  0x4b   : > { %11028 = vmatmul.mubr.msk.bf16.gmra.mrb[12].mxu0 %vm553_vm1, %v735_v61 }
  0x4c   : > { %11031 = vmatprep.mubr.msk.bf16.mxu0 %vm553_vm1, %v736_v0 }
  0x53   : > { %11032 = vmatmul.mubr.msk.bf16.gmra.mrb[16].mxu0 %vm553_vm1, %v737_v16  ;;  %v1907_v16 = vsel %vm1118_vm2, %v10051_v59, 0 }
  0x54   : > { %11035 = vmatprep.mubr.msk.bf16.mxu0 %vm553_vm1, %v738_v19  ;;  %v12517_v19 = vld [vmem:[%s15429_s5 + $0x10] sm:$0xf] }
  0x5b   : > { %11036 = vmatmul.mubr.msk.bf16.gmra.mrb[20].mxu0 %vm553_vm1, %v739_v35 }
  0x5c   : > { %11039 = vmatprep.mubr.msk.bf16.mxu0 %vm553_vm1, %v740_v38 }
  0x63   : > { %11040 = vmatmul.mubr.msk.bf16.gmra.mrb[24].mxu0 %vm553_vm1, %v741_v49 }
  0x64   : > { %11043 = vmatprep.mubr.msk.bf16.mxu0 %vm553_vm1, %v742_v52 }
  0x6b   : > { %11044 = vmatmul.mubr.msk.bf16.gmra.mrb[28].mxu0 %vm553_vm1, %v743_v55 }
 0x106   : > { %v11017_v61 = vpop.f32.mrb[0].mxu0 }
 0x107   : > { %v847_v62 = vadd.f32 %v11017_v61, %v12496_v60  ;;  %v838_v63 = vpop.f32.mrb[1].mxu0 }
 0x108   : > { %v839_v0 = vadd.f32 %v12496_v60, %v838_v63  ;;  %v11018_v1 = vpop.f32.mrb[2].mxu0 }
 0x109   : > { %v850_v2 = vadd.f32 %v11018_v1, %v12496_v60  ;;  %v841_v3 = vpop.f32.mrb[3].mxu0  ;;  %v967_v5 = vmax.f32 %v847_v62, 0.0 }
 0x10a   : > { %v842_v4 = vadd.f32 %v12496_v60, %v841_v3  ;;  %v965_v7 = vmax.f32 %v839_v0, 0.0 }
 0x10b   : > { %v968_v6 = vmax.f32 %v850_v2, 0.0 }
 0x10c   : > { %v966_v8 = vmax.f32 %v842_v4, 0.0 }
 0x10d   : > { %v12502_v9 = vpack.c.bf16 %v968_v6, %v967_v5 }
 0x10e   : > { %v12504_v10 = vpack.c.bf16 %v966_v8, %v965_v7  ;;  %v11021_v11 = vpop.f32.mrb[4].mxu0 }
 0x10f   : > { %v863_v12 = vadd.f32 %v11021_v11, %v12496_v60  ;;  %v854_v13 = vpop.f32.mrb[5].mxu0 }
 0x110   : > { %v855_v17 = vadd.f32 %v12496_v60, %v854_v13  ;;  %v11022_v18 = vpop.f32.mrb[6].mxu0  ;;  %11049 = vmatprep.mubr.msk.bf16.mxu1 %vm1069_vm3, %v12504_v10  ;;  %11083 = vmatprep.mubr.msk.bf16.mxu0 %vm1069_vm3, %v12504_v10 }
 0x111   : > { %v866_v22 = vadd.f32 %v11022_v18, %v12496_v60  ;;  %v857_v23 = vpop.f32.mrb[7].mxu0  ;;  %11050 = vmatmul.mubr.msk.bf16.vlgmr.msra.gmra.mrb[0].mxu1 %vm1069_vm3, %v12502_v9  ;;  %11084 = vmatmul.mubr.msk.bf16.vlgmr.msra.gmra.mrb[32].mxu0 %vm1069_vm3, %v12502_v9  ;;  %v971_v25 = vmax.f32 %v863_v12, 0.0 }
 0x112   : > { %v858_v24 = vadd.f32 %v12496_v60, %v857_v23  ;;  %11116 = vmatpush3.bf16.msra.mxu1 %v1645_v15  ;;  %11150 = vmatpush3.bf16.msra.mxu0 %v1907_v16  ;;  %v969_v27 = vmax.f32 %v855_v17, 0.0 }
 0x113   : > { %v972_v26 = vmax.f32 %v866_v22, 0.0  ;;  %12038 = vmatprep.subr.msk.bf16.mxu1 %vm1118_vm2, %v12517_v19  ;;  %12039 = vmatprep.subr.msk.bf16.mxu0 %vm1118_vm2, %v12522_v20 }
 0x114   : > { %v970_v28 = vmax.f32 %v858_v24, 0.0 }
 0x115   : > { %v12534_v29 = vpack.c.bf16 %v972_v26, %v971_v25 }
 0x116   : > { %v12536_v30 = vpack.c.bf16 %v970_v28, %v969_v27  ;;  %v11025_v31 = vpop.f32.mrb[8].mxu0 }
 0x117   : > { %v879_v32 = vadd.f32 %v11025_v31, %v12496_v60  ;;  %v870_v33 = vpop.f32.mrb[9].mxu0 }
 0x118   : > { %v871_v34 = vadd.f32 %v12496_v60, %v870_v33  ;;  %v11026_v35 = vpop.f32.mrb[10].mxu0  ;;  %11053 = vmatprep.mubr.msk.bf16.mxu1 %vm1069_vm3, %v12536_v30  ;;  %11087 = vmatprep.mubr.msk.bf16.mxu0 %vm1069_vm3, %v12536_v30 }
 0x119   : > { %v882_v36 = vadd.f32 %v11026_v35, %v12496_v60  ;;  %v873_v37 = vpop.f32.mrb[11].mxu0  ;;  %11054 = vmatmul.mubr.msk.bf16.gmra.mrb[4].mxu1 %vm1069_vm3, %v12534_v29  ;;  %11088 = vmatmul.mubr.msk.bf16.gmra.mrb[36].mxu0 %vm1069_vm3, %v12534_v29  ;;  %v975_v39 = vmax.f32 %v879_v32, 0.0 }
 0x11a   : > { %v874_v38 = vadd.f32 %v12496_v60, %v873_v37  ;;  %v973_v41 = vmax.f32 %v871_v34, 0.0 }
 0x11b   : > { %v976_v40 = vmax.f32 %v882_v36, 0.0 }
 0x11c   : > { %v974_v42 = vmax.f32 %v874_v38, 0.0 }
 0x11d   : > { %v12550_v43 = vpack.c.bf16 %v976_v40, %v975_v39 }
 0x11e   : > { %v12552_v44 = vpack.c.bf16 %v974_v42, %v973_v41  ;;  %v11029_v45 = vpop.f32.mrb[12].mxu0 }
 0x11f   : > { %v895_v46 = vadd.f32 %v11029_v45, %v12496_v60  ;;  %v886_v47 = vpop.f32.mrb[13].mxu0 }
 0x120   : > { %v887_v48 = vadd.f32 %v12496_v60, %v886_v47  ;;  %v11030_v49 = vpop.f32.mrb[14].mxu0  ;;  %11057 = vmatprep.mubr.msk.bf16.mxu1 %vm1069_vm3, %v12552_v44  ;;  %11091 = vmatprep.mubr.msk.bf16.mxu0 %vm1069_vm3, %v12552_v44 }
 0x121   : > { %v898_v50 = vadd.f32 %v11030_v49, %v12496_v60  ;;  %v889_v51 = vpop.f32.mrb[15].mxu0  ;;  %11058 = vmatmul.mubr.msk.bf16.gmra.mrb[8].mxu1 %vm1069_vm3, %v12550_v43  ;;  %11092 = vmatmul.mubr.msk.bf16.gmra.mrb[40].mxu0 %vm1069_vm3, %v12550_v43  ;;  %v979_v53 = vmax.f32 %v895_v46, 0.0 }
 0x122   : > { %v890_v52 = vadd.f32 %v12496_v60, %v889_v51  ;;  %v977_v55 = vmax.f32 %v887_v48, 0.0 }
 0x123   : > { %v980_v54 = vmax.f32 %v898_v50, 0.0 }
 0x124   : > { %v978_v14 = vmax.f32 %v890_v52, 0.0 }
 0x125   : > { %v12566_v56 = vpack.c.bf16 %v980_v54, %v979_v53 }
 0x126   : > { %v12568_v21 = vpack.c.bf16 %v978_v14, %v977_v55  ;;  %v11033_v57 = vpop.f32.mrb[16].mxu0 }
 0x127   : > { %v911_v58 = vadd.f32 %v11033_v57, %v12496_v60  ;;  %v902_v59 = vpop.f32.mrb[17].mxu0 }
 0x128   : > { %v903_v61 = vadd.f32 %v12496_v60, %v902_v59  ;;  %v11034_v62 = vpop.f32.mrb[18].mxu0  ;;  %11061 = vmatprep.mubr.msk.bf16.mxu1 %vm1069_vm3, %v12568_v21  ;;  %11095 = vmatprep.mubr.msk.bf16.mxu0 %vm1069_vm3, %v12568_v21 }
 0x129   : > { %v914_v63 = vadd.f32 %v11034_v62, %v12496_v60  ;;  %v905_v0 = vpop.f32.mrb[19].mxu0  ;;  %11062 = vmatmul.mubr.msk.bf16.gmra.mrb[12].mxu1 %vm1069_vm3, %v12566_v56  ;;  %11096 = vmatmul.mubr.msk.bf16.gmra.mrb[44].mxu0 %vm1069_vm3, %v12566_v56  ;;  %v983_v2 = vmax.f32 %v911_v58, 0.0  ;;  %v12657_v62 = vld [vmem:[%s15429_s5 + $0x18] sm:$0xf] }
 0x12a   : > { %v906_v1 = vadd.f32 %v12496_v60, %v905_v0  ;;  %v981_v4 = vmax.f32 %v903_v61, 0.0  ;;  %v2432_v61 = vsel %vm1118_vm2, %v12522_v20, 0  ;;  %v2694_v20 = vsel %vm1118_vm2, %v12657_v62, 0 }
 0x12b   : > { %v984_v3 = vmax.f32 %v914_v63, 0.0  ;;  %v12662_v63 = vld [vmem:[%s15429_s5 + $0x1c] sm:$0xf] }
 0x12c   : > { %v982_v5 = vmax.f32 %v906_v1, 0.0  ;;  %v2956_v0 = vsel %vm1118_vm2, %v12662_v63, 0  ;;  %v10136_v1 = vld [vmem:[%s15429_s5 + $0x20] sm:$0xf] }
 0x12d   : > { %v12582_v6 = vpack.c.bf16 %v984_v3, %v983_v2  ;;  %v3218_v2 = vsel %vm1118_vm2, %v10136_v1, 0 }
 0x12e   : > { %v12584_v7 = vpack.c.bf16 %v982_v5, %v981_v4  ;;  %v11037_v8 = vpop.f32.mrb[20].mxu0 }
 0x12f   : > { %v927_v11 = vadd.f32 %v11037_v8, %v12496_v60  ;;  %v918_v12 = vpop.f32.mrb[21].mxu0 }
 0x130   : > { %v919_v13 = vadd.f32 %v12496_v60, %v918_v12  ;;  %v11038_v15 = vpop.f32.mrb[22].mxu0  ;;  %11065 = vmatprep.mubr.msk.bf16.mxu1 %vm1069_vm3, %v12584_v7  ;;  %11099 = vmatprep.mubr.msk.bf16.mxu0 %vm1069_vm3, %v12584_v7 }
 0x131   : > { %v930_v16 = vadd.f32 %v11038_v15, %v12496_v60  ;;  %v921_v17 = vpop.f32.mrb[23].mxu0  ;;  %11066 = vmatmul.mubr.msk.bf16.gmra.mrb[16].mxu1 %vm1069_vm3, %v12582_v6  ;;  %11100 = vmatmul.mubr.msk.bf16.gmra.mrb[48].mxu0 %vm1069_vm3, %v12582_v6  ;;  %v987_v22 = vmax.f32 %v927_v11, 0.0 }
 0x132   : > { %v922_v18 = vadd.f32 %v12496_v60, %v921_v17  ;;  %v985_v24 = vmax.f32 %v919_v13, 0.0 }
 0x133   : > { %v988_v23 = vmax.f32 %v930_v16, 0.0 }
 0x134   : > { %v986_v25 = vmax.f32 %v922_v18, 0.0 }
 0x135   : > { %v12598_v26 = vpack.c.bf16 %v988_v23, %v987_v22 }
 0x136   : > { %v12600_v27 = vpack.c.bf16 %v986_v25, %v985_v24  ;;  %v11041_v28 = vpop.f32.mrb[24].mxu0 }
 0x137   : > { %v943_v31 = vadd.f32 %v11041_v28, %v12496_v60  ;;  %v934_v32 = vpop.f32.mrb[25].mxu0 }
 0x138   : > { %v935_v33 = vadd.f32 %v12496_v60, %v934_v32  ;;  %v11042_v34 = vpop.f32.mrb[26].mxu0  ;;  %11069 = vmatprep.mubr.msk.bf16.mxu1 %vm1069_vm3, %v12600_v27  ;;  %11103 = vmatprep.mubr.msk.bf16.mxu0 %vm1069_vm3, %v12600_v27 }
 0x139   : > { %v946_v35 = vadd.f32 %v11042_v34, %v12496_v60  ;;  %v937_v36 = vpop.f32.mrb[27].mxu0  ;;  %11070 = vmatmul.mubr.msk.bf16.gmra.mrb[20].mxu1 %vm1069_vm3, %v12598_v26  ;;  %11104 = vmatmul.mubr.msk.bf16.gmra.mrb[52].mxu0 %vm1069_vm3, %v12598_v26  ;;  %v991_v38 = vmax.f32 %v943_v31, 0.0 }
 0x13a   : > { %v938_v37 = vadd.f32 %v12496_v60, %v937_v36  ;;  %v989_v40 = vmax.f32 %v935_v33, 0.0 }
 0x13b   : > { %v992_v39 = vmax.f32 %v946_v35, 0.0 }
 0x13c   : > { %v990_v41 = vmax.f32 %v938_v37, 0.0 }
 0x13d   : > { %v12614_v42 = vpack.c.bf16 %v992_v39, %v991_v38 }
 0x13e   : > { %v12616_v45 = vpack.c.bf16 %v990_v41, %v989_v40  ;;  %v11045_v46 = vpop.f32.mrb[28].mxu0 }
 0x13f   : > { %v959_v47 = vadd.f32 %v11045_v46, %v12496_v60  ;;  %v950_v48 = vpop.f32.mrb[29].mxu0 }
 0x140   : > { %v951_v49 = vadd.f32 %v12496_v60, %v950_v48  ;;  %v11046_v50 = vpop.f32.mrb[30].mxu0  ;;  %11073 = vmatprep.mubr.msk.bf16.mxu1 %vm1069_vm3, %v12616_v45  ;;  %11107 = vmatprep.mubr.msk.bf16.mxu0 %vm1069_vm3, %v12616_v45 }
 0x141   : > { %v962_v51 = vadd.f32 %v11046_v50, %v12496_v60  ;;  %v953_v52 = vpop.f32.mrb[31].mxu0  ;;  %11074 = vmatmul.mubr.msk.bf16.gmra.mrb[24].mxu1 %vm1069_vm3, %v12614_v42  ;;  %11108 = vmatmul.mubr.msk.bf16.gmra.mrb[56].mxu0 %vm1069_vm3, %v12614_v42  ;;  %v995_v54 = vmax.f32 %v959_v47, 0.0 }
 0x142   : > { %v954_v53 = vadd.f32 %v12496_v60, %v953_v52  ;;  %v993_v14 = vmax.f32 %v951_v49, 0.0  ;;  %v2170_v60 = vsel %vm1118_vm2, %v12517_v19, 0  ;;  %v12172_v19 = vmov 0.0  }
 0x143   : > { %v996_v55 = vmax.f32 %v962_v51, 0.0  ;;  %1023 = vst.msk [vmem:[#allocation3 + $0x48] sm:$0xff] %vm553_vm1, %v12172_v19  ;;  %1024 = vst.msk [vmem:[#allocation3 + $0x50] sm:$0xff] %vm553_vm1, %v12172_v19 }
 0x144   : > { %v994_v57 = vmax.f32 %v954_v53, 0.0  ;;  %1013 = vst.msk [vmem:[#allocation3] sm:$0xff] %vm553_vm1, %v12172_v19  ;;  %1014 = vst.msk [vmem:[#allocation3 + $0x8] sm:$0xff] %vm553_vm1, %v12172_v19 }
 0x145   : > { %v12630_v58 = vpack.c.bf16 %v996_v55, %v995_v54  ;;  %1017 = vst.msk [vmem:[#allocation3 + $0x18] sm:$0xff] %vm553_vm1, %v12172_v19  ;;  %1018 = vst.msk [vmem:[#allocation3 + $0x20] sm:$0xff] %vm553_vm1, %v12172_v19 }
 0x146   : > { %v12632_v59 = vpack.c.bf16 %v994_v57, %v993_v14  ;;  %1020 = vst.msk [vmem:[#allocation3 + $0x30] sm:$0xff] %vm553_vm1, %v12172_v19  ;;  %1021 = vst.msk [vmem:[#allocation3 + $0x38] sm:$0xff] %vm553_vm1, %v12172_v19 }
 0x147   : > { %1026 = vst.msk [vmem:[#allocation3 + $0x60] sm:$0xff] %vm553_vm1, %v12172_v19  ;;  %1027 = vst.msk [vmem:[#allocation3 + $0x68] sm:$0xff] %vm553_vm1, %v12172_v19 }
 0x148   : > { %11077 = vmatprep.mubr.msk.bf16.mxu1 %vm1069_vm3, %v12632_v59  ;;  %11111 = vmatprep.mubr.msk.bf16.mxu0 %vm1069_vm3, %v12632_v59  ;;  %1029 = vst.msk [vmem:[#allocation3 + $0x78] sm:$0xff] %vm553_vm1, %v12172_v19  ;;  %1030 = vst.msk [vmem:[#allocation3 + $0x80] sm:$0xff] %vm553_vm1, %v12172_v19 }
 0x149   : > { %11078 = vmatmul.mubr.msk.bf16.gmra.mrb[28].mxu1 %vm1069_vm3, %v12630_v58  ;;  %11112 = vmatmul.mubr.msk.bf16.gmra.mrb[60].mxu0 %vm1069_vm3, %v12630_v58  ;;  %1032 = vst.msk [vmem:[#allocation3 + $0x90] sm:$0xff] %vm553_vm1, %v12172_v19  ;;  %1033 = vst.msk [vmem:[#allocation3 + $0x98] sm:$0xff] %vm553_vm1, %v12172_v19 }
 0x14a   : > { %11117 = vmatprep.mubr.msk.bf16.mxu1 %vm1069_vm3, %v12504_v10  ;;  %11151 = vmatprep.mubr.msk.bf16.mxu0 %vm1069_vm3, %v12504_v10  ;;  %1035 = vst.msk [vmem:[#allocation3 + $0xa8] sm:$0xff] %vm553_vm1, %v12172_v19  ;;  %1036 = vst.msk [vmem:[#allocation3 + $0xb0] sm:$0xff] %vm553_vm1, %v12172_v19  ;;  %v1286_v3 = vld [vmem:[#allocation3 + $0x4a] sm:$0xff] }
 0x14b   : > { %1038 = vst.msk [vmem:[#allocation3 + $0xc0] sm:$0xff] %vm553_vm1, %v12172_v19  ;;  %1039 = vst.msk [vmem:[#allocation3 + $0xc8] sm:$0xff] %vm553_vm1, %v12172_v19 }
 0x14c   : > { %1041 = vst.msk [vmem:[#allocation3 + $0xd8] sm:$0xff] %vm553_vm1, %v12172_v19  ;;  %1042 = vst.msk [vmem:[#allocation3 + $0xe0] sm:$0xff] %vm553_vm1, %v12172_v19 }
 0x14d   : > { %1044 = vst.msk [vmem:[#allocation3 + $0xf0] sm:$0xff] %vm553_vm1, %v12172_v19  ;;  %1045 = vst.msk [vmem:[#allocation3 + $0xf8] sm:$0xff] %vm553_vm1, %v12172_v19  ;;  %v1284_v4 = vld [vmem:[#allocation3 + $0x32] sm:$0xff] }
 0x14e   : > { %1047 = vst.msk [vmem:[#allocation3 + $0x108] sm:$0xff] %vm553_vm1, %v12172_v19  ;;  %1048 = vst.msk [vmem:[#allocation3 + $0x110] sm:$0xff] %vm553_vm1, %v12172_v19  ;;  %v1288_v32 = vld [vmem:[#allocation3 + $0x62] sm:$0xff] }
 0x14f   : > { %1050 = vst.msk [vmem:[#allocation3 + $0x120] sm:$0xff] %vm553_vm1, %v12172_v19  ;;  %1051 = vst.msk [vmem:[#allocation3 + $0x128] sm:$0xff] %vm553_vm1, %v12172_v19  ;;  %v1290_v31 = vld [vmem:[#allocation3 + $0x7a] sm:$0xff] }
 0x150   : > { %1053 = vst.msk [vmem:[#allocation3 + $0x138] sm:$0xff] %vm553_vm1, %v12172_v19  ;;  %1054 = vst.msk [vmem:[#allocation3 + $0x140] sm:$0xff] %vm553_vm1, %v12172_v19 }
 0x151   : > { %11118 = vmatmul.mubr.msk.bf16.vlgmr.msra.gmra.mrb[32].mxu1 %vm1069_vm3, %v12502_v9  ;;  %11152 = vmatmul.mubr.msk.bf16.vlgmr.msra.gmra.mrb[64].mxu0 %vm1069_vm3, %v12502_v9  ;;  %1056 = vst.msk [vmem:[#allocation3 + $0x150] sm:$0xff] %vm553_vm1, %v12172_v19  ;;  %1057 = vst.msk [vmem:[#allocation3 + $0x158] sm:$0xff] %vm553_vm1, %v12172_v19 }
 0x152   : > { %11184 = vmatpush3.bf16.msra.mxu1 %v2170_v60  ;;  %11121 = vmatprep.mubr.msk.bf16.mxu1 %vm1069_vm3, %v12536_v30  ;;  %1059 = vst.msk [vmem:[#allocation3 + $0x168] sm:$0xff] %vm553_vm1, %v12172_v19  ;;  %1060 = vst.msk [vmem:[#allocation3 + $0x170] sm:$0xff] %vm553_vm1, %v12172_v19 }
 0x153   : > { %11155 = vmatprep.mubr.msk.bf16.mxu0 %vm1069_vm3, %v12536_v30  ;;  %11218 = vmatpush3.bf16.msra.mxu0 %v2432_v61  ;;  %1062 = vst.msk [vmem:[#allocation3 + $0x180] sm:$0xff] %vm553_vm1, %v12172_v19  ;;  %1063 = vst.msk [vmem:[#allocation3 + $0x188] sm:$0xff] %vm553_vm1, %v12172_v19  ;;  %v1294_v61 = vld [vmem:[#allocation3 + $0xaa] sm:$0xff] }
 0x154   : > { %12040 = vmatprep.subr.msk.bf16.mxu1 %vm1118_vm2, %v12657_v62  ;;  %12041 = vmatprep.subr.msk.bf16.mxu0 %vm1118_vm2, %v12662_v63  ;;  %1065 = vst.msk [vmem:[#allocation3 + $0x198] sm:$0xff] %vm553_vm1, %v12172_v19  ;;  %1066 = vst.msk [vmem:[#allocation3 + $0x1a0] sm:$0xff] %vm553_vm1, %v12172_v19  ;;  %v1292_v62 = vld [vmem:[#allocation3 + $0x92] sm:$0xff] }
 0x155   : > { %1025 = vst.msk [vmem:[#allocation3 + $0x58] sm:$0x3] %vm1015_vm4, %v12172_v19  ;;  %1016 = vst.msk [vmem:[#allocation3 + $0x10] sm:$0x3] %vm1015_vm4, %v12172_v19 }
 0x156   : > { %1019 = vst.msk [vmem:[#allocation3 + $0x28] sm:$0x3] %vm1015_vm4, %v12172_v19  ;;  %1022 = vst.msk [vmem:[#allocation3 + $0x40] sm:$0x3] %vm1015_vm4, %v12172_v19 }
 0x157   : > { %1028 = vst.msk [vmem:[#allocation3 + $0x70] sm:$0x3] %vm1015_vm4, %v12172_v19  ;;  %1031 = vst.msk [vmem:[#allocation3 + $0x88] sm:$0x3] %vm1015_vm4, %v12172_v19 }
 0x158   : > { %1034 = vst.msk [vmem:[#allocation3 + $0xa0] sm:$0x3] %vm1015_vm4, %v12172_v19  ;;  %1037 = vst.msk [vmem:[#allocation3 + $0xb8] sm:$0x3] %vm1015_vm4, %v12172_v19 }
 0x159   : > { %11122 = vmatmul.mubr.msk.bf16.gmra.mrb[36].mxu1 %vm1069_vm3, %v12534_v29  ;;  %11156 = vmatmul.mubr.msk.bf16.gmra.mrb[68].mxu0 %vm1069_vm3, %v12534_v29  ;;  %1040 = vst.msk [vmem:[#allocation3 + $0xd0] sm:$0x3] %vm1015_vm4, %v12172_v19  ;;  %1043 = vst.msk [vmem:[#allocation3 + $0xe8] sm:$0x3] %vm1015_vm4, %v12172_v19 }
 0x15a   : > { %11125 = vmatprep.mubr.msk.bf16.mxu1 %vm1069_vm3, %v12552_v44  ;;  %11159 = vmatprep.mubr.msk.bf16.mxu0 %vm1069_vm3, %v12552_v44  ;;  %1046 = vst.msk [vmem:[#allocation3 + $0x100] sm:$0x3] %vm1015_vm4, %v12172_v19  ;;  %1049 = vst.msk [vmem:[#allocation3 + $0x118] sm:$0x3] %vm1015_vm4, %v12172_v19 }
 0x15b   : > { %1052 = vst.msk [vmem:[#allocation3 + $0x130] sm:$0x3] %vm1015_vm4, %v12172_v19  ;;  %1055 = vst.msk [vmem:[#allocation3 + $0x148] sm:$0x3] %vm1015_vm4, %v12172_v19 }
 0x15c   : > { %1058 = vst.msk [vmem:[#allocation3 + $0x160] sm:$0x3] %vm1015_vm4, %v12172_v19  ;;  %1061 = vst.msk [vmem:[#allocation3 + $0x178] sm:$0x3] %vm1015_vm4, %v12172_v19  ;;  %v1287_v11 = vld [vmem:[#allocation3 + $0x52] sm:$0xff] }
 0x15d   : > { %1064 = vst.msk [vmem:[#allocation3 + $0x190] sm:$0x3] %vm1015_vm4, %v12172_v19  ;;  %1067 = vst.msk [vmem:[#allocation3 + $0x1a8] sm:$0x3] %vm1015_vm4, %v12172_v19  ;;  %v1285_v16 = vld [vmem:[#allocation3 + $0x3a] sm:$0xff] }
 0x15e   : > { %v1291_v35 = vld [vmem:[#allocation3 + $0x82] sm:$0xff]  ;;  %v1289_v39 = vld [vmem:[#allocation3 + $0x6a] sm:$0xff] }
 0x161   : > { %11126 = vmatmul.mubr.msk.bf16.gmra.mrb[40].mxu1 %vm1069_vm3, %v12550_v43  ;;  %11160 = vmatmul.mubr.msk.bf16.gmra.mrb[72].mxu0 %vm1069_vm3, %v12550_v43 }
 0x162   : > { %11129 = vmatprep.mubr.msk.bf16.mxu1 %vm1069_vm3, %v12568_v21  ;;  %11163 = vmatprep.mubr.msk.bf16.mxu0 %vm1069_vm3, %v12568_v21 }
 0x169   : > { %11130 = vmatmul.mubr.msk.bf16.gmra.mrb[44].mxu1 %vm1069_vm3, %v12566_v56  ;;  %11164 = vmatmul.mubr.msk.bf16.gmra.mrb[76].mxu0 %vm1069_vm3, %v12566_v56 }
 0x16a   : > { %11133 = vmatprep.mubr.msk.bf16.mxu1 %vm1069_vm3, %v12584_v7  ;;  %11167 = vmatprep.mubr.msk.bf16.mxu0 %vm1069_vm3, %v12584_v7 }
 0x171   : > { %11134 = vmatmul.mubr.msk.bf16.gmra.mrb[48].mxu1 %vm1069_vm3, %v12582_v6  ;;  %11168 = vmatmul.mubr.msk.bf16.gmra.mrb[80].mxu0 %vm1069_vm3, %v12582_v6 }
 0x172   : > { %11137 = vmatprep.mubr.msk.bf16.mxu1 %vm1069_vm3, %v12600_v27  ;;  %11171 = vmatprep.mubr.msk.bf16.mxu0 %vm1069_vm3, %v12600_v27 }
 0x179   : > { %11138 = vmatmul.mubr.msk.bf16.gmra.mrb[52].mxu1 %vm1069_vm3, %v12598_v26  ;;  %11172 = vmatmul.mubr.msk.bf16.gmra.mrb[84].mxu0 %vm1069_vm3, %v12598_v26 }
 0x17a   : > { %11141 = vmatprep.mubr.msk.bf16.mxu1 %vm1069_vm3, %v12616_v45  ;;  %11175 = vmatprep.mubr.msk.bf16.mxu0 %vm1069_vm3, %v12616_v45 }
 0x181   : > { %11142 = vmatmul.mubr.msk.bf16.gmra.mrb[56].mxu1 %vm1069_vm3, %v12614_v42  ;;  %11176 = vmatmul.mubr.msk.bf16.gmra.mrb[88].mxu0 %vm1069_vm3, %v12614_v42 }
 0x182   : > { %11145 = vmatprep.mubr.msk.bf16.mxu1 %vm1069_vm3, %v12632_v59  ;;  %11179 = vmatprep.mubr.msk.bf16.mxu0 %vm1069_vm3, %v12632_v59 }
 0x189   : > { %11146 = vmatmul.mubr.msk.bf16.gmra.mrb[60].mxu1 %vm1069_vm3, %v12630_v58  ;;  %11180 = vmatmul.mubr.msk.bf16.gmra.mrb[92].mxu0 %vm1069_vm3, %v12630_v58 }
 0x18a   : > { %11185 = vmatprep.mubr.msk.bf16.mxu1 %vm1069_vm3, %v12504_v10  ;;  %11219 = vmatprep.mubr.msk.bf16.mxu0 %vm1069_vm3, %v12504_v10 }
 0x191   : > { %11186 = vmatmul.mubr.msk.bf16.vlgmr.msra.gmra.mrb[64].mxu1 %vm1069_vm3, %v12502_v9  ;;  %11220 = vmatmul.mubr.msk.bf16.vlgmr.msra.gmra.mrb[96].mxu0 %vm1069_vm3, %v12502_v9 }
 0x192   : > { %11252 = vmatpush3.bf16.msra.mxu1 %v2694_v20  ;;  %11189 = vmatprep.mubr.msk.bf16.mxu1 %vm1069_vm3, %v12536_v30 }
 0x193   : > { %11223 = vmatprep.mubr.msk.bf16.mxu0 %vm1069_vm3, %v12536_v30  ;;  %11286 = vmatpush3.bf16.msra.mxu0 %v2956_v0  ;;  %v1295_v0 = vld [vmem:[#allocation3 + $0xb2] sm:$0xff] }
 0x194   : > { %12042 = vmatprep.subr.msk.bf16.mxu1 %vm1118_vm2, %v10136_v1 }
 0x199   : > { %11190 = vmatmul.mubr.msk.bf16.gmra.mrb[68].mxu1 %vm1069_vm3, %v12534_v29  ;;  %11224 = vmatmul.mubr.msk.bf16.gmra.mrb[100].mxu0 %vm1069_vm3, %v12534_v29 }
 0x19a   : > { %11193 = vmatprep.mubr.msk.bf16.mxu1 %vm1069_vm3, %v12552_v44  ;;  %11227 = vmatprep.mubr.msk.bf16.mxu0 %vm1069_vm3, %v12552_v44 }
 0x1a1   : > { %11194 = vmatmul.mubr.msk.bf16.gmra.mrb[72].mxu1 %vm1069_vm3, %v12550_v43  ;;  %11228 = vmatmul.mubr.msk.bf16.gmra.mrb[104].mxu0 %vm1069_vm3, %v12550_v43 }
 0x1a2   : > { %11197 = vmatprep.mubr.msk.bf16.mxu1 %vm1069_vm3, %v12568_v21  ;;  %11231 = vmatprep.mubr.msk.bf16.mxu0 %vm1069_vm3, %v12568_v21 }
 0x1a9   : > { %11198 = vmatmul.mubr.msk.bf16.gmra.mrb[76].mxu1 %vm1069_vm3, %v12566_v56  ;;  %11232 = vmatmul.mubr.msk.bf16.gmra.mrb[108].mxu0 %vm1069_vm3, %v12566_v56 }
 0x1aa   : > { %11201 = vmatprep.mubr.msk.bf16.mxu1 %vm1069_vm3, %v12584_v7  ;;  %11235 = vmatprep.mubr.msk.bf16.mxu0 %vm1069_vm3, %v12584_v7 }
 0x1b1   : > { %11202 = vmatmul.mubr.msk.bf16.gmra.mrb[80].mxu1 %vm1069_vm3, %v12582_v6  ;;  %11236 = vmatmul.mubr.msk.bf16.gmra.mrb[112].mxu0 %vm1069_vm3, %v12582_v6 }
 0x1b2   : > { %11205 = vmatprep.mubr.msk.bf16.mxu1 %vm1069_vm3, %v12600_v27  ;;  %11239 = vmatprep.mubr.msk.bf16.mxu0 %vm1069_vm3, %v12600_v27 }
 0x1b9   : > { %11206 = vmatmul.mubr.msk.bf16.gmra.mrb[84].mxu1 %vm1069_vm3, %v12598_v26  ;;  %11240 = vmatmul.mubr.msk.bf16.gmra.mrb[116].mxu0 %vm1069_vm3, %v12598_v26 }
 0x1ba   : > { %11209 = vmatprep.mubr.msk.bf16.mxu1 %vm1069_vm3, %v12616_v45  ;;  %11243 = vmatprep.mubr.msk.bf16.mxu0 %vm1069_vm3, %v12616_v45 }
 0x1c1   : > { %11210 = vmatmul.mubr.msk.bf16.gmra.mrb[88].mxu1 %vm1069_vm3, %v12614_v42  ;;  %11244 = vmatmul.mubr.msk.bf16.gmra.mrb[120].mxu0 %vm1069_vm3, %v12614_v42 }
 0x1c2   : > { %11213 = vmatprep.mubr.msk.bf16.mxu1 %vm1069_vm3, %v12632_v59  ;;  %11247 = vmatprep.mubr.msk.bf16.mxu0 %vm1069_vm3, %v12632_v59 }
 0x1c9   : > { %11214 = vmatmul.mubr.msk.bf16.gmra.mrb[92].mxu1 %vm1069_vm3, %v12630_v58  ;;  %11248 = vmatmul.mubr.msk.bf16.gmra.mrb[124].mxu0 %vm1069_vm3, %v12630_v58 }
 0x1ca   : > { %11253 = vmatprep.mubr.msk.bf16.mxu1 %vm1069_vm3, %v12504_v10  ;;  %11287 = vmatprep.mubr.msk.bf16.mxu0 %vm1069_vm3, %v12504_v10 }
 0x1d1   : > { %11254 = vmatmul.mubr.msk.bf16.vlgmr.msra.gmra.mrb[96].mxu1 %vm1069_vm3, %v12502_v9  ;;  %11288 = vmatmul.mubr.msk.bf16.vlgmr.msra.gmra.mrb[128].mxu0 %vm1069_vm3, %v12502_v9 }
 0x1d2   : > { %11320 = vmatpush3.bf16.msra.mxu1 %v3218_v2  ;;  %11257 = vmatprep.mubr.msk.bf16.mxu1 %vm1069_vm3, %v12536_v30 }
 0x1d3   : > { %11291 = vmatprep.mubr.msk.bf16.mxu0 %vm1069_vm3, %v12536_v30 }
 0x1d9   : > { %11258 = vmatmul.mubr.msk.bf16.gmra.mrb[100].mxu1 %vm1069_vm3, %v12534_v29  ;;  %11292 = vmatmul.mubr.msk.bf16.gmra.mrb[132].mxu0 %vm1069_vm3, %v12534_v29 }
 0x1da   : > { %11261 = vmatprep.mubr.msk.bf16.mxu1 %vm1069_vm3, %v12552_v44  ;;  %11295 = vmatprep.mubr.msk.bf16.mxu0 %vm1069_vm3, %v12552_v44 }
 0x1e1   : > { %11262 = vmatmul.mubr.msk.bf16.gmra.mrb[104].mxu1 %vm1069_vm3, %v12550_v43  ;;  %11296 = vmatmul.mubr.msk.bf16.gmra.mrb[136].mxu0 %vm1069_vm3, %v12550_v43 }
 0x1e2   : > { %11265 = vmatprep.mubr.msk.bf16.mxu1 %vm1069_vm3, %v12568_v21  ;;  %11299 = vmatprep.mubr.msk.bf16.mxu0 %vm1069_vm3, %v12568_v21 }
 0x1e4   : > { %v11051_v5 = vpop.f32.mrb[0].mxu1  ;;  %v11085_v8 = vpop.f32.mrb[32].mxu0 }
 0x1e5   : > { %v1318_v12 = vadd.f32 %v11051_v5, %v1286_v3  ;;  %v1156_v13 = vpop.f32.mrb[1].mxu1  ;;  %v1419_v15 = vpop.f32.mrb[33].mxu0 }
 0x1e6   : > { %v1316_v17 = vadd.f32 %v1284_v4, %v1156_v13  ;;  %v11052_v18 = vpop.f32.mrb[2].mxu1  ;;  %v11086_v22 = vpop.f32.mrb[34].mxu0  ;;  %v1293_v4 = vld [vmem:[#allocation3 + $0x9a] sm:$0xff] }
 0x1e7   : > { %1350 = vst.msk [vmem:[#allocation3 + $0x4a] sm:$0xff] %vm553_vm1, %v1318_v12  ;;  %v1319_v23 = vadd.f32 %v11052_v18, %v1287_v11  ;;  %v1159_v24 = vpop.f32.mrb[3].mxu1  ;;  %v1422_v25 = vpop.f32.mrb[35].mxu0 }
 0x1e8   : > { %1348 = vst.msk [vmem:[#allocation3 + $0x32] sm:$0xff] %vm553_vm1, %v1316_v17  ;;  %v1317_v28 = vadd.f32 %v1285_v16, %v1159_v24 }
 0x1e9   : > { %1351 = vst.msk [vmem:[#allocation3 + $0x52] sm:$0xff] %vm553_vm1, %v1319_v23  ;;  %11266 = vmatmul.mubr.msk.bf16.gmra.mrb[108].mxu1 %vm1069_vm3, %v12566_v56  ;;  %11300 = vmatmul.mubr.msk.bf16.gmra.mrb[140].mxu0 %vm1069_vm3, %v12566_v56 }
 0x1ea   : > { %1349 = vst.msk [vmem:[#allocation3 + $0x3a] sm:$0xff] %vm553_vm1, %v1317_v28  ;;  %11269 = vmatprep.mubr.msk.bf16.mxu1 %vm1069_vm3, %v12584_v7  ;;  %11303 = vmatprep.mubr.msk.bf16.mxu0 %vm1069_vm3, %v12584_v7 }
 0x1ec   : > { %v11055_v33 = vpop.f32.mrb[4].mxu1  ;;  %v11089_v34 = vpop.f32.mrb[36].mxu0 }
 0x1ed   : > { %v1322_v36 = vadd.f32 %v11055_v33, %v1290_v31  ;;  %v1172_v37 = vpop.f32.mrb[5].mxu1  ;;  %v1435_v38 = vpop.f32.mrb[37].mxu0  ;;  %v1296_v33 = vld [vmem:[#allocation3 + $0xc2] sm:$0xff] }
 0x1ee   : > { %v1548_v40 = vld [vmem:[#allocation3 + $0x49] sm:$0xff]  ;;  %v1320_v41 = vadd.f32 %v1288_v32, %v1172_v37  ;;  %v11056_v46 = vpop.f32.mrb[6].mxu1  ;;  %v11090_v47 = vpop.f32.mrb[38].mxu0  ;;  %v1298_v32 = vld [vmem:[#allocation3 + $0xda] sm:$0xff] }
 0x1ef   : > { %v1580_v48 = vadd.f32 %v11085_v8, %v1548_v40  ;;  %v1546_v49 = vld [vmem:[#allocation3 + $0x31] sm:$0xff]  ;;  %1354 = vst.msk [vmem:[#allocation3 + $0x7a] sm:$0xff] %vm553_vm1, %v1322_v36  ;;  %v1323_v50 = vadd.f32 %v11056_v46, %v1291_v35  ;;  %v1175_v51 = vpop.f32.mrb[7].mxu1  ;;  %v1438_v52 = vpop.f32.mrb[39].mxu0  ;;  %v1299_v36 = vld [vmem:[#allocation3 + $0xe2] sm:$0xff] }
 0x1f0   : > { %v1578_v53 = vadd.f32 %v1546_v49, %v1419_v15  ;;  %v1549_v54 = vld [vmem:[#allocation3 + $0x51] sm:$0xff]  ;;  %1352 = vst.msk [vmem:[#allocation3 + $0x62] sm:$0xff] %vm553_vm1, %v1320_v41  ;;  %v1321_v55 = vadd.f32 %v1289_v39, %v1175_v51 }
 0x1f1   : > { %1612 = vst.msk [vmem:[#allocation3 + $0x49] sm:$0xff] %vm553_vm1, %v1580_v48  ;;  %v1581_v14 = vadd.f32 %v11086_v22, %v1549_v54  ;;  %v1547_v57 = vld [vmem:[#allocation3 + $0x39] sm:$0xff]  ;;  %1355 = vst.msk [vmem:[#allocation3 + $0x82] sm:$0xff] %vm553_vm1, %v1323_v50  ;;  %11270 = vmatmul.mubr.msk.bf16.gmra.mrb[112].mxu1 %vm1069_vm3, %v12582_v6  ;;  %11304 = vmatmul.mubr.msk.bf16.gmra.mrb[144].mxu0 %vm1069_vm3, %v12582_v6  ;;  %v1297_v40 = vld [vmem:[#allocation3 + $0xca] sm:$0xff] }
 0x1f2   : > { %1610 = vst.msk [vmem:[#allocation3 + $0x31] sm:$0xff] %vm553_vm1, %v1578_v53  ;;  %v1579_v60 = vadd.f32 %v1547_v57, %v1422_v25  ;;  %1353 = vst.msk [vmem:[#allocation3 + $0x6a] sm:$0xff] %vm553_vm1, %v1321_v55  ;;  %11273 = vmatprep.mubr.msk.bf16.mxu1 %vm1069_vm3, %v12600_v27  ;;  %11307 = vmatprep.mubr.msk.bf16.mxu0 %vm1069_vm3, %v12600_v27 }
 0x1f3   : > { %1613 = vst.msk [vmem:[#allocation3 + $0x51] sm:$0xff] %vm553_vm1, %v1581_v14 }
 0x1f4   : > { %1611 = vst.msk [vmem:[#allocation3 + $0x39] sm:$0xff] %vm553_vm1, %v1579_v60  ;;  %v11059_v63 = vpop.f32.mrb[8].mxu1  ;;  %v11093_v20 = vpop.f32.mrb[40].mxu0 }
 0x1f5   : > { %v1326_v1 = vadd.f32 %v11059_v63, %v1294_v61  ;;  %v1188_v2 = vpop.f32.mrb[9].mxu1  ;;  %v1451_v3 = vpop.f32.mrb[41].mxu0  ;;  %v1300_v63 = vld [vmem:[#allocation3 + $0xf2] sm:$0xff] }
 0x1f6   : > { %v1552_v5 = vld [vmem:[#allocation3 + $0x79] sm:$0xff]  ;;  %v1324_v8 = vadd.f32 %v1292_v62, %v1188_v2  ;;  %v11060_v11 = vpop.f32.mrb[10].mxu1  ;;  %v11094_v12 = vpop.f32.mrb[42].mxu0  ;;  %v1302_v62 = vld [vmem:[#allocation3 + $0x10a] sm:$0xff] }
 0x1f7   : > { %v1584_v13 = vadd.f32 %v11089_v34, %v1552_v5  ;;  %v1550_v15 = vld [vmem:[#allocation3 + $0x61] sm:$0xff]  ;;  %1358 = vst.msk [vmem:[#allocation3 + $0xaa] sm:$0xff] %vm553_vm1, %v1326_v1  ;;  %v1327_v16 = vadd.f32 %v11060_v11, %v1295_v0  ;;  %v1191_v17 = vpop.f32.mrb[11].mxu1  ;;  %v1454_v18 = vpop.f32.mrb[43].mxu0  ;;  %v1303_v1 = vld [vmem:[#allocation3 + $0x112] sm:$0xff] }
 0x1f8   : > { %v1582_v22 = vadd.f32 %v1550_v15, %v1435_v38  ;;  %v1553_v23 = vld [vmem:[#allocation3 + $0x81] sm:$0xff]  ;;  %1356 = vst.msk [vmem:[#allocation3 + $0x92] sm:$0xff] %vm553_vm1, %v1324_v8  ;;  %v1325_v24 = vadd.f32 %v1293_v4, %v1191_v17 }
 0x1f9   : > { %1616 = vst.msk [vmem:[#allocation3 + $0x79] sm:$0xff] %vm553_vm1, %v1584_v13  ;;  %v1585_v25 = vadd.f32 %v11090_v47, %v1553_v23  ;;  %v1551_v28 = vld [vmem:[#allocation3 + $0x69] sm:$0xff]  ;;  %1359 = vst.msk [vmem:[#allocation3 + $0xb2] sm:$0xff] %vm553_vm1, %v1327_v16  ;;  %11274 = vmatmul.mubr.msk.bf16.gmra.mrb[116].mxu1 %vm1069_vm3, %v12598_v26  ;;  %11308 = vmatmul.mubr.msk.bf16.gmra.mrb[148].mxu0 %vm1069_vm3, %v12598_v26  ;;  %v1301_v5 = vld [vmem:[#allocation3 + $0xfa] sm:$0xff] }
 0x1fa   : > { %1614 = vst.msk [vmem:[#allocation3 + $0x61] sm:$0xff] %vm553_vm1, %v1582_v22  ;;  %v1583_v31 = vadd.f32 %v1551_v28, %v1438_v52  ;;  %1357 = vst.msk [vmem:[#allocation3 + $0x9a] sm:$0xff] %vm553_vm1, %v1325_v24  ;;  %11277 = vmatprep.mubr.msk.bf16.mxu1 %vm1069_vm3, %v12616_v45  ;;  %11311 = vmatprep.mubr.msk.bf16.mxu0 %vm1069_vm3, %v12616_v45 }
 0x1fb   : > { %1617 = vst.msk [vmem:[#allocation3 + $0x81] sm:$0xff] %vm553_vm1, %v1585_v25 }
 0x1fc   : > { %1615 = vst.msk [vmem:[#allocation3 + $0x69] sm:$0xff] %vm553_vm1, %v1583_v31  ;;  %v11063_v34 = vpop.f32.mrb[12].mxu1  ;;  %v11097_v35 = vpop.f32.mrb[44].mxu0 }
 0x1fd   : > { %v1330_v37 = vadd.f32 %v11063_v34, %v1298_v32  ;;  %v1204_v38 = vpop.f32.mrb[13].mxu1  ;;  %v1467_v39 = vpop.f32.mrb[45].mxu0  ;;  %v1304_v34 = vld [vmem:[#allocation3 + $0x122] sm:$0xff] }
 0x1fe   : > { %v1556_v41 = vld [vmem:[#allocation3 + $0xa9] sm:$0xff]  ;;  %v1328_v46 = vadd.f32 %v1296_v33, %v1204_v38  ;;  %v11064_v47 = vpop.f32.mrb[14].mxu1  ;;  %v11098_v48 = vpop.f32.mrb[46].mxu0  ;;  %v1306_v33 = vld [vmem:[#allocation3 + $0x13a] sm:$0xff] }
 0x1ff   : > { %v1588_v49 = vadd.f32 %v11093_v20, %v1556_v41  ;;  %v1554_v50 = vld [vmem:[#allocation3 + $0x91] sm:$0xff]  ;;  %1362 = vst.msk [vmem:[#allocation3 + $0xda] sm:$0xff] %vm553_vm1, %v1330_v37  ;;  %v1331_v51 = vadd.f32 %v11064_v47, %v1299_v36  ;;  %v1207_v52 = vpop.f32.mrb[15].mxu1  ;;  %v1470_v53 = vpop.f32.mrb[47].mxu0  ;;  %v1307_v37 = vld [vmem:[#allocation3 + $0x142] sm:$0xff] }
 0x200   : > { %v1586_v54 = vadd.f32 %v1554_v50, %v1451_v3  ;;  %v1557_v55 = vld [vmem:[#allocation3 + $0xb1] sm:$0xff]  ;;  %1360 = vst.msk [vmem:[#allocation3 + $0xc2] sm:$0xff] %vm553_vm1, %v1328_v46  ;;  %v1329_v14 = vadd.f32 %v1297_v40, %v1207_v52 }
 0x201   : > { %1620 = vst.msk [vmem:[#allocation3 + $0xa9] sm:$0xff] %vm553_vm1, %v1588_v49  ;;  %v1589_v57 = vadd.f32 %v11094_v12, %v1557_v55  ;;  %v1555_v60 = vld [vmem:[#allocation3 + $0x99] sm:$0xff]  ;;  %1363 = vst.msk [vmem:[#allocation3 + $0xe2] sm:$0xff] %vm553_vm1, %v1331_v51  ;;  %11278 = vmatmul.mubr.msk.bf16.gmra.mrb[120].mxu1 %vm1069_vm3, %v12614_v42  ;;  %11312 = vmatmul.mubr.msk.bf16.gmra.mrb[152].mxu0 %vm1069_vm3, %v12614_v42  ;;  %v1305_v41 = vld [vmem:[#allocation3 + $0x12a] sm:$0xff] }
 0x202   : > { %1618 = vst.msk [vmem:[#allocation3 + $0x91] sm:$0xff] %vm553_vm1, %v1586_v54  ;;  %v1587_v61 = vadd.f32 %v1555_v60, %v1454_v18  ;;  %1361 = vst.msk [vmem:[#allocation3 + $0xca] sm:$0xff] %vm553_vm1, %v1329_v14  ;;  %11281 = vmatprep.mubr.msk.bf16.mxu1 %vm1069_vm3, %v12632_v59  ;;  %11315 = vmatprep.mubr.msk.bf16.mxu0 %vm1069_vm3, %v12632_v59 }
 0x203   : > { %1621 = vst.msk [vmem:[#allocation3 + $0xb1] sm:$0xff] %vm553_vm1, %v1589_v57 }
 0x204   : > { %1619 = vst.msk [vmem:[#allocation3 + $0x99] sm:$0xff] %vm553_vm1, %v1587_v61  ;;  %v11067_v20 = vpop.f32.mrb[16].mxu1  ;;  %v11101_v0 = vpop.f32.mrb[48].mxu0 }
 0x205   : > { %v1334_v2 = vadd.f32 %v11067_v20, %v1302_v62  ;;  %v1220_v3 = vpop.f32.mrb[17].mxu1  ;;  %v1483_v4 = vpop.f32.mrb[49].mxu0  ;;  %v1310_v62 = vld [vmem:[#allocation3 + $0x16a] sm:$0xff] }
 0x206   : > { %v1560_v8 = vld [vmem:[#allocation3 + $0xd9] sm:$0xff]  ;;  %v1332_v11 = vadd.f32 %v1300_v63, %v1220_v3  ;;  %v11068_v12 = vpop.f32.mrb[18].mxu1  ;;  %v11102_v13 = vpop.f32.mrb[50].mxu0 }
 0x207   : > { %v1592_v15 = vadd.f32 %v11097_v35, %v1560_v8  ;;  %v1558_v16 = vld [vmem:[#allocation3 + $0xc1] sm:$0xff]  ;;  %1366 = vst.msk [vmem:[#allocation3 + $0x10a] sm:$0xff] %vm553_vm1, %v1334_v2  ;;  %v1335_v17 = vadd.f32 %v11068_v12, %v1303_v1  ;;  %v1223_v18 = vpop.f32.mrb[19].mxu1  ;;  %v1486_v22 = vpop.f32.mrb[51].mxu0  ;;  %v1308_v63 = vld [vmem:[#allocation3 + $0x152] sm:$0xff] }
 0x208   : > { %v1590_v23 = vadd.f32 %v1558_v16, %v1467_v39  ;;  %v1561_v24 = vld [vmem:[#allocation3 + $0xe1] sm:$0xff]  ;;  %1364 = vst.msk [vmem:[#allocation3 + $0xf2] sm:$0xff] %vm553_vm1, %v1332_v11  ;;  %v1333_v25 = vadd.f32 %v1301_v5, %v1223_v18  ;;  %v1311_v1 = vld [vmem:[#allocation3 + $0x172] sm:$0xff] }
 0x209   : > { %1624 = vst.msk [vmem:[#allocation3 + $0xd9] sm:$0xff] %vm553_vm1, %v1592_v15  ;;  %v1593_v28 = vadd.f32 %v11098_v48, %v1561_v24  ;;  %v1559_v31 = vld [vmem:[#allocation3 + $0xc9] sm:$0xff]  ;;  %1367 = vst.msk [vmem:[#allocation3 + $0x112] sm:$0xff] %vm553_vm1, %v1335_v17  ;;  %11282 = vmatmul.mubr.msk.bf16.gmra.mrb[124].mxu1 %vm1069_vm3, %v12630_v58  ;;  %11316 = vmatmul.mubr.msk.bf16.gmra.mrb[156].mxu0 %vm1069_vm3, %v12630_v58 }
 0x20a   : > { %1622 = vst.msk [vmem:[#allocation3 + $0xc1] sm:$0xff] %vm553_vm1, %v1590_v23  ;;  %v1591_v32 = vadd.f32 %v1559_v31, %v1470_v53  ;;  %1365 = vst.msk [vmem:[#allocation3 + $0xfa] sm:$0xff] %vm553_vm1, %v1333_v25  ;;  %11321 = vmatprep.mubr.msk.bf16.mxu1 %vm1069_vm3, %v12504_v10  ;;  %v1314_v31 = vld [vmem:[#allocation3 + $0x19a] sm:$0xff] }
 0x20b   : > { %1625 = vst.msk [vmem:[#allocation3 + $0xe1] sm:$0xff] %vm553_vm1, %v1593_v28 }
 0x20c   : > { %1623 = vst.msk [vmem:[#allocation3 + $0xc9] sm:$0xff] %vm553_vm1, %v1591_v32  ;;  %v11071_v35 = vpop.f32.mrb[20].mxu1  ;;  %v11105_v36 = vpop.f32.mrb[52].mxu0  ;;  %v1312_v32 = vld [vmem:[#allocation3 + $0x182] sm:$0xff] }
 0x20d   : > { %v1338_v38 = vadd.f32 %v11071_v35, %v1306_v33  ;;  %v1236_v39 = vpop.f32.mrb[21].mxu1  ;;  %v1499_v40 = vpop.f32.mrb[53].mxu0  ;;  %v1315_v35 = vld [vmem:[#allocation3 + $0x1a2] sm:$0xff] }
 0x20e   : > { %v1564_v46 = vld [vmem:[#allocation3 + $0x109] sm:$0xff]  ;;  %v1336_v47 = vadd.f32 %v1304_v34, %v1236_v39  ;;  %v11072_v48 = vpop.f32.mrb[22].mxu1  ;;  %v11106_v49 = vpop.f32.mrb[54].mxu0 }
 0x20f   : > { %v1596_v50 = vadd.f32 %v11101_v0, %v1564_v46  ;;  %v1562_v51 = vld [vmem:[#allocation3 + $0xf1] sm:$0xff]  ;;  %1370 = vst.msk [vmem:[#allocation3 + $0x13a] sm:$0xff] %vm553_vm1, %v1338_v38  ;;  %v1339_v10 = vadd.f32 %v11072_v48, %v1307_v37  ;;  %v1239_v52 = vpop.f32.mrb[23].mxu1  ;;  %v1502_v53 = vpop.f32.mrb[55].mxu0 }
 0x210   : > { %v1594_v54 = vadd.f32 %v1562_v51, %v1483_v4  ;;  %v1565_v55 = vld [vmem:[#allocation3 + $0x111] sm:$0xff]  ;;  %1368 = vst.msk [vmem:[#allocation3 + $0x122] sm:$0xff] %vm553_vm1, %v1336_v47  ;;  %v1337_v14 = vadd.f32 %v1305_v41, %v1239_v52  ;;  %v1309_v4 = vld [vmem:[#allocation3 + $0x15a] sm:$0xff] }
 0x211   : > { %1628 = vst.msk [vmem:[#allocation3 + $0x109] sm:$0xff] %vm553_vm1, %v1596_v50  ;;  %v1597_v57 = vadd.f32 %v11102_v13, %v1565_v55  ;;  %v1563_v60 = vld [vmem:[#allocation3 + $0xf9] sm:$0xff]  ;;  %1371 = vst.msk [vmem:[#allocation3 + $0x142] sm:$0xff] %vm553_vm1, %v1339_v10  ;;  %11322 = vmatmul.mubr.msk.bf16.vlgmr.msra.gmra.mrb[128].mxu1 %vm1069_vm3, %v12502_v9  ;;  %v1313_v38 = vld [vmem:[#allocation3 + $0x18a] sm:$0xff] }
 0x212   : > { %1626 = vst.msk [vmem:[#allocation3 + $0xf1] sm:$0xff] %vm553_vm1, %v1594_v54  ;;  %v1595_v61 = vadd.f32 %v1563_v60, %v1486_v22  ;;  %1369 = vst.msk [vmem:[#allocation3 + $0x12a] sm:$0xff] %vm553_vm1, %v1337_v14  ;;  %11325 = vmatprep.mubr.msk.bf16.mxu1 %vm1069_vm3, %v12536_v30  ;;  %v2071_v14 = vld [vmem:[#allocation3 + $0x1a] sm:$0xff]  ;;  %v1810_v60 = vld [vmem:[#allocation3 + $0x48] sm:$0xff] }
 0x213   : > { %1629 = vst.msk [vmem:[#allocation3 + $0x111] sm:$0xff] %vm553_vm1, %v1597_v57 }
 0x214   : > { %1627 = vst.msk [vmem:[#allocation3 + $0xf9] sm:$0xff] %vm553_vm1, %v1595_v61  ;;  %v11075_v20 = vpop.f32.mrb[24].mxu1  ;;  %v11109_v0 = vpop.f32.mrb[56].mxu0 }
 0x215   : > { %v1342_v2 = vadd.f32 %v11075_v20, %v1310_v62  ;;  %v1252_v3 = vpop.f32.mrb[25].mxu1  ;;  %v1515_v9 = vpop.f32.mrb[57].mxu0 }
 0x216   : > { %v1568_v5 = vld [vmem:[#allocation3 + $0x139] sm:$0xff]  ;;  %v1340_v8 = vadd.f32 %v1308_v63, %v1252_v3  ;;  %v11076_v11 = vpop.f32.mrb[26].mxu1  ;;  %v11110_v12 = vpop.f32.mrb[58].mxu0 }
 0x217   : > { %v1600_v13 = vadd.f32 %v11105_v36, %v1568_v5  ;;  %v1566_v15 = vld [vmem:[#allocation3 + $0x121] sm:$0xff]  ;;  %1374 = vst.msk [vmem:[#allocation3 + $0x16a] sm:$0xff] %vm553_vm1, %v1342_v2  ;;  %v1343_v30 = vadd.f32 %v11076_v11, %v1311_v1  ;;  %v1255_v16 = vpop.f32.mrb[27].mxu1  ;;  %v1518_v17 = vpop.f32.mrb[59].mxu0 }
 0x218   : > { %v1598_v18 = vadd.f32 %v1566_v15, %v1499_v40  ;;  %v1569_v22 = vld [vmem:[#allocation3 + $0x141] sm:$0xff]  ;;  %1372 = vst.msk [vmem:[#allocation3 + $0x152] sm:$0xff] %vm553_vm1, %v1340_v8  ;;  %v1341_v23 = vadd.f32 %v1309_v4, %v1255_v16  ;;  %v1811_v4 = vld [vmem:[#allocation3 + $0x50] sm:$0xff] }
 0x219   : > { %1632 = vst.msk [vmem:[#allocation3 + $0x139] sm:$0xff] %vm553_vm1, %v1600_v13  ;;  %v1601_v24 = vadd.f32 %v11106_v49, %v1569_v22  ;;  %v1567_v25 = vld [vmem:[#allocation3 + $0x129] sm:$0xff]  ;;  %1375 = vst.msk [vmem:[#allocation3 + $0x172] sm:$0xff] %vm553_vm1, %v1343_v30  ;;  %11326 = vmatmul.mubr.msk.bf16.gmra.mrb[132].mxu1 %vm1069_vm3, %v12534_v29  ;;  %v1809_v13 = vld [vmem:[#allocation3 + $0x38] sm:$0xff] }
 0x21a   : > { %1630 = vst.msk [vmem:[#allocation3 + $0x121] sm:$0xff] %vm553_vm1, %v1598_v18  ;;  %v1599_v28 = vadd.f32 %v1567_v25, %v1502_v53  ;;  %1373 = vst.msk [vmem:[#allocation3 + $0x15a] sm:$0xff] %vm553_vm1, %v1341_v23  ;;  %11329 = vmatprep.mubr.msk.bf16.mxu1 %vm1069_vm3, %v12552_v44 }
 0x21b   : > { %1633 = vst.msk [vmem:[#allocation3 + $0x141] sm:$0xff] %vm553_vm1, %v1601_v24 }
 0x21c   : > { %1631 = vst.msk [vmem:[#allocation3 + $0x129] sm:$0xff] %vm553_vm1, %v1599_v28  ;;  %v11079_v33 = vpop.f32.mrb[28].mxu1  ;;  %v11113_v34 = vpop.f32.mrb[60].mxu0  ;;  %v1814_v28 = vld [vmem:[#allocation3 + $0x78] sm:$0xff] }
 0x21d   : > { %v1346_v36 = vadd.f32 %v11079_v33, %v1314_v31  ;;  %v1268_v37 = vpop.f32.mrb[29].mxu1  ;;  %v1531_v29 = vpop.f32.mrb[61].mxu0  ;;  %v1812_v33 = vld [vmem:[#allocation3 + $0x60] sm:$0xff] }
 0x21e   : > { %v1572_v39 = vld [vmem:[#allocation3 + $0x169] sm:$0xff]  ;;  %v1344_v40 = vadd.f32 %v1312_v32, %v1268_v37  ;;  %v11080_v41 = vpop.f32.mrb[30].mxu1  ;;  %v11114_v46 = vpop.f32.mrb[62].mxu0  ;;  %v1815_v37 = vld [vmem:[#allocation3 + $0x80] sm:$0xff] }
 0x21f   : > { %v1604_v47 = vadd.f32 %v11109_v0, %v1572_v39  ;;  %v1570_v48 = vld [vmem:[#allocation3 + $0x151] sm:$0xff]  ;;  %1378 = vst.msk [vmem:[#allocation3 + $0x19a] sm:$0xff] %vm553_vm1, %v1346_v36  ;;  %v1347_v44 = vadd.f32 %v11080_v41, %v1315_v35  ;;  %v1271_v49 = vpop.f32.mrb[31].mxu1  ;;  %v1534_v50 = vpop.f32.mrb[63].mxu0  ;;  %v2072_v0 = vld [vmem:[#allocation3 + $0x22] sm:$0xff] }
 0x220   : > { %v1602_v51 = vadd.f32 %v1570_v48, %v1515_v9  ;;  %v1573_v10 = vld [vmem:[#allocation3 + $0x171] sm:$0xff]  ;;  %1376 = vst.msk [vmem:[#allocation3 + $0x182] sm:$0xff] %vm553_vm1, %v1344_v40  ;;  %v1345_v52 = vadd.f32 %v1313_v38, %v1271_v49  ;;  %v1813_v39 = vld [vmem:[#allocation3 + $0x68] sm:$0xff] }
 0x221   : > { %1636 = vst.msk [vmem:[#allocation3 + $0x169] sm:$0xff] %vm553_vm1, %v1604_v47  ;;  %v1605_v53 = vadd.f32 %v11110_v12, %v1573_v10  ;;  %v1571_v54 = vld [vmem:[#allocation3 + $0x159] sm:$0xff]  ;;  %1379 = vst.msk [vmem:[#allocation3 + $0x1a2] sm:$0xff] %vm553_vm1, %v1347_v44  ;;  %11330 = vmatmul.mubr.msk.bf16.gmra.mrb[136].mxu1 %vm1069_vm3, %v12550_v43  ;;  %v1808_v43 = vld [vmem:[#allocation3 + $0x30] sm:$0xff] }
 0x222   : > { %1634 = vst.msk [vmem:[#allocation3 + $0x151] sm:$0xff] %vm553_vm1, %v1602_v51  ;;  %v1603_v55 = vadd.f32 %v1571_v54, %v1518_v17  ;;  %1377 = vst.msk [vmem:[#allocation3 + $0x18a] sm:$0xff] %vm553_vm1, %v1345_v52  ;;  %11333 = vmatprep.mubr.msk.bf16.mxu1 %vm1069_vm3, %v12568_v21 }
 0x223   : > { %1637 = vst.msk [vmem:[#allocation3 + $0x171] sm:$0xff] %vm553_vm1, %v1605_v53  ;;  %v1818_v53 = vld [vmem:[#allocation3 + $0xa8] sm:$0xff] }
 0x224   : > { %1635 = vst.msk [vmem:[#allocation3 + $0x159] sm:$0xff] %vm553_vm1, %v1603_v55  ;;  %v11119_v57 = vpop.f32.mrb[32].mxu1  ;;  %v13043_v61 = vpop.f32.mrb[64].mxu0 }
 0x225   : > { %v1842_v62 = vadd.f32 %v11119_v57, %v1810_v60  ;;  %v1681_v63 = vpop.f32.mrb[33].mxu1  ;;  %v1943_v20 = vpop.f32.mrb[65].mxu0 }
 0x226   : > { %v1576_v1 = vld [vmem:[#allocation3 + $0x199] sm:$0xff]  ;;  %v1840_v2 = vadd.f32 %v1808_v43, %v1681_v63  ;;  %v2103_v3 = vadd.f32 %v2071_v14, %v1943_v20  ;;  %v11120_v9 = vpop.f32.mrb[34].mxu1  ;;  %v11154_v21 = vpop.f32.mrb[66].mxu0  ;;  %v1816_v14 = vld [vmem:[#allocation3 + $0x90] sm:$0xff] }
 0x227   : > { %v1608_v5 = vadd.f32 %v11113_v34, %v1576_v1  ;;  %v1574_v8 = vld [vmem:[#allocation3 + $0x181] sm:$0xff]  ;;  %1874 = vst.msk [vmem:[#allocation3 + $0x48] sm:$0xff] %vm553_vm1, %v1842_v62  ;;  %v1843_v11 = vadd.f32 %v11120_v9, %v1811_v4  ;;  %v1684_v12 = vpop.f32.mrb[35].mxu1  ;;  %v1946_v15 = vpop.f32.mrb[67].mxu0  ;;  %v1819_v62 = vld [vmem:[#allocation3 + $0xb0] sm:$0xff]  ;;  %v1817_v20 = vld [vmem:[#allocation3 + $0x98] sm:$0xff] }
 0x228   : > { %v1606_v30 = vadd.f32 %v1574_v8, %v1531_v29  ;;  %v1577_v16 = vld [vmem:[#allocation3 + $0x1a1] sm:$0xff]  ;;  %1872 = vst.msk [vmem:[#allocation3 + $0x30] sm:$0xff] %vm553_vm1, %v1840_v2  ;;  %2135 = vst.msk [vmem:[#allocation3 + $0x1a] sm:$0xff] %vm553_vm1, %v2103_v3  ;;  %v1841_v17 = vadd.f32 %v1809_v13, %v1684_v12  ;;  %v2104_v18 = vadd.f32 %v2072_v0, %v1946_v15  ;;  %v1822_v13 = vld [vmem:[#allocation3 + $0xd8] sm:$0xff] }
 0x229   : > { %1640 = vst.msk [vmem:[#allocation3 + $0x199] sm:$0xff] %vm553_vm1, %v1608_v5  ;;  %v1609_v22 = vadd.f32 %v11114_v46, %v1577_v16  ;;  %v1575_v23 = vld [vmem:[#allocation3 + $0x189] sm:$0xff]  ;;  %1875 = vst.msk [vmem:[#allocation3 + $0x50] sm:$0xff] %vm553_vm1, %v1843_v11  ;;  %11334 = vmatmul.mubr.msk.bf16.gmra.mrb[140].mxu1 %vm1069_vm3, %v12566_v56  ;;  %v1820_v16 = vld [vmem:[#allocation3 + $0xc0] sm:$0xff] }
 0x22a   : > { %1638 = vst.msk [vmem:[#allocation3 + $0x181] sm:$0xff] %vm553_vm1, %v1606_v30  ;;  %v1607_v24 = vadd.f32 %v1575_v23, %v1534_v50  ;;  %1873 = vst.msk [vmem:[#allocation3 + $0x38] sm:$0xff] %vm553_vm1, %v1841_v17  ;;  %11337 = vmatprep.mubr.msk.bf16.mxu1 %vm1069_vm3, %v12584_v7  ;;  %v1823_v23 = vld [vmem:[#allocation3 + $0xe0] sm:$0xff] }
 0x22b   : > { %2136 = vst.msk [vmem:[#allocation3 + $0x22] sm:$0xff] %vm553_vm1, %v2104_v18  ;;  %1641 = vst.msk [vmem:[#allocation3 + $0x1a1] sm:$0xff] %vm553_vm1, %v1609_v22 }
 0x22c   : > { %4149 = vst.msk [vmem:[#allocation3 + $0x1a8] sm:$0x3] %vm1015_vm4, %v12172_v19  ;;  %v11123_v25 = vpop.f32.mrb[36].mxu1  ;;  %v11157_v56 = vpop.f32.mrb[68].mxu0 }
 0x22d   : > { %1639 = vst.msk [vmem:[#allocation3 + $0x189] sm:$0xff] %vm553_vm1, %v1607_v24  ;;  %v1846_v31 = vadd.f32 %v11123_v25, %v1814_v28  ;;  %v1697_v32 = vpop.f32.mrb[37].mxu1  ;;  %v1959_v34 = vpop.f32.mrb[69].mxu0  ;;  %v1821_v28 = vld [vmem:[#allocation3 + $0xc8] sm:$0xff] }
 0x22e   : > { %v1844_v35 = vadd.f32 %v1812_v33, %v1697_v32  ;;  %v11124_v36 = vpop.f32.mrb[38].mxu1  ;;  %v11158_v29 = vpop.f32.mrb[70].mxu0 }
 0x22f   : > { %1878 = vst.msk [vmem:[#allocation3 + $0x78] sm:$0xff] %vm553_vm1, %v1846_v31  ;;  %v1847_v7 = vadd.f32 %v11124_v36, %v1815_v37  ;;  %v1700_v38 = vpop.f32.mrb[39].mxu1  ;;  %v1962_v40 = vpop.f32.mrb[71].mxu0 }
 0x230   : > { %1876 = vst.msk [vmem:[#allocation3 + $0x60] sm:$0xff] %vm553_vm1, %v1844_v35  ;;  %v2075_v41 = vld [vmem:[#allocation3 + $0x4a] sm:$0xff]  ;;  %v1845_v46 = vadd.f32 %v1813_v39, %v1700_v38  ;;  %v2076_v47 = vld [vmem:[#allocation3 + $0x52] sm:$0xff] }
 0x231   : > { %v2073_v48 = vld [vmem:[#allocation3 + $0x32] sm:$0xff]  ;;  %v2107_v44 = vadd.f32 %v2075_v41, %v1959_v34  ;;  %1879 = vst.msk [vmem:[#allocation3 + $0x80] sm:$0xff] %vm553_vm1, %v1847_v7  ;;  %v2108_v49 = vadd.f32 %v2076_v47, %v1962_v40  ;;  %11338 = vmatmul.mubr.msk.bf16.gmra.mrb[144].mxu1 %vm1069_vm3, %v12582_v6  ;;  %v2074_v50 = vld [vmem:[#allocation3 + $0x3a] sm:$0xff]  ;;  %v1826_v39 = vld [vmem:[#allocation3 + $0x108] sm:$0xff] }
 0x232   : > { %v2105_v51 = vadd.f32 %v13043_v61, %v2073_v48  ;;  %1877 = vst.msk [vmem:[#allocation3 + $0x68] sm:$0xff] %vm553_vm1, %v1845_v46  ;;  %11341 = vmatprep.mubr.msk.bf16.mxu1 %vm1069_vm3, %v12600_v27  ;;  %v2106_v10 = vadd.f32 %v11154_v21, %v2074_v50  ;;  %v1824_v46 = vld [vmem:[#allocation3 + $0xf0] sm:$0xff] }
 0x233   : > { %2139 = vst.msk [vmem:[#allocation3 + $0x4a] sm:$0xff] %vm553_vm1, %v2107_v44  ;;  %2140 = vst.msk [vmem:[#allocation3 + $0x52] sm:$0xff] %vm553_vm1, %v2108_v49  ;;  %v1827_v49 = vld [vmem:[#allocation3 + $0x110] sm:$0xff] }
 0x234   : > { %2137 = vst.msk [vmem:[#allocation3 + $0x32] sm:$0xff] %vm553_vm1, %v2105_v51  ;;  %v11127_v52 = vpop.f32.mrb[40].mxu1  ;;  %v11161_v54 = vpop.f32.mrb[72].mxu0  ;;  %2138 = vst.msk [vmem:[#allocation3 + $0x3a] sm:$0xff] %vm553_vm1, %v2106_v10  ;;  %v1825_v10 = vld [vmem:[#allocation3 + $0xf8] sm:$0xff] }
 0x235   : > { %v1850_v6 = vadd.f32 %v11127_v52, %v1818_v53  ;;  %v1713_v55 = vpop.f32.mrb[41].mxu1  ;;  %v1975_v57 = vpop.f32.mrb[73].mxu0 }
 0x236   : > { %v1848_v60 = vadd.f32 %v1816_v14, %v1713_v55  ;;  %v11128_v61 = vpop.f32.mrb[42].mxu1  ;;  %v11162_v27 = vpop.f32.mrb[74].mxu0 }
 0x237   : > { %1882 = vst.msk [vmem:[#allocation3 + $0xa8] sm:$0xff] %vm553_vm1, %v1850_v6  ;;  %v1851_v63 = vadd.f32 %v11128_v61, %v1819_v62  ;;  %v1716_v43 = vpop.f32.mrb[43].mxu1  ;;  %v1978_v0 = vpop.f32.mrb[75].mxu0 }
 0x238   : > { %1880 = vst.msk [vmem:[#allocation3 + $0x90] sm:$0xff] %vm553_vm1, %v1848_v60  ;;  %v2079_v1 = vld [vmem:[#allocation3 + $0x7a] sm:$0xff]  ;;  %v1849_v2 = vadd.f32 %v1817_v20, %v1716_v43  ;;  %v2080_v3 = vld [vmem:[#allocation3 + $0x82] sm:$0xff] }
 0x239   : > { %v2077_v9 = vld [vmem:[#allocation3 + $0x62] sm:$0xff]  ;;  %v2111_v4 = vadd.f32 %v2079_v1, %v1975_v57  ;;  %1883 = vst.msk [vmem:[#allocation3 + $0xb0] sm:$0xff] %vm553_vm1, %v1851_v63  ;;  %v2112_v21 = vadd.f32 %v2080_v3, %v1978_v0  ;;  %11342 = vmatmul.mubr.msk.bf16.gmra.mrb[148].mxu1 %vm1069_vm3, %v12598_v26  ;;  %v2078_v5 = vld [vmem:[#allocation3 + $0x6a] sm:$0xff]  ;;  %v1830_v63 = vld [vmem:[#allocation3 + $0x138] sm:$0xff] }
 0x23a   : > { %v2109_v8 = vadd.f32 %v11157_v56, %v2077_v9  ;;  %1881 = vst.msk [vmem:[#allocation3 + $0x98] sm:$0xff] %vm553_vm1, %v1849_v2  ;;  %11345 = vmatprep.mubr.msk.bf16.mxu1 %vm1069_vm3, %v12616_v45  ;;  %v2110_v11 = vadd.f32 %v11158_v29, %v2078_v5  ;;  %v1828_v1 = vld [vmem:[#allocation3 + $0x120] sm:$0xff] }
 0x23b   : > { %2143 = vst.msk [vmem:[#allocation3 + $0x7a] sm:$0xff] %vm553_vm1, %v2111_v4  ;;  %2144 = vst.msk [vmem:[#allocation3 + $0x82] sm:$0xff] %vm553_vm1, %v2112_v21  ;;  %v1831_v9 = vld [vmem:[#allocation3 + $0x140] sm:$0xff] }
 0x23c   : > { %2141 = vst.msk [vmem:[#allocation3 + $0x62] sm:$0xff] %vm553_vm1, %v2109_v8  ;;  %v11131_v12 = vpop.f32.mrb[44].mxu1  ;;  %v11165_v15 = vpop.f32.mrb[76].mxu0  ;;  %2142 = vst.msk [vmem:[#allocation3 + $0x6a] sm:$0xff] %vm553_vm1, %v2110_v11  ;;  %v1829_v8 = vld [vmem:[#allocation3 + $0x128] sm:$0xff] }
 0x23d   : > { %v1854_v26 = vadd.f32 %v11131_v12, %v1822_v13  ;;  %v1729_v30 = vpop.f32.mrb[45].mxu1  ;;  %v1991_v17 = vpop.f32.mrb[77].mxu0 }
 0x23e   : > { %v1852_v18 = vadd.f32 %v1820_v16, %v1729_v30  ;;  %v11132_v22 = vpop.f32.mrb[46].mxu1  ;;  %v11166_v45 = vpop.f32.mrb[78].mxu0 }
 0x23f   : > { %1886 = vst.msk [vmem:[#allocation3 + $0xd8] sm:$0xff] %vm553_vm1, %v1854_v26  ;;  %v1855_v24 = vadd.f32 %v11132_v22, %v1823_v23  ;;  %v1732_v25 = vpop.f32.mrb[47].mxu1  ;;  %v1994_v56 = vpop.f32.mrb[79].mxu0 }
 0x240   : > { %1884 = vst.msk [vmem:[#allocation3 + $0xc0] sm:$0xff] %vm553_vm1, %v1852_v18  ;;  %v2083_v31 = vld [vmem:[#allocation3 + $0xaa] sm:$0xff]  ;;  %v1853_v32 = vadd.f32 %v1821_v28, %v1732_v25  ;;  %v2084_v33 = vld [vmem:[#allocation3 + $0xb2] sm:$0xff] }
 0x241   : > { %v2081_v34 = vld [vmem:[#allocation3 + $0x92] sm:$0xff]  ;;  %v2115_v35 = vadd.f32 %v2083_v31, %v1991_v17  ;;  %1887 = vst.msk [vmem:[#allocation3 + $0xe0] sm:$0xff] %vm553_vm1, %v1855_v24  ;;  %v2116_v36 = vadd.f32 %v2084_v33, %v1994_v56  ;;  %11346 = vmatmul.mubr.msk.bf16.gmra.mrb[152].mxu1 %vm1069_vm3, %v12614_v42  ;;  %v2082_v37 = vld [vmem:[#allocation3 + $0x9a] sm:$0xff] }
 0x242   : > { %v2113_v29 = vadd.f32 %v11161_v54, %v2081_v34  ;;  %1885 = vst.msk [vmem:[#allocation3 + $0xc8] sm:$0xff] %vm553_vm1, %v1853_v32  ;;  %11349 = vmatprep.mubr.msk.bf16.mxu1 %vm1069_vm3, %v12632_v59  ;;  %v2114_v7 = vadd.f32 %v11162_v27, %v2082_v37  ;;  %v1832_v56 = vld [vmem:[#allocation3 + $0x150] sm:$0xff] }
 0x243   : > { %2147 = vst.msk [vmem:[#allocation3 + $0xaa] sm:$0xff] %vm553_vm1, %v2115_v35  ;;  %2148 = vst.msk [vmem:[#allocation3 + $0xb2] sm:$0xff] %vm553_vm1, %v2116_v36  ;;  %v1835_v34 = vld [vmem:[#allocation3 + $0x170] sm:$0xff] }
 0x244   : > { %2145 = vst.msk [vmem:[#allocation3 + $0x92] sm:$0xff] %vm553_vm1, %v2113_v29  ;;  %v11135_v38 = vpop.f32.mrb[48].mxu1  ;;  %v11169_v40 = vpop.f32.mrb[80].mxu0  ;;  %2146 = vst.msk [vmem:[#allocation3 + $0x9a] sm:$0xff] %vm553_vm1, %v2114_v7  ;;  %v1833_v29 = vld [vmem:[#allocation3 + $0x158] sm:$0xff] }
 0x245   : > { %v1858_v42 = vadd.f32 %v11135_v38, %v1826_v39  ;;  %v1745_v41 = vpop.f32.mrb[49].mxu1  ;;  %v2007_v47 = vpop.f32.mrb[81].mxu0 }
 0x246   : > { %v1856_v48 = vadd.f32 %v1824_v46, %v1745_v41  ;;  %v11136_v44 = vpop.f32.mrb[50].mxu1  ;;  %v11170_v59 = vpop.f32.mrb[82].mxu0 }
 0x247   : > { %1890 = vst.msk [vmem:[#allocation3 + $0x108] sm:$0xff] %vm553_vm1, %v1858_v42  ;;  %v1859_v50 = vadd.f32 %v11136_v44, %v1827_v49  ;;  %v1748_v51 = vpop.f32.mrb[51].mxu1  ;;  %v2010_v52 = vpop.f32.mrb[83].mxu0 }
 0x248   : > { %1888 = vst.msk [vmem:[#allocation3 + $0xf0] sm:$0xff] %vm553_vm1, %v1856_v48  ;;  %v2087_v53 = vld [vmem:[#allocation3 + $0xda] sm:$0xff]  ;;  %v1857_v54 = vadd.f32 %v1825_v10, %v1748_v51  ;;  %v2088_v6 = vld [vmem:[#allocation3 + $0xe2] sm:$0xff] }
 0x249   : > { %v2085_v55 = vld [vmem:[#allocation3 + $0xc2] sm:$0xff]  ;;  %v2119_v14 = vadd.f32 %v2087_v53, %v2007_v47  ;;  %1891 = vst.msk [vmem:[#allocation3 + $0x110] sm:$0xff] %vm553_vm1, %v1859_v50  ;;  %v2120_v57 = vadd.f32 %v2088_v6, %v2010_v52  ;;  %11350 = vmatmul.mubr.msk.bf16.gmra.mrb[156].mxu1 %vm1069_vm3, %v12630_v58  ;;  %v2086_v60 = vld [vmem:[#allocation3 + $0xca] sm:$0xff] }
 0x24a   : > { %v2117_v61 = vadd.f32 %v11165_v15, %v2085_v55  ;;  %1889 = vst.msk [vmem:[#allocation3 + $0xf8] sm:$0xff] %vm553_vm1, %v1857_v54  ;;  %v2118_v62 = vadd.f32 %v11166_v45, %v2086_v60  ;;  %v1834_v45 = vld [vmem:[#allocation3 + $0x168] sm:$0xff]  ;;  %v1836_v52 = vld [vmem:[#allocation3 + $0x180] sm:$0xff] }
 0x24b   : > { %2151 = vst.msk [vmem:[#allocation3 + $0xda] sm:$0xff] %vm553_vm1, %v2119_v14  ;;  %2152 = vst.msk [vmem:[#allocation3 + $0xe2] sm:$0xff] %vm553_vm1, %v2120_v57  ;;  %v1839_v55 = vld [vmem:[#allocation3 + $0x1a0] sm:$0xff] }
 0x24c   : > { %2149 = vst.msk [vmem:[#allocation3 + $0xc2] sm:$0xff] %vm553_vm1, %v2117_v61  ;;  %v11139_v27 = vpop.f32.mrb[52].mxu1  ;;  %v11173_v43 = vpop.f32.mrb[84].mxu0  ;;  %2150 = vst.msk [vmem:[#allocation3 + $0xca] sm:$0xff] %vm553_vm1, %v2118_v62  ;;  %v1837_v61 = vld [vmem:[#allocation3 + $0x188] sm:$0xff] }
 0x24d   : > { %v1862_v20 = vadd.f32 %v11139_v27, %v1830_v63  ;;  %v1761_v0 = vpop.f32.mrb[53].mxu1  ;;  %v2023_v58 = vpop.f32.mrb[85].mxu0 }
 0x24e   : > { %v1860_v2 = vadd.f32 %v1828_v1, %v1761_v0  ;;  %v11140_v3 = vpop.f32.mrb[54].mxu1  ;;  %v11174_v4 = vpop.f32.mrb[86].mxu0 }
 0x24f   : > { %1894 = vst.msk [vmem:[#allocation3 + $0x138] sm:$0xff] %vm553_vm1, %v1862_v20  ;;  %v1863_v21 = vadd.f32 %v11140_v3, %v1831_v9  ;;  %v1764_v5 = vpop.f32.mrb[55].mxu1  ;;  %v2026_v11 = vpop.f32.mrb[87].mxu0 }
 0x250   : > { %1892 = vst.msk [vmem:[#allocation3 + $0x120] sm:$0xff] %vm553_vm1, %v1860_v2  ;;  %v2091_v12 = vld [vmem:[#allocation3 + $0x10a] sm:$0xff]  ;;  %v1861_v13 = vadd.f32 %v1829_v8, %v1764_v5  ;;  %v2092_v15 = vld [vmem:[#allocation3 + $0x112] sm:$0xff] }
 0x251   : > { %v2089_v26 = vld [vmem:[#allocation3 + $0xf2] sm:$0xff]  ;;  %v2123_v30 = vadd.f32 %v2091_v12, %v2023_v58  ;;  %1895 = vst.msk [vmem:[#allocation3 + $0x140] sm:$0xff] %vm553_vm1, %v1863_v21  ;;  %v2124_v16 = vadd.f32 %v2092_v15, %v2026_v11  ;;  %v2090_v17 = vld [vmem:[#allocation3 + $0xfa] sm:$0xff] }
 0x252   : > { %v2121_v18 = vadd.f32 %v11169_v40, %v2089_v26  ;;  %1893 = vst.msk [vmem:[#allocation3 + $0x128] sm:$0xff] %vm553_vm1, %v1861_v13  ;;  %v2122_v22 = vadd.f32 %v11170_v59, %v2090_v17  ;;  %v1838_v59 = vld [vmem:[#allocation3 + $0x198] sm:$0xff] }
 0x253   : > { %2155 = vst.msk [vmem:[#allocation3 + $0x10a] sm:$0xff] %vm553_vm1, %v2123_v30  ;;  %2156 = vst.msk [vmem:[#allocation3 + $0x112] sm:$0xff] %vm553_vm1, %v2124_v16  ;;  %v2333_v11 = vld [vmem:[#allocation3 + $0x19] sm:$0xff] }
 0x254   : > { %2153 = vst.msk [vmem:[#allocation3 + $0xf2] sm:$0xff] %vm553_vm1, %v2121_v18  ;;  %v11143_v23 = vpop.f32.mrb[56].mxu1  ;;  %v11177_v24 = vpop.f32.mrb[88].mxu0  ;;  %2154 = vst.msk [vmem:[#allocation3 + $0xfa] sm:$0xff] %vm553_vm1, %v2122_v22  ;;  %v2336_v26 = vld [vmem:[#allocation3 + $0x39] sm:$0xff]  ;;  %v2334_v18 = vld [vmem:[#allocation3 + $0x21] sm:$0xff] }
 0x255   : > { %v1866_v25 = vadd.f32 %v11143_v23, %v1834_v45  ;;  %v1777_v28 = vpop.f32.mrb[57].mxu1  ;;  %v2039_v31 = vpop.f32.mrb[89].mxu0 }
 0x256   : > { %v1864_v32 = vadd.f32 %v1832_v56, %v1777_v28  ;;  %v11144_v33 = vpop.f32.mrb[58].mxu1  ;;  %v11178_v35 = vpop.f32.mrb[90].mxu0 }
 0x257   : > { %1898 = vst.msk [vmem:[#allocation3 + $0x168] sm:$0xff] %vm553_vm1, %v1866_v25  ;;  %v1867_v36 = vadd.f32 %v11144_v33, %v1835_v34  ;;  %v1780_v37 = vpop.f32.mrb[59].mxu1  ;;  %v2042_v7 = vpop.f32.mrb[91].mxu0 }
 0x258   : > { %1896 = vst.msk [vmem:[#allocation3 + $0x150] sm:$0xff] %vm553_vm1, %v1864_v32  ;;  %v2095_v38 = vld [vmem:[#allocation3 + $0x13a] sm:$0xff]  ;;  %v1865_v39 = vadd.f32 %v1833_v29, %v1780_v37  ;;  %v2096_v40 = vld [vmem:[#allocation3 + $0x142] sm:$0xff] }
 0x259   : > { %v2093_v42 = vld [vmem:[#allocation3 + $0x122] sm:$0xff]  ;;  %v2127_v41 = vadd.f32 %v2095_v38, %v2039_v31  ;;  %1899 = vst.msk [vmem:[#allocation3 + $0x170] sm:$0xff] %vm553_vm1, %v1867_v36  ;;  %v2128_v46 = vadd.f32 %v2096_v40, %v2042_v7  ;;  %v2094_v47 = vld [vmem:[#allocation3 + $0x12a] sm:$0xff] }
 0x25a   : > { %v2125_v48 = vadd.f32 %v11173_v43, %v2093_v42  ;;  %1897 = vst.msk [vmem:[#allocation3 + $0x158] sm:$0xff] %vm553_vm1, %v1865_v39  ;;  %v2126_v44 = vadd.f32 %v11174_v4, %v2094_v47  ;;  %v2335_v4 = vld [vmem:[#allocation3 + $0x31] sm:$0xff]  ;;  %v2339_v31 = vld [vmem:[#allocation3 + $0x61] sm:$0xff]  ;;  %v2340_v38 = vld [vmem:[#allocation3 + $0x69] sm:$0xff] }
 0x25b   : > { %2159 = vst.msk [vmem:[#allocation3 + $0x13a] sm:$0xff] %vm553_vm1, %v2127_v41  ;;  %2160 = vst.msk [vmem:[#allocation3 + $0x142] sm:$0xff] %vm553_vm1, %v2128_v46  ;;  %v2338_v47 = vld [vmem:[#allocation3 + $0x51] sm:$0xff] }
 0x25c   : > { %2157 = vst.msk [vmem:[#allocation3 + $0x122] sm:$0xff] %vm553_vm1, %v2125_v48  ;;  %v11147_v49 = vpop.f32.mrb[60].mxu1  ;;  %v11181_v50 = vpop.f32.mrb[92].mxu0  ;;  %2158 = vst.msk [vmem:[#allocation3 + $0x12a] sm:$0xff] %vm553_vm1, %v2126_v44 }
 0x25d   : > { %v1870_v51 = vadd.f32 %v11147_v49, %v1838_v59  ;;  %v1793_v10 = vpop.f32.mrb[61].mxu1  ;;  %v2055_v53 = vpop.f32.mrb[93].mxu0 }
 0x25e   : > { %v1868_v54 = vadd.f32 %v1836_v52, %v1793_v10  ;;  %v11148_v6 = vpop.f32.mrb[62].mxu1  ;;  %v11182_v14 = vpop.f32.mrb[94].mxu0 }
 0x25f   : > { %1902 = vst.msk [vmem:[#allocation3 + $0x198] sm:$0xff] %vm553_vm1, %v1870_v51  ;;  %v1871_v57 = vadd.f32 %v11148_v6, %v1839_v55  ;;  %v1796_v60 = vpop.f32.mrb[63].mxu1  ;;  %v2058_v62 = vpop.f32.mrb[95].mxu0 }
 0x260   : > { %4147 = vst.msk [vmem:[#allocation3 + $0x198] sm:$0xff] %vm553_vm1, %v12172_v19  ;;  %1900 = vst.msk [vmem:[#allocation3 + $0x180] sm:$0xff] %vm553_vm1, %v1868_v54  ;;  %v2099_v27 = vld [vmem:[#allocation3 + $0x16a] sm:$0xff]  ;;  %v1869_v63 = vadd.f32 %v1837_v61, %v1796_v60  ;;  %v2100_v43 = vld [vmem:[#allocation3 + $0x172] sm:$0xff] }
 0x261   : > { %v2097_v20 = vld [vmem:[#allocation3 + $0x152] sm:$0xff]  ;;  %v2131_v0 = vadd.f32 %v2099_v27, %v2055_v53  ;;  %1903 = vst.msk [vmem:[#allocation3 + $0x1a0] sm:$0xff] %vm553_vm1, %v1871_v57  ;;  %v2132_v1 = vadd.f32 %v2100_v43, %v2058_v62  ;;  %v2098_v58 = vld [vmem:[#allocation3 + $0x15a] sm:$0xff] }
 0x262   : > { %v2129_v2 = vadd.f32 %v11177_v24, %v2097_v20  ;;  %4148 = vst.msk [vmem:[#allocation3 + $0x1a0] sm:$0xff] %vm553_vm1, %v12172_v19  ;;  %1901 = vst.msk [vmem:[#allocation3 + $0x188] sm:$0xff] %vm553_vm1, %v1869_v63  ;;  %v2130_v3 = vadd.f32 %v11178_v35, %v2098_v58  ;;  %v2337_v35 = vld [vmem:[#allocation3 + $0x49] sm:$0xff]  ;;  %v2343_v53 = vld [vmem:[#allocation3 + $0x91] sm:$0xff] }
 0x263   : > { %2163 = vst.msk [vmem:[#allocation3 + $0x16a] sm:$0xff] %vm553_vm1, %v2131_v0  ;;  %2164 = vst.msk [vmem:[#allocation3 + $0x172] sm:$0xff] %vm553_vm1, %v2132_v1  ;;  %v2344_v27 = vld [vmem:[#allocation3 + $0x99] sm:$0xff]  ;;  %v2342_v58 = vld [vmem:[#allocation3 + $0x81] sm:$0xff] }
 0x264   : > { %2161 = vst.msk [vmem:[#allocation3 + $0x152] sm:$0xff] %vm553_vm1, %v2129_v2  ;;  %v11187_v9 = vpop.f32.mrb[64].mxu1  ;;  %v11221_v21 = vpop.f32.mrb[96].mxu0  ;;  %2162 = vst.msk [vmem:[#allocation3 + $0x15a] sm:$0xff] %vm553_vm1, %v2130_v3 }
 0x265   : > { %v2367_v5 = vadd.f32 %v11187_v9, %v2335_v4  ;;  %v2206_v8 = vpop.f32.mrb[65].mxu1  ;;  %v2468_v12 = vpop.f32.mrb[97].mxu0 }
 0x266   : > { %v2365_v13 = vadd.f32 %v2333_v11, %v2206_v8  ;;  %v11188_v15 = vpop.f32.mrb[66].mxu1  ;;  %v11222_v30 = vpop.f32.mrb[98].mxu0 }
 0x267   : > { %2399 = vst.msk [vmem:[#allocation3 + $0x31] sm:$0xff] %vm553_vm1, %v2367_v5  ;;  %v2368_v16 = vadd.f32 %v11188_v15, %v2336_v26  ;;  %v2209_v17 = vpop.f32.mrb[67].mxu1  ;;  %v2471_v22 = vpop.f32.mrb[99].mxu0 }
 0x268   : > { %2397 = vst.msk [vmem:[#allocation3 + $0x19] sm:$0xff] %vm553_vm1, %v2365_v13  ;;  %v2366_v23 = vadd.f32 %v2334_v18, %v2209_v17 }
 0x269   : > { %2400 = vst.msk [vmem:[#allocation3 + $0x39] sm:$0xff] %vm553_vm1, %v2368_v16  ;;  %v2101_v45 = vld [vmem:[#allocation3 + $0x182] sm:$0xff]  ;;  %v2102_v24 = vld [vmem:[#allocation3 + $0x18a] sm:$0xff] }
 0x26a   : > { %2398 = vst.msk [vmem:[#allocation3 + $0x21] sm:$0xff] %vm553_vm1, %v2366_v23  ;;  %v2133_v25 = vadd.f32 %v11181_v50, %v2101_v45  ;;  %v2134_v28 = vadd.f32 %v11182_v14, %v2102_v24  ;;  %v2341_v14 = vld [vmem:[#allocation3 + $0x79] sm:$0xff]  ;;  %v2348_v23 = vld [vmem:[#allocation3 + $0xc9] sm:$0xff] }
 0x26c   : > { %v11191_v56 = vpop.f32.mrb[68].mxu1  ;;  %v11225_v32 = vpop.f32.mrb[100].mxu0  ;;  %2165 = vst.msk [vmem:[#allocation3 + $0x182] sm:$0xff] %vm553_vm1, %v2133_v25  ;;  %2166 = vst.msk [vmem:[#allocation3 + $0x18a] sm:$0xff] %vm553_vm1, %v2134_v28 }
 0x26d   : > { %v2371_v33 = vadd.f32 %v11191_v56, %v2339_v31  ;;  %v2222_v34 = vpop.f32.mrb[69].mxu1  ;;  %v2484_v36 = vpop.f32.mrb[101].mxu0  ;;  %v2346_v31 = vld [vmem:[#allocation3 + $0xb1] sm:$0xff] }
 0x26e   : > { %v2597_v37 = vld [vmem:[#allocation3 + $0x30] sm:$0xff]  ;;  %v2369_v29 = vadd.f32 %v2337_v35, %v2222_v34  ;;  %v11192_v7 = vpop.f32.mrb[70].mxu1  ;;  %v11226_v39 = vpop.f32.mrb[102].mxu0 }
 0x26f   : > { %v2629_v40 = vadd.f32 %v11221_v21, %v2597_v37  ;;  %v2595_v42 = vld [vmem:[#allocation3 + $0x18] sm:$0xff]  ;;  %2403 = vst.msk [vmem:[#allocation3 + $0x61] sm:$0xff] %vm553_vm1, %v2371_v33  ;;  %v2372_v41 = vadd.f32 %v11192_v7, %v2340_v38  ;;  %v2225_v46 = vpop.f32.mrb[71].mxu1  ;;  %v2487_v48 = vpop.f32.mrb[103].mxu0 }
 0x270   : > { %v2627_v44 = vadd.f32 %v2595_v42, %v2468_v12  ;;  %v2598_v49 = vld [vmem:[#allocation3 + $0x38] sm:$0xff]  ;;  %2401 = vst.msk [vmem:[#allocation3 + $0x49] sm:$0xff] %vm553_vm1, %v2369_v29  ;;  %v2370_v59 = vadd.f32 %v2338_v47, %v2225_v46  ;;  %v2347_v12 = vld [vmem:[#allocation3 + $0xc1] sm:$0xff] }
 0x271   : > { %2661 = vst.msk [vmem:[#allocation3 + $0x30] sm:$0xff] %vm553_vm1, %v2629_v40  ;;  %v2630_v50 = vadd.f32 %v11222_v30, %v2598_v49  ;;  %v2596_v51 = vld [vmem:[#allocation3 + $0x20] sm:$0xff]  ;;  %2404 = vst.msk [vmem:[#allocation3 + $0x69] sm:$0xff] %vm553_vm1, %v2372_v41  ;;  %v2345_v30 = vld [vmem:[#allocation3 + $0xa9] sm:$0xff] }
 0x272   : > { %2659 = vst.msk [vmem:[#allocation3 + $0x18] sm:$0xff] %vm553_vm1, %v2627_v44  ;;  %v2628_v10 = vadd.f32 %v2596_v51, %v2471_v22  ;;  %2402 = vst.msk [vmem:[#allocation3 + $0x51] sm:$0xff] %vm553_vm1, %v2370_v59  ;;  %v2351_v38 = vld [vmem:[#allocation3 + $0xf1] sm:$0xff]  ;;  %v2349_v41 = vld [vmem:[#allocation3 + $0xd9] sm:$0xff] }
 0x273   : > { %2662 = vst.msk [vmem:[#allocation3 + $0x38] sm:$0xff] %vm553_vm1, %v2630_v50  ;;  %v2352_v49 = vld [vmem:[#allocation3 + $0xf9] sm:$0xff] }
 0x274   : > { %2660 = vst.msk [vmem:[#allocation3 + $0x20] sm:$0xff] %vm553_vm1, %v2628_v10  ;;  %v11195_v52 = vpop.f32.mrb[72].mxu1  ;;  %v11229_v54 = vpop.f32.mrb[104].mxu0 }
 0x275   : > { %v2375_v6 = vadd.f32 %v11195_v52, %v2343_v53  ;;  %v2238_v55 = vpop.f32.mrb[73].mxu1  ;;  %v2500_v57 = vpop.f32.mrb[105].mxu0  ;;  %v2350_v53 = vld [vmem:[#allocation3 + $0xe1] sm:$0xff] }
 0x276   : > { %v2601_v60 = vld [vmem:[#allocation3 + $0x60] sm:$0xff]  ;;  %v2373_v61 = vadd.f32 %v2341_v14, %v2238_v55  ;;  %v11196_v62 = vpop.f32.mrb[74].mxu1  ;;  %v11230_v63 = vpop.f32.mrb[106].mxu0 }
 0x277   : > { %v2633_v43 = vadd.f32 %v11225_v32, %v2601_v60  ;;  %v2599_v20 = vld [vmem:[#allocation3 + $0x48] sm:$0xff]  ;;  %2407 = vst.msk [vmem:[#allocation3 + $0x91] sm:$0xff] %vm553_vm1, %v2375_v6  ;;  %v2376_v0 = vadd.f32 %v11196_v62, %v2344_v27  ;;  %v2241_v1 = vpop.f32.mrb[75].mxu1  ;;  %v2503_v2 = vpop.f32.mrb[107].mxu0 }
 0x278   : > { %v2631_v3 = vadd.f32 %v2599_v20, %v2484_v36  ;;  %v2602_v9 = vld [vmem:[#allocation3 + $0x68] sm:$0xff]  ;;  %2405 = vst.msk [vmem:[#allocation3 + $0x79] sm:$0xff] %vm553_vm1, %v2373_v61  ;;  %v2374_v4 = vadd.f32 %v2342_v58, %v2241_v1 }
 0x279   : > { %2665 = vst.msk [vmem:[#allocation3 + $0x60] sm:$0xff] %vm553_vm1, %v2633_v43  ;;  %v2634_v21 = vadd.f32 %v11226_v39, %v2602_v9  ;;  %v2600_v5 = vld [vmem:[#allocation3 + $0x50] sm:$0xff]  ;;  %2408 = vst.msk [vmem:[#allocation3 + $0x99] sm:$0xff] %vm553_vm1, %v2376_v0  ;;  %v2355_v27 = vld [vmem:[#allocation3 + $0x121] sm:$0xff] }
 0x27a   : > { %2663 = vst.msk [vmem:[#allocation3 + $0x48] sm:$0xff] %vm553_vm1, %v2631_v3  ;;  %v2632_v8 = vadd.f32 %v2600_v5, %v2487_v48  ;;  %2406 = vst.msk [vmem:[#allocation3 + $0x81] sm:$0xff] %vm553_vm1, %v2374_v4  ;;  %v2353_v0 = vld [vmem:[#allocation3 + $0x109] sm:$0xff] }
 0x27b   : > { %2666 = vst.msk [vmem:[#allocation3 + $0x68] sm:$0xff] %vm553_vm1, %v2634_v21  ;;  %v2356_v9 = vld [vmem:[#allocation3 + $0x129] sm:$0xff] }
 0x27c   : > { %2664 = vst.msk [vmem:[#allocation3 + $0x50] sm:$0xff] %vm553_vm1, %v2632_v8  ;;  %v11199_v11 = vpop.f32.mrb[76].mxu1  ;;  %v11233_v13 = vpop.f32.mrb[108].mxu0 }
 0x27d   : > { %v2379_v15 = vadd.f32 %v11199_v11, %v2347_v12  ;;  %v2254_v26 = vpop.f32.mrb[77].mxu1  ;;  %v2516_v16 = vpop.f32.mrb[109].mxu0  ;;  %v2354_v12 = vld [vmem:[#allocation3 + $0x111] sm:$0xff] }
 0x27e   : > { %v2605_v17 = vld [vmem:[#allocation3 + $0x90] sm:$0xff]  ;;  %v2377_v18 = vadd.f32 %v2345_v30, %v2254_v26  ;;  %v11200_v22 = vpop.f32.mrb[78].mxu1  ;;  %v11234_v45 = vpop.f32.mrb[110].mxu0 }
 0x27f   : > { %v2637_v24 = vadd.f32 %v11229_v54, %v2605_v17  ;;  %v2603_v25 = vld [vmem:[#allocation3 + $0x78] sm:$0xff]  ;;  %2411 = vst.msk [vmem:[#allocation3 + $0xc1] sm:$0xff] %vm553_vm1, %v2379_v15  ;;  %v2380_v28 = vadd.f32 %v11200_v22, %v2348_v23  ;;  %v2257_v56 = vpop.f32.mrb[79].mxu1  ;;  %v2519_v32 = vpop.f32.mrb[111].mxu0 }
 0x280   : > { %v2635_v33 = vadd.f32 %v2603_v25, %v2500_v57  ;;  %v2606_v34 = vld [vmem:[#allocation3 + $0x98] sm:$0xff]  ;;  %2409 = vst.msk [vmem:[#allocation3 + $0xa9] sm:$0xff] %vm553_vm1, %v2377_v18  ;;  %v2378_v35 = vadd.f32 %v2346_v31, %v2257_v56 }
 0x281   : > { %2669 = vst.msk [vmem:[#allocation3 + $0x90] sm:$0xff] %vm553_vm1, %v2637_v24  ;;  %v2638_v36 = vadd.f32 %v11230_v63, %v2606_v34  ;;  %v2604_v37 = vld [vmem:[#allocation3 + $0x80] sm:$0xff]  ;;  %2412 = vst.msk [vmem:[#allocation3 + $0xc9] sm:$0xff] %vm553_vm1, %v2380_v28  ;;  %v2359_v23 = vld [vmem:[#allocation3 + $0x151] sm:$0xff] }
 0x282   : > { %2667 = vst.msk [vmem:[#allocation3 + $0x78] sm:$0xff] %vm553_vm1, %v2635_v33  ;;  %v2636_v29 = vadd.f32 %v2604_v37, %v2503_v2  ;;  %2410 = vst.msk [vmem:[#allocation3 + $0xb1] sm:$0xff] %vm553_vm1, %v2378_v35  ;;  %v2357_v28 = vld [vmem:[#allocation3 + $0x139] sm:$0xff] }
 0x283   : > { %2670 = vst.msk [vmem:[#allocation3 + $0x98] sm:$0xff] %vm553_vm1, %v2638_v36  ;;  %v2360_v34 = vld [vmem:[#allocation3 + $0x159] sm:$0xff] }
 0x284   : > { %2668 = vst.msk [vmem:[#allocation3 + $0x80] sm:$0xff] %vm553_vm1, %v2636_v29  ;;  %v11203_v7 = vpop.f32.mrb[80].mxu1  ;;  %v11237_v39 = vpop.f32.mrb[112].mxu0 }
 0x285   : > { %v2383_v40 = vadd.f32 %v11203_v7, %v2351_v38  ;;  %v2270_v42 = vpop.f32.mrb[81].mxu1  ;;  %v2532_v46 = vpop.f32.mrb[113].mxu0  ;;  %v2358_v38 = vld [vmem:[#allocation3 + $0x141] sm:$0xff] }
 0x286   : > { %v2609_v47 = vld [vmem:[#allocation3 + $0xc0] sm:$0xff]  ;;  %v2381_v48 = vadd.f32 %v2349_v41, %v2270_v42  ;;  %v11204_v44 = vpop.f32.mrb[82].mxu1  ;;  %v11238_v59 = vpop.f32.mrb[114].mxu0 }
 0x287   : > { %v2641_v50 = vadd.f32 %v11233_v13, %v2609_v47  ;;  %v2607_v51 = vld [vmem:[#allocation3 + $0xa8] sm:$0xff]  ;;  %2415 = vst.msk [vmem:[#allocation3 + $0xf1] sm:$0xff] %vm553_vm1, %v2383_v40  ;;  %v2384_v10 = vadd.f32 %v11204_v44, %v2352_v49  ;;  %v2273_v52 = vpop.f32.mrb[83].mxu1  ;;  %v2535_v54 = vpop.f32.mrb[115].mxu0 }
 0x288   : > { %v2639_v6 = vadd.f32 %v2607_v51, %v2516_v16  ;;  %v2610_v55 = vld [vmem:[#allocation3 + $0xc8] sm:$0xff]  ;;  %2413 = vst.msk [vmem:[#allocation3 + $0xd9] sm:$0xff] %vm553_vm1, %v2381_v48  ;;  %v2382_v14 = vadd.f32 %v2350_v53, %v2273_v52 }
 0x289   : > { %2673 = vst.msk [vmem:[#allocation3 + $0xc0] sm:$0xff] %vm553_vm1, %v2641_v50  ;;  %v2642_v57 = vadd.f32 %v11234_v45, %v2610_v55  ;;  %v2608_v60 = vld [vmem:[#allocation3 + $0xb0] sm:$0xff]  ;;  %2416 = vst.msk [vmem:[#allocation3 + $0xf9] sm:$0xff] %vm553_vm1, %v2384_v10  ;;  %v2363_v49 = vld [vmem:[#allocation3 + $0x181] sm:$0xff] }
 0x28a   : > { %2671 = vst.msk [vmem:[#allocation3 + $0xa8] sm:$0xff] %vm553_vm1, %v2639_v6  ;;  %v2640_v61 = vadd.f32 %v2608_v60, %v2519_v32  ;;  %2414 = vst.msk [vmem:[#allocation3 + $0xe1] sm:$0xff] %vm553_vm1, %v2382_v14  ;;  %v2361_v10 = vld [vmem:[#allocation3 + $0x169] sm:$0xff] }
 0x28b   : > { %2674 = vst.msk [vmem:[#allocation3 + $0xc8] sm:$0xff] %vm553_vm1, %v2642_v57  ;;  %v2364_v55 = vld [vmem:[#allocation3 + $0x189] sm:$0xff] }
 0x28c   : > { %2672 = vst.msk [vmem:[#allocation3 + $0xb0] sm:$0xff] %vm553_vm1, %v2640_v61  ;;  %v11207_v62 = vpop.f32.mrb[84].mxu1  ;;  %v11241_v63 = vpop.f32.mrb[116].mxu0 }
 0x28d   : > { %v2387_v43 = vadd.f32 %v11207_v62, %v2355_v27  ;;  %v2286_v20 = vpop.f32.mrb[85].mxu1  ;;  %v2548_v1 = vpop.f32.mrb[117].mxu0  ;;  %v2362_v27 = vld [vmem:[#allocation3 + $0x171] sm:$0xff] }
 0x28e   : > { %v2613_v58 = vld [vmem:[#allocation3 + $0xf0] sm:$0xff]  ;;  %v2385_v2 = vadd.f32 %v2353_v0, %v2286_v20  ;;  %v11208_v3 = vpop.f32.mrb[86].mxu1  ;;  %v11242_v4 = vpop.f32.mrb[118].mxu0 }
 0x28f   : > { %v2645_v21 = vadd.f32 %v11237_v39, %v2613_v58  ;;  %v2611_v5 = vld [vmem:[#allocation3 + $0xd8] sm:$0xff]  ;;  %2419 = vst.msk [vmem:[#allocation3 + $0x121] sm:$0xff] %vm553_vm1, %v2387_v43  ;;  %v2388_v8 = vadd.f32 %v11208_v3, %v2356_v9  ;;  %v2289_v11 = vpop.f32.mrb[87].mxu1  ;;  %v2551_v13 = vpop.f32.mrb[119].mxu0  ;;  %v2857_v3 = vld [vmem:[#allocation3 + $0x2] sm:$0xff] }
 0x290   : > { %v2643_v15 = vadd.f32 %v2611_v5, %v2532_v46  ;;  %v2614_v26 = vld [vmem:[#allocation3 + $0xf8] sm:$0xff]  ;;  %2417 = vst.msk [vmem:[#allocation3 + $0x109] sm:$0xff] %vm553_vm1, %v2385_v2  ;;  %v2386_v30 = vadd.f32 %v2354_v12, %v2289_v11  ;;  %v2858_v12 = vld [vmem:[#allocation3 + $0xa] sm:$0xff] }
 0x291   : > { %2677 = vst.msk [vmem:[#allocation3 + $0xf0] sm:$0xff] %vm553_vm1, %v2645_v21  ;;  %v2646_v16 = vadd.f32 %v11238_v59, %v2614_v26  ;;  %v2612_v17 = vld [vmem:[#allocation3 + $0xe0] sm:$0xff]  ;;  %2420 = vst.msk [vmem:[#allocation3 + $0x129] sm:$0xff] %vm553_vm1, %v2388_v8 }
 0x292   : > { %2675 = vst.msk [vmem:[#allocation3 + $0xd8] sm:$0xff] %vm553_vm1, %v2643_v15  ;;  %v2644_v18 = vadd.f32 %v2612_v17, %v2535_v54  ;;  %2418 = vst.msk [vmem:[#allocation3 + $0x111] sm:$0xff] %vm553_vm1, %v2386_v30  ;;  %v2860_v30 = vld [vmem:[#allocation3 + $0x22] sm:$0xff] }
 0x293   : > { %2678 = vst.msk [vmem:[#allocation3 + $0xf8] sm:$0xff] %vm553_vm1, %v2646_v16 }
 0x294   : > { %2676 = vst.msk [vmem:[#allocation3 + $0xe0] sm:$0xff] %vm553_vm1, %v2644_v18  ;;  %v11211_v22 = vpop.f32.mrb[88].mxu1  ;;  %v11245_v45 = vpop.f32.mrb[120].mxu0 }
 0x295   : > { %v2391_v24 = vadd.f32 %v11211_v22, %v2359_v23  ;;  %v2302_v25 = vpop.f32.mrb[89].mxu1  ;;  %v2564_v56 = vpop.f32.mrb[121].mxu0 }
 0x296   : > { %v2617_v31 = vld [vmem:[#allocation3 + $0x120] sm:$0xff]  ;;  %v2389_v32 = vadd.f32 %v2357_v28, %v2302_v25  ;;  %v11212_v33 = vpop.f32.mrb[90].mxu1  ;;  %v11246_v35 = vpop.f32.mrb[122].mxu0 }
 0x297   : > { %v2649_v36 = vadd.f32 %v11241_v63, %v2617_v31  ;;  %v2615_v37 = vld [vmem:[#allocation3 + $0x108] sm:$0xff]  ;;  %2423 = vst.msk [vmem:[#allocation3 + $0x151] sm:$0xff] %vm553_vm1, %v2391_v24  ;;  %v2392_v29 = vadd.f32 %v11212_v33, %v2360_v34  ;;  %v2305_v7 = vpop.f32.mrb[91].mxu1  ;;  %v2567_v39 = vpop.f32.mrb[123].mxu0 }
 0x298   : > { %v2647_v40 = vadd.f32 %v2615_v37, %v2548_v1  ;;  %v2618_v42 = vld [vmem:[#allocation3 + $0x128] sm:$0xff]  ;;  %2421 = vst.msk [vmem:[#allocation3 + $0x139] sm:$0xff] %vm553_vm1, %v2389_v32  ;;  %v2390_v41 = vadd.f32 %v2358_v38, %v2305_v7 }
 0x299   : > { %2681 = vst.msk [vmem:[#allocation3 + $0x120] sm:$0xff] %vm553_vm1, %v2649_v36  ;;  %v2650_v46 = vadd.f32 %v11242_v4, %v2618_v42  ;;  %v2616_v47 = vld [vmem:[#allocation3 + $0x110] sm:$0xff]  ;;  %2424 = vst.msk [vmem:[#allocation3 + $0x159] sm:$0xff] %vm553_vm1, %v2392_v29  ;;  %v2859_v4 = vld [vmem:[#allocation3 + $0x1a] sm:$0xff] }
 0x29a   : > { %2679 = vst.msk [vmem:[#allocation3 + $0x108] sm:$0xff] %vm553_vm1, %v2647_v40  ;;  %v2648_v48 = vadd.f32 %v2616_v47, %v2551_v13  ;;  %2422 = vst.msk [vmem:[#allocation3 + $0x141] sm:$0xff] %vm553_vm1, %v2390_v41  ;;  %v2863_v34 = vld [vmem:[#allocation3 + $0x4a] sm:$0xff]  ;;  %v2861_v29 = vld [vmem:[#allocation3 + $0x32] sm:$0xff] }
 0x29b   : > { %2682 = vst.msk [vmem:[#allocation3 + $0x128] sm:$0xff] %vm553_vm1, %v2650_v46  ;;  %v2864_v42 = vld [vmem:[#allocation3 + $0x52] sm:$0xff] }
 0x29c   : > { %2680 = vst.msk [vmem:[#allocation3 + $0x110] sm:$0xff] %vm553_vm1, %v2648_v48  ;;  %v11215_v44 = vpop.f32.mrb[92].mxu1  ;;  %v11249_v59 = vpop.f32.mrb[124].mxu0 }
 0x29d   : > { %v2395_v50 = vadd.f32 %v11215_v44, %v2363_v49  ;;  %v2318_v51 = vpop.f32.mrb[93].mxu1  ;;  %v2580_v52 = vpop.f32.mrb[125].mxu0  ;;  %v2862_v49 = vld [vmem:[#allocation3 + $0x3a] sm:$0xff] }
 0x29e   : > { %v2621_v53 = vld [vmem:[#allocation3 + $0x150] sm:$0xff]  ;;  %v2393_v54 = vadd.f32 %v2361_v10, %v2318_v51  ;;  %v11216_v6 = vpop.f32.mrb[94].mxu1  ;;  %v11250_v14 = vpop.f32.mrb[126].mxu0 }
 0x29f   : > { %v2653_v57 = vadd.f32 %v11245_v45, %v2621_v53  ;;  %v2619_v60 = vld [vmem:[#allocation3 + $0x138] sm:$0xff]  ;;  %2427 = vst.msk [vmem:[#allocation3 + $0x181] sm:$0xff] %vm553_vm1, %v2395_v50  ;;  %v2396_v61 = vadd.f32 %v11216_v6, %v2364_v55  ;;  %v2321_v62 = vpop.f32.mrb[95].mxu1  ;;  %v2583_v63 = vpop.f32.mrb[127].mxu0 }
 0x2a0   : > { %v2651_v43 = vadd.f32 %v2619_v60, %v2564_v56  ;;  %v2622_v20 = vld [vmem:[#allocation3 + $0x158] sm:$0xff]  ;;  %2425 = vst.msk [vmem:[#allocation3 + $0x169] sm:$0xff] %vm553_vm1, %v2393_v54  ;;  %v2394_v0 = vadd.f32 %v2362_v27, %v2321_v62  ;;  %v2865_v27 = vld [vmem:[#allocation3 + $0x62] sm:$0xff] }
 0x2a1   : > { %2685 = vst.msk [vmem:[#allocation3 + $0x150] sm:$0xff] %vm553_vm1, %v2653_v57  ;;  %v2654_v1 = vadd.f32 %v11246_v35, %v2622_v20  ;;  %v2620_v58 = vld [vmem:[#allocation3 + $0x140] sm:$0xff]  ;;  %2428 = vst.msk [vmem:[#allocation3 + $0x189] sm:$0xff] %vm553_vm1, %v2396_v61 }
 0x2a2   : > { %2683 = vst.msk [vmem:[#allocation3 + $0x138] sm:$0xff] %vm553_vm1, %v2651_v43  ;;  %v2652_v2 = vadd.f32 %v2620_v58, %v2567_v39  ;;  %2426 = vst.msk [vmem:[#allocation3 + $0x171] sm:$0xff] %vm553_vm1, %v2394_v0  ;;  %v2867_v57 = vld [vmem:[#allocation3 + $0x7a] sm:$0xff] }
 0x2a3   : > { %2686 = vst.msk [vmem:[#allocation3 + $0x158] sm:$0xff] %vm553_vm1, %v2654_v1  ;;  %v2868_v1 = vld [vmem:[#allocation3 + $0x82] sm:$0xff] }
 0x2a4   : > { %2684 = vst.msk [vmem:[#allocation3 + $0x140] sm:$0xff] %vm553_vm1, %v2652_v2  ;;  %v11255_v9 = vpop.f32.mrb[96].mxu1  ;;  %v11289_v21 = vpop.f32.mrb[128].mxu0  ;;  %v3828_v2 = vld [vmem:[%s15432_s8] sm:$0xf] }
 0x2a5   : > { %v2891_v5 = vadd.f32 %v11255_v9, %v2859_v4  ;;  %v2730_v8 = vpop.f32.mrb[97].mxu1  ;;  %v2992_v11 = vpop.f32.mrb[129].mxu0  ;;  %12043 = vmatprep.subr.msk.bf16.mxu0 %vm1118_vm2, %v3828_v2 }
 0x2a6   : > { %v2625_v13 = vld [vmem:[#allocation3 + $0x180] sm:$0xff]  ;;  %v2889_v15 = vadd.f32 %v2857_v3, %v2730_v8  ;;  %v11256_v26 = vpop.f32.mrb[98].mxu1  ;;  %v11290_v16 = vpop.f32.mrb[130].mxu0 }
 0x2a7   : > { %v2657_v17 = vadd.f32 %v11249_v59, %v2625_v13  ;;  %v2623_v18 = vld [vmem:[#allocation3 + $0x168] sm:$0xff]  ;;  %2923 = vst.msk [vmem:[#allocation3 + $0x1a] sm:$0xff] %vm553_vm1, %v2891_v5  ;;  %v2892_v22 = vadd.f32 %v11256_v26, %v2860_v30  ;;  %v2733_v23 = vpop.f32.mrb[99].mxu1  ;;  %v2995_v45 = vpop.f32.mrb[131].mxu0 }
 0x2a8   : > { %v2655_v24 = vadd.f32 %v2623_v18, %v2580_v52  ;;  %v2626_v25 = vld [vmem:[#allocation3 + $0x188] sm:$0xff]  ;;  %2921 = vst.msk [vmem:[#allocation3 + $0x2] sm:$0xff] %vm553_vm1, %v2889_v15  ;;  %v2890_v28 = vadd.f32 %v2858_v12, %v2733_v23 }
 0x2a9   : > { %2689 = vst.msk [vmem:[#allocation3 + $0x180] sm:$0xff] %vm553_vm1, %v2657_v17  ;;  %v2658_v56 = vadd.f32 %v11250_v14, %v2626_v25  ;;  %v2624_v31 = vld [vmem:[#allocation3 + $0x170] sm:$0xff]  ;;  %2924 = vst.msk [vmem:[#allocation3 + $0x22] sm:$0xff] %vm553_vm1, %v2892_v22 }
 0x2aa   : > { %2687 = vst.msk [vmem:[#allocation3 + $0x168] sm:$0xff] %vm553_vm1, %v2655_v24  ;;  %v2656_v32 = vadd.f32 %v2624_v31, %v2583_v63  ;;  %2922 = vst.msk [vmem:[#allocation3 + $0xa] sm:$0xff] %vm553_vm1, %v2890_v28  ;;  %v2866_v5 = vld [vmem:[#allocation3 + $0x6a] sm:$0xff]  ;;  %v2869_v24 = vld [vmem:[#allocation3 + $0x92] sm:$0xff] }
 0x2ab   : > { %2690 = vst.msk [vmem:[#allocation3 + $0x188] sm:$0xff] %vm553_vm1, %v2658_v56  ;;  %v2871_v18 = vld [vmem:[#allocation3 + $0xaa] sm:$0xff] }
 0x2ac   : > { %2688 = vst.msk [vmem:[#allocation3 + $0x170] sm:$0xff] %vm553_vm1, %v2656_v32  ;;  %v11259_v33 = vpop.f32.mrb[100].mxu1  ;;  %v11293_v35 = vpop.f32.mrb[132].mxu0  ;;  %v2872_v32 = vld [vmem:[#allocation3 + $0xb2] sm:$0xff] }
 0x2ad   : > { %v2895_v36 = vadd.f32 %v11259_v33, %v2863_v34  ;;  %v2746_v37 = vpop.f32.mrb[101].mxu1  ;;  %v3008_v7 = vpop.f32.mrb[133].mxu0 }
 0x2ae   : > { %v3121_v38 = vld [vmem:[#allocation3 + $0x19] sm:$0xff]  ;;  %v2893_v39 = vadd.f32 %v2861_v29, %v2746_v37  ;;  %v11260_v40 = vpop.f32.mrb[102].mxu1  ;;  %v11294_v41 = vpop.f32.mrb[134].mxu0 }
 0x2af   : > { %v3153_v46 = vadd.f32 %v11289_v21, %v3121_v38  ;;  %v3119_v47 = vld [vmem:[#allocation3 + $0x1] sm:$0xff]  ;;  %2927 = vst.msk [vmem:[#allocation3 + $0x4a] sm:$0xff] %vm553_vm1, %v2895_v36  ;;  %v2896_v48 = vadd.f32 %v11260_v40, %v2864_v42  ;;  %v2749_v44 = vpop.f32.mrb[103].mxu1  ;;  %v3011_v59 = vpop.f32.mrb[135].mxu0 }
 0x2b0   : > { %v3151_v50 = vadd.f32 %v3119_v47, %v2992_v11  ;;  %v3122_v51 = vld [vmem:[#allocation3 + $0x21] sm:$0xff]  ;;  %2925 = vst.msk [vmem:[#allocation3 + $0x32] sm:$0xff] %vm553_vm1, %v2893_v39  ;;  %v2894_v10 = vadd.f32 %v2862_v49, %v2749_v44  ;;  %v3885_v11 = vsel %vm1118_vm2, %v3828_v2, 0 }
 0x2b1   : > { %3185 = vst.msk [vmem:[#allocation3 + $0x19] sm:$0xff] %vm553_vm1, %v3153_v46  ;;  %v3154_v52 = vadd.f32 %v11290_v16, %v3122_v51  ;;  %v3120_v53 = vld [vmem:[#allocation3 + $0x9] sm:$0xff]  ;;  %2928 = vst.msk [vmem:[#allocation3 + $0x52] sm:$0xff] %vm553_vm1, %v2896_v48  ;;  %11354 = vmatpush3.bf16.msra.mxu0 %v3885_v11  ;;  %v2870_v29 = vld [vmem:[#allocation3 + $0x9a] sm:$0xff] }
 0x2b2   : > { %v13210_v54 = vld [vmem:[#allocation3 + $0x181] sm:$0xff]  ;;  %v13212_v6 = vld [vmem:[#allocation3 + $0x189] sm:$0xff]  ;;  %3183 = vst.msk [vmem:[#allocation3 + $0x1] sm:$0xff] %vm553_vm1, %v3151_v50  ;;  %v3152_v55 = vadd.f32 %v3120_v53, %v2995_v45  ;;  %2926 = vst.msk [vmem:[#allocation3 + $0x3a] sm:$0xff] %vm553_vm1, %v2894_v10 }
 0x2b3   : > { %4145 = vst.msk [vmem:[#allocation3 + $0x188] sm:$0xff] %vm553_vm1, %v12172_v19  ;;  %4144 = vst.msk [vmem:[#allocation3 + $0x180] sm:$0xff] %vm553_vm1, %v12172_v19  ;;  %v2875_v48 = vld [vmem:[#allocation3 + $0xda] sm:$0xff]  ;;  %v2873_v50 = vld [vmem:[#allocation3 + $0xc2] sm:$0xff] }
 0x2b4   : > { %4146 = vst.msk [vmem:[#allocation3 + $0x190] sm:$0x3] %vm1015_vm4, %v12172_v19  ;;  %v11263_v14 = vpop.f32.mrb[104].mxu1  ;;  %v11297_v60 = vpop.f32.mrb[136].mxu0 }
 0x2b5   : > { %3186 = vst.msk [vmem:[#allocation3 + $0x21] sm:$0xff] %vm553_vm1, %v3154_v52  ;;  %3184 = vst.msk [vmem:[#allocation3 + $0x9] sm:$0xff] %vm553_vm1, %v3152_v55  ;;  %v2899_v61 = vadd.f32 %v11263_v14, %v2867_v57  ;;  %v2762_v62 = vpop.f32.mrb[105].mxu1  ;;  %v3024_v63 = vpop.f32.mrb[137].mxu0  ;;  %v2876_v55 = vld [vmem:[#allocation3 + $0xe2] sm:$0xff] }
 0x2b6   : > { %4098 = vst.msk [vmem:[#allocation3 + $0x10] sm:$0x3] %vm1015_vm4, %v12172_v19  ;;  %v3125_v43 = vld [vmem:[#allocation3 + $0x49] sm:$0xff]  ;;  %v2897_v20 = vadd.f32 %v2865_v27, %v2762_v62  ;;  %v11264_v0 = vpop.f32.mrb[106].mxu1  ;;  %v11298_v58 = vpop.f32.mrb[138].mxu0 }
 0x2b7   : > { %v3157_v3 = vadd.f32 %v11293_v35, %v3125_v43  ;;  %v3123_v9 = vld [vmem:[#allocation3 + $0x31] sm:$0xff]  ;;  %2931 = vst.msk [vmem:[#allocation3 + $0x7a] sm:$0xff] %vm553_vm1, %v2899_v61  ;;  %v2900_v4 = vadd.f32 %v11264_v0, %v2868_v1  ;;  %v2765_v21 = vpop.f32.mrb[107].mxu1  ;;  %v3027_v8 = vpop.f32.mrb[139].mxu0 }
 0x2b8   : > { %v3155_v12 = vadd.f32 %v3123_v9, %v3008_v7  ;;  %v3126_v13 = vld [vmem:[#allocation3 + $0x51] sm:$0xff]  ;;  %2929 = vst.msk [vmem:[#allocation3 + $0x62] sm:$0xff] %vm553_vm1, %v2897_v20  ;;  %v2898_v15 = vadd.f32 %v2866_v5, %v2765_v21 }
 0x2b9   : > { %3189 = vst.msk [vmem:[#allocation3 + $0x49] sm:$0xff] %vm553_vm1, %v3157_v3  ;;  %v3158_v26 = vadd.f32 %v11294_v41, %v3126_v13  ;;  %v3124_v30 = vld [vmem:[#allocation3 + $0x39] sm:$0xff]  ;;  %2932 = vst.msk [vmem:[#allocation3 + $0x82] sm:$0xff] %vm553_vm1, %v2900_v4  ;;  %v2874_v27 = vld [vmem:[#allocation3 + $0xca] sm:$0xff] }
 0x2ba   : > { %3187 = vst.msk [vmem:[#allocation3 + $0x31] sm:$0xff] %vm553_vm1, %v3155_v12  ;;  %v3156_v16 = vadd.f32 %v3124_v30, %v3011_v59  ;;  %2930 = vst.msk [vmem:[#allocation3 + $0x6a] sm:$0xff] %vm553_vm1, %v2898_v15  ;;  %v2879_v9 = vld [vmem:[#allocation3 + $0x10a] sm:$0xff] }
 0x2bb   : > { %3190 = vst.msk [vmem:[#allocation3 + $0x51] sm:$0xff] %vm553_vm1, %v3158_v26  ;;  %v2880_v26 = vld [vmem:[#allocation3 + $0x112] sm:$0xff] }
 0x2bc   : > { %3188 = vst.msk [vmem:[#allocation3 + $0x39] sm:$0xff] %vm553_vm1, %v3156_v16  ;;  %v11267_v17 = vpop.f32.mrb[108].mxu1  ;;  %v11301_v22 = vpop.f32.mrb[140].mxu0 }
 0x2bd   : > { %v2903_v23 = vadd.f32 %v11267_v17, %v2871_v18  ;;  %v2778_v45 = vpop.f32.mrb[109].mxu1  ;;  %v3040_v25 = vpop.f32.mrb[141].mxu0 }
 0x2be   : > { %v3129_v28 = vld [vmem:[#allocation3 + $0x79] sm:$0xff]  ;;  %v2901_v56 = vadd.f32 %v2869_v24, %v2778_v45  ;;  %v11268_v31 = vpop.f32.mrb[110].mxu1  ;;  %v11302_v33 = vpop.f32.mrb[142].mxu0 }
 0x2bf   : > { %v3161_v34 = vadd.f32 %v11297_v60, %v3129_v28  ;;  %v3127_v35 = vld [vmem:[#allocation3 + $0x61] sm:$0xff]  ;;  %2935 = vst.msk [vmem:[#allocation3 + $0xaa] sm:$0xff] %vm553_vm1, %v2903_v23  ;;  %v2904_v36 = vadd.f32 %v11268_v31, %v2872_v32  ;;  %v2781_v37 = vpop.f32.mrb[111].mxu1  ;;  %v3043_v7 = vpop.f32.mrb[143].mxu0 }
 0x2c0   : > { %v3159_v38 = vadd.f32 %v3127_v35, %v3024_v63  ;;  %v3130_v39 = vld [vmem:[#allocation3 + $0x81] sm:$0xff]  ;;  %2933 = vst.msk [vmem:[#allocation3 + $0x92] sm:$0xff] %vm553_vm1, %v2901_v56  ;;  %v2902_v40 = vadd.f32 %v2870_v29, %v2781_v37 }
 0x2c1   : > { %3193 = vst.msk [vmem:[#allocation3 + $0x79] sm:$0xff] %vm553_vm1, %v3161_v34  ;;  %v3162_v42 = vadd.f32 %v11298_v58, %v3130_v39  ;;  %v3128_v41 = vld [vmem:[#allocation3 + $0x69] sm:$0xff]  ;;  %2936 = vst.msk [vmem:[#allocation3 + $0xb2] sm:$0xff] %vm553_vm1, %v2904_v36  ;;  %v2878_v23 = vld [vmem:[#allocation3 + $0xfa] sm:$0xff] }
 0x2c2   : > { %3191 = vst.msk [vmem:[#allocation3 + $0x61] sm:$0xff] %vm553_vm1, %v3159_v38  ;;  %v3160_v46 = vadd.f32 %v3128_v41, %v3027_v8  ;;  %2934 = vst.msk [vmem:[#allocation3 + $0x9a] sm:$0xff] %vm553_vm1, %v2902_v40  ;;  %v2877_v8 = vld [vmem:[#allocation3 + $0xf2] sm:$0xff]  ;;  %v2883_v34 = vld [vmem:[#allocation3 + $0x13a] sm:$0xff] }
 0x2c3   : > { %3194 = vst.msk [vmem:[#allocation3 + $0x81] sm:$0xff] %vm553_vm1, %v3162_v42  ;;  %v2881_v29 = vld [vmem:[#allocation3 + $0x122] sm:$0xff] }
 0x2c4   : > { %3192 = vst.msk [vmem:[#allocation3 + $0x69] sm:$0xff] %vm553_vm1, %v3160_v46  ;;  %v11271_v47 = vpop.f32.mrb[112].mxu1  ;;  %v11305_v44 = vpop.f32.mrb[144].mxu0  ;;  %v2884_v42 = vld [vmem:[#allocation3 + $0x142] sm:$0xff] }
 0x2c5   : > { %v2907_v49 = vadd.f32 %v11271_v47, %v2875_v48  ;;  %v2794_v59 = vpop.f32.mrb[113].mxu1  ;;  %v3056_v51 = vpop.f32.mrb[145].mxu0 }
 0x2c6   : > { %v3133_v10 = vld [vmem:[#allocation3 + $0xa9] sm:$0xff]  ;;  %v2905_v52 = vadd.f32 %v2873_v50, %v2794_v59  ;;  %v11272_v53 = vpop.f32.mrb[114].mxu1  ;;  %v11306_v14 = vpop.f32.mrb[146].mxu0 }
 0x2c7   : > { %v3165_v57 = vadd.f32 %v11301_v22, %v3133_v10  ;;  %v3131_v60 = vld [vmem:[#allocation3 + $0x91] sm:$0xff]  ;;  %2939 = vst.msk [vmem:[#allocation3 + $0xda] sm:$0xff] %vm553_vm1, %v2907_v49  ;;  %v2908_v61 = vadd.f32 %v11272_v53, %v2876_v55  ;;  %v2797_v62 = vpop.f32.mrb[115].mxu1  ;;  %v3059_v63 = vpop.f32.mrb[147].mxu0 }
 0x2c8   : > { %v3163_v43 = vadd.f32 %v3131_v60, %v3040_v25  ;;  %v3134_v20 = vld [vmem:[#allocation3 + $0xb1] sm:$0xff]  ;;  %2937 = vst.msk [vmem:[#allocation3 + $0xc2] sm:$0xff] %vm553_vm1, %v2905_v52  ;;  %v2906_v0 = vadd.f32 %v2874_v27, %v2797_v62 }
 0x2c9   : > { %3197 = vst.msk [vmem:[#allocation3 + $0xa9] sm:$0xff] %vm553_vm1, %v3165_v57  ;;  %v3166_v1 = vadd.f32 %v11302_v33, %v3134_v20  ;;  %v3132_v58 = vld [vmem:[#allocation3 + $0x99] sm:$0xff]  ;;  %2940 = vst.msk [vmem:[#allocation3 + $0xe2] sm:$0xff] %vm553_vm1, %v2908_v61  ;;  %v2882_v49 = vld [vmem:[#allocation3 + $0x12a] sm:$0xff] }
 0x2ca   : > { %3195 = vst.msk [vmem:[#allocation3 + $0x91] sm:$0xff] %vm553_vm1, %v3163_v43  ;;  %v3164_v2 = vadd.f32 %v3132_v58, %v3043_v7  ;;  %2938 = vst.msk [vmem:[#allocation3 + $0xca] sm:$0xff] %vm553_vm1, %v2906_v0  ;;  %v2887_v57 = vld [vmem:[#allocation3 + $0x16a] sm:$0xff]  ;;  %v2885_v27 = vld [vmem:[#allocation3 + $0x152] sm:$0xff] }
 0x2cb   : > { %3198 = vst.msk [vmem:[#allocation3 + $0xb1] sm:$0xff] %vm553_vm1, %v3166_v1  ;;  %v2888_v1 = vld [vmem:[#allocation3 + $0x172] sm:$0xff] }
 0x2cc   : > { %3196 = vst.msk [vmem:[#allocation3 + $0x99] sm:$0xff] %vm553_vm1, %v3164_v2  ;;  %v11275_v3 = vpop.f32.mrb[116].mxu1  ;;  %v11309_v4 = vpop.f32.mrb[148].mxu0 }
 0x2cd   : > { %v2911_v21 = vadd.f32 %v11275_v3, %v2879_v9  ;;  %v2810_v5 = vpop.f32.mrb[117].mxu1  ;;  %v3072_v11 = vpop.f32.mrb[149].mxu0 }
 0x2ce   : > { %v3137_v12 = vld [vmem:[#allocation3 + $0xd9] sm:$0xff]  ;;  %v2909_v13 = vadd.f32 %v2877_v8, %v2810_v5  ;;  %v11276_v15 = vpop.f32.mrb[118].mxu1  ;;  %v11310_v30 = vpop.f32.mrb[150].mxu0 }
 0x2cf   : > { %v3169_v16 = vadd.f32 %v11305_v44, %v3137_v12  ;;  %v3135_v17 = vld [vmem:[#allocation3 + $0xc1] sm:$0xff]  ;;  %2943 = vst.msk [vmem:[#allocation3 + $0x10a] sm:$0xff] %vm553_vm1, %v2911_v21  ;;  %v2912_v18 = vadd.f32 %v11276_v15, %v2880_v26  ;;  %v2813_v22 = vpop.f32.mrb[119].mxu1  ;;  %v3075_v45 = vpop.f32.mrb[151].mxu0 }
 0x2d0   : > { %v3167_v24 = vadd.f32 %v3135_v17, %v3056_v51  ;;  %v3138_v25 = vld [vmem:[#allocation3 + $0xe1] sm:$0xff]  ;;  %2941 = vst.msk [vmem:[#allocation3 + $0xf2] sm:$0xff] %vm553_vm1, %v2909_v13  ;;  %v2910_v28 = vadd.f32 %v2878_v23, %v2813_v22 }
 0x2d1   : > { %3201 = vst.msk [vmem:[#allocation3 + $0xd9] sm:$0xff] %vm553_vm1, %v3169_v16  ;;  %v3170_v56 = vadd.f32 %v11306_v14, %v3138_v25  ;;  %v3136_v31 = vld [vmem:[#allocation3 + $0xc9] sm:$0xff]  ;;  %2944 = vst.msk [vmem:[#allocation3 + $0x112] sm:$0xff] %vm553_vm1, %v2912_v18  ;;  %v2886_v21 = vld [vmem:[#allocation3 + $0x15a] sm:$0xff] }
 0x2d2   : > { %3199 = vst.msk [vmem:[#allocation3 + $0xc1] sm:$0xff] %vm553_vm1, %v3167_v24  ;;  %v3168_v32 = vadd.f32 %v3136_v31, %v3059_v63  ;;  %2942 = vst.msk [vmem:[#allocation3 + $0xfa] sm:$0xff] %vm553_vm1, %v2910_v28  ;;  %v3383_v16 = vld [vmem:[#allocation3 + $0x18] sm:$0xff]  ;;  %v3381_v22 = vld [vmem:[#allocation3] sm:$0xff] }
 0x2d3   : > { %3202 = vst.msk [vmem:[#allocation3 + $0xe1] sm:$0xff] %vm553_vm1, %v3170_v56  ;;  %v3384_v25 = vld [vmem:[#allocation3 + $0x20] sm:$0xff] }
 0x2d4   : > { %3200 = vst.msk [vmem:[#allocation3 + $0xc9] sm:$0xff] %vm553_vm1, %v3168_v32  ;;  %v11279_v33 = vpop.f32.mrb[120].mxu1  ;;  %v11313_v35 = vpop.f32.mrb[152].mxu0 }
 0x2d5   : > { %v2915_v36 = vadd.f32 %v11279_v33, %v2883_v34  ;;  %v2826_v37 = vpop.f32.mrb[121].mxu1  ;;  %v3088_v7 = vpop.f32.mrb[153].mxu0  ;;  %v3382_v33 = vld [vmem:[#allocation3 + $0x8] sm:$0xff] }
 0x2d6   : > { %v3141_v38 = vld [vmem:[#allocation3 + $0x109] sm:$0xff]  ;;  %v2913_v39 = vadd.f32 %v2881_v29, %v2826_v37  ;;  %v11280_v40 = vpop.f32.mrb[122].mxu1  ;;  %v11314_v41 = vpop.f32.mrb[154].mxu0 }
 0x2d7   : > { %v3173_v46 = vadd.f32 %v11309_v4, %v3141_v38  ;;  %v3139_v47 = vld [vmem:[#allocation3 + $0xf1] sm:$0xff]  ;;  %2947 = vst.msk [vmem:[#allocation3 + $0x13a] sm:$0xff] %vm553_vm1, %v2915_v36  ;;  %v2916_v48 = vadd.f32 %v11280_v40, %v2884_v42  ;;  %v2829_v44 = vpop.f32.mrb[123].mxu1  ;;  %v3091_v59 = vpop.f32.mrb[155].mxu0 }
 0x2d8   : > { %v3171_v50 = vadd.f32 %v3139_v47, %v3072_v11  ;;  %v3142_v51 = vld [vmem:[#allocation3 + $0x111] sm:$0xff]  ;;  %2945 = vst.msk [vmem:[#allocation3 + $0x122] sm:$0xff] %vm553_vm1, %v2913_v39  ;;  %v2914_v10 = vadd.f32 %v2882_v49, %v2829_v44  ;;  %v3387_v39 = vld [vmem:[#allocation3 + $0x48] sm:$0xff] }
 0x2d9   : > { %3205 = vst.msk [vmem:[#allocation3 + $0x109] sm:$0xff] %vm553_vm1, %v3173_v46  ;;  %v3174_v52 = vadd.f32 %v11310_v30, %v3142_v51  ;;  %v3140_v53 = vld [vmem:[#allocation3 + $0xf9] sm:$0xff]  ;;  %2948 = vst.msk [vmem:[#allocation3 + $0x142] sm:$0xff] %vm553_vm1, %v2916_v48  ;;  %v3388_v48 = vld [vmem:[#allocation3 + $0x50] sm:$0xff] }
 0x2da   : > { %3203 = vst.msk [vmem:[#allocation3 + $0xf1] sm:$0xff] %vm553_vm1, %v3171_v50  ;;  %v3172_v55 = vadd.f32 %v3140_v53, %v3075_v45  ;;  %2946 = vst.msk [vmem:[#allocation3 + $0x12a] sm:$0xff] %vm553_vm1, %v2914_v10  ;;  %v3391_v53 = vld [vmem:[#allocation3 + $0x78] sm:$0xff] }
 0x2db   : > { %3206 = vst.msk [vmem:[#allocation3 + $0x111] sm:$0xff] %vm553_vm1, %v3174_v52 }
 0x2dc   : > { %3204 = vst.msk [vmem:[#allocation3 + $0xf9] sm:$0xff] %vm553_vm1, %v3172_v55  ;;  %v11283_v14 = vpop.f32.mrb[124].mxu1  ;;  %v11317_v60 = vpop.f32.mrb[156].mxu0 }
 0x2dd   : > { %v2919_v61 = vadd.f32 %v11283_v14, %v2887_v57  ;;  %v2842_v62 = vpop.f32.mrb[125].mxu1  ;;  %v3104_v63 = vpop.f32.mrb[157].mxu0  ;;  %v3389_v57 = vld [vmem:[#allocation3 + $0x60] sm:$0xff] }
 0x2de   : > { %v3145_v43 = vld [vmem:[#allocation3 + $0x139] sm:$0xff]  ;;  %v2917_v20 = vadd.f32 %v2885_v27, %v2842_v62  ;;  %v11284_v0 = vpop.f32.mrb[126].mxu1  ;;  %v11318_v58 = vpop.f32.mrb[158].mxu0 }
 0x2df   : > { %v3177_v2 = vadd.f32 %v11313_v35, %v3145_v43  ;;  %v3143_v3 = vld [vmem:[#allocation3 + $0x121] sm:$0xff]  ;;  %2951 = vst.msk [vmem:[#allocation3 + $0x16a] sm:$0xff] %vm553_vm1, %v2919_v61  ;;  %v2920_v9 = vadd.f32 %v11284_v0, %v2888_v1  ;;  %v2845_v4 = vpop.f32.mrb[127].mxu1  ;;  %v3107_v5 = vpop.f32.mrb[159].mxu0 }
 0x2e0   : > { %v3175_v8 = vadd.f32 %v3143_v3, %v3088_v7  ;;  %v3146_v11 = vld [vmem:[#allocation3 + $0x141] sm:$0xff]  ;;  %2949 = vst.msk [vmem:[#allocation3 + $0x152] sm:$0xff] %vm553_vm1, %v2917_v20  ;;  %v2918_v12 = vadd.f32 %v2886_v21, %v2845_v4 }
 0x2e1   : > { %3209 = vst.msk [vmem:[#allocation3 + $0x139] sm:$0xff] %vm553_vm1, %v3177_v2  ;;  %v3178_v13 = vadd.f32 %v11314_v41, %v3146_v11  ;;  %v3144_v15 = vld [vmem:[#allocation3 + $0x129] sm:$0xff]  ;;  %2952 = vst.msk [vmem:[#allocation3 + $0x172] sm:$0xff] %vm553_vm1, %v2920_v9  ;;  %v3392_v62 = vld [vmem:[#allocation3 + $0x80] sm:$0xff] }
 0x2e2   : > { %3207 = vst.msk [vmem:[#allocation3 + $0x121] sm:$0xff] %vm553_vm1, %v3175_v8  ;;  %v3176_v26 = vadd.f32 %v3144_v15, %v3091_v59  ;;  %2950 = vst.msk [vmem:[#allocation3 + $0x15a] sm:$0xff] %vm553_vm1, %v2918_v12  ;;  %v3385_v41 = vld [vmem:[#allocation3 + $0x30] sm:$0xff]  ;;  %v3386_v59 = vld [vmem:[#allocation3 + $0x38] sm:$0xff] }
 0x2e3   : > { %3210 = vst.msk [vmem:[#allocation3 + $0x141] sm:$0xff] %vm553_vm1, %v3178_v13  ;;  %v3390_v43 = vld [vmem:[#allocation3 + $0x68] sm:$0xff]  ;;  %v3396_v12 = vld [vmem:[#allocation3 + $0xb0] sm:$0xff] }
 0x2e4   : > { %3208 = vst.msk [vmem:[#allocation3 + $0x129] sm:$0xff] %vm553_vm1, %v3176_v26  ;;  %v11323_v30 = vpop.f32.mrb[128].mxu1  ;;  %v3395_v9 = vld [vmem:[#allocation3 + $0xa8] sm:$0xff]  ;;  %v3394_v26 = vld [vmem:[#allocation3 + $0x98] sm:$0xff] }
 0x2e5   : > { %v3415_v17 = vadd.f32 %v11323_v30, %v3383_v16  ;;  %v3254_v18 = vpop.f32.mrb[129].mxu1 }
 0x2e6   : > { %v3149_v23 = vld [vmem:[#allocation3 + $0x169] sm:$0xff]  ;;  %v3413_v45 = vadd.f32 %v3381_v22, %v3254_v18  ;;  %v11324_v24 = vpop.f32.mrb[130].mxu1 }
 0x2e7   : > { %v3181_v28 = vadd.f32 %v11317_v60, %v3149_v23  ;;  %v3147_v56 = vld [vmem:[#allocation3 + $0x151] sm:$0xff]  ;;  %3447 = vst.msk [vmem:[#allocation3 + $0x18] sm:$0xff] %vm553_vm1, %v3415_v17  ;;  %v3416_v31 = vadd.f32 %v11324_v24, %v3384_v25  ;;  %v3257_v32 = vpop.f32.mrb[131].mxu1 }
 0x2e8   : > { %v3179_v34 = vadd.f32 %v3147_v56, %v3104_v63  ;;  %v3150_v35 = vld [vmem:[#allocation3 + $0x171] sm:$0xff]  ;;  %3445 = vst.msk [vmem:[#allocation3] sm:$0xff] %vm553_vm1, %v3413_v45  ;;  %v3414_v36 = vadd.f32 %v3382_v33, %v3257_v32  ;;  %v3400_v32 = vld [vmem:[#allocation3 + $0xe0] sm:$0xff] }
 0x2e9   : > { %3213 = vst.msk [vmem:[#allocation3 + $0x169] sm:$0xff] %vm553_vm1, %v3181_v28  ;;  %v3182_v37 = vadd.f32 %v11318_v58, %v3150_v35  ;;  %v3148_v29 = vld [vmem:[#allocation3 + $0x159] sm:$0xff]  ;;  %4096 = vst.msk [vmem:[#allocation3] sm:$0xff] %vm553_vm1, %v12172_v19  ;;  %v3398_v35 = vld [vmem:[#allocation3 + $0xc8] sm:$0xff] }
 0x2ea   : > { %3448 = vst.msk [vmem:[#allocation3 + $0x20] sm:$0xff] %vm553_vm1, %v3416_v31  ;;  %3211 = vst.msk [vmem:[#allocation3 + $0x151] sm:$0xff] %vm553_vm1, %v3179_v34  ;;  %v3180_v7 = vadd.f32 %v3148_v29, %v3107_v5  ;;  %v3393_v5 = vld [vmem:[#allocation3 + $0x90] sm:$0xff]  ;;  %v3399_v45 = vld [vmem:[#allocation3 + $0xd8] sm:$0xff] }
 0x2eb   : > { %3446 = vst.msk [vmem:[#allocation3 + $0x8] sm:$0xff] %vm553_vm1, %v3414_v36  ;;  %3214 = vst.msk [vmem:[#allocation3 + $0x171] sm:$0xff] %vm553_vm1, %v3182_v37  ;;  %v3397_v28 = vld [vmem:[#allocation3 + $0xc0] sm:$0xff] }
 0x2ec   : > { %4097 = vst.msk [vmem:[#allocation3 + $0x8] sm:$0xff] %vm553_vm1, %v12172_v19  ;;  %3212 = vst.msk [vmem:[#allocation3 + $0x159] sm:$0xff] %vm553_vm1, %v3180_v7  ;;  %v11327_v38 = vpop.f32.mrb[132].mxu1 }
 0x2ed   : > { %v3419_v40 = vadd.f32 %v11327_v38, %v3387_v39  ;;  %v3270_v42 = vpop.f32.mrb[133].mxu1 }
 0x2ee   : > { %v3417_v46 = vadd.f32 %v3385_v41, %v3270_v42  ;;  %v11328_v47 = vpop.f32.mrb[134].mxu1 }
 0x2ef   : > { %3451 = vst.msk [vmem:[#allocation3 + $0x48] sm:$0xff] %vm553_vm1, %v3419_v40  ;;  %v3420_v44 = vadd.f32 %v11328_v47, %v3388_v48  ;;  %v3273_v49 = vpop.f32.mrb[135].mxu1  ;;  %v3403_v40 = vld [vmem:[#allocation3 + $0x108] sm:$0xff] }
 0x2f0   : > { %3449 = vst.msk [vmem:[#allocation3 + $0x30] sm:$0xff] %vm553_vm1, %v3417_v46  ;;  %v3418_v10 = vadd.f32 %v3386_v59, %v3273_v49  ;;  %v3401_v46 = vld [vmem:[#allocation3 + $0xf0] sm:$0xff] }
 0x2f1   : > { %v3477_v50 = vld [vmem:[#allocation3 + $0x19] sm:$0xff]  ;;  %v3478_v51 = vld [vmem:[#allocation3 + $0x21] sm:$0xff]  ;;  %3452 = vst.msk [vmem:[#allocation3 + $0x50] sm:$0xff] %vm553_vm1, %v3420_v44  ;;  %v3404_v44 = vld [vmem:[#allocation3 + $0x110] sm:$0xff] }
 0x2f2   : > { %4100 = vst.msk [vmem:[#allocation3 + $0x20] sm:$0xff] %vm553_vm1, %v12172_v19  ;;  %4099 = vst.msk [vmem:[#allocation3 + $0x18] sm:$0xff] %vm553_vm1, %v12172_v19  ;;  %3541 = vrot.lane.b32.xlu0 %v3477_v50, %s12173_s19  ;;  %v3402_v50 = vld [vmem:[#allocation3 + $0xf8] sm:$0xff] }
 0x2f3   : > { %4101 = vst.msk [vmem:[#allocation3 + $0x28] sm:$0x3] %vm1015_vm4, %v12172_v19 }
 0x2f4   : > { %3450 = vst.msk [vmem:[#allocation3 + $0x38] sm:$0xff] %vm553_vm1, %v3418_v10  ;;  %v11331_v52 = vpop.f32.mrb[136].mxu1 }
 0x2f5   : > { %v3423_v55 = vadd.f32 %v11331_v52, %v3391_v53  ;;  %v3286_v14 = vpop.f32.mrb[137].mxu1 }
 0x2f6   : > { %3543 = vrot.lane.b32.xlu0 %v3478_v51, %s12173_s19  ;;  %v3421_v60 = vadd.f32 %v3389_v57, %v3286_v14  ;;  %v11332_v61 = vpop.f32.mrb[138].mxu1  ;;  %v3407_v57 = vld [vmem:[#allocation3 + $0x138] sm:$0xff] }
 0x2f7   : > { %3455 = vst.msk [vmem:[#allocation3 + $0x78] sm:$0xff] %vm553_vm1, %v3423_v55  ;;  %v3424_v27 = vadd.f32 %v11332_v61, %v3392_v62  ;;  %v3289_v63 = vpop.f32.mrb[139].mxu1  ;;  %v3405_v62 = vld [vmem:[#allocation3 + $0x120] sm:$0xff] }
 0x2f8   : > { %v3481_v20 = vld [vmem:[#allocation3 + $0x49] sm:$0xff]  ;;  %v3482_v0 = vld [vmem:[#allocation3 + $0x51] sm:$0xff]  ;;  %3453 = vst.msk [vmem:[#allocation3 + $0x60] sm:$0xff] %vm553_vm1, %v3421_v60  ;;  %v3422_v1 = vadd.f32 %v3390_v43, %v3289_v63  ;;  %v3408_v43 = vld [vmem:[#allocation3 + $0x140] sm:$0xff] }
 0x2f9   : > { %4106 = vst.msk [vmem:[#allocation3 + $0x50] sm:$0xff] %vm553_vm1, %v12172_v19  ;;  %4105 = vst.msk [vmem:[#allocation3 + $0x48] sm:$0xff] %vm553_vm1, %v12172_v19 }
 0x2fa   : > { %4107 = vst.msk [vmem:[#allocation3 + $0x58] sm:$0x3] %vm1015_vm4, %v12172_v19  ;;  %3549 = vrot.lane.b32.xlu0 %v3481_v20, %s12173_s19 }
 0x2fb   : > { %v3479_v58 = vld [vmem:[#allocation3 + $0x31] sm:$0xff]  ;;  %v3480_v2 = vld [vmem:[#allocation3 + $0x39] sm:$0xff]  ;;  %3456 = vst.msk [vmem:[#allocation3 + $0x80] sm:$0xff] %vm553_vm1, %v3424_v27  ;;  %3454 = vst.msk [vmem:[#allocation3 + $0x68] sm:$0xff] %vm553_vm1, %v3422_v1 }
 0x2fc   : > { %4103 = vst.msk [vmem:[#allocation3 + $0x38] sm:$0xff] %vm553_vm1, %v12172_v19  ;;  %4102 = vst.msk [vmem:[#allocation3 + $0x30] sm:$0xff] %vm553_vm1, %v12172_v19  ;;  %3545 = vrot.lane.b32.xlu1 %v3479_v58, %s12173_s19  ;;  %v11335_v3 = vpop.f32.mrb[140].mxu1  ;;  %v3406_v1 = vld [vmem:[#allocation3 + $0x128] sm:$0xff] }
 0x2fd   : > { %4104 = vst.msk [vmem:[#allocation3 + $0x40] sm:$0x3] %vm1015_vm4, %v12172_v19  ;;  %v3427_v4 = vadd.f32 %v11335_v3, %v3395_v9  ;;  %v3302_v21 = vpop.f32.mrb[141].mxu1 }
 0x2fe   : > { %v3425_v8 = vadd.f32 %v3393_v5, %v3302_v21  ;;  %v11336_v11 = vpop.f32.mrb[142].mxu1  ;;  %v3411_v5 = vld [vmem:[#allocation3 + $0x168] sm:$0xff] }
 0x2ff   : > { %3459 = vst.msk [vmem:[#allocation3 + $0xa8] sm:$0xff] %vm553_vm1, %v3427_v4  ;;  %v3428_v13 = vadd.f32 %v11336_v11, %v3396_v12  ;;  %v3305_v15 = vpop.f32.mrb[143].mxu1  ;;  %v3409_v12 = vld [vmem:[#allocation3 + $0x150] sm:$0xff] }
 0x300   : > { %3547 = vrot.lane.b32.xlu1 %v3480_v2, %s12173_s19  ;;  %3457 = vst.msk [vmem:[#allocation3 + $0x90] sm:$0xff] %vm553_vm1, %v3425_v8  ;;  %v3426_v17 = vadd.f32 %v3394_v26, %v3305_v15  ;;  %v3412_v26 = vld [vmem:[#allocation3 + $0x170] sm:$0xff] }
 0x301   : > { %3460 = vst.msk [vmem:[#allocation3 + $0xb0] sm:$0xff] %vm553_vm1, %v3428_v13 }
 0x302   : > { %v3485_v30 = vld [vmem:[#allocation3 + $0x79] sm:$0xff]  ;;  %v3486_v16 = vld [vmem:[#allocation3 + $0x81] sm:$0xff]  ;;  %v3484_v22 = vld [vmem:[#allocation3 + $0x69] sm:$0xff]  ;;  %3458 = vst.msk [vmem:[#allocation3 + $0x98] sm:$0xff] %vm553_vm1, %v3426_v17 }
 0x303   : > { %4112 = vst.msk [vmem:[#allocation3 + $0x80] sm:$0xff] %vm553_vm1, %v12172_v19  ;;  %4111 = vst.msk [vmem:[#allocation3 + $0x78] sm:$0xff] %vm553_vm1, %v12172_v19  ;;  %v3483_v18 = vld [vmem:[#allocation3 + $0x61] sm:$0xff]  ;;  %v3410_v17 = vld [vmem:[#allocation3 + $0x158] sm:$0xff] }
 0x304   : > { %4113 = vst.msk [vmem:[#allocation3 + $0x88] sm:$0x3] %vm1015_vm4, %v12172_v19  ;;  %4110 = vst.msk [vmem:[#allocation3 + $0x70] sm:$0x3] %vm1015_vm4, %v12172_v19  ;;  %3551 = vrot.lane.b32.xlu1 %v3482_v0, %s12173_s19  ;;  %3553 = vrot.lane.b32.xlu0 %v3483_v18, %s12173_s19  ;;  %v11339_v23 = vpop.f32.mrb[144].mxu1 }
 0x305   : > { %4109 = vst.msk [vmem:[#allocation3 + $0x68] sm:$0xff] %vm553_vm1, %v12172_v19  ;;  %4108 = vst.msk [vmem:[#allocation3 + $0x60] sm:$0xff] %vm553_vm1, %v12172_v19  ;;  %v3431_v24 = vadd.f32 %v11339_v23, %v3399_v45  ;;  %v3318_v25 = vpop.f32.mrb[145].mxu1 }
 0x306   : > { %v3429_v56 = vadd.f32 %v3397_v28, %v3318_v25  ;;  %v11340_v31 = vpop.f32.mrb[146].mxu1 }
 0x307   : > { %3463 = vst.msk [vmem:[#allocation3 + $0xd8] sm:$0xff] %vm553_vm1, %v3431_v24  ;;  %v3432_v33 = vadd.f32 %v11340_v31, %v3400_v32  ;;  %v3321_v34 = vpop.f32.mrb[147].mxu1  ;;  %v4150_v32 = vld [vmem:[%s15434_s10] sm:$0xf] }
 0x308   : > { %3555 = vrot.lane.b32.xlu1 %v3484_v22, %s12173_s19  ;;  %3557 = vrot.lane.b32.xlu0 %v3485_v30, %s12173_s19  ;;  %v3489_v36 = vld [vmem:[#allocation3 + $0xa9] sm:$0xff]  ;;  %v3490_v37 = vld [vmem:[#allocation3 + $0xb1] sm:$0xff]  ;;  %3461 = vst.msk [vmem:[#allocation3 + $0xc0] sm:$0xff] %vm553_vm1, %v3429_v56  ;;  %v3430_v29 = vadd.f32 %v3398_v35, %v3321_v34 }
 0x309   : > { %4118 = vst.msk [vmem:[#allocation3 + $0xb0] sm:$0xff] %vm553_vm1, %v12172_v19  ;;  %4117 = vst.msk [vmem:[#allocation3 + $0xa8] sm:$0xff] %vm553_vm1, %v12172_v19  ;;  %v3487_v7 = vld [vmem:[#allocation3 + $0x91] sm:$0xff]  ;;  %v3488_v38 = vld [vmem:[#allocation3 + $0x99] sm:$0xff]  ;;  %12044 = vmatprep.subr.msk.bf16.mxu1 %vm1118_vm2, %v4150_v32 }
 0x30a   : > { %4119 = vst.msk [vmem:[#allocation3 + $0xb8] sm:$0x3] %vm1015_vm4, %v12172_v19  ;;  %4116 = vst.msk [vmem:[#allocation3 + $0xa0] sm:$0x3] %vm1015_vm4, %v12172_v19 }
 0x30b   : > { %3464 = vst.msk [vmem:[#allocation3 + $0xe0] sm:$0xff] %vm553_vm1, %v3432_v33  ;;  %4115 = vst.msk [vmem:[#allocation3 + $0x98] sm:$0xff] %vm553_vm1, %v12172_v19  ;;  %v4200_v33 = vsel %vm1118_vm2, %v4150_v32, 0 }
 0x30c   : > { %4114 = vst.msk [vmem:[#allocation3 + $0x90] sm:$0xff] %vm553_vm1, %v12172_v19  ;;  %3462 = vst.msk [vmem:[#allocation3 + $0xc8] sm:$0xff] %vm553_vm1, %v3430_v29  ;;  %3559 = vrot.lane.b32.xlu1 %v3486_v16, %s12173_s19  ;;  %3561 = vrot.lane.b32.xlu0 %v3487_v7, %s12173_s19  ;;  %v11343_v39 = vpop.f32.mrb[148].mxu1  ;;  %v13461_v7 = vld [vmem:[%s15431_s7] ss:$0 sm:$0xff] }
 0x30d   : > { %v3435_v42 = vadd.f32 %v11343_v39, %v3403_v40  ;;  %v3334_v41 = vpop.f32.mrb[149].mxu1  ;;  %11388 = vmatpush3.bf16.msra.mxu1 %v4200_v33 }
 0x30e   : > { %v3433_v47 = vadd.f32 %v3401_v46, %v3334_v41  ;;  %v11344_v48 = vpop.f32.mrb[150].mxu1 }
 0x30f   : > { %3467 = vst.msk [vmem:[#allocation3 + $0x108] sm:$0xff] %vm553_vm1, %v3435_v42  ;;  %v3436_v49 = vadd.f32 %v11344_v48, %v3404_v44  ;;  %v3337_v59 = vpop.f32.mrb[151].mxu1 }
 0x310   : > { %3563 = vrot.lane.b32.xlu1 %v3488_v38, %s12173_s19  ;;  %3565 = vrot.lane.b32.xlu0 %v3489_v36, %s12173_s19  ;;  %3465 = vst.msk [vmem:[#allocation3 + $0xf0] sm:$0xff] %vm553_vm1, %v3433_v47  ;;  %v3434_v52 = vadd.f32 %v3402_v50, %v3337_v59 }
 0x311   : > { %3468 = vst.msk [vmem:[#allocation3 + $0x110] sm:$0xff] %vm553_vm1, %v3436_v49 }
 0x312   : > { %v3493_v51 = vld [vmem:[#allocation3 + $0xd9] sm:$0xff]  ;;  %v3494_v10 = vld [vmem:[#allocation3 + $0xe1] sm:$0xff]  ;;  %3466 = vst.msk [vmem:[#allocation3 + $0xf8] sm:$0xff] %vm553_vm1, %v3434_v52 }
 0x313   : > { %4124 = vst.msk [vmem:[#allocation3 + $0xe0] sm:$0xff] %vm553_vm1, %v12172_v19  ;;  %4123 = vst.msk [vmem:[#allocation3 + $0xd8] sm:$0xff] %vm553_vm1, %v12172_v19  ;;  %v3491_v53 = vld [vmem:[#allocation3 + $0xc1] sm:$0xff]  ;;  %v3492_v55 = vld [vmem:[#allocation3 + $0xc9] sm:$0xff] }
 0x314   : > { %4125 = vst.msk [vmem:[#allocation3 + $0xe8] sm:$0x3] %vm1015_vm4, %v12172_v19  ;;  %4122 = vst.msk [vmem:[#allocation3 + $0xd0] sm:$0x3] %vm1015_vm4, %v12172_v19  ;;  %3567 = vrot.lane.b32.xlu1 %v3490_v37, %s12173_s19  ;;  %3569 = vrot.lane.b32.xlu0 %v3491_v53, %s12173_s19  ;;  %v11347_v14 = vpop.f32.mrb[152].mxu1 }
 0x315   : > { %4121 = vst.msk [vmem:[#allocation3 + $0xc8] sm:$0xff] %vm553_vm1, %v12172_v19  ;;  %4120 = vst.msk [vmem:[#allocation3 + $0xc0] sm:$0xff] %vm553_vm1, %v12172_v19  ;;  %v3439_v60 = vadd.f32 %v11347_v14, %v3407_v57  ;;  %v3350_v61 = vpop.f32.mrb[153].mxu1 }
 0x316   : > { %v3437_v27 = vadd.f32 %v3405_v62, %v3350_v61  ;;  %v11348_v63 = vpop.f32.mrb[154].mxu1 }
 0x317   : > { %3471 = vst.msk [vmem:[#allocation3 + $0x138] sm:$0xff] %vm553_vm1, %v3439_v60  ;;  %v3440_v20 = vadd.f32 %v11348_v63, %v3408_v43  ;;  %v3353_v0 = vpop.f32.mrb[155].mxu1 }
 0x318   : > { %3571 = vrot.lane.b32.xlu1 %v3492_v55, %s12173_s19  ;;  %3573 = vrot.lane.b32.xlu0 %v3493_v51, %s12173_s19  ;;  %v3497_v58 = vld [vmem:[#allocation3 + $0x109] sm:$0xff]  ;;  %v3498_v2 = vld [vmem:[#allocation3 + $0x111] sm:$0xff]  ;;  %3469 = vst.msk [vmem:[#allocation3 + $0x120] sm:$0xff] %vm553_vm1, %v3437_v27  ;;  %v3438_v3 = vadd.f32 %v3406_v1, %v3353_v0 }
 0x319   : > { %4130 = vst.msk [vmem:[#allocation3 + $0x110] sm:$0xff] %vm553_vm1, %v12172_v19  ;;  %4129 = vst.msk [vmem:[#allocation3 + $0x108] sm:$0xff] %vm553_vm1, %v12172_v19  ;;  %v3495_v9 = vld [vmem:[#allocation3 + $0xf1] sm:$0xff]  ;;  %v3496_v4 = vld [vmem:[#allocation3 + $0xf9] sm:$0xff] }
 0x31a   : > { %4131 = vst.msk [vmem:[#allocation3 + $0x118] sm:$0x3] %vm1015_vm4, %v12172_v19  ;;  %4128 = vst.msk [vmem:[#allocation3 + $0x100] sm:$0x3] %vm1015_vm4, %v12172_v19 }
 0x31b   : > { %3472 = vst.msk [vmem:[#allocation3 + $0x140] sm:$0xff] %vm553_vm1, %v3440_v20  ;;  %4127 = vst.msk [vmem:[#allocation3 + $0xf8] sm:$0xff] %vm553_vm1, %v12172_v19 }
 0x31c   : > { %4126 = vst.msk [vmem:[#allocation3 + $0xf0] sm:$0xff] %vm553_vm1, %v12172_v19  ;;  %3470 = vst.msk [vmem:[#allocation3 + $0x128] sm:$0xff] %vm553_vm1, %v3438_v3  ;;  %3575 = vrot.lane.b32.xlu1 %v3494_v10, %s12173_s19  ;;  %3577 = vrot.lane.b32.xlu0 %v3495_v9, %s12173_s19  ;;  %v11351_v21 = vpop.f32.mrb[156].mxu1 }
 0x31d   : > { %v3443_v8 = vadd.f32 %v11351_v21, %v3411_v5  ;;  %v3366_v11 = vpop.f32.mrb[157].mxu1 }
 0x31e   : > { %v3441_v13 = vadd.f32 %v3409_v12, %v3366_v11  ;;  %v11352_v15 = vpop.f32.mrb[158].mxu1 }
 0x31f   : > { %3475 = vst.msk [vmem:[#allocation3 + $0x168] sm:$0xff] %vm553_vm1, %v3443_v8  ;;  %v3444_v30 = vadd.f32 %v11352_v15, %v3412_v26  ;;  %v3369_v16 = vpop.f32.mrb[159].mxu1 }
 0x320   : > { %3579 = vrot.lane.b32.xlu1 %v3496_v4, %s12173_s19  ;;  %3581 = vrot.lane.b32.xlu0 %v3497_v58, %s12173_s19  ;;  %3473 = vst.msk [vmem:[#allocation3 + $0x150] sm:$0xff] %vm553_vm1, %v3441_v13  ;;  %v3442_v23 = vadd.f32 %v3410_v17, %v3369_v16 }
 0x321   : > { %3476 = vst.msk [vmem:[#allocation3 + $0x170] sm:$0xff] %vm553_vm1, %v3444_v30 }
 0x322   : > { %v3501_v18 = vld [vmem:[#allocation3 + $0x139] sm:$0xff]  ;;  %v3502_v22 = vld [vmem:[#allocation3 + $0x141] sm:$0xff]  ;;  %3474 = vst.msk [vmem:[#allocation3 + $0x158] sm:$0xff] %vm553_vm1, %v3442_v23 }
 0x323   : > { %4136 = vst.msk [vmem:[#allocation3 + $0x140] sm:$0xff] %vm553_vm1, %v12172_v19  ;;  %4135 = vst.msk [vmem:[#allocation3 + $0x138] sm:$0xff] %vm553_vm1, %v12172_v19  ;;  %v3499_v45 = vld [vmem:[#allocation3 + $0x121] sm:$0xff]  ;;  %v3500_v24 = vld [vmem:[#allocation3 + $0x129] sm:$0xff] }
 0x324   : > { %4137 = vst.msk [vmem:[#allocation3 + $0x148] sm:$0x3] %vm1015_vm4, %v12172_v19  ;;  %4134 = vst.msk [vmem:[#allocation3 + $0x130] sm:$0x3] %vm1015_vm4, %v12172_v19  ;;  %3583 = vrot.lane.b32.xlu1 %v3498_v2, %s12173_s19  ;;  %3585 = vrot.lane.b32.xlu0 %v3499_v45, %s12173_s19 }
 0x325   : > { %4133 = vst.msk [vmem:[#allocation3 + $0x128] sm:$0xff] %vm553_vm1, %v12172_v19  ;;  %4132 = vst.msk [vmem:[#allocation3 + $0x120] sm:$0xff] %vm553_vm1, %v12172_v19 }
 0x328   : > { %3587 = vrot.lane.b32.xlu1 %v3500_v24, %s12173_s19  ;;  %3589 = vrot.lane.b32.xlu0 %v3501_v18, %s12173_s19  ;;  %v3505_v25 = vld [vmem:[#allocation3 + $0x169] sm:$0xff]  ;;  %v3506_v28 = vld [vmem:[#allocation3 + $0x171] sm:$0xff] }
 0x329   : > { %4142 = vst.msk [vmem:[#allocation3 + $0x170] sm:$0xff] %vm553_vm1, %v12172_v19  ;;  %4141 = vst.msk [vmem:[#allocation3 + $0x168] sm:$0xff] %vm553_vm1, %v12172_v19  ;;  %v3503_v56 = vld [vmem:[#allocation3 + $0x151] sm:$0xff]  ;;  %v3504_v31 = vld [vmem:[#allocation3 + $0x159] sm:$0xff] }
 0x32a   : > { %4143 = vst.msk [vmem:[#allocation3 + $0x178] sm:$0x3] %vm1015_vm4, %v12172_v19  ;;  %4140 = vst.msk [vmem:[#allocation3 + $0x160] sm:$0x3] %vm1015_vm4, %v12172_v19 }
 0x32b   : > { %4139 = vst.msk [vmem:[#allocation3 + $0x158] sm:$0xff] %vm553_vm1, %v12172_v19  ;;  %4138 = vst.msk [vmem:[#allocation3 + $0x150] sm:$0xff] %vm553_vm1, %v12172_v19 }
 0x32c   : > { %3591 = vrot.lane.b32.xlu1 %v3502_v22, %s12173_s19  ;;  %3593 = vrot.lane.b32.xlu0 %v3503_v56, %s12173_s19 }
 0x330   : > { %3595 = vrot.lane.b32.xlu1 %v3504_v31, %s12173_s19  ;;  %3597 = vrot.lane.b32.xlu0 %v3505_v25, %s12173_s19 }
 0x334   : > { %3599 = vrot.lane.b32.xlu1 %v3506_v28, %s12173_s19  ;;  %3601 = vrot.lane.b32.xlu0 %v13210_v54, %s12173_s19  ;;  %v13453_v54 = vld [vmem:[%s15430_s6] ss:$0 sm:$0xff] }
 0x338   : > { %3603 = vrot.lane.b32.xlu1 %v13212_v6, %s12173_s19  ;;  %s512_s19 = sand.u32 1, %s12162_s22  }
 0x339   : > { %s9979_s20 = sshll.u32 %s512_s19, 8  ;;  %s15382_s25 = scalar_lea.sflag [#allocation5], %s512_s19 }
 0x33a   : > { %s15275_s23 = scalar_lea.vmem [#allocation4], %s9979_s20  ;;  %s15372_s20 = scalar_lea.hbm %s15440_s16, %s10502_s28 }
 0x33b   : > { %s9913_s29 = sshll.u32 %s15275_s23, 4  ;;  %s12176_s28 = smov [#allocation4]   ;;  %s15374_s29 = int_to_ptr.vmem [resolvable:$true] %s9913_s29 }
 0x33c   : > { %s12112_s30 = sshll.u32 %s12176_s28, 4  ;;  %s12113_s30 = int_to_ptr.vmem [resolvable:$false] %s12112_s30 }
 0x33d   : > { %p12115_p0 = scmp.lt.s32.totalorder %s15374_s29, %s12113_s30 }
 0x364   : > { %v3542_v34 = vpop.permute.xlu0 %3541 }
 0x365   : > { %3638 = vst.msk [vmem:[#allocation2] sm:$0xff] %vm3637_vm5, %v3542_v34 }
 0x368   : > { %v3544_v35 = vpop.permute.xlu0 %3543 }
 0x369   : > { %3639 = vst.msk [vmem:[#allocation2 + $0x8] sm:$0xff] %vm3637_vm5, %v3544_v35 }
 0x36c   : > { %v3550_v6 = vpop.permute.xlu0 %3549  ;;  %v3670_v36 = vld [vmem:[#allocation2] sm:$0xff] }
 0x36d   : > { %3642 = vst.msk [vmem:[#allocation2 + $0x20] sm:$0xff] %vm3637_vm5, %v3550_v6  ;;  %v3709_v29 = vmul.f32 %v13453_v54, %v3670_v36 }
 0x36e   : > { %v3546_v37 = vpop.permute.xlu1 %3545 }
 0x36f   : > { %3640 = vst.msk [vmem:[#allocation2 + $0x10] sm:$0xff] %vm3637_vm5, %v3546_v37  ;;  %v3748_v42 = vadd.f32 %v13461_v7, %v3709_v29 }
 0x370   : > { %v3671_v38 = vld [vmem:[#allocation2 + $0x8] sm:$0xff] }
 0x371   : > { %v3710_v40 = vmul.f32 %v13453_v54, %v3671_v38  ;;  %v3780_v48 = vmax.f32 %v3748_v42, 0.0 }
 0x372   : > { %v3548_v39 = vpop.permute.xlu1 %3547 }
 0x373   : > { %3641 = vst.msk [vmem:[#allocation2 + $0x18] sm:$0xff] %vm3637_vm5, %v3548_v39  ;;  %v3749_v41 = vadd.f32 %v13461_v7, %v3710_v40 }
 0x374   : > { %v3674_v50 = vld [vmem:[#allocation2 + $0x20] sm:$0xff] }
 0x375   : > { %v3781_v44 = vmax.f32 %v3749_v41, 0.0  ;;  %v3713_v55 = vmul.f32 %v13453_v54, %v3674_v50 }
 0x376   : > { %v3552_v46 = vpop.permute.xlu1 %3551  ;;  %v3554_v47 = vpop.permute.xlu0 %3553  ;;  %v3672_v49 = vld [vmem:[#allocation2 + $0x10] sm:$0xff] }
 0x377   : > { %3643 = vst.msk [vmem:[#allocation2 + $0x28] sm:$0xff] %vm3637_vm5, %v3552_v46  ;;  %3644 = vst.msk [vmem:[#allocation2 + $0x30] sm:$0xff] %vm3637_vm5, %v3554_v47  ;;  %v3711_v59 = vmul.f32 %v13453_v54, %v3672_v49  ;;  %v3812_v51 = vpack.c.bf16 %v3781_v44, %v3780_v48  ;;  %v3752_v63 = vadd.f32 %v13461_v7, %v3713_v55 }
 0x379   : > { %11355 = vmatprep.mubr.msk.bf16.mxu0 %vm1069_vm3, %v3812_v51  ;;  %v3750_v57 = vadd.f32 %v13461_v7, %v3711_v59  ;;  %v3784_v11 = vmax.f32 %v3752_v63, 0.0 }
 0x37a   : > { %v3556_v10 = vpop.permute.xlu1 %3555  ;;  %v3558_v52 = vpop.permute.xlu0 %3557  ;;  %v3673_v53 = vld [vmem:[#allocation2 + $0x18] sm:$0xff] }
 0x37b   : > { %3645 = vst.msk [vmem:[#allocation2 + $0x38] sm:$0xff] %vm3637_vm5, %v3556_v10  ;;  %3646 = vst.msk [vmem:[#allocation2 + $0x40] sm:$0xff] %vm3637_vm5, %v3558_v52  ;;  %v3712_v14 = vmul.f32 %v13453_v54, %v3673_v53  ;;  %v3782_v20 = vmax.f32 %v3750_v57, 0.0 }
 0x37d   : > { %v3751_v60 = vadd.f32 %v13461_v7, %v3712_v14 }
 0x37e   : > { %v3560_v61 = vpop.permute.xlu1 %3559  ;;  %v3562_v62 = vpop.permute.xlu0 %3561  ;;  %v3675_v27 = vld [vmem:[#allocation2 + $0x28] sm:$0xff]  ;;  %v3676_v43 = vld [vmem:[#allocation2 + $0x30] sm:$0xff] }
 0x37f   : > { %3647 = vst.msk [vmem:[#allocation2 + $0x48] sm:$0xff] %vm3637_vm5, %v3560_v61  ;;  %3648 = vst.msk [vmem:[#allocation2 + $0x50] sm:$0xff] %vm3637_vm5, %v3562_v62  ;;  %v3783_v0 = vmax.f32 %v3751_v60, 0.0  ;;  %v3714_v1 = vmul.f32 %v13453_v54, %v3675_v27  ;;  %v3715_v58 = vmul.f32 %v13453_v54, %v3676_v43 }
 0x381   : > { %v3813_v2 = vpack.c.bf16 %v3783_v0, %v3782_v20  ;;  %v3753_v3 = vadd.f32 %v13461_v7, %v3714_v1  ;;  %v3754_v5 = vadd.f32 %v13461_v7, %v3715_v58 }
 0x382   : > { %v3564_v9 = vpop.permute.xlu1 %3563  ;;  %v3566_v4 = vpop.permute.xlu0 %3565  ;;  %v3677_v21 = vld [vmem:[#allocation2 + $0x38] sm:$0xff]  ;;  %v3678_v8 = vld [vmem:[#allocation2 + $0x40] sm:$0xff] }
 0x383   : > { %3649 = vst.msk [vmem:[#allocation2 + $0x58] sm:$0xff] %vm3637_vm5, %v3564_v9  ;;  %3650 = vst.msk [vmem:[#allocation2 + $0x60] sm:$0xff] %vm3637_vm5, %v3566_v4  ;;  %11356 = vmatmul.mubr.msk.bf16.vlgmr.msra.gmra.mrb[160].mxu0 %vm1069_vm3, %v3813_v2  ;;  %v3785_v12 = vmax.f32 %v3753_v3, 0.0  ;;  %v3716_v13 = vmul.f32 %v13453_v54, %v3677_v21  ;;  %v3717_v15 = vmul.f32 %v13453_v54, %v3678_v8  ;;  %v3786_v18 = vmax.f32 %v3754_v5, 0.0 }
 0x385   : > { %v3814_v26 = vpack.c.bf16 %v3785_v12, %v3784_v11  ;;  %v3755_v30 = vadd.f32 %v13461_v7, %v3716_v13  ;;  %v3756_v25 = vadd.f32 %v13461_v7, %v3717_v15 }
 0x386   : > { %v3568_v16 = vpop.permute.xlu1 %3567  ;;  %v3570_v17 = vpop.permute.xlu0 %3569  ;;  %v3679_v22 = vld [vmem:[#allocation2 + $0x48] sm:$0xff]  ;;  %v3680_v23 = vld [vmem:[#allocation2 + $0x50] sm:$0xff] }
 0x387   : > { %3651 = vst.msk [vmem:[#allocation2 + $0x68] sm:$0xff] %vm3637_vm5, %v3568_v16  ;;  %3652 = vst.msk [vmem:[#allocation2 + $0x70] sm:$0xff] %vm3637_vm5, %v3570_v17  ;;  %11359 = vmatprep.mubr.msk.bf16.mxu0 %vm1069_vm3, %v3814_v26  ;;  %v3787_v45 = vmax.f32 %v3755_v30, 0.0  ;;  %v3718_v24 = vmul.f32 %v13453_v54, %v3679_v22  ;;  %v3719_v28 = vmul.f32 %v13453_v54, %v3680_v23  ;;  %v3788_v36 = vmax.f32 %v3756_v25, 0.0 }
 0x389   : > { %v3815_v56 = vpack.c.bf16 %v3787_v45, %v3786_v18  ;;  %v3757_v31 = vadd.f32 %v13461_v7, %v3718_v24  ;;  %v3758_v35 = vadd.f32 %v13461_v7, %v3719_v28 }
 0x38a   : > { %v3572_v32 = vpop.permute.xlu1 %3571  ;;  %v3574_v33 = vpop.permute.xlu0 %3573  ;;  %v3681_v34 = vld [vmem:[#allocation2 + $0x58] sm:$0xff]  ;;  %v3682_v6 = vld [vmem:[#allocation2 + $0x60] sm:$0xff] }
 0x38b   : > { %3653 = vst.msk [vmem:[#allocation2 + $0x78] sm:$0xff] %vm3637_vm5, %v3572_v32  ;;  %3654 = vst.msk [vmem:[#allocation2 + $0x80] sm:$0xff] %vm3637_vm5, %v3574_v33  ;;  %11360 = vmatmul.mubr.msk.bf16.gmra.mrb[164].mxu0 %vm1069_vm3, %v3815_v56  ;;  %v3789_v37 = vmax.f32 %v3757_v31, 0.0  ;;  %v3720_v29 = vmul.f32 %v13453_v54, %v3681_v34  ;;  %v3721_v38 = vmul.f32 %v13453_v54, %v3682_v6  ;;  %v3790_v46 = vmax.f32 %v3758_v35, 0.0 }
 0x38d   : > { %v3816_v39 = vpack.c.bf16 %v3789_v37, %v3788_v36  ;;  %v3759_v40 = vadd.f32 %v13461_v7, %v3720_v29  ;;  %v3760_v59 = vadd.f32 %v13461_v7, %v3721_v38 }
 0x38e   : > { %v3576_v42 = vpop.permute.xlu1 %3575  ;;  %v3578_v41 = vpop.permute.xlu0 %3577  ;;  %v3683_v47 = vld [vmem:[#allocation2 + $0x68] sm:$0xff]  ;;  %v3684_v48 = vld [vmem:[#allocation2 + $0x70] sm:$0xff] }
 0x38f   : > { %3655 = vst.msk [vmem:[#allocation2 + $0x88] sm:$0xff] %vm3637_vm5, %v3576_v42  ;;  %3656 = vst.msk [vmem:[#allocation2 + $0x90] sm:$0xff] %vm3637_vm5, %v3578_v41  ;;  %11363 = vmatprep.mubr.msk.bf16.mxu0 %vm1069_vm3, %v3816_v39  ;;  %v3791_v44 = vmax.f32 %v3759_v40, 0.0  ;;  %v3722_v49 = vmul.f32 %v13453_v54, %v3683_v47  ;;  %v3723_v50 = vmul.f32 %v13453_v54, %v3684_v48  ;;  %v3792_v60 = vmax.f32 %v3760_v59, 0.0 }
 0x391   : > { %v3817_v51 = vpack.c.bf16 %v3791_v44, %v3790_v46  ;;  %v3761_v10 = vadd.f32 %v13461_v7, %v3722_v49  ;;  %v3762_v14 = vadd.f32 %v13461_v7, %v3723_v50 }
 0x392   : > { %v3580_v52 = vpop.permute.xlu1 %3579  ;;  %v3582_v53 = vpop.permute.xlu0 %3581  ;;  %v3685_v55 = vld [vmem:[#allocation2 + $0x78] sm:$0xff]  ;;  %v3686_v57 = vld [vmem:[#allocation2 + $0x80] sm:$0xff] }
 0x393   : > { %3657 = vst.msk [vmem:[#allocation2 + $0x98] sm:$0xff] %vm3637_vm5, %v3580_v52  ;;  %3658 = vst.msk [vmem:[#allocation2 + $0xa0] sm:$0xff] %vm3637_vm5, %v3582_v53  ;;  %11364 = vmatmul.mubr.msk.bf16.gmra.mrb[168].mxu0 %vm1069_vm3, %v3817_v51  ;;  %v3793_v61 = vmax.f32 %v3761_v10, 0.0  ;;  %v3724_v62 = vmul.f32 %v13453_v54, %v3685_v55  ;;  %v3725_v27 = vmul.f32 %v13453_v54, %v3686_v57  ;;  %v3794_v1 = vmax.f32 %v3762_v14, 0.0 }
 0x395   : > { %v3818_v63 = vpack.c.bf16 %v3793_v61, %v3792_v60  ;;  %v3763_v43 = vadd.f32 %v13461_v7, %v3724_v62  ;;  %v3764_v4 = vadd.f32 %v13461_v7, %v3725_v27 }
 0x396   : > { %v3584_v20 = vpop.permute.xlu1 %3583  ;;  %v3586_v0 = vpop.permute.xlu0 %3585  ;;  %v3687_v58 = vld [vmem:[#allocation2 + $0x88] sm:$0xff]  ;;  %v3688_v2 = vld [vmem:[#allocation2 + $0x90] sm:$0xff] }
 0x397   : > { %3659 = vst.msk [vmem:[#allocation2 + $0xa8] sm:$0xff] %vm3637_vm5, %v3584_v20  ;;  %3660 = vst.msk [vmem:[#allocation2 + $0xb0] sm:$0xff] %vm3637_vm5, %v3586_v0  ;;  %11367 = vmatprep.mubr.msk.bf16.mxu0 %vm1069_vm3, %v3818_v63  ;;  %v3795_v3 = vmax.f32 %v3763_v43, 0.0  ;;  %v3726_v9 = vmul.f32 %v13453_v54, %v3687_v58  ;;  %v3727_v21 = vmul.f32 %v13453_v54, %v3688_v2  ;;  %v3796_v30 = vmax.f32 %v3764_v4, 0.0 }
 0x399   : > { %v3819_v5 = vpack.c.bf16 %v3795_v3, %v3794_v1  ;;  %v3765_v8 = vadd.f32 %v13461_v7, %v3726_v9  ;;  %v3766_v15 = vadd.f32 %v13461_v7, %v3727_v21 }
 0x39a   : > { %v3588_v11 = vpop.permute.xlu1 %3587  ;;  %v3590_v12 = vpop.permute.xlu0 %3589  ;;  %v3689_v13 = vld [vmem:[#allocation2 + $0x98] sm:$0xff]  ;;  %v3690_v26 = vld [vmem:[#allocation2 + $0xa0] sm:$0xff] }
 0x39b   : > { %3661 = vst.msk [vmem:[#allocation2 + $0xb8] sm:$0xff] %vm3637_vm5, %v3588_v11  ;;  %3662 = vst.msk [vmem:[#allocation2 + $0xc0] sm:$0xff] %vm3637_vm5, %v3590_v12  ;;  %11368 = vmatmul.mubr.msk.bf16.gmra.mrb[172].mxu0 %vm1069_vm3, %v3819_v5  ;;  %v3797_v16 = vmax.f32 %v3765_v8, 0.0  ;;  %v3728_v17 = vmul.f32 %v13453_v54, %v3689_v13  ;;  %v3729_v18 = vmul.f32 %v13453_v54, %v3690_v26  ;;  %v3798_v25 = vmax.f32 %v3766_v15, 0.0 }
 0x39d   : > { %v3820_v22 = vpack.c.bf16 %v3797_v16, %v3796_v30  ;;  %v3767_v23 = vadd.f32 %v13461_v7, %v3728_v17  ;;  %v3768_v33 = vadd.f32 %v13461_v7, %v3729_v18 }
 0x39e   : > { %v3592_v45 = vpop.permute.xlu1 %3591  ;;  %v3594_v24 = vpop.permute.xlu0 %3593  ;;  %v3691_v28 = vld [vmem:[#allocation2 + $0xa8] sm:$0xff]  ;;  %v3692_v56 = vld [vmem:[#allocation2 + $0xb0] sm:$0xff] }
 0x39f   : > { %3663 = vst.msk [vmem:[#allocation2 + $0xc8] sm:$0xff] %vm3637_vm5, %v3592_v45  ;;  %3664 = vst.msk [vmem:[#allocation2 + $0xd0] sm:$0xff] %vm3637_vm5, %v3594_v24  ;;  %11371 = vmatprep.mubr.msk.bf16.mxu0 %vm1069_vm3, %v3820_v22  ;;  %v3799_v31 = vmax.f32 %v3767_v23, 0.0  ;;  %v3730_v32 = vmul.f32 %v13453_v54, %v3691_v28  ;;  %v3731_v34 = vmul.f32 %v13453_v54, %v3692_v56  ;;  %v3800_v40 = vmax.f32 %v3768_v33, 0.0  ;;  %v10188_v24 = vld [vmem:[%s15434_s10 + $0x4] sm:$0xf] }
 0x3a0   : > { %12045 = vmatprep.subr.msk.bf16.mxu0 %vm1118_vm2, %v10188_v24  ;;  %v13586_v28 = vld [vmem:[%s15433_s9] ss:$0 sm:$0xff] }
 0x3a1   : > { %v3821_v35 = vpack.c.bf16 %v3799_v31, %v3798_v25  ;;  %v3769_v6 = vadd.f32 %v13461_v7, %v3730_v32  ;;  %v3770_v38 = vadd.f32 %v13461_v7, %v3731_v34  ;;  %v10222_v25 = vld [vmem:[%s15434_s10 + $0xc] sm:$0xf] }
 0x3a2   : > { %v3596_v36 = vpop.permute.xlu1 %3595  ;;  %v3598_v37 = vpop.permute.xlu0 %3597  ;;  %v3693_v29 = vld [vmem:[#allocation2 + $0xb8] sm:$0xff]  ;;  %v3694_v39 = vld [vmem:[#allocation2 + $0xc0] sm:$0xff] }
 0x3a3   : > { %3665 = vst.msk [vmem:[#allocation2 + $0xd8] sm:$0xff] %vm3637_vm5, %v3596_v36  ;;  %3666 = vst.msk [vmem:[#allocation2 + $0xe0] sm:$0xff] %vm3637_vm5, %v3598_v37  ;;  %11372 = vmatmul.mubr.msk.bf16.gmra.mrb[176].mxu0 %vm1069_vm3, %v3821_v35  ;;  %v3801_v42 = vmax.f32 %v3769_v6, 0.0  ;;  %v3732_v41 = vmul.f32 %v13453_v54, %v3693_v29  ;;  %v3733_v46 = vmul.f32 %v13453_v54, %v3694_v39  ;;  %v3802_v59 = vmax.f32 %v3770_v38, 0.0 }
 0x3a5   : > { %v3822_v47 = vpack.c.bf16 %v3801_v42, %v3800_v40  ;;  %v3771_v48 = vadd.f32 %v13461_v7, %v3732_v41  ;;  %v3772_v53 = vadd.f32 %v13461_v7, %v3733_v46 }
 0x3a6   : > { %v3600_v44 = vpop.permute.xlu1 %3599  ;;  %v3602_v49 = vpop.permute.xlu0 %3601  ;;  %v3695_v50 = vld [vmem:[#allocation2 + $0xc8] sm:$0xff]  ;;  %v3696_v51 = vld [vmem:[#allocation2 + $0xd0] sm:$0xff] }
 0x3a7   : > { %3667 = vst.msk [vmem:[#allocation2 + $0xe8] sm:$0xff] %vm3637_vm5, %v3600_v44  ;;  %3668 = vst.msk [vmem:[#allocation2 + $0xf0] sm:$0xff] %vm3637_vm5, %v3602_v49  ;;  %11375 = vmatprep.mubr.msk.bf16.mxu0 %vm1069_vm3, %v3822_v47  ;;  %v3803_v10 = vmax.f32 %v3771_v48, 0.0  ;;  %v3734_v52 = vmul.f32 %v13453_v54, %v3695_v50  ;;  %v3735_v55 = vmul.f32 %v13453_v54, %v3696_v51  ;;  %v3804_v63 = vmax.f32 %v3772_v53, 0.0  ;;  %v13607_v50 = vld [vmem:[%s15434_s10 + $0x10] sm:$0xf] }
 0x3a8   : > { %v4986_v44 = vsel %vm1118_vm2, %v10222_v25, 0  ;;  %v13612_v51 = vld [vmem:[%s15434_s10 + $0x14] sm:$0xf] }
 0x3a9   : > { %v3823_v14 = vpack.c.bf16 %v3803_v10, %v3802_v59  ;;  %v3773_v57 = vadd.f32 %v13461_v7, %v3734_v52  ;;  %v3774_v62 = vadd.f32 %v13461_v7, %v3735_v55 }
 0x3aa   : > { %v3604_v60 = vpop.permute.xlu1 %3603  ;;  %v3697_v61 = vld [vmem:[#allocation2 + $0xd8] sm:$0xff]  ;;  %v3698_v27 = vld [vmem:[#allocation2 + $0xe0] sm:$0xff] }
 0x3ab   : > { %3669 = vst.msk [vmem:[#allocation2 + $0xf8] sm:$0xff] %vm3637_vm5, %v3604_v60  ;;  %11376 = vmatmul.mubr.msk.bf16.gmra.mrb[180].mxu0 %vm1069_vm3, %v3823_v14  ;;  %v3805_v43 = vmax.f32 %v3773_v57, 0.0  ;;  %v3736_v20 = vmul.f32 %v13453_v54, %v3697_v61  ;;  %v3737_v0 = vmul.f32 %v13453_v54, %v3698_v27  ;;  %v3806_v2 = vmax.f32 %v3774_v62, 0.0 }
 0x3ad   : > { %v3824_v1 = vpack.c.bf16 %v3805_v43, %v3804_v63  ;;  %v3775_v58 = vadd.f32 %v13461_v7, %v3736_v20  ;;  %v3776_v5 = vadd.f32 %v13461_v7, %v3737_v0 }
 0x3ae   : > { %v3699_v3 = vld [vmem:[#allocation2 + $0xe8] sm:$0xff]  ;;  %v3700_v9 = vld [vmem:[#allocation2 + $0xf0] sm:$0xff] }
 0x3af   : > { %11379 = vmatprep.mubr.msk.bf16.mxu0 %vm1069_vm3, %v3824_v1  ;;  %v3807_v4 = vmax.f32 %v3775_v58, 0.0  ;;  %v3738_v21 = vmul.f32 %v13453_v54, %v3699_v3  ;;  %v3739_v8 = vmul.f32 %v13453_v54, %v3700_v9  ;;  %v3808_v15 = vmax.f32 %v3776_v5, 0.0 }
 0x3b1   : > { %v3825_v11 = vpack.c.bf16 %v3807_v4, %v3806_v2  ;;  %v3777_v12 = vadd.f32 %v13461_v7, %v3738_v21  ;;  %v3778_v16 = vadd.f32 %v13461_v7, %v3739_v8 }
 0x3b2   : > { %v3701_v13 = vld [vmem:[#allocation2 + $0xf8] sm:$0xff] }
 0x3b3   : > { %11380 = vmatmul.mubr.msk.bf16.gmra.mrb[184].mxu0 %vm1069_vm3, %v3825_v11  ;;  %v3809_v26 = vmax.f32 %v3777_v12, 0.0  ;;  %v3740_v30 = vmul.f32 %v13453_v54, %v3701_v13  ;;  %v3810_v22 = vmax.f32 %v3778_v16, 0.0  ;;  %v4462_v54 = vsel %vm1118_vm2, %v10188_v24, 0 }
 0x3b4   : > { %11422 = vmatpush3.bf16.msra.mxu0 %v4462_v54 }
 0x3b5   : > { %v3826_v17 = vpack.c.bf16 %v3809_v26, %v3808_v15  ;;  %v3779_v18 = vadd.f32 %v13461_v7, %v3740_v30  ;;  %v10205_v7 = vld [vmem:[%s15434_s10 + $0x8] sm:$0xf]  ;;  %12047 = vmatprep.subr.msk.bf16.mxu0 %vm1118_vm2, %v10222_v25 }
 0x3b6   : > { %12046 = vmatprep.subr.msk.bf16.mxu1 %vm1118_vm2, %v10205_v7  ;;  %v4724_v48 = vsel %vm1118_vm2, %v10205_v7, 0 }
 0x3b7   : > { %11383 = vmatprep.mubr.msk.bf16.mxu0 %vm1069_vm3, %v3826_v17  ;;  %v3811_v23 = vmax.f32 %v3779_v18, 0.0 }
 0x3b9   : > { %v3827_v45 = vpack.c.bf16 %v3811_v23, %v3810_v22 }
 0x3bb   : > { %11384 = vmatmul.mubr.msk.bf16.gmra.mrb[188].mxu0 %vm1069_vm3, %v3827_v45 }
 0x456   : > { %v11357_v56 = vpop.f32.mrb[160].mxu0 }
 0x457   : > { %v3930_v31 = vadd.f32 %v11357_v56, %v13586_v28  ;;  %v3921_v32 = vpop.f32.mrb[161].mxu0 }
 0x458   : > { %v3922_v33 = vadd.f32 %v13586_v28, %v3921_v32  ;;  %v11358_v34 = vpop.f32.mrb[162].mxu0 }
 0x459   : > { %v3933_v35 = vadd.f32 %v11358_v34, %v13586_v28  ;;  %v3924_v6 = vpop.f32.mrb[163].mxu0  ;;  %v4050_v37 = vmax.f32 %v3930_v31, 0.0 }
 0x45a   : > { %v3925_v36 = vadd.f32 %v13586_v28, %v3924_v6  ;;  %v4048_v38 = vmax.f32 %v3922_v33, 0.0 }
 0x45b   : > { %v4051_v29 = vmax.f32 %v3933_v35, 0.0 }
 0x45c   : > { %v4049_v39 = vmax.f32 %v3925_v36, 0.0 }
 0x45d   : > { %v13592_v40 = vpack.c.bf16 %v4051_v29, %v4050_v37 }
 0x45e   : > { %v13594_v42 = vpack.c.bf16 %v4049_v39, %v4048_v38  ;;  %v11361_v41 = vpop.f32.mrb[164].mxu0 }
 0x45f   : > { %v3946_v46 = vadd.f32 %v11361_v41, %v13586_v28  ;;  %v3937_v47 = vpop.f32.mrb[165].mxu0 }
 0x460   : > { %v3938_v49 = vadd.f32 %v13586_v28, %v3937_v47  ;;  %v11362_v59 = vpop.f32.mrb[166].mxu0  ;;  %11389 = vmatprep.mubr.msk.bf16.mxu1 %vm1069_vm3, %v13594_v42  ;;  %11423 = vmatprep.mubr.msk.bf16.mxu0 %vm1069_vm3, %v13594_v42 }
 0x461   : > { %v3949_v10 = vadd.f32 %v11362_v59, %v13586_v28  ;;  %v3940_v52 = vpop.f32.mrb[167].mxu0  ;;  %11390 = vmatmul.mubr.msk.bf16.vlgmr.msra.gmra.mrb[160].mxu1 %vm1069_vm3, %v13592_v40  ;;  %11424 = vmatmul.mubr.msk.bf16.vlgmr.msra.gmra.mrb[192].mxu0 %vm1069_vm3, %v13592_v40  ;;  %v4054_v55 = vmax.f32 %v3946_v46, 0.0 }
 0x462   : > { %v3941_v53 = vadd.f32 %v13586_v28, %v3940_v52  ;;  %11456 = vmatpush3.bf16.msra.mxu1 %v4724_v48  ;;  %11490 = vmatpush3.bf16.msra.mxu0 %v4986_v44  ;;  %v4052_v57 = vmax.f32 %v3938_v49, 0.0 }
 0x463   : > { %v4055_v14 = vmax.f32 %v3949_v10, 0.0  ;;  %12048 = vmatprep.subr.msk.bf16.mxu1 %vm1118_vm2, %v13607_v50  ;;  %12049 = vmatprep.subr.msk.bf16.mxu0 %vm1118_vm2, %v13612_v51 }
 0x464   : > { %v4053_v60 = vmax.f32 %v3941_v53, 0.0 }
 0x465   : > { %v13624_v61 = vpack.c.bf16 %v4055_v14, %v4054_v55 }
 0x466   : > { %v13626_v62 = vpack.c.bf16 %v4053_v60, %v4052_v57  ;;  %v11365_v27 = vpop.f32.mrb[168].mxu0 }
 0x467   : > { %v3962_v63 = vadd.f32 %v11365_v27, %v13586_v28  ;;  %v3953_v43 = vpop.f32.mrb[169].mxu0 }
 0x468   : > { %v3954_v20 = vadd.f32 %v13586_v28, %v3953_v43  ;;  %v11366_v0 = vpop.f32.mrb[170].mxu0  ;;  %11393 = vmatprep.mubr.msk.bf16.mxu1 %vm1069_vm3, %v13626_v62  ;;  %11427 = vmatprep.mubr.msk.bf16.mxu0 %vm1069_vm3, %v13626_v62 }
 0x469   : > { %v3965_v1 = vadd.f32 %v11366_v0, %v13586_v28  ;;  %v3956_v58 = vpop.f32.mrb[171].mxu0  ;;  %11394 = vmatmul.mubr.msk.bf16.gmra.mrb[164].mxu1 %vm1069_vm3, %v13624_v61  ;;  %11428 = vmatmul.mubr.msk.bf16.gmra.mrb[196].mxu0 %vm1069_vm3, %v13624_v61  ;;  %v4058_v3 = vmax.f32 %v3962_v63, 0.0 }
 0x46a   : > { %v3957_v2 = vadd.f32 %v13586_v28, %v3956_v58  ;;  %v4056_v4 = vmax.f32 %v3954_v20, 0.0 }
 0x46b   : > { %v4059_v9 = vmax.f32 %v3965_v1, 0.0 }
 0x46c   : > { %v4057_v21 = vmax.f32 %v3957_v2, 0.0 }
 0x46d   : > { %v13640_v5 = vpack.c.bf16 %v4059_v9, %v4058_v3 }
 0x46e   : > { %v13642_v8 = vpack.c.bf16 %v4057_v21, %v4056_v4  ;;  %v11369_v11 = vpop.f32.mrb[172].mxu0 }
 0x46f   : > { %v3978_v12 = vadd.f32 %v11369_v11, %v13586_v28  ;;  %v3969_v13 = vpop.f32.mrb[173].mxu0 }
 0x470   : > { %v3970_v15 = vadd.f32 %v13586_v28, %v3969_v13  ;;  %v11370_v26 = vpop.f32.mrb[174].mxu0  ;;  %11397 = vmatprep.mubr.msk.bf16.mxu1 %vm1069_vm3, %v13642_v8  ;;  %11431 = vmatprep.mubr.msk.bf16.mxu0 %vm1069_vm3, %v13642_v8 }
 0x471   : > { %v3981_v30 = vadd.f32 %v11370_v26, %v13586_v28  ;;  %v3972_v16 = vpop.f32.mrb[175].mxu0  ;;  %11398 = vmatmul.mubr.msk.bf16.gmra.mrb[168].mxu1 %vm1069_vm3, %v13640_v5  ;;  %11432 = vmatmul.mubr.msk.bf16.gmra.mrb[200].mxu0 %vm1069_vm3, %v13640_v5  ;;  %v4062_v18 = vmax.f32 %v3978_v12, 0.0 }
 0x472   : > { %v3973_v17 = vadd.f32 %v13586_v28, %v3972_v16  ;;  %v4060_v23 = vmax.f32 %v3970_v15, 0.0 }
 0x473   : > { %v4063_v22 = vmax.f32 %v3981_v30, 0.0 }
 0x474   : > { %v4061_v45 = vmax.f32 %v3973_v17, 0.0 }
 0x475   : > { %v13656_v24 = vpack.c.bf16 %v4063_v22, %v4062_v18 }
 0x476   : > { %v13658_v54 = vpack.c.bf16 %v4061_v45, %v4060_v23  ;;  %v11373_v7 = vpop.f32.mrb[176].mxu0 }
 0x477   : > { %v3994_v25 = vadd.f32 %v11373_v7, %v13586_v28  ;;  %v3985_v56 = vpop.f32.mrb[177].mxu0 }
 0x478   : > { %v3986_v31 = vadd.f32 %v13586_v28, %v3985_v56  ;;  %v11374_v32 = vpop.f32.mrb[178].mxu0  ;;  %11401 = vmatprep.mubr.msk.bf16.mxu1 %vm1069_vm3, %v13658_v54  ;;  %11435 = vmatprep.mubr.msk.bf16.mxu0 %vm1069_vm3, %v13658_v54 }
 0x479   : > { %v3997_v33 = vadd.f32 %v11374_v32, %v13586_v28  ;;  %v3988_v34 = vpop.f32.mrb[179].mxu0  ;;  %11402 = vmatmul.mubr.msk.bf16.gmra.mrb[172].mxu1 %vm1069_vm3, %v13656_v24  ;;  %11436 = vmatmul.mubr.msk.bf16.gmra.mrb[204].mxu0 %vm1069_vm3, %v13656_v24  ;;  %v4066_v6 = vmax.f32 %v3994_v25, 0.0  ;;  %v5510_v32 = vsel %vm1118_vm2, %v13612_v51, 0 }
 0x47a   : > { %v3989_v35 = vadd.f32 %v13586_v28, %v3988_v34  ;;  %v4064_v37 = vmax.f32 %v3986_v31, 0.0  ;;  %v10290_v34 = vld [vmem:[%s15434_s10 + $0x1c] sm:$0xf] }
 0x47b   : > { %v4067_v36 = vmax.f32 %v3997_v33, 0.0  ;;  %v10273_v33 = vld [vmem:[%s15434_s10 + $0x18] sm:$0xf]  ;;  %v6034_v51 = vsel %vm1118_vm2, %v10290_v34, 0 }
 0x47c   : > { %v4065_v29 = vmax.f32 %v3989_v35, 0.0  ;;  %v10307_v35 = vld [vmem:[%s15434_s10 + $0x20] sm:$0xf] }
 0x47d   : > { %v13672_v38 = vpack.c.bf16 %v4067_v36, %v4066_v6  ;;  %v6296_v6 = vsel %vm1118_vm2, %v10307_v35, 0  ;;  %v4365_v36 = vld [vmem:[#allocation3 + $0x4a] sm:$0xff] }
 0x47e   : > { %v13674_v39 = vpack.c.bf16 %v4065_v29, %v4064_v37  ;;  %v11377_v41 = vpop.f32.mrb[180].mxu0  ;;  %v4363_v37 = vld [vmem:[#allocation3 + $0x32] sm:$0xff] }
 0x47f   : > { %v4010_v46 = vadd.f32 %v11377_v41, %v13586_v28  ;;  %v4001_v47 = vpop.f32.mrb[181].mxu0 }
 0x480   : > { %v4002_v48 = vadd.f32 %v13586_v28, %v4001_v47  ;;  %v11378_v44 = vpop.f32.mrb[182].mxu0  ;;  %11405 = vmatprep.mubr.msk.bf16.mxu1 %vm1069_vm3, %v13674_v39  ;;  %11439 = vmatprep.mubr.msk.bf16.mxu0 %vm1069_vm3, %v13674_v39 }
 0x481   : > { %v4013_v49 = vadd.f32 %v11378_v44, %v13586_v28  ;;  %v4004_v59 = vpop.f32.mrb[183].mxu0  ;;  %11406 = vmatmul.mubr.msk.bf16.gmra.mrb[176].mxu1 %vm1069_vm3, %v13672_v38  ;;  %11440 = vmatmul.mubr.msk.bf16.gmra.mrb[208].mxu0 %vm1069_vm3, %v13672_v38  ;;  %v4070_v52 = vmax.f32 %v4010_v46, 0.0  ;;  %v4366_v46 = vld [vmem:[#allocation3 + $0x52] sm:$0xff] }
 0x482   : > { %v4005_v10 = vadd.f32 %v13586_v28, %v4004_v59  ;;  %v4068_v55 = vmax.f32 %v4002_v48, 0.0 }
 0x483   : > { %v4071_v53 = vmax.f32 %v4013_v49, 0.0  ;;  %v4364_v49 = vld [vmem:[#allocation3 + $0x3a] sm:$0xff] }
 0x484   : > { %v4069_v14 = vmax.f32 %v4005_v10, 0.0 }
 0x485   : > { %v13688_v57 = vpack.c.bf16 %v4071_v53, %v4070_v52 }
 0x486   : > { %v13690_v60 = vpack.c.bf16 %v4069_v14, %v4068_v55  ;;  %v11381_v27 = vpop.f32.mrb[184].mxu0 }
 0x487   : > { %v4026_v63 = vadd.f32 %v11381_v27, %v13586_v28  ;;  %v4017_v43 = vpop.f32.mrb[185].mxu0 }
 0x488   : > { %v4018_v20 = vadd.f32 %v13586_v28, %v4017_v43  ;;  %v11382_v0 = vpop.f32.mrb[186].mxu0  ;;  %11409 = vmatprep.mubr.msk.bf16.mxu1 %vm1069_vm3, %v13690_v60  ;;  %11443 = vmatprep.mubr.msk.bf16.mxu0 %vm1069_vm3, %v13690_v60  ;;  %v4367_v43 = vld [vmem:[#allocation3 + $0x62] sm:$0xff] }
 0x489   : > { %v4029_v1 = vadd.f32 %v11382_v0, %v13586_v28  ;;  %v4020_v58 = vpop.f32.mrb[187].mxu0  ;;  %11410 = vmatmul.mubr.msk.bf16.gmra.mrb[180].mxu1 %vm1069_vm3, %v13688_v57  ;;  %11444 = vmatmul.mubr.msk.bf16.gmra.mrb[212].mxu0 %vm1069_vm3, %v13688_v57  ;;  %v4074_v3 = vmax.f32 %v4026_v63, 0.0  ;;  %v4369_v63 = vld [vmem:[#allocation3 + $0x7a] sm:$0xff] }
 0x48a   : > { %v4021_v2 = vadd.f32 %v13586_v28, %v4020_v58  ;;  %v4072_v4 = vmax.f32 %v4018_v20, 0.0 }
 0x48b   : > { %v4075_v9 = vmax.f32 %v4029_v1, 0.0  ;;  %v4370_v1 = vld [vmem:[#allocation3 + $0x82] sm:$0xff] }
 0x48c   : > { %v4073_v21 = vmax.f32 %v4021_v2, 0.0 }
 0x48d   : > { %v13704_v11 = vpack.c.bf16 %v4075_v9, %v4074_v3  ;;  %v4368_v9 = vld [vmem:[#allocation3 + $0x6a] sm:$0xff] }
 0x48e   : > { %v13706_v12 = vpack.c.bf16 %v4073_v21, %v4072_v4  ;;  %v11385_v13 = vpop.f32.mrb[188].mxu0 }
 0x48f   : > { %v4042_v15 = vadd.f32 %v11385_v13, %v13586_v28  ;;  %v4033_v26 = vpop.f32.mrb[189].mxu0 }
 0x490   : > { %v4034_v30 = vadd.f32 %v13586_v28, %v4033_v26  ;;  %v11386_v16 = vpop.f32.mrb[190].mxu0  ;;  %11413 = vmatprep.mubr.msk.bf16.mxu1 %vm1069_vm3, %v13706_v12  ;;  %11447 = vmatprep.mubr.msk.bf16.mxu0 %vm1069_vm3, %v13706_v12 }
 0x491   : > { %v4045_v17 = vadd.f32 %v11386_v16, %v13586_v28  ;;  %v4036_v18 = vpop.f32.mrb[191].mxu0  ;;  %11414 = vmatmul.mubr.msk.bf16.gmra.mrb[184].mxu1 %vm1069_vm3, %v13704_v11  ;;  %11448 = vmatmul.mubr.msk.bf16.gmra.mrb[216].mxu0 %vm1069_vm3, %v13704_v11  ;;  %v4078_v23 = vmax.f32 %v4042_v15, 0.0 }
 0x492   : > { %v4037_v22 = vadd.f32 %v13586_v28, %v4036_v18  ;;  %v4076_v7 = vmax.f32 %v4034_v30, 0.0  ;;  %v5248_v28 = vsel %vm1118_vm2, %v13607_v50, 0  ;;  %v5772_v50 = vsel %vm1118_vm2, %v10273_v33, 0 }
 0x493   : > { %v4079_v45 = vmax.f32 %v4045_v17, 0.0 }
 0x494   : > { %v4077_v25 = vmax.f32 %v4037_v22, 0.0 }
 0x495   : > { %v13720_v56 = vpack.c.bf16 %v4079_v45, %v4078_v23 }
 0x496   : > { %v13722_v31 = vpack.c.bf16 %v4077_v25, %v4076_v7 }
 0x498   : > { %11417 = vmatprep.mubr.msk.bf16.mxu1 %vm1069_vm3, %v13722_v31  ;;  %11451 = vmatprep.mubr.msk.bf16.mxu0 %vm1069_vm3, %v13722_v31 }
 0x499   : > { %11418 = vmatmul.mubr.msk.bf16.gmra.mrb[188].mxu1 %vm1069_vm3, %v13720_v56  ;;  %11452 = vmatmul.mubr.msk.bf16.gmra.mrb[220].mxu0 %vm1069_vm3, %v13720_v56 }
 0x49a   : > { %11457 = vmatprep.mubr.msk.bf16.mxu1 %vm1069_vm3, %v13594_v42  ;;  %11491 = vmatprep.mubr.msk.bf16.mxu0 %vm1069_vm3, %v13594_v42 }
 0x4a1   : > { %11458 = vmatmul.mubr.msk.bf16.vlgmr.msra.gmra.mrb[192].mxu1 %vm1069_vm3, %v13592_v40  ;;  %11492 = vmatmul.mubr.msk.bf16.vlgmr.msra.gmra.mrb[224].mxu0 %vm1069_vm3, %v13592_v40 }
 0x4a2   : > { %11524 = vmatpush3.bf16.msra.mxu1 %v5248_v28  ;;  %11461 = vmatprep.mubr.msk.bf16.mxu1 %vm1069_vm3, %v13626_v62 }
 0x4a3   : > { %11495 = vmatprep.mubr.msk.bf16.mxu0 %vm1069_vm3, %v13626_v62  ;;  %11558 = vmatpush3.bf16.msra.mxu0 %v5510_v32  ;;  %v4373_v32 = vld [vmem:[#allocation3 + $0xaa] sm:$0xff] }
 0x4a4   : > { %12050 = vmatprep.subr.msk.bf16.mxu1 %vm1118_vm2, %v10273_v33  ;;  %12051 = vmatprep.subr.msk.bf16.mxu0 %vm1118_vm2, %v10290_v34  ;;  %v4371_v33 = vld [vmem:[#allocation3 + $0x92] sm:$0xff] }
 0x4a9   : > { %11462 = vmatmul.mubr.msk.bf16.gmra.mrb[196].mxu1 %vm1069_vm3, %v13624_v61  ;;  %11496 = vmatmul.mubr.msk.bf16.gmra.mrb[228].mxu0 %vm1069_vm3, %v13624_v61 }
 0x4aa   : > { %11465 = vmatprep.mubr.msk.bf16.mxu1 %vm1069_vm3, %v13642_v8  ;;  %11499 = vmatprep.mubr.msk.bf16.mxu0 %vm1069_vm3, %v13642_v8 }
 0x4b1   : > { %11466 = vmatmul.mubr.msk.bf16.gmra.mrb[200].mxu1 %vm1069_vm3, %v13640_v5  ;;  %11500 = vmatmul.mubr.msk.bf16.gmra.mrb[232].mxu0 %vm1069_vm3, %v13640_v5 }
 0x4b2   : > { %11469 = vmatprep.mubr.msk.bf16.mxu1 %vm1069_vm3, %v13658_v54  ;;  %11503 = vmatprep.mubr.msk.bf16.mxu0 %vm1069_vm3, %v13658_v54 }
 0x4b9   : > { %11470 = vmatmul.mubr.msk.bf16.gmra.mrb[204].mxu1 %vm1069_vm3, %v13656_v24  ;;  %11504 = vmatmul.mubr.msk.bf16.gmra.mrb[236].mxu0 %vm1069_vm3, %v13656_v24 }
 0x4ba   : > { %11473 = vmatprep.mubr.msk.bf16.mxu1 %vm1069_vm3, %v13674_v39  ;;  %11507 = vmatprep.mubr.msk.bf16.mxu0 %vm1069_vm3, %v13674_v39 }
 0x4c1   : > { %11474 = vmatmul.mubr.msk.bf16.gmra.mrb[208].mxu1 %vm1069_vm3, %v13672_v38  ;;  %11508 = vmatmul.mubr.msk.bf16.gmra.mrb[240].mxu0 %vm1069_vm3, %v13672_v38 }
 0x4c2   : > { %11477 = vmatprep.mubr.msk.bf16.mxu1 %vm1069_vm3, %v13690_v60  ;;  %11511 = vmatprep.mubr.msk.bf16.mxu0 %vm1069_vm3, %v13690_v60 }
 0x4c9   : > { %11478 = vmatmul.mubr.msk.bf16.gmra.mrb[212].mxu1 %vm1069_vm3, %v13688_v57  ;;  %11512 = vmatmul.mubr.msk.bf16.gmra.mrb[244].mxu0 %vm1069_vm3, %v13688_v57 }
 0x4ca   : > { %11481 = vmatprep.mubr.msk.bf16.mxu1 %vm1069_vm3, %v13706_v12  ;;  %11515 = vmatprep.mubr.msk.bf16.mxu0 %vm1069_vm3, %v13706_v12 }
 0x4d1   : > { %11482 = vmatmul.mubr.msk.bf16.gmra.mrb[216].mxu1 %vm1069_vm3, %v13704_v11  ;;  %11516 = vmatmul.mubr.msk.bf16.gmra.mrb[248].mxu0 %vm1069_vm3, %v13704_v11 }
 0x4d2   : > { %11485 = vmatprep.mubr.msk.bf16.mxu1 %vm1069_vm3, %v13722_v31  ;;  %11519 = vmatprep.mubr.msk.bf16.mxu0 %vm1069_vm3, %v13722_v31 }
 0x4d9   : > { %11486 = vmatmul.mubr.msk.bf16.gmra.mrb[220].mxu1 %vm1069_vm3, %v13720_v56  ;;  %11520 = vmatmul.mubr.msk.bf16.gmra.mrb[252].mxu0 %vm1069_vm3, %v13720_v56 }
 0x4da   : > { %11525 = vmatprep.mubr.msk.bf16.mxu1 %vm1069_vm3, %v13594_v42  ;;  %11559 = vmatprep.mubr.msk.bf16.mxu0 %vm1069_vm3, %v13594_v42 }
 0x4e1   : > { %11526 = vmatmul.mubr.msk.bf16.vlgmr.msra.gmra.mrb[224].mxu1 %vm1069_vm3, %v13592_v40  ;;  %11560 = vmatmul.mubr.msk.bf16.vlgmr.msra.gmra.mrb[0].mxu0 %vm1069_vm3, %v13592_v40 }
 0x4e2   : > { %11592 = vmatpush3.bf16.msra.mxu1 %v5772_v50  ;;  %11529 = vmatprep.mubr.msk.bf16.mxu1 %vm1069_vm3, %v13626_v62 }
 0x4e3   : > { %11563 = vmatprep.mubr.msk.bf16.mxu0 %vm1069_vm3, %v13626_v62  ;;  %11626 = vmatpush3.bf16.msra.mxu0 %v6034_v51  ;;  %v4374_v51 = vld [vmem:[#allocation3 + $0xb2] sm:$0xff] }
 0x4e4   : > { %12052 = vmatprep.subr.msk.bf16.mxu1 %vm1118_vm2, %v10307_v35 }
 0x4e9   : > { %11530 = vmatmul.mubr.msk.bf16.gmra.mrb[228].mxu1 %vm1069_vm3, %v13624_v61  ;;  %11564 = vmatmul.mubr.msk.bf16.gmra.mrb[4].mxu0 %vm1069_vm3, %v13624_v61 }
 0x4ea   : > { %11533 = vmatprep.mubr.msk.bf16.mxu1 %vm1069_vm3, %v13642_v8  ;;  %11567 = vmatprep.mubr.msk.bf16.mxu0 %vm1069_vm3, %v13642_v8 }
 0x4f1   : > { %11534 = vmatmul.mubr.msk.bf16.gmra.mrb[232].mxu1 %vm1069_vm3, %v13640_v5  ;;  %11568 = vmatmul.mubr.msk.bf16.gmra.mrb[8].mxu0 %vm1069_vm3, %v13640_v5 }
 0x4f2   : > { %11537 = vmatprep.mubr.msk.bf16.mxu1 %vm1069_vm3, %v13658_v54  ;;  %11571 = vmatprep.mubr.msk.bf16.mxu0 %vm1069_vm3, %v13658_v54 }
 0x4f9   : > { %11538 = vmatmul.mubr.msk.bf16.gmra.mrb[236].mxu1 %vm1069_vm3, %v13656_v24  ;;  %11572 = vmatmul.mubr.msk.bf16.gmra.mrb[12].mxu0 %vm1069_vm3, %v13656_v24 }
 0x4fa   : > { %11541 = vmatprep.mubr.msk.bf16.mxu1 %vm1069_vm3, %v13674_v39  ;;  %11575 = vmatprep.mubr.msk.bf16.mxu0 %vm1069_vm3, %v13674_v39 }
 0x501   : > { %11542 = vmatmul.mubr.msk.bf16.gmra.mrb[240].mxu1 %vm1069_vm3, %v13672_v38  ;;  %11576 = vmatmul.mubr.msk.bf16.gmra.mrb[16].mxu0 %vm1069_vm3, %v13672_v38 }
 0x502   : > { %11545 = vmatprep.mubr.msk.bf16.mxu1 %vm1069_vm3, %v13690_v60  ;;  %11579 = vmatprep.mubr.msk.bf16.mxu0 %vm1069_vm3, %v13690_v60 }
 0x509   : > { %11546 = vmatmul.mubr.msk.bf16.gmra.mrb[244].mxu1 %vm1069_vm3, %v13688_v57  ;;  %11580 = vmatmul.mubr.msk.bf16.gmra.mrb[20].mxu0 %vm1069_vm3, %v13688_v57 }
 0x50a   : > { %11549 = vmatprep.mubr.msk.bf16.mxu1 %vm1069_vm3, %v13706_v12  ;;  %11583 = vmatprep.mubr.msk.bf16.mxu0 %vm1069_vm3, %v13706_v12 }
 0x511   : > { %11550 = vmatmul.mubr.msk.bf16.gmra.mrb[248].mxu1 %vm1069_vm3, %v13704_v11  ;;  %11584 = vmatmul.mubr.msk.bf16.gmra.mrb[24].mxu0 %vm1069_vm3, %v13704_v11 }
 0x512   : > { %11553 = vmatprep.mubr.msk.bf16.mxu1 %vm1069_vm3, %v13722_v31  ;;  %11587 = vmatprep.mubr.msk.bf16.mxu0 %vm1069_vm3, %v13722_v31 }
 0x519   : > { %11554 = vmatmul.mubr.msk.bf16.gmra.mrb[252].mxu1 %vm1069_vm3, %v13720_v56  ;;  %11588 = vmatmul.mubr.msk.bf16.gmra.mrb[28].mxu0 %vm1069_vm3, %v13720_v56 }
 0x51a   : > { %11593 = vmatprep.mubr.msk.bf16.mxu1 %vm1069_vm3, %v13594_v42  ;;  %11627 = vmatprep.mubr.msk.bf16.mxu0 %vm1069_vm3, %v13594_v42 }
 0x521   : > { %11594 = vmatmul.mubr.msk.bf16.vlgmr.msra.gmra.mrb[0].mxu1 %vm1069_vm3, %v13592_v40  ;;  %11628 = vmatmul.mubr.msk.bf16.vlgmr.msra.gmra.mrb[32].mxu0 %vm1069_vm3, %v13592_v40 }
 0x522   : > { %11660 = vmatpush3.bf16.msra.mxu1 %v6296_v6  ;;  %11597 = vmatprep.mubr.msk.bf16.mxu1 %vm1069_vm3, %v13626_v62 }
 0x523   : > { %11631 = vmatprep.mubr.msk.bf16.mxu0 %vm1069_vm3, %v13626_v62 }
 0x529   : > { %11598 = vmatmul.mubr.msk.bf16.gmra.mrb[4].mxu1 %vm1069_vm3, %v13624_v61  ;;  %11632 = vmatmul.mubr.msk.bf16.gmra.mrb[36].mxu0 %vm1069_vm3, %v13624_v61 }
 0x52a   : > { %11601 = vmatprep.mubr.msk.bf16.mxu1 %vm1069_vm3, %v13642_v8  ;;  %11635 = vmatprep.mubr.msk.bf16.mxu0 %vm1069_vm3, %v13642_v8 }
 0x531   : > { %11602 = vmatmul.mubr.msk.bf16.gmra.mrb[8].mxu1 %vm1069_vm3, %v13640_v5  ;;  %11636 = vmatmul.mubr.msk.bf16.gmra.mrb[40].mxu0 %vm1069_vm3, %v13640_v5 }
 0x532   : > { %11605 = vmatprep.mubr.msk.bf16.mxu1 %vm1069_vm3, %v13658_v54  ;;  %11639 = vmatprep.mubr.msk.bf16.mxu0 %vm1069_vm3, %v13658_v54 }
 0x534   : > { %v11391_v29 = vpop.f32.mrb[160].mxu1  ;;  %v11425_v41 = vpop.f32.mrb[192].mxu0 }
 0x535   : > { %v4397_v47 = vadd.f32 %v11391_v29, %v4365_v36  ;;  %v4236_v48 = vpop.f32.mrb[161].mxu1  ;;  %v4498_v44 = vpop.f32.mrb[193].mxu0 }
 0x536   : > { %v4395_v59 = vadd.f32 %v4363_v37, %v4236_v48  ;;  %v11392_v10 = vpop.f32.mrb[162].mxu1  ;;  %v11426_v52 = vpop.f32.mrb[194].mxu0  ;;  %v4372_v37 = vld [vmem:[#allocation3 + $0x9a] sm:$0xff] }
 0x537   : > { %4429 = vst.msk [vmem:[#allocation3 + $0x4a] sm:$0xff] %vm553_vm1, %v4397_v47  ;;  %v4398_v53 = vadd.f32 %v11392_v10, %v4366_v46  ;;  %v4239_v55 = vpop.f32.mrb[163].mxu1  ;;  %v4501_v14 = vpop.f32.mrb[195].mxu0 }
 0x538   : > { %4427 = vst.msk [vmem:[#allocation3 + $0x32] sm:$0xff] %vm553_vm1, %v4395_v59  ;;  %v4396_v27 = vadd.f32 %v4364_v49, %v4239_v55 }
 0x539   : > { %4430 = vst.msk [vmem:[#allocation3 + $0x52] sm:$0xff] %vm553_vm1, %v4398_v53  ;;  %11606 = vmatmul.mubr.msk.bf16.gmra.mrb[12].mxu1 %vm1069_vm3, %v13656_v24  ;;  %11640 = vmatmul.mubr.msk.bf16.gmra.mrb[44].mxu0 %vm1069_vm3, %v13656_v24 }
 0x53a   : > { %4428 = vst.msk [vmem:[#allocation3 + $0x3a] sm:$0xff] %vm553_vm1, %v4396_v27  ;;  %11609 = vmatprep.mubr.msk.bf16.mxu1 %vm1069_vm3, %v13674_v39  ;;  %11643 = vmatprep.mubr.msk.bf16.mxu0 %vm1069_vm3, %v13674_v39 }
 0x53c   : > { %v11395_v20 = vpop.f32.mrb[164].mxu1  ;;  %v11429_v0 = vpop.f32.mrb[196].mxu0 }
 0x53d   : > { %v4401_v58 = vadd.f32 %v11395_v20, %v4369_v63  ;;  %v4252_v2 = vpop.f32.mrb[165].mxu1  ;;  %v4514_v3 = vpop.f32.mrb[197].mxu0  ;;  %v4375_v20 = vld [vmem:[#allocation3 + $0xc2] sm:$0xff] }
 0x53e   : > { %v4627_v4 = vld [vmem:[#allocation3 + $0x49] sm:$0xff]  ;;  %v4399_v21 = vadd.f32 %v4367_v43, %v4252_v2  ;;  %v11396_v13 = vpop.f32.mrb[166].mxu1  ;;  %v11430_v15 = vpop.f32.mrb[198].mxu0  ;;  %v4377_v43 = vld [vmem:[#allocation3 + $0xda] sm:$0xff] }
 0x53f   : > { %v4659_v26 = vadd.f32 %v11425_v41, %v4627_v4  ;;  %v4625_v30 = vld [vmem:[#allocation3 + $0x31] sm:$0xff]  ;;  %4433 = vst.msk [vmem:[#allocation3 + $0x7a] sm:$0xff] %vm553_vm1, %v4401_v58  ;;  %v4402_v16 = vadd.f32 %v11396_v13, %v4370_v1  ;;  %v4255_v17 = vpop.f32.mrb[167].mxu1  ;;  %v4517_v18 = vpop.f32.mrb[199].mxu0  ;;  %v4378_v58 = vld [vmem:[#allocation3 + $0xe2] sm:$0xff] }
 0x540   : > { %v4657_v22 = vadd.f32 %v4625_v30, %v4498_v44  ;;  %v4628_v23 = vld [vmem:[#allocation3 + $0x51] sm:$0xff]  ;;  %4431 = vst.msk [vmem:[#allocation3 + $0x62] sm:$0xff] %vm553_vm1, %v4399_v21  ;;  %v4400_v45 = vadd.f32 %v4368_v9, %v4255_v17 }
 0x541   : > { %4691 = vst.msk [vmem:[#allocation3 + $0x49] sm:$0xff] %vm553_vm1, %v4659_v26  ;;  %v4660_v7 = vadd.f32 %v11426_v52, %v4628_v23  ;;  %v4626_v25 = vld [vmem:[#allocation3 + $0x39] sm:$0xff]  ;;  %4434 = vst.msk [vmem:[#allocation3 + $0x82] sm:$0xff] %vm553_vm1, %v4402_v16  ;;  %11610 = vmatmul.mubr.msk.bf16.gmra.mrb[16].mxu1 %vm1069_vm3, %v13672_v38  ;;  %11644 = vmatmul.mubr.msk.bf16.gmra.mrb[48].mxu0 %vm1069_vm3, %v13672_v38  ;;  %v4376_v4 = vld [vmem:[#allocation3 + $0xca] sm:$0xff] }
 0x542   : > { %4689 = vst.msk [vmem:[#allocation3 + $0x31] sm:$0xff] %vm553_vm1, %v4657_v22  ;;  %v4658_v28 = vadd.f32 %v4626_v25, %v4501_v14  ;;  %4432 = vst.msk [vmem:[#allocation3 + $0x6a] sm:$0xff] %vm553_vm1, %v4400_v45  ;;  %11613 = vmatprep.mubr.msk.bf16.mxu1 %vm1069_vm3, %v13690_v60  ;;  %11647 = vmatprep.mubr.msk.bf16.mxu0 %vm1069_vm3, %v13690_v60 }
 0x543   : > { %4692 = vst.msk [vmem:[#allocation3 + $0x51] sm:$0xff] %vm553_vm1, %v4660_v7 }
 0x544   : > { %4690 = vst.msk [vmem:[#allocation3 + $0x39] sm:$0xff] %vm553_vm1, %v4658_v28  ;;  %v11399_v34 = vpop.f32.mrb[168].mxu1  ;;  %v11433_v50 = vpop.f32.mrb[200].mxu0 }
 0x545   : > { %v4405_v35 = vadd.f32 %v11399_v34, %v4373_v32  ;;  %v4268_v6 = vpop.f32.mrb[169].mxu1  ;;  %v4530_v36 = vpop.f32.mrb[201].mxu0  ;;  %v4379_v34 = vld [vmem:[#allocation3 + $0xf2] sm:$0xff] }
 0x546   : > { %v4631_v29 = vld [vmem:[#allocation3 + $0x79] sm:$0xff]  ;;  %v4403_v41 = vadd.f32 %v4371_v33, %v4268_v6  ;;  %v11400_v46 = vpop.f32.mrb[170].mxu1  ;;  %v11434_v47 = vpop.f32.mrb[202].mxu0  ;;  %v4381_v33 = vld [vmem:[#allocation3 + $0x10a] sm:$0xff] }
 0x547   : > { %v4663_v48 = vadd.f32 %v11429_v0, %v4631_v29  ;;  %v4629_v44 = vld [vmem:[#allocation3 + $0x61] sm:$0xff]  ;;  %4437 = vst.msk [vmem:[#allocation3 + $0xaa] sm:$0xff] %vm553_vm1, %v4405_v35  ;;  %v4406_v49 = vadd.f32 %v11400_v46, %v4374_v51  ;;  %v4271_v59 = vpop.f32.mrb[171].mxu1  ;;  %v4533_v10 = vpop.f32.mrb[203].mxu0  ;;  %v4382_v35 = vld [vmem:[#allocation3 + $0x112] sm:$0xff] }
 0x548   : > { %v4661_v52 = vadd.f32 %v4629_v44, %v4514_v3  ;;  %v4632_v53 = vld [vmem:[#allocation3 + $0x81] sm:$0xff]  ;;  %4435 = vst.msk [vmem:[#allocation3 + $0x92] sm:$0xff] %vm553_vm1, %v4403_v41  ;;  %v4404_v55 = vadd.f32 %v4372_v37, %v4271_v59 }
 0x549   : > { %4695 = vst.msk [vmem:[#allocation3 + $0x79] sm:$0xff] %vm553_vm1, %v4663_v48  ;;  %v4664_v14 = vadd.f32 %v11430_v15, %v4632_v53  ;;  %v4630_v27 = vld [vmem:[#allocation3 + $0x69] sm:$0xff]  ;;  %4438 = vst.msk [vmem:[#allocation3 + $0xb2] sm:$0xff] %vm553_vm1, %v4406_v49  ;;  %11614 = vmatmul.mubr.msk.bf16.gmra.mrb[20].mxu1 %vm1069_vm3, %v13688_v57  ;;  %11648 = vmatmul.mubr.msk.bf16.gmra.mrb[52].mxu0 %vm1069_vm3, %v13688_v57  ;;  %v4380_v29 = vld [vmem:[#allocation3 + $0xfa] sm:$0xff] }
 0x54a   : > { %4693 = vst.msk [vmem:[#allocation3 + $0x61] sm:$0xff] %vm553_vm1, %v4661_v52  ;;  %v4662_v63 = vadd.f32 %v4630_v27, %v4517_v18  ;;  %4436 = vst.msk [vmem:[#allocation3 + $0x9a] sm:$0xff] %vm553_vm1, %v4404_v55  ;;  %11617 = vmatprep.mubr.msk.bf16.mxu1 %vm1069_vm3, %v13706_v12  ;;  %11651 = vmatprep.mubr.msk.bf16.mxu0 %vm1069_vm3, %v13706_v12 }
 0x54b   : > { %4696 = vst.msk [vmem:[#allocation3 + $0x81] sm:$0xff] %vm553_vm1, %v4664_v14 }
 0x54c   : > { %4694 = vst.msk [vmem:[#allocation3 + $0x69] sm:$0xff] %vm553_vm1, %v4662_v63  ;;  %v11403_v0 = vpop.f32.mrb[172].mxu1  ;;  %v11437_v1 = vpop.f32.mrb[204].mxu0 }
 0x54d   : > { %v4409_v2 = vadd.f32 %v11403_v0, %v4377_v43  ;;  %v4284_v3 = vpop.f32.mrb[173].mxu1  ;;  %v4546_v9 = vpop.f32.mrb[205].mxu0  ;;  %v4383_v0 = vld [vmem:[#allocation3 + $0x122] sm:$0xff] }
 0x54e   : > { %v4635_v21 = vld [vmem:[#allocation3 + $0xa9] sm:$0xff]  ;;  %v4407_v13 = vadd.f32 %v4375_v20, %v4284_v3  ;;  %v11404_v15 = vpop.f32.mrb[174].mxu1  ;;  %v11438_v26 = vpop.f32.mrb[206].mxu0  ;;  %v4385_v20 = vld [vmem:[#allocation3 + $0x13a] sm:$0xff] }
 0x54f   : > { %v4667_v30 = vadd.f32 %v11433_v50, %v4635_v21  ;;  %v4633_v16 = vld [vmem:[#allocation3 + $0x91] sm:$0xff]  ;;  %4441 = vst.msk [vmem:[#allocation3 + $0xda] sm:$0xff] %vm553_vm1, %v4409_v2  ;;  %v4410_v17 = vadd.f32 %v11404_v15, %v4378_v58  ;;  %v4287_v18 = vpop.f32.mrb[175].mxu1  ;;  %v4549_v22 = vpop.f32.mrb[207].mxu0  ;;  %v4386_v2 = vld [vmem:[#allocation3 + $0x142] sm:$0xff] }
 0x550   : > { %v4665_v23 = vadd.f32 %v4633_v16, %v4530_v36  ;;  %v4636_v45 = vld [vmem:[#allocation3 + $0xb1] sm:$0xff]  ;;  %4439 = vst.msk [vmem:[#allocation3 + $0xc2] sm:$0xff] %vm553_vm1, %v4407_v13  ;;  %v4408_v7 = vadd.f32 %v4376_v4, %v4287_v18 }
 0x551   : > { %4699 = vst.msk [vmem:[#allocation3 + $0xa9] sm:$0xff] %vm553_vm1, %v4667_v30  ;;  %v4668_v25 = vadd.f32 %v11434_v47, %v4636_v45  ;;  %v4634_v28 = vld [vmem:[#allocation3 + $0x99] sm:$0xff]  ;;  %4442 = vst.msk [vmem:[#allocation3 + $0xe2] sm:$0xff] %vm553_vm1, %v4410_v17  ;;  %11618 = vmatmul.mubr.msk.bf16.gmra.mrb[24].mxu1 %vm1069_vm3, %v13704_v11  ;;  %11652 = vmatmul.mubr.msk.bf16.gmra.mrb[56].mxu0 %vm1069_vm3, %v13704_v11  ;;  %v4384_v21 = vld [vmem:[#allocation3 + $0x12a] sm:$0xff] }
 0x552   : > { %4697 = vst.msk [vmem:[#allocation3 + $0x91] sm:$0xff] %vm553_vm1, %v4665_v23  ;;  %v4666_v32 = vadd.f32 %v4634_v28, %v4533_v10  ;;  %4440 = vst.msk [vmem:[#allocation3 + $0xca] sm:$0xff] %vm553_vm1, %v4408_v7  ;;  %11621 = vmatprep.mubr.msk.bf16.mxu1 %vm1069_vm3, %v13722_v31  ;;  %11655 = vmatprep.mubr.msk.bf16.mxu0 %vm1069_vm3, %v13722_v31 }
 0x553   : > { %4700 = vst.msk [vmem:[#allocation3 + $0xb1] sm:$0xff] %vm553_vm1, %v4668_v25 }
 0x554   : > { %4698 = vst.msk [vmem:[#allocation3 + $0x99] sm:$0xff] %vm553_vm1, %v4666_v32  ;;  %v11407_v50 = vpop.f32.mrb[176].mxu1  ;;  %v11441_v51 = vpop.f32.mrb[208].mxu0 }
 0x555   : > { %v4413_v6 = vadd.f32 %v11407_v50, %v4381_v33  ;;  %v4300_v36 = vpop.f32.mrb[177].mxu1  ;;  %v4562_v37 = vpop.f32.mrb[209].mxu0  ;;  %v4389_v33 = vld [vmem:[#allocation3 + $0x16a] sm:$0xff] }
 0x556   : > { %v4639_v41 = vld [vmem:[#allocation3 + $0xd9] sm:$0xff]  ;;  %v4411_v46 = vadd.f32 %v4379_v34, %v4300_v36  ;;  %v11408_v47 = vpop.f32.mrb[178].mxu1  ;;  %v11442_v48 = vpop.f32.mrb[210].mxu0 }
 0x557   : > { %v4671_v44 = vadd.f32 %v11437_v1, %v4639_v41  ;;  %v4637_v49 = vld [vmem:[#allocation3 + $0xc1] sm:$0xff]  ;;  %4445 = vst.msk [vmem:[#allocation3 + $0x10a] sm:$0xff] %vm553_vm1, %v4413_v6  ;;  %v4414_v59 = vadd.f32 %v11408_v47, %v4382_v35  ;;  %v4303_v10 = vpop.f32.mrb[179].mxu1  ;;  %v4565_v52 = vpop.f32.mrb[211].mxu0  ;;  %v4387_v34 = vld [vmem:[#allocation3 + $0x152] sm:$0xff] }
 0x558   : > { %v4669_v53 = vadd.f32 %v4637_v49, %v4546_v9  ;;  %v4640_v55 = vld [vmem:[#allocation3 + $0xe1] sm:$0xff]  ;;  %4443 = vst.msk [vmem:[#allocation3 + $0xf2] sm:$0xff] %vm553_vm1, %v4411_v46  ;;  %v4412_v14 = vadd.f32 %v4380_v29, %v4303_v10  ;;  %v4390_v35 = vld [vmem:[#allocation3 + $0x172] sm:$0xff] }
 0x559   : > { %4703 = vst.msk [vmem:[#allocation3 + $0xd9] sm:$0xff] %vm553_vm1, %v4671_v44  ;;  %v4672_v27 = vadd.f32 %v11438_v26, %v4640_v55  ;;  %v4638_v63 = vld [vmem:[#allocation3 + $0xc9] sm:$0xff]  ;;  %4446 = vst.msk [vmem:[#allocation3 + $0x112] sm:$0xff] %vm553_vm1, %v4414_v59  ;;  %11622 = vmatmul.mubr.msk.bf16.gmra.mrb[28].mxu1 %vm1069_vm3, %v13720_v56  ;;  %11656 = vmatmul.mubr.msk.bf16.gmra.mrb[60].mxu0 %vm1069_vm3, %v13720_v56 }
 0x55a   : > { %4701 = vst.msk [vmem:[#allocation3 + $0xc1] sm:$0xff] %vm553_vm1, %v4669_v53  ;;  %v4670_v43 = vadd.f32 %v4638_v63, %v4549_v22  ;;  %4444 = vst.msk [vmem:[#allocation3 + $0xfa] sm:$0xff] %vm553_vm1, %v4412_v14  ;;  %11661 = vmatprep.mubr.msk.bf16.mxu1 %vm1069_vm3, %v13594_v42  ;;  %v4393_v63 = vld [vmem:[#allocation3 + $0x19a] sm:$0xff] }
 0x55b   : > { %4704 = vst.msk [vmem:[#allocation3 + $0xe1] sm:$0xff] %vm553_vm1, %v4672_v27 }
 0x55c   : > { %4702 = vst.msk [vmem:[#allocation3 + $0xc9] sm:$0xff] %vm553_vm1, %v4670_v43  ;;  %v11411_v1 = vpop.f32.mrb[180].mxu1  ;;  %v11445_v58 = vpop.f32.mrb[212].mxu0  ;;  %v4391_v43 = vld [vmem:[#allocation3 + $0x182] sm:$0xff] }
 0x55d   : > { %v4417_v3 = vadd.f32 %v11411_v1, %v4385_v20  ;;  %v4316_v9 = vpop.f32.mrb[181].mxu1  ;;  %v4578_v4 = vpop.f32.mrb[213].mxu0  ;;  %v4394_v1 = vld [vmem:[#allocation3 + $0x1a2] sm:$0xff] }
 0x55e   : > { %v4643_v13 = vld [vmem:[#allocation3 + $0x109] sm:$0xff]  ;;  %v4415_v15 = vadd.f32 %v4383_v0, %v4316_v9  ;;  %v11412_v26 = vpop.f32.mrb[182].mxu1  ;;  %v11446_v30 = vpop.f32.mrb[214].mxu0 }
 0x55f   : > { %v4675_v16 = vadd.f32 %v11441_v51, %v4643_v13  ;;  %v4641_v17 = vld [vmem:[#allocation3 + $0xf1] sm:$0xff]  ;;  %4449 = vst.msk [vmem:[#allocation3 + $0x13a] sm:$0xff] %vm553_vm1, %v4417_v3  ;;  %v4418_v42 = vadd.f32 %v11412_v26, %v4386_v2  ;;  %v4319_v18 = vpop.f32.mrb[183].mxu1  ;;  %v4581_v22 = vpop.f32.mrb[215].mxu0 }
 0x560   : > { %v4673_v23 = vadd.f32 %v4641_v17, %v4562_v37  ;;  %v4644_v45 = vld [vmem:[#allocation3 + $0x111] sm:$0xff]  ;;  %4447 = vst.msk [vmem:[#allocation3 + $0x122] sm:$0xff] %vm553_vm1, %v4415_v15  ;;  %v4416_v7 = vadd.f32 %v4384_v21, %v4319_v18  ;;  %v4388_v37 = vld [vmem:[#allocation3 + $0x15a] sm:$0xff] }
 0x561   : > { %4707 = vst.msk [vmem:[#allocation3 + $0x109] sm:$0xff] %vm553_vm1, %v4675_v16  ;;  %v4676_v25 = vadd.f32 %v11442_v48, %v4644_v45  ;;  %v4642_v28 = vld [vmem:[#allocation3 + $0xf9] sm:$0xff]  ;;  %4450 = vst.msk [vmem:[#allocation3 + $0x142] sm:$0xff] %vm553_vm1, %v4418_v42  ;;  %11662 = vmatmul.mubr.msk.bf16.vlgmr.msra.gmra.mrb[32].mxu1 %vm1069_vm3, %v13592_v40  ;;  %v4392_v3 = vld [vmem:[#allocation3 + $0x18a] sm:$0xff] }
 0x562   : > { %4705 = vst.msk [vmem:[#allocation3 + $0xf1] sm:$0xff] %vm553_vm1, %v4673_v23  ;;  %v4674_v32 = vadd.f32 %v4642_v28, %v4565_v52  ;;  %4448 = vst.msk [vmem:[#allocation3 + $0x12a] sm:$0xff] %vm553_vm1, %v4416_v7  ;;  %11665 = vmatprep.mubr.msk.bf16.mxu1 %vm1069_vm3, %v13626_v62  ;;  %v5149_v7 = vld [vmem:[#allocation3 + $0x1a] sm:$0xff]  ;;  %v4889_v28 = vld [vmem:[#allocation3 + $0x48] sm:$0xff] }
 0x563   : > { %4708 = vst.msk [vmem:[#allocation3 + $0x111] sm:$0xff] %vm553_vm1, %v4676_v25 }
 0x564   : > { %4706 = vst.msk [vmem:[#allocation3 + $0xf9] sm:$0xff] %vm553_vm1, %v4674_v32  ;;  %v11415_v50 = vpop.f32.mrb[184].mxu1  ;;  %v11449_v51 = vpop.f32.mrb[216].mxu0 }
 0x565   : > { %v4421_v6 = vadd.f32 %v11415_v50, %v4389_v33  ;;  %v4332_v36 = vpop.f32.mrb[185].mxu1  ;;  %v4594_v40 = vpop.f32.mrb[217].mxu0 }
 0x566   : > { %v4647_v29 = vld [vmem:[#allocation3 + $0x139] sm:$0xff]  ;;  %v4419_v41 = vadd.f32 %v4387_v34, %v4332_v36  ;;  %v11416_v46 = vpop.f32.mrb[186].mxu1  ;;  %v11450_v47 = vpop.f32.mrb[218].mxu0 }
 0x567   : > { %v4679_v48 = vadd.f32 %v11445_v58, %v4647_v29  ;;  %v4645_v44 = vld [vmem:[#allocation3 + $0x121] sm:$0xff]  ;;  %4453 = vst.msk [vmem:[#allocation3 + $0x16a] sm:$0xff] %vm553_vm1, %v4421_v6  ;;  %v4422_v62 = vadd.f32 %v11416_v46, %v4390_v35  ;;  %v4335_v49 = vpop.f32.mrb[187].mxu1  ;;  %v4597_v59 = vpop.f32.mrb[219].mxu0 }
 0x568   : > { %v4677_v10 = vadd.f32 %v4645_v44, %v4578_v4  ;;  %v4648_v52 = vld [vmem:[#allocation3 + $0x141] sm:$0xff]  ;;  %4451 = vst.msk [vmem:[#allocation3 + $0x152] sm:$0xff] %vm553_vm1, %v4419_v41  ;;  %v4420_v53 = vadd.f32 %v4388_v37, %v4335_v49  ;;  %v4890_v37 = vld [vmem:[#allocation3 + $0x50] sm:$0xff] }
 0x569   : > { %4711 = vst.msk [vmem:[#allocation3 + $0x139] sm:$0xff] %vm553_vm1, %v4679_v48  ;;  %v4680_v55 = vadd.f32 %v11446_v30, %v4648_v52  ;;  %v4646_v14 = vld [vmem:[#allocation3 + $0x129] sm:$0xff]  ;;  %4454 = vst.msk [vmem:[#allocation3 + $0x172] sm:$0xff] %vm553_vm1, %v4422_v62  ;;  %11666 = vmatmul.mubr.msk.bf16.gmra.mrb[36].mxu1 %vm1069_vm3, %v13624_v61  ;;  %v4888_v48 = vld [vmem:[#allocation3 + $0x38] sm:$0xff] }
 0x56a   : > { %4709 = vst.msk [vmem:[#allocation3 + $0x121] sm:$0xff] %vm553_vm1, %v4677_v10  ;;  %v4678_v27 = vadd.f32 %v4646_v14, %v4581_v22  ;;  %4452 = vst.msk [vmem:[#allocation3 + $0x15a] sm:$0xff] %vm553_vm1, %v4420_v53  ;;  %11669 = vmatprep.mubr.msk.bf16.mxu1 %vm1069_vm3, %v13642_v8 }
 0x56b   : > { %4712 = vst.msk [vmem:[#allocation3 + $0x141] sm:$0xff] %vm553_vm1, %v4680_v55 }
 0x56c   : > { %4710 = vst.msk [vmem:[#allocation3 + $0x129] sm:$0xff] %vm553_vm1, %v4678_v27  ;;  %v11419_v20 = vpop.f32.mrb[188].mxu1  ;;  %v11453_v0 = vpop.f32.mrb[220].mxu0  ;;  %v4893_v27 = vld [vmem:[#allocation3 + $0x78] sm:$0xff] }
 0x56d   : > { %v4425_v58 = vadd.f32 %v11419_v20, %v4393_v63  ;;  %v4348_v2 = vpop.f32.mrb[189].mxu1  ;;  %v4610_v61 = vpop.f32.mrb[221].mxu0  ;;  %v4891_v20 = vld [vmem:[#allocation3 + $0x60] sm:$0xff] }
 0x56e   : > { %v4651_v9 = vld [vmem:[#allocation3 + $0x169] sm:$0xff]  ;;  %v4423_v4 = vadd.f32 %v4391_v43, %v4348_v2  ;;  %v11420_v21 = vpop.f32.mrb[190].mxu1  ;;  %v11454_v13 = vpop.f32.mrb[222].mxu0  ;;  %v4894_v2 = vld [vmem:[#allocation3 + $0x80] sm:$0xff] }
 0x56f   : > { %v4683_v15 = vadd.f32 %v11449_v51, %v4651_v9  ;;  %v4649_v26 = vld [vmem:[#allocation3 + $0x151] sm:$0xff]  ;;  %4457 = vst.msk [vmem:[#allocation3 + $0x19a] sm:$0xff] %vm553_vm1, %v4425_v58  ;;  %v4426_v8 = vadd.f32 %v11420_v21, %v4394_v1  ;;  %v4351_v30 = vpop.f32.mrb[191].mxu1  ;;  %v4613_v16 = vpop.f32.mrb[223].mxu0  ;;  %v5150_v51 = vld [vmem:[#allocation3 + $0x22] sm:$0xff] }
 0x570   : > { %v4681_v17 = vadd.f32 %v4649_v26, %v4594_v40  ;;  %v4652_v42 = vld [vmem:[#allocation3 + $0x171] sm:$0xff]  ;;  %4455 = vst.msk [vmem:[#allocation3 + $0x182] sm:$0xff] %vm553_vm1, %v4423_v4  ;;  %v4424_v18 = vadd.f32 %v4392_v3, %v4351_v30  ;;  %v4892_v9 = vld [vmem:[#allocation3 + $0x68] sm:$0xff] }
 0x571   : > { %4715 = vst.msk [vmem:[#allocation3 + $0x169] sm:$0xff] %vm553_vm1, %v4683_v15  ;;  %v4684_v22 = vadd.f32 %v11450_v47, %v4652_v42  ;;  %v4650_v23 = vld [vmem:[#allocation3 + $0x159] sm:$0xff]  ;;  %4458 = vst.msk [vmem:[#allocation3 + $0x1a2] sm:$0xff] %vm553_vm1, %v4426_v8  ;;  %11670 = vmatmul.mubr.msk.bf16.gmra.mrb[40].mxu1 %vm1069_vm3, %v13640_v5  ;;  %v4887_v5 = vld [vmem:[#allocation3 + $0x30] sm:$0xff] }
 0x572   : > { %4713 = vst.msk [vmem:[#allocation3 + $0x151] sm:$0xff] %vm553_vm1, %v4681_v17  ;;  %v4682_v45 = vadd.f32 %v4650_v23, %v4597_v59  ;;  %4456 = vst.msk [vmem:[#allocation3 + $0x18a] sm:$0xff] %vm553_vm1, %v4424_v18  ;;  %11673 = vmatprep.mubr.msk.bf16.mxu1 %vm1069_vm3, %v13658_v54 }
 0x573   : > { %4716 = vst.msk [vmem:[#allocation3 + $0x171] sm:$0xff] %vm553_vm1, %v4684_v22  ;;  %v4897_v22 = vld [vmem:[#allocation3 + $0xa8] sm:$0xff] }
 0x574   : > { %4714 = vst.msk [vmem:[#allocation3 + $0x159] sm:$0xff] %vm553_vm1, %v4682_v45  ;;  %v11459_v25 = vpop.f32.mrb[192].mxu1  ;;  %v14017_v32 = vpop.f32.mrb[224].mxu0 }
 0x575   : > { %v4921_v33 = vadd.f32 %v11459_v25, %v4889_v28  ;;  %v4760_v34 = vpop.f32.mrb[193].mxu1  ;;  %v5022_v50 = vpop.f32.mrb[225].mxu0 }
 0x576   : > { %v4655_v35 = vld [vmem:[#allocation3 + $0x199] sm:$0xff]  ;;  %v4919_v6 = vadd.f32 %v4887_v5, %v4760_v34  ;;  %v5181_v36 = vadd.f32 %v5149_v7, %v5022_v50  ;;  %v11460_v40 = vpop.f32.mrb[194].mxu1  ;;  %v11494_v54 = vpop.f32.mrb[226].mxu0  ;;  %v4895_v7 = vld [vmem:[#allocation3 + $0x90] sm:$0xff] }
 0x577   : > { %v4687_v29 = vadd.f32 %v11453_v0, %v4655_v35  ;;  %v4653_v41 = vld [vmem:[#allocation3 + $0x181] sm:$0xff]  ;;  %4953 = vst.msk [vmem:[#allocation3 + $0x48] sm:$0xff] %vm553_vm1, %v4921_v33  ;;  %v4922_v46 = vadd.f32 %v11460_v40, %v4890_v37  ;;  %v4763_v47 = vpop.f32.mrb[195].mxu1  ;;  %v5025_v44 = vpop.f32.mrb[227].mxu0  ;;  %v4898_v33 = vld [vmem:[#allocation3 + $0xb0] sm:$0xff]  ;;  %v4896_v50 = vld [vmem:[#allocation3 + $0x98] sm:$0xff] }
 0x578   : > { %v4685_v62 = vadd.f32 %v4653_v41, %v4610_v61  ;;  %v4656_v49 = vld [vmem:[#allocation3 + $0x1a1] sm:$0xff]  ;;  %4951 = vst.msk [vmem:[#allocation3 + $0x30] sm:$0xff] %vm553_vm1, %v4919_v6  ;;  %5213 = vst.msk [vmem:[#allocation3 + $0x1a] sm:$0xff] %vm553_vm1, %v5181_v36  ;;  %v4920_v59 = vadd.f32 %v4888_v48, %v4763_v47  ;;  %v5182_v10 = vadd.f32 %v5150_v51, %v5025_v44  ;;  %v4901_v48 = vld [vmem:[#allocation3 + $0xd8] sm:$0xff] }
 0x579   : > { %4719 = vst.msk [vmem:[#allocation3 + $0x199] sm:$0xff] %vm553_vm1, %v4687_v29  ;;  %v4688_v52 = vadd.f32 %v11454_v13, %v4656_v49  ;;  %v4654_v53 = vld [vmem:[#allocation3 + $0x189] sm:$0xff]  ;;  %4954 = vst.msk [vmem:[#allocation3 + $0x50] sm:$0xff] %vm553_vm1, %v4922_v46  ;;  %11674 = vmatmul.mubr.msk.bf16.gmra.mrb[44].mxu1 %vm1069_vm3, %v13656_v24  ;;  %v4899_v49 = vld [vmem:[#allocation3 + $0xc0] sm:$0xff] }
 0x57a   : > { %4717 = vst.msk [vmem:[#allocation3 + $0x181] sm:$0xff] %vm553_vm1, %v4685_v62  ;;  %v4686_v55 = vadd.f32 %v4654_v53, %v4613_v16  ;;  %4952 = vst.msk [vmem:[#allocation3 + $0x38] sm:$0xff] %vm553_vm1, %v4920_v59  ;;  %11677 = vmatprep.mubr.msk.bf16.mxu1 %vm1069_vm3, %v13674_v39  ;;  %v4902_v53 = vld [vmem:[#allocation3 + $0xe0] sm:$0xff] }
 0x57b   : > { %5214 = vst.msk [vmem:[#allocation3 + $0x22] sm:$0xff] %vm553_vm1, %v5182_v10  ;;  %4720 = vst.msk [vmem:[#allocation3 + $0x1a1] sm:$0xff] %vm553_vm1, %v4688_v52 }
 0x57c   : > { %7235 = vst.msk [vmem:[#allocation3 + $0x1a8] sm:$0x3] %vm1015_vm4, %v12172_v19  ;;  %v11463_v14 = vpop.f32.mrb[196].mxu1  ;;  %v11497_v24 = vpop.f32.mrb[228].mxu0 }
 0x57d   : > { %4718 = vst.msk [vmem:[#allocation3 + $0x189] sm:$0xff] %vm553_vm1, %v4686_v55  ;;  %v4925_v63 = vadd.f32 %v11463_v14, %v4893_v27  ;;  %v4776_v43 = vpop.f32.mrb[197].mxu1  ;;  %v5038_v0 = vpop.f32.mrb[229].mxu0  ;;  %v4900_v27 = vld [vmem:[#allocation3 + $0xc8] sm:$0xff] }
 0x57e   : > { %v4923_v1 = vadd.f32 %v4891_v20, %v4776_v43  ;;  %v11464_v58 = vpop.f32.mrb[198].mxu1  ;;  %v11498_v61 = vpop.f32.mrb[230].mxu0 }
 0x57f   : > { %4957 = vst.msk [vmem:[#allocation3 + $0x78] sm:$0xff] %vm553_vm1, %v4925_v63  ;;  %v4926_v39 = vadd.f32 %v11464_v58, %v4894_v2  ;;  %v4779_v3 = vpop.f32.mrb[199].mxu1  ;;  %v5041_v4 = vpop.f32.mrb[231].mxu0 }
 0x580   : > { %4955 = vst.msk [vmem:[#allocation3 + $0x60] sm:$0xff] %vm553_vm1, %v4923_v1  ;;  %v5153_v21 = vld [vmem:[#allocation3 + $0x4a] sm:$0xff]  ;;  %v4924_v13 = vadd.f32 %v4892_v9, %v4779_v3  ;;  %v5154_v15 = vld [vmem:[#allocation3 + $0x52] sm:$0xff] }
 0x581   : > { %v5151_v26 = vld [vmem:[#allocation3 + $0x32] sm:$0xff]  ;;  %v5185_v8 = vadd.f32 %v5153_v21, %v5038_v0  ;;  %4958 = vst.msk [vmem:[#allocation3 + $0x80] sm:$0xff] %vm553_vm1, %v4926_v39  ;;  %v5186_v30 = vadd.f32 %v5154_v15, %v5041_v4  ;;  %11678 = vmatmul.mubr.msk.bf16.gmra.mrb[48].mxu1 %vm1069_vm3, %v13672_v38  ;;  %v5152_v16 = vld [vmem:[#allocation3 + $0x3a] sm:$0xff]  ;;  %v4905_v9 = vld [vmem:[#allocation3 + $0x108] sm:$0xff] }
 0x582   : > { %v5183_v17 = vadd.f32 %v14017_v32, %v5151_v26  ;;  %4956 = vst.msk [vmem:[#allocation3 + $0x68] sm:$0xff] %vm553_vm1, %v4924_v13  ;;  %11681 = vmatprep.mubr.msk.bf16.mxu1 %vm1069_vm3, %v13690_v60  ;;  %v5184_v42 = vadd.f32 %v11494_v54, %v5152_v16  ;;  %v4903_v13 = vld [vmem:[#allocation3 + $0xf0] sm:$0xff] }
 0x583   : > { %5217 = vst.msk [vmem:[#allocation3 + $0x4a] sm:$0xff] %vm553_vm1, %v5185_v8  ;;  %5218 = vst.msk [vmem:[#allocation3 + $0x52] sm:$0xff] %vm553_vm1, %v5186_v30  ;;  %v4906_v30 = vld [vmem:[#allocation3 + $0x110] sm:$0xff] }
 0x584   : > { %5215 = vst.msk [vmem:[#allocation3 + $0x32] sm:$0xff] %vm553_vm1, %v5183_v17  ;;  %v11467_v18 = vpop.f32.mrb[200].mxu1  ;;  %v11501_v23 = vpop.f32.mrb[232].mxu0  ;;  %5216 = vst.msk [vmem:[#allocation3 + $0x3a] sm:$0xff] %vm553_vm1, %v5184_v42  ;;  %v4904_v42 = vld [vmem:[#allocation3 + $0xf8] sm:$0xff] }
 0x585   : > { %v4929_v38 = vadd.f32 %v11467_v18, %v4897_v22  ;;  %v4792_v45 = vpop.f32.mrb[201].mxu1  ;;  %v5054_v25 = vpop.f32.mrb[233].mxu0 }
 0x586   : > { %v4927_v28 = vadd.f32 %v4895_v7, %v4792_v45  ;;  %v11468_v32 = vpop.f32.mrb[202].mxu1  ;;  %v11502_v60 = vpop.f32.mrb[234].mxu0 }
 0x587   : > { %4961 = vst.msk [vmem:[#allocation3 + $0xa8] sm:$0xff] %vm553_vm1, %v4929_v38  ;;  %v4930_v34 = vadd.f32 %v11468_v32, %v4898_v33  ;;  %v4795_v5 = vpop.f32.mrb[203].mxu1  ;;  %v5057_v51 = vpop.f32.mrb[235].mxu0 }
 0x588   : > { %4959 = vst.msk [vmem:[#allocation3 + $0x90] sm:$0xff] %vm553_vm1, %v4927_v28  ;;  %v5157_v35 = vld [vmem:[#allocation3 + $0x7a] sm:$0xff]  ;;  %v4928_v6 = vadd.f32 %v4896_v50, %v4795_v5  ;;  %v5158_v36 = vld [vmem:[#allocation3 + $0x82] sm:$0xff] }
 0x589   : > { %v5155_v40 = vld [vmem:[#allocation3 + $0x62] sm:$0xff]  ;;  %v5189_v37 = vadd.f32 %v5157_v35, %v5054_v25  ;;  %4962 = vst.msk [vmem:[#allocation3 + $0xb0] sm:$0xff] %vm553_vm1, %v4930_v34  ;;  %v5190_v54 = vadd.f32 %v5158_v36, %v5057_v51  ;;  %11682 = vmatmul.mubr.msk.bf16.gmra.mrb[52].mxu1 %vm1069_vm3, %v13688_v57  ;;  %v5156_v29 = vld [vmem:[#allocation3 + $0x6a] sm:$0xff]  ;;  %v4909_v34 = vld [vmem:[#allocation3 + $0x138] sm:$0xff] }
 0x58a   : > { %v5187_v41 = vadd.f32 %v11497_v24, %v5155_v40  ;;  %4960 = vst.msk [vmem:[#allocation3 + $0x98] sm:$0xff] %vm553_vm1, %v4928_v6  ;;  %11685 = vmatprep.mubr.msk.bf16.mxu1 %vm1069_vm3, %v13706_v12  ;;  %v5188_v46 = vadd.f32 %v11498_v61, %v5156_v29  ;;  %v4907_v35 = vld [vmem:[#allocation3 + $0x120] sm:$0xff] }
 0x58b   : > { %5221 = vst.msk [vmem:[#allocation3 + $0x7a] sm:$0xff] %vm553_vm1, %v5189_v37  ;;  %5222 = vst.msk [vmem:[#allocation3 + $0x82] sm:$0xff] %vm553_vm1, %v5190_v54  ;;  %v4910_v40 = vld [vmem:[#allocation3 + $0x140] sm:$0xff] }
 0x58c   : > { %5219 = vst.msk [vmem:[#allocation3 + $0x62] sm:$0xff] %vm553_vm1, %v5187_v41  ;;  %v11471_v47 = vpop.f32.mrb[204].mxu1  ;;  %v11505_v44 = vpop.f32.mrb[236].mxu0  ;;  %5220 = vst.msk [vmem:[#allocation3 + $0x6a] sm:$0xff] %vm553_vm1, %v5188_v46  ;;  %v4908_v41 = vld [vmem:[#allocation3 + $0x128] sm:$0xff] }
 0x58d   : > { %v4933_v57 = vadd.f32 %v11471_v47, %v4901_v48  ;;  %v4808_v62 = vpop.f32.mrb[205].mxu1  ;;  %v5070_v59 = vpop.f32.mrb[237].mxu0 }
 0x58e   : > { %v4931_v10 = vadd.f32 %v4899_v49, %v4808_v62  ;;  %v11472_v52 = vpop.f32.mrb[206].mxu1  ;;  %v11506_v12 = vpop.f32.mrb[238].mxu0 }
 0x58f   : > { %4965 = vst.msk [vmem:[#allocation3 + $0xd8] sm:$0xff] %vm553_vm1, %v4933_v57  ;;  %v4934_v55 = vadd.f32 %v11472_v52, %v4902_v53  ;;  %v4811_v14 = vpop.f32.mrb[207].mxu1  ;;  %v5073_v24 = vpop.f32.mrb[239].mxu0 }
 0x590   : > { %4963 = vst.msk [vmem:[#allocation3 + $0xc0] sm:$0xff] %vm553_vm1, %v4931_v10  ;;  %v5161_v63 = vld [vmem:[#allocation3 + $0xaa] sm:$0xff]  ;;  %v4932_v43 = vadd.f32 %v4900_v27, %v4811_v14  ;;  %v5162_v20 = vld [vmem:[#allocation3 + $0xb2] sm:$0xff] }
 0x591   : > { %v5159_v0 = vld [vmem:[#allocation3 + $0x92] sm:$0xff]  ;;  %v5193_v1 = vadd.f32 %v5161_v63, %v5070_v59  ;;  %4966 = vst.msk [vmem:[#allocation3 + $0xe0] sm:$0xff] %vm553_vm1, %v4934_v55  ;;  %v5194_v58 = vadd.f32 %v5162_v20, %v5073_v24  ;;  %11686 = vmatmul.mubr.msk.bf16.gmra.mrb[56].mxu1 %vm1069_vm3, %v13704_v11  ;;  %v5160_v2 = vld [vmem:[#allocation3 + $0x9a] sm:$0xff] }
 0x592   : > { %v5191_v61 = vadd.f32 %v11501_v23, %v5159_v0  ;;  %4964 = vst.msk [vmem:[#allocation3 + $0xc8] sm:$0xff] %vm553_vm1, %v4932_v43  ;;  %11689 = vmatprep.mubr.msk.bf16.mxu1 %vm1069_vm3, %v13722_v31  ;;  %v5192_v39 = vadd.f32 %v11502_v60, %v5160_v2  ;;  %v4911_v24 = vld [vmem:[#allocation3 + $0x150] sm:$0xff] }
 0x593   : > { %5225 = vst.msk [vmem:[#allocation3 + $0xaa] sm:$0xff] %vm553_vm1, %v5193_v1  ;;  %5226 = vst.msk [vmem:[#allocation3 + $0xb2] sm:$0xff] %vm553_vm1, %v5194_v58  ;;  %v4914_v0 = vld [vmem:[#allocation3 + $0x170] sm:$0xff] }
 0x594   : > { %5223 = vst.msk [vmem:[#allocation3 + $0x92] sm:$0xff] %vm553_vm1, %v5191_v61  ;;  %v11475_v3 = vpop.f32.mrb[208].mxu1  ;;  %v11509_v4 = vpop.f32.mrb[240].mxu0  ;;  %5224 = vst.msk [vmem:[#allocation3 + $0x9a] sm:$0xff] %vm553_vm1, %v5192_v39  ;;  %v4912_v61 = vld [vmem:[#allocation3 + $0x158] sm:$0xff] }
 0x595   : > { %v4937_v11 = vadd.f32 %v11475_v3, %v4905_v9  ;;  %v4824_v21 = vpop.f32.mrb[209].mxu1  ;;  %v5086_v15 = vpop.f32.mrb[241].mxu0 }
 0x596   : > { %v4935_v26 = vadd.f32 %v4903_v13, %v4824_v21  ;;  %v11476_v8 = vpop.f32.mrb[210].mxu1  ;;  %v11510_v31 = vpop.f32.mrb[242].mxu0 }
 0x597   : > { %4969 = vst.msk [vmem:[#allocation3 + $0x108] sm:$0xff] %vm553_vm1, %v4937_v11  ;;  %v4938_v16 = vadd.f32 %v11476_v8, %v4906_v30  ;;  %v4827_v17 = vpop.f32.mrb[211].mxu1  ;;  %v5089_v18 = vpop.f32.mrb[243].mxu0 }
 0x598   : > { %4967 = vst.msk [vmem:[#allocation3 + $0xf0] sm:$0xff] %vm553_vm1, %v4935_v26  ;;  %v5165_v22 = vld [vmem:[#allocation3 + $0xda] sm:$0xff]  ;;  %v4936_v23 = vadd.f32 %v4904_v42, %v4827_v17  ;;  %v5166_v38 = vld [vmem:[#allocation3 + $0xe2] sm:$0xff] }
 0x599   : > { %v5163_v45 = vld [vmem:[#allocation3 + $0xc2] sm:$0xff]  ;;  %v5197_v7 = vadd.f32 %v5165_v22, %v5086_v15  ;;  %4970 = vst.msk [vmem:[#allocation3 + $0x110] sm:$0xff] %vm553_vm1, %v4938_v16  ;;  %v5198_v25 = vadd.f32 %v5166_v38, %v5089_v18  ;;  %11690 = vmatmul.mubr.msk.bf16.gmra.mrb[60].mxu1 %vm1069_vm3, %v13720_v56  ;;  %v5164_v28 = vld [vmem:[#allocation3 + $0xca] sm:$0xff] }
 0x59a   : > { %v5195_v32 = vadd.f32 %v11505_v44, %v5163_v45  ;;  %4968 = vst.msk [vmem:[#allocation3 + $0xf8] sm:$0xff] %vm553_vm1, %v4936_v23  ;;  %v5196_v33 = vadd.f32 %v11506_v12, %v5164_v28  ;;  %v4913_v12 = vld [vmem:[#allocation3 + $0x168] sm:$0xff]  ;;  %v4915_v18 = vld [vmem:[#allocation3 + $0x180] sm:$0xff] }
 0x59b   : > { %5229 = vst.msk [vmem:[#allocation3 + $0xda] sm:$0xff] %vm553_vm1, %v5197_v7  ;;  %5230 = vst.msk [vmem:[#allocation3 + $0xe2] sm:$0xff] %vm553_vm1, %v5198_v25  ;;  %v4918_v45 = vld [vmem:[#allocation3 + $0x1a0] sm:$0xff] }
 0x59c   : > { %5227 = vst.msk [vmem:[#allocation3 + $0xc2] sm:$0xff] %vm553_vm1, %v5195_v32  ;;  %v11479_v60 = vpop.f32.mrb[212].mxu1  ;;  %v11513_v5 = vpop.f32.mrb[244].mxu0  ;;  %5228 = vst.msk [vmem:[#allocation3 + $0xca] sm:$0xff] %vm553_vm1, %v5196_v33  ;;  %v4916_v32 = vld [vmem:[#allocation3 + $0x188] sm:$0xff] }
 0x59d   : > { %v4941_v50 = vadd.f32 %v11479_v60, %v4909_v34  ;;  %v4840_v51 = vpop.f32.mrb[213].mxu1  ;;  %v5102_v56 = vpop.f32.mrb[245].mxu0 }
 0x59e   : > { %v4939_v6 = vadd.f32 %v4907_v35, %v4840_v51  ;;  %v11480_v36 = vpop.f32.mrb[214].mxu1  ;;  %v11514_v37 = vpop.f32.mrb[246].mxu0 }
 0x59f   : > { %4973 = vst.msk [vmem:[#allocation3 + $0x138] sm:$0xff] %vm553_vm1, %v4941_v50  ;;  %v4942_v54 = vadd.f32 %v11480_v36, %v4910_v40  ;;  %v4843_v29 = vpop.f32.mrb[215].mxu1  ;;  %v5105_v46 = vpop.f32.mrb[247].mxu0 }
 0x5a0   : > { %4971 = vst.msk [vmem:[#allocation3 + $0x120] sm:$0xff] %vm553_vm1, %v4939_v6  ;;  %v5169_v47 = vld [vmem:[#allocation3 + $0x10a] sm:$0xff]  ;;  %v4940_v48 = vadd.f32 %v4908_v41, %v4843_v29  ;;  %v5170_v44 = vld [vmem:[#allocation3 + $0x112] sm:$0xff] }
 0x5a1   : > { %v5167_v57 = vld [vmem:[#allocation3 + $0xf2] sm:$0xff]  ;;  %v5201_v62 = vadd.f32 %v5169_v47, %v5102_v56  ;;  %4974 = vst.msk [vmem:[#allocation3 + $0x140] sm:$0xff] %vm553_vm1, %v4942_v54  ;;  %v5202_v49 = vadd.f32 %v5170_v44, %v5105_v46  ;;  %v5168_v59 = vld [vmem:[#allocation3 + $0xfa] sm:$0xff] }
 0x5a2   : > { %v5199_v10 = vadd.f32 %v11509_v4, %v5167_v57  ;;  %4972 = vst.msk [vmem:[#allocation3 + $0x128] sm:$0xff] %vm553_vm1, %v4940_v48  ;;  %v5200_v52 = vadd.f32 %v11510_v31, %v5168_v59  ;;  %v4917_v31 = vld [vmem:[#allocation3 + $0x198] sm:$0xff] }
 0x5a3   : > { %5233 = vst.msk [vmem:[#allocation3 + $0x10a] sm:$0xff] %vm553_vm1, %v5201_v62  ;;  %5234 = vst.msk [vmem:[#allocation3 + $0x112] sm:$0xff] %vm553_vm1, %v5202_v49  ;;  %v5411_v46 = vld [vmem:[#allocation3 + $0x19] sm:$0xff] }
 0x5a4   : > { %5231 = vst.msk [vmem:[#allocation3 + $0xf2] sm:$0xff] %vm553_vm1, %v5199_v10  ;;  %v11483_v53 = vpop.f32.mrb[216].mxu1  ;;  %v11517_v55 = vpop.f32.mrb[248].mxu0  ;;  %5232 = vst.msk [vmem:[#allocation3 + $0xfa] sm:$0xff] %vm553_vm1, %v5200_v52  ;;  %v5414_v57 = vld [vmem:[#allocation3 + $0x39] sm:$0xff]  ;;  %v5412_v10 = vld [vmem:[#allocation3 + $0x21] sm:$0xff] }
 0x5a5   : > { %v4945_v14 = vadd.f32 %v11483_v53, %v4913_v12  ;;  %v4856_v27 = vpop.f32.mrb[217].mxu1  ;;  %v5118_v63 = vpop.f32.mrb[249].mxu0 }
 0x5a6   : > { %v4943_v43 = vadd.f32 %v4911_v24, %v4856_v27  ;;  %v11484_v20 = vpop.f32.mrb[218].mxu1  ;;  %v11518_v1 = vpop.f32.mrb[250].mxu0 }
 0x5a7   : > { %4977 = vst.msk [vmem:[#allocation3 + $0x168] sm:$0xff] %vm553_vm1, %v4945_v14  ;;  %v4946_v58 = vadd.f32 %v11484_v20, %v4914_v0  ;;  %v4859_v2 = vpop.f32.mrb[219].mxu1  ;;  %v5121_v39 = vpop.f32.mrb[251].mxu0 }
 0x5a8   : > { %4975 = vst.msk [vmem:[#allocation3 + $0x150] sm:$0xff] %vm553_vm1, %v4943_v43  ;;  %v5173_v3 = vld [vmem:[#allocation3 + $0x13a] sm:$0xff]  ;;  %v4944_v9 = vadd.f32 %v4912_v61, %v4859_v2  ;;  %v5174_v4 = vld [vmem:[#allocation3 + $0x142] sm:$0xff] }
 0x5a9   : > { %v5171_v11 = vld [vmem:[#allocation3 + $0x122] sm:$0xff]  ;;  %v5205_v21 = vadd.f32 %v5173_v3, %v5118_v63  ;;  %4978 = vst.msk [vmem:[#allocation3 + $0x170] sm:$0xff] %vm553_vm1, %v4946_v58  ;;  %v5206_v13 = vadd.f32 %v5174_v4, %v5121_v39  ;;  %v5172_v15 = vld [vmem:[#allocation3 + $0x12a] sm:$0xff] }
 0x5aa   : > { %v5203_v26 = vadd.f32 %v11513_v5, %v5171_v11  ;;  %4976 = vst.msk [vmem:[#allocation3 + $0x158] sm:$0xff] %vm553_vm1, %v4944_v9  ;;  %v5204_v8 = vadd.f32 %v11514_v37, %v5172_v15  ;;  %v5413_v37 = vld [vmem:[#allocation3 + $0x31] sm:$0xff]  ;;  %v5417_v63 = vld [vmem:[#allocation3 + $0x61] sm:$0xff]  ;;  %v5418_v3 = vld [vmem:[#allocation3 + $0x69] sm:$0xff] }
 0x5ab   : > { %5237 = vst.msk [vmem:[#allocation3 + $0x13a] sm:$0xff] %vm553_vm1, %v5205_v21  ;;  %5238 = vst.msk [vmem:[#allocation3 + $0x142] sm:$0xff] %vm553_vm1, %v5206_v13  ;;  %v5416_v15 = vld [vmem:[#allocation3 + $0x51] sm:$0xff] }
 0x5ac   : > { %5235 = vst.msk [vmem:[#allocation3 + $0x122] sm:$0xff] %vm553_vm1, %v5203_v26  ;;  %v11487_v30 = vpop.f32.mrb[220].mxu1  ;;  %v11521_v16 = vpop.f32.mrb[252].mxu0  ;;  %5236 = vst.msk [vmem:[#allocation3 + $0x12a] sm:$0xff] %vm553_vm1, %v5204_v8 }
 0x5ad   : > { %v4949_v17 = vadd.f32 %v11487_v30, %v4917_v31  ;;  %v4872_v42 = vpop.f32.mrb[221].mxu1  ;;  %v5134_v22 = vpop.f32.mrb[253].mxu0 }
 0x5ae   : > { %v4947_v23 = vadd.f32 %v4915_v18, %v4872_v42  ;;  %v11488_v38 = vpop.f32.mrb[222].mxu1  ;;  %v11522_v7 = vpop.f32.mrb[254].mxu0 }
 0x5af   : > { %4981 = vst.msk [vmem:[#allocation3 + $0x198] sm:$0xff] %vm553_vm1, %v4949_v17  ;;  %v4950_v25 = vadd.f32 %v11488_v38, %v4918_v45  ;;  %v4875_v28 = vpop.f32.mrb[223].mxu1  ;;  %v5137_v33 = vpop.f32.mrb[255].mxu0 }
 0x5b0   : > { %7233 = vst.msk [vmem:[#allocation3 + $0x198] sm:$0xff] %vm553_vm1, %v12172_v19  ;;  %4979 = vst.msk [vmem:[#allocation3 + $0x180] sm:$0xff] %vm553_vm1, %v4947_v23  ;;  %v5177_v60 = vld [vmem:[#allocation3 + $0x16a] sm:$0xff]  ;;  %v4948_v34 = vadd.f32 %v4916_v32, %v4875_v28  ;;  %v5178_v5 = vld [vmem:[#allocation3 + $0x172] sm:$0xff] }
 0x5b1   : > { %v5175_v50 = vld [vmem:[#allocation3 + $0x152] sm:$0xff]  ;;  %v5209_v51 = vadd.f32 %v5177_v60, %v5134_v22  ;;  %4982 = vst.msk [vmem:[#allocation3 + $0x1a0] sm:$0xff] %vm553_vm1, %v4950_v25  ;;  %v5210_v35 = vadd.f32 %v5178_v5, %v5137_v33  ;;  %v5176_v56 = vld [vmem:[#allocation3 + $0x15a] sm:$0xff] }
 0x5b2   : > { %v5207_v6 = vadd.f32 %v11517_v55, %v5175_v50  ;;  %7234 = vst.msk [vmem:[#allocation3 + $0x1a0] sm:$0xff] %vm553_vm1, %v12172_v19  ;;  %4980 = vst.msk [vmem:[#allocation3 + $0x188] sm:$0xff] %vm553_vm1, %v4948_v34  ;;  %v5208_v36 = vadd.f32 %v11518_v1, %v5176_v56  ;;  %v5415_v1 = vld [vmem:[#allocation3 + $0x49] sm:$0xff]  ;;  %v5421_v22 = vld [vmem:[#allocation3 + $0x91] sm:$0xff] }
 0x5b3   : > { %5241 = vst.msk [vmem:[#allocation3 + $0x16a] sm:$0xff] %vm553_vm1, %v5209_v51  ;;  %5242 = vst.msk [vmem:[#allocation3 + $0x172] sm:$0xff] %vm553_vm1, %v5210_v35  ;;  %v5422_v60 = vld [vmem:[#allocation3 + $0x99] sm:$0xff]  ;;  %v5420_v56 = vld [vmem:[#allocation3 + $0x81] sm:$0xff] }
 0x5b4   : > { %5239 = vst.msk [vmem:[#allocation3 + $0x152] sm:$0xff] %vm553_vm1, %v5207_v6  ;;  %v11527_v40 = vpop.f32.mrb[224].mxu1  ;;  %v11561_v54 = vpop.f32.mrb[0].mxu0  ;;  %5240 = vst.msk [vmem:[#allocation3 + $0x15a] sm:$0xff] %vm553_vm1, %v5208_v36 }
 0x5b5   : > { %v5445_v29 = vadd.f32 %v11527_v40, %v5413_v37  ;;  %v5284_v41 = vpop.f32.mrb[225].mxu1  ;;  %v5546_v47 = vpop.f32.mrb[1].mxu0 }
 0x5b6   : > { %v5443_v48 = vadd.f32 %v5411_v46, %v5284_v41  ;;  %v11528_v44 = vpop.f32.mrb[226].mxu1  ;;  %v11562_v62 = vpop.f32.mrb[2].mxu0 }
 0x5b7   : > { %5477 = vst.msk [vmem:[#allocation3 + $0x31] sm:$0xff] %vm553_vm1, %v5445_v29  ;;  %v5446_v49 = vadd.f32 %v11528_v44, %v5414_v57  ;;  %v5287_v59 = vpop.f32.mrb[227].mxu1  ;;  %v5549_v52 = vpop.f32.mrb[3].mxu0 }
 0x5b8   : > { %5475 = vst.msk [vmem:[#allocation3 + $0x19] sm:$0xff] %vm553_vm1, %v5443_v48  ;;  %v5444_v53 = vadd.f32 %v5412_v10, %v5287_v59 }
 0x5b9   : > { %5478 = vst.msk [vmem:[#allocation3 + $0x39] sm:$0xff] %vm553_vm1, %v5446_v49  ;;  %v5179_v12 = vld [vmem:[#allocation3 + $0x182] sm:$0xff]  ;;  %v5180_v55 = vld [vmem:[#allocation3 + $0x18a] sm:$0xff] }
 0x5ba   : > { %5476 = vst.msk [vmem:[#allocation3 + $0x21] sm:$0xff] %vm553_vm1, %v5444_v53  ;;  %v5211_v14 = vadd.f32 %v11521_v16, %v5179_v12  ;;  %v5212_v27 = vadd.f32 %v11522_v7, %v5180_v55  ;;  %v5419_v7 = vld [vmem:[#allocation3 + $0x79] sm:$0xff]  ;;  %v5426_v53 = vld [vmem:[#allocation3 + $0xc9] sm:$0xff] }
 0x5bc   : > { %v11531_v24 = vpop.f32.mrb[228].mxu1  ;;  %v11565_v43 = vpop.f32.mrb[4].mxu0  ;;  %5243 = vst.msk [vmem:[#allocation3 + $0x182] sm:$0xff] %vm553_vm1, %v5211_v14  ;;  %5244 = vst.msk [vmem:[#allocation3 + $0x18a] sm:$0xff] %vm553_vm1, %v5212_v27 }
 0x5bd   : > { %v5449_v20 = vadd.f32 %v11531_v24, %v5417_v63  ;;  %v5300_v0 = vpop.f32.mrb[229].mxu1  ;;  %v5562_v58 = vpop.f32.mrb[5].mxu0  ;;  %v5424_v63 = vld [vmem:[#allocation3 + $0xb1] sm:$0xff] }
 0x5be   : > { %v5675_v2 = vld [vmem:[#allocation3 + $0x30] sm:$0xff]  ;;  %v5447_v61 = vadd.f32 %v5415_v1, %v5300_v0  ;;  %v11532_v39 = vpop.f32.mrb[230].mxu1  ;;  %v11566_v9 = vpop.f32.mrb[6].mxu0 }
 0x5bf   : > { %v5707_v4 = vadd.f32 %v11561_v54, %v5675_v2  ;;  %v5673_v11 = vld [vmem:[#allocation3 + $0x18] sm:$0xff]  ;;  %5481 = vst.msk [vmem:[#allocation3 + $0x61] sm:$0xff] %vm553_vm1, %v5449_v20  ;;  %v5450_v21 = vadd.f32 %v11532_v39, %v5418_v3  ;;  %v5303_v13 = vpop.f32.mrb[231].mxu1  ;;  %v5565_v26 = vpop.f32.mrb[7].mxu0 }
 0x5c0   : > { %v5705_v8 = vadd.f32 %v5673_v11, %v5546_v47  ;;  %v5676_v30 = vld [vmem:[#allocation3 + $0x38] sm:$0xff]  ;;  %5479 = vst.msk [vmem:[#allocation3 + $0x49] sm:$0xff] %vm553_vm1, %v5447_v61  ;;  %v5448_v31 = vadd.f32 %v5416_v15, %v5303_v13  ;;  %v5425_v47 = vld [vmem:[#allocation3 + $0xc1] sm:$0xff] }
 0x5c1   : > { %5739 = vst.msk [vmem:[#allocation3 + $0x30] sm:$0xff] %vm553_vm1, %v5707_v4  ;;  %v5708_v16 = vadd.f32 %v11562_v62, %v5676_v30  ;;  %v5674_v17 = vld [vmem:[#allocation3 + $0x20] sm:$0xff]  ;;  %5482 = vst.msk [vmem:[#allocation3 + $0x69] sm:$0xff] %vm553_vm1, %v5450_v21  ;;  %v5423_v62 = vld [vmem:[#allocation3 + $0xa9] sm:$0xff] }
 0x5c2   : > { %5737 = vst.msk [vmem:[#allocation3 + $0x18] sm:$0xff] %vm553_vm1, %v5705_v8  ;;  %v5706_v42 = vadd.f32 %v5674_v17, %v5549_v52  ;;  %5480 = vst.msk [vmem:[#allocation3 + $0x51] sm:$0xff] %vm553_vm1, %v5448_v31  ;;  %v5429_v3 = vld [vmem:[#allocation3 + $0xf1] sm:$0xff]  ;;  %v5427_v21 = vld [vmem:[#allocation3 + $0xd9] sm:$0xff] }
 0x5c3   : > { %5740 = vst.msk [vmem:[#allocation3 + $0x38] sm:$0xff] %vm553_vm1, %v5708_v16  ;;  %v5430_v30 = vld [vmem:[#allocation3 + $0xf9] sm:$0xff] }
 0x5c4   : > { %5738 = vst.msk [vmem:[#allocation3 + $0x20] sm:$0xff] %vm553_vm1, %v5706_v42  ;;  %v11535_v18 = vpop.f32.mrb[232].mxu1  ;;  %v11569_v23 = vpop.f32.mrb[8].mxu0 }
 0x5c5   : > { %v5453_v38 = vadd.f32 %v11535_v18, %v5421_v22  ;;  %v5316_v45 = vpop.f32.mrb[233].mxu1  ;;  %v5578_v25 = vpop.f32.mrb[9].mxu0  ;;  %v5428_v22 = vld [vmem:[#allocation3 + $0xe1] sm:$0xff] }
 0x5c6   : > { %v5679_v28 = vld [vmem:[#allocation3 + $0x60] sm:$0xff]  ;;  %v5451_v32 = vadd.f32 %v5419_v7, %v5316_v45  ;;  %v11536_v33 = vpop.f32.mrb[234].mxu1  ;;  %v11570_v34 = vpop.f32.mrb[10].mxu0 }
 0x5c7   : > { %v5711_v5 = vadd.f32 %v11565_v43, %v5679_v28  ;;  %v5677_v50 = vld [vmem:[#allocation3 + $0x48] sm:$0xff]  ;;  %5485 = vst.msk [vmem:[#allocation3 + $0x91] sm:$0xff] %vm553_vm1, %v5453_v38  ;;  %v5454_v51 = vadd.f32 %v11536_v33, %v5422_v60  ;;  %v5319_v35 = vpop.f32.mrb[235].mxu1  ;;  %v5581_v6 = vpop.f32.mrb[11].mxu0 }
 0x5c8   : > { %v5709_v36 = vadd.f32 %v5677_v50, %v5562_v58  ;;  %v5680_v40 = vld [vmem:[#allocation3 + $0x68] sm:$0xff]  ;;  %5483 = vst.msk [vmem:[#allocation3 + $0x79] sm:$0xff] %vm553_vm1, %v5451_v32  ;;  %v5452_v37 = vadd.f32 %v5420_v56, %v5319_v35 }
 0x5c9   : > { %5743 = vst.msk [vmem:[#allocation3 + $0x60] sm:$0xff] %vm553_vm1, %v5711_v5  ;;  %v5712_v54 = vadd.f32 %v11566_v9, %v5680_v40  ;;  %v5678_v29 = vld [vmem:[#allocation3 + $0x50] sm:$0xff]  ;;  %5486 = vst.msk [vmem:[#allocation3 + $0x99] sm:$0xff] %vm553_vm1, %v5454_v51  ;;  %v5433_v60 = vld [vmem:[#allocation3 + $0x121] sm:$0xff] }
 0x5ca   : > { %5741 = vst.msk [vmem:[#allocation3 + $0x48] sm:$0xff] %vm553_vm1, %v5709_v36  ;;  %v5710_v41 = vadd.f32 %v5678_v29, %v5565_v26  ;;  %5484 = vst.msk [vmem:[#allocation3 + $0x81] sm:$0xff] %vm553_vm1, %v5452_v37  ;;  %v5431_v51 = vld [vmem:[#allocation3 + $0x109] sm:$0xff] }
 0x5cb   : > { %5744 = vst.msk [vmem:[#allocation3 + $0x68] sm:$0xff] %vm553_vm1, %v5712_v54  ;;  %v5434_v40 = vld [vmem:[#allocation3 + $0x129] sm:$0xff] }
 0x5cc   : > { %5742 = vst.msk [vmem:[#allocation3 + $0x50] sm:$0xff] %vm553_vm1, %v5710_v41  ;;  %v11539_v46 = vpop.f32.mrb[236].mxu1  ;;  %v11573_v48 = vpop.f32.mrb[12].mxu0 }
 0x5cd   : > { %v5457_v44 = vadd.f32 %v11539_v46, %v5425_v47  ;;  %v5332_v57 = vpop.f32.mrb[237].mxu1  ;;  %v5594_v49 = vpop.f32.mrb[13].mxu0  ;;  %v5432_v47 = vld [vmem:[#allocation3 + $0x111] sm:$0xff] }
 0x5ce   : > { %v5683_v59 = vld [vmem:[#allocation3 + $0x90] sm:$0xff]  ;;  %v5455_v10 = vadd.f32 %v5423_v62, %v5332_v57  ;;  %v11540_v52 = vpop.f32.mrb[238].mxu1  ;;  %v11574_v12 = vpop.f32.mrb[14].mxu0 }
 0x5cf   : > { %v5715_v55 = vadd.f32 %v11569_v23, %v5683_v59  ;;  %v5681_v14 = vld [vmem:[#allocation3 + $0x78] sm:$0xff]  ;;  %5489 = vst.msk [vmem:[#allocation3 + $0xc1] sm:$0xff] %vm553_vm1, %v5457_v44  ;;  %v5458_v27 = vadd.f32 %v11540_v52, %v5426_v53  ;;  %v5335_v24 = vpop.f32.mrb[239].mxu1  ;;  %v5597_v43 = vpop.f32.mrb[15].mxu0 }
 0x5d0   : > { %v5713_v20 = vadd.f32 %v5681_v14, %v5578_v25  ;;  %v5684_v0 = vld [vmem:[#allocation3 + $0x98] sm:$0xff]  ;;  %5487 = vst.msk [vmem:[#allocation3 + $0xa9] sm:$0xff] %vm553_vm1, %v5455_v10  ;;  %v5456_v1 = vadd.f32 %v5424_v63, %v5335_v24 }
 0x5d1   : > { %5747 = vst.msk [vmem:[#allocation3 + $0x90] sm:$0xff] %vm553_vm1, %v5715_v55  ;;  %v5716_v58 = vadd.f32 %v11570_v34, %v5684_v0  ;;  %v5682_v2 = vld [vmem:[#allocation3 + $0x80] sm:$0xff]  ;;  %5490 = vst.msk [vmem:[#allocation3 + $0xc9] sm:$0xff] %vm553_vm1, %v5458_v27  ;;  %v5437_v53 = vld [vmem:[#allocation3 + $0x151] sm:$0xff] }
 0x5d2   : > { %5745 = vst.msk [vmem:[#allocation3 + $0x78] sm:$0xff] %vm553_vm1, %v5713_v20  ;;  %v5714_v61 = vadd.f32 %v5682_v2, %v5581_v6  ;;  %5488 = vst.msk [vmem:[#allocation3 + $0xb1] sm:$0xff] %vm553_vm1, %v5456_v1  ;;  %v5435_v27 = vld [vmem:[#allocation3 + $0x139] sm:$0xff] }
 0x5d3   : > { %5748 = vst.msk [vmem:[#allocation3 + $0x98] sm:$0xff] %vm553_vm1, %v5716_v58  ;;  %v5438_v0 = vld [vmem:[#allocation3 + $0x159] sm:$0xff] }
 0x5d4   : > { %5746 = vst.msk [vmem:[#allocation3 + $0x80] sm:$0xff] %vm553_vm1, %v5714_v61  ;;  %v11543_v39 = vpop.f32.mrb[240].mxu1  ;;  %v11577_v9 = vpop.f32.mrb[16].mxu0 }
 0x5d5   : > { %v5461_v4 = vadd.f32 %v11543_v39, %v5429_v3  ;;  %v5348_v11 = vpop.f32.mrb[241].mxu1  ;;  %v5610_v13 = vpop.f32.mrb[17].mxu0  ;;  %v5436_v3 = vld [vmem:[#allocation3 + $0x141] sm:$0xff] }
 0x5d6   : > { %v5687_v15 = vld [vmem:[#allocation3 + $0xc0] sm:$0xff]  ;;  %v5459_v26 = vadd.f32 %v5427_v21, %v5348_v11  ;;  %v11544_v8 = vpop.f32.mrb[242].mxu1  ;;  %v11578_v31 = vpop.f32.mrb[18].mxu0 }
 0x5d7   : > { %v5719_v16 = vadd.f32 %v11573_v48, %v5687_v15  ;;  %v5685_v17 = vld [vmem:[#allocation3 + $0xa8] sm:$0xff]  ;;  %5493 = vst.msk [vmem:[#allocation3 + $0xf1] sm:$0xff] %vm553_vm1, %v5461_v4  ;;  %v5462_v42 = vadd.f32 %v11544_v8, %v5430_v30  ;;  %v5351_v18 = vpop.f32.mrb[243].mxu1  ;;  %v5613_v23 = vpop.f32.mrb[19].mxu0 }
 0x5d8   : > { %v5717_v38 = vadd.f32 %v5685_v17, %v5594_v49  ;;  %v5688_v45 = vld [vmem:[#allocation3 + $0xc8] sm:$0xff]  ;;  %5491 = vst.msk [vmem:[#allocation3 + $0xd9] sm:$0xff] %vm553_vm1, %v5459_v26  ;;  %v5460_v7 = vadd.f32 %v5428_v22, %v5351_v18 }
 0x5d9   : > { %5751 = vst.msk [vmem:[#allocation3 + $0xc0] sm:$0xff] %vm553_vm1, %v5719_v16  ;;  %v5720_v25 = vadd.f32 %v11574_v12, %v5688_v45  ;;  %v5686_v28 = vld [vmem:[#allocation3 + $0xb0] sm:$0xff]  ;;  %5494 = vst.msk [vmem:[#allocation3 + $0xf9] sm:$0xff] %vm553_vm1, %v5462_v42  ;;  %v5441_v30 = vld [vmem:[#allocation3 + $0x181] sm:$0xff] }
 0x5da   : > { %5749 = vst.msk [vmem:[#allocation3 + $0xa8] sm:$0xff] %vm553_vm1, %v5717_v38  ;;  %v5718_v32 = vadd.f32 %v5686_v28, %v5597_v43  ;;  %5492 = vst.msk [vmem:[#allocation3 + $0xe1] sm:$0xff] %vm553_vm1, %v5460_v7  ;;  %v5439_v42 = vld [vmem:[#allocation3 + $0x169] sm:$0xff] }
 0x5db   : > { %5752 = vst.msk [vmem:[#allocation3 + $0xc8] sm:$0xff] %vm553_vm1, %v5720_v25  ;;  %v5442_v45 = vld [vmem:[#allocation3 + $0x189] sm:$0xff] }
 0x5dc   : > { %5750 = vst.msk [vmem:[#allocation3 + $0xb0] sm:$0xff] %vm553_vm1, %v5718_v32  ;;  %v11547_v33 = vpop.f32.mrb[244].mxu1  ;;  %v11581_v34 = vpop.f32.mrb[20].mxu0 }
 0x5dd   : > { %v5465_v5 = vadd.f32 %v11547_v33, %v5433_v60  ;;  %v5364_v50 = vpop.f32.mrb[245].mxu1  ;;  %v5626_v35 = vpop.f32.mrb[21].mxu0  ;;  %v5440_v60 = vld [vmem:[#allocation3 + $0x171] sm:$0xff] }
 0x5de   : > { %v5691_v56 = vld [vmem:[#allocation3 + $0xf0] sm:$0xff]  ;;  %v5463_v6 = vadd.f32 %v5431_v51, %v5364_v50  ;;  %v11548_v36 = vpop.f32.mrb[246].mxu1  ;;  %v11582_v37 = vpop.f32.mrb[22].mxu0 }
 0x5df   : > { %v5723_v54 = vadd.f32 %v11577_v9, %v5691_v56  ;;  %v5689_v29 = vld [vmem:[#allocation3 + $0xd8] sm:$0xff]  ;;  %5497 = vst.msk [vmem:[#allocation3 + $0x121] sm:$0xff] %vm553_vm1, %v5465_v5  ;;  %v5466_v41 = vadd.f32 %v11548_v36, %v5434_v40  ;;  %v5367_v46 = vpop.f32.mrb[247].mxu1  ;;  %v5629_v48 = vpop.f32.mrb[23].mxu0  ;;  %v5935_v36 = vld [vmem:[#allocation3 + $0x2] sm:$0xff] }
 0x5e0   : > { %v5721_v44 = vadd.f32 %v5689_v29, %v5610_v13  ;;  %v5692_v57 = vld [vmem:[#allocation3 + $0xf8] sm:$0xff]  ;;  %5495 = vst.msk [vmem:[#allocation3 + $0x109] sm:$0xff] %vm553_vm1, %v5463_v6  ;;  %v5464_v62 = vadd.f32 %v5432_v47, %v5367_v46  ;;  %v5936_v47 = vld [vmem:[#allocation3 + $0xa] sm:$0xff] }
 0x5e1   : > { %5755 = vst.msk [vmem:[#allocation3 + $0xf0] sm:$0xff] %vm553_vm1, %v5723_v54  ;;  %v5724_v49 = vadd.f32 %v11578_v31, %v5692_v57  ;;  %v5690_v59 = vld [vmem:[#allocation3 + $0xe0] sm:$0xff]  ;;  %5498 = vst.msk [vmem:[#allocation3 + $0x129] sm:$0xff] %vm553_vm1, %v5466_v41 }
 0x5e2   : > { %5753 = vst.msk [vmem:[#allocation3 + $0xd8] sm:$0xff] %vm553_vm1, %v5721_v44  ;;  %v5722_v10 = vadd.f32 %v5690_v59, %v5613_v23  ;;  %5496 = vst.msk [vmem:[#allocation3 + $0x111] sm:$0xff] %vm553_vm1, %v5464_v62  ;;  %v5938_v62 = vld [vmem:[#allocation3 + $0x22] sm:$0xff] }
 0x5e3   : > { %5756 = vst.msk [vmem:[#allocation3 + $0xf8] sm:$0xff] %vm553_vm1, %v5724_v49 }
 0x5e4   : > { %5754 = vst.msk [vmem:[#allocation3 + $0xe0] sm:$0xff] %vm553_vm1, %v5722_v10  ;;  %v11551_v52 = vpop.f32.mrb[248].mxu1  ;;  %v11585_v12 = vpop.f32.mrb[24].mxu0 }
 0x5e5   : > { %v5469_v55 = vadd.f32 %v11551_v52, %v5437_v53  ;;  %v5380_v14 = vpop.f32.mrb[249].mxu1  ;;  %v5642_v24 = vpop.f32.mrb[25].mxu0 }
 0x5e6   : > { %v5695_v63 = vld [vmem:[#allocation3 + $0x120] sm:$0xff]  ;;  %v5467_v43 = vadd.f32 %v5435_v27, %v5380_v14  ;;  %v11552_v20 = vpop.f32.mrb[250].mxu1  ;;  %v11586_v1 = vpop.f32.mrb[26].mxu0 }
 0x5e7   : > { %v5727_v58 = vadd.f32 %v11581_v34, %v5695_v63  ;;  %v5693_v2 = vld [vmem:[#allocation3 + $0x108] sm:$0xff]  ;;  %5501 = vst.msk [vmem:[#allocation3 + $0x151] sm:$0xff] %vm553_vm1, %v5469_v55  ;;  %v5470_v61 = vadd.f32 %v11552_v20, %v5438_v0  ;;  %v5383_v39 = vpop.f32.mrb[251].mxu1  ;;  %v5645_v9 = vpop.f32.mrb[27].mxu0 }
 0x5e8   : > { %v5725_v4 = vadd.f32 %v5693_v2, %v5626_v35  ;;  %v5696_v11 = vld [vmem:[#allocation3 + $0x128] sm:$0xff]  ;;  %5499 = vst.msk [vmem:[#allocation3 + $0x139] sm:$0xff] %vm553_vm1, %v5467_v43  ;;  %v5468_v21 = vadd.f32 %v5436_v3, %v5383_v39 }
 0x5e9   : > { %5759 = vst.msk [vmem:[#allocation3 + $0x120] sm:$0xff] %vm553_vm1, %v5727_v58  ;;  %v5728_v13 = vadd.f32 %v11582_v37, %v5696_v11  ;;  %v5694_v15 = vld [vmem:[#allocation3 + $0x110] sm:$0xff]  ;;  %5502 = vst.msk [vmem:[#allocation3 + $0x159] sm:$0xff] %vm553_vm1, %v5470_v61  ;;  %v5937_v37 = vld [vmem:[#allocation3 + $0x1a] sm:$0xff] }
 0x5ea   : > { %5757 = vst.msk [vmem:[#allocation3 + $0x108] sm:$0xff] %vm553_vm1, %v5725_v4  ;;  %v5726_v26 = vadd.f32 %v5694_v15, %v5629_v48  ;;  %5500 = vst.msk [vmem:[#allocation3 + $0x141] sm:$0xff] %vm553_vm1, %v5468_v21  ;;  %v5941_v0 = vld [vmem:[#allocation3 + $0x4a] sm:$0xff]  ;;  %v5939_v61 = vld [vmem:[#allocation3 + $0x32] sm:$0xff] }
 0x5eb   : > { %5760 = vst.msk [vmem:[#allocation3 + $0x128] sm:$0xff] %vm553_vm1, %v5728_v13  ;;  %v5942_v11 = vld [vmem:[#allocation3 + $0x52] sm:$0xff] }
 0x5ec   : > { %5758 = vst.msk [vmem:[#allocation3 + $0x110] sm:$0xff] %vm553_vm1, %v5726_v26  ;;  %v11555_v8 = vpop.f32.mrb[252].mxu1  ;;  %v11589_v31 = vpop.f32.mrb[28].mxu0 }
 0x5ed   : > { %v5473_v16 = vadd.f32 %v11555_v8, %v5441_v30  ;;  %v5396_v17 = vpop.f32.mrb[253].mxu1  ;;  %v5658_v18 = vpop.f32.mrb[29].mxu0  ;;  %v5940_v30 = vld [vmem:[#allocation3 + $0x3a] sm:$0xff] }
 0x5ee   : > { %v5699_v22 = vld [vmem:[#allocation3 + $0x150] sm:$0xff]  ;;  %v5471_v23 = vadd.f32 %v5439_v42, %v5396_v17  ;;  %v11556_v38 = vpop.f32.mrb[254].mxu1  ;;  %v11590_v7 = vpop.f32.mrb[30].mxu0 }
 0x5ef   : > { %v5731_v25 = vadd.f32 %v11585_v12, %v5699_v22  ;;  %v5697_v28 = vld [vmem:[#allocation3 + $0x138] sm:$0xff]  ;;  %5505 = vst.msk [vmem:[#allocation3 + $0x181] sm:$0xff] %vm553_vm1, %v5473_v16  ;;  %v5474_v32 = vadd.f32 %v11556_v38, %v5442_v45  ;;  %v5399_v33 = vpop.f32.mrb[255].mxu1  ;;  %v5661_v34 = vpop.f32.mrb[31].mxu0 }
 0x5f0   : > { %v5729_v5 = vadd.f32 %v5697_v28, %v5642_v24  ;;  %v5700_v50 = vld [vmem:[#allocation3 + $0x158] sm:$0xff]  ;;  %5503 = vst.msk [vmem:[#allocation3 + $0x169] sm:$0xff] %vm553_vm1, %v5471_v23  ;;  %v5472_v51 = vadd.f32 %v5440_v60, %v5399_v33 }
 0x5f1   : > { %5763 = vst.msk [vmem:[#allocation3 + $0x150] sm:$0xff] %vm553_vm1, %v5731_v25  ;;  %v5732_v35 = vadd.f32 %v11586_v1, %v5700_v50  ;;  %v5698_v56 = vld [vmem:[#allocation3 + $0x140] sm:$0xff]  ;;  %5506 = vst.msk [vmem:[#allocation3 + $0x189] sm:$0xff] %vm553_vm1, %v5474_v32 }
 0x5f2   : > { %5761 = vst.msk [vmem:[#allocation3 + $0x138] sm:$0xff] %vm553_vm1, %v5729_v5  ;;  %v5730_v6 = vadd.f32 %v5698_v56, %v5645_v9  ;;  %5504 = vst.msk [vmem:[#allocation3 + $0x171] sm:$0xff] %vm553_vm1, %v5472_v51  ;;  %v5945_v28 = vld [vmem:[#allocation3 + $0x7a] sm:$0xff]  ;;  %v5943_v5 = vld [vmem:[#allocation3 + $0x62] sm:$0xff] }
 0x5f3   : > { %5764 = vst.msk [vmem:[#allocation3 + $0x158] sm:$0xff] %vm553_vm1, %v5732_v35 }
 0x5f4   : > { %5762 = vst.msk [vmem:[#allocation3 + $0x140] sm:$0xff] %vm553_vm1, %v5730_v6  ;;  %v11595_v40 = vpop.f32.mrb[0].mxu1  ;;  %v11629_v54 = vpop.f32.mrb[32].mxu0  ;;  %v5946_v6 = vld [vmem:[#allocation3 + $0x82] sm:$0xff] }
 0x5f5   : > { %v5969_v29 = vadd.f32 %v11595_v40, %v5937_v37  ;;  %v5808_v41 = vpop.f32.mrb[1].mxu1  ;;  %v6070_v46 = vpop.f32.mrb[33].mxu0 }
 0x5f6   : > { %v5703_v48 = vld [vmem:[#allocation3 + $0x180] sm:$0xff]  ;;  %v5967_v44 = vadd.f32 %v5935_v36, %v5808_v41  ;;  %v11596_v57 = vpop.f32.mrb[2].mxu1  ;;  %v11630_v49 = vpop.f32.mrb[34].mxu0  ;;  %v5944_v41 = vld [vmem:[#allocation3 + $0x6a] sm:$0xff] }
 0x5f7   : > { %v5735_v59 = vadd.f32 %v11589_v31, %v5703_v48  ;;  %v5701_v10 = vld [vmem:[#allocation3 + $0x168] sm:$0xff]  ;;  %6001 = vst.msk [vmem:[#allocation3 + $0x1a] sm:$0xff] %vm553_vm1, %v5969_v29  ;;  %v5970_v52 = vadd.f32 %v11596_v57, %v5938_v62  ;;  %v5811_v53 = vpop.f32.mrb[3].mxu1  ;;  %v6073_v12 = vpop.f32.mrb[35].mxu0 }
 0x5f8   : > { %v5733_v55 = vadd.f32 %v5701_v10, %v5658_v18  ;;  %v5704_v14 = vld [vmem:[#allocation3 + $0x188] sm:$0xff]  ;;  %5999 = vst.msk [vmem:[#allocation3 + $0x2] sm:$0xff] %vm553_vm1, %v5967_v44  ;;  %v5968_v27 = vadd.f32 %v5936_v47, %v5811_v53 }
 0x5f9   : > { %5767 = vst.msk [vmem:[#allocation3 + $0x180] sm:$0xff] %vm553_vm1, %v5735_v59  ;;  %v5736_v24 = vadd.f32 %v11590_v7, %v5704_v14  ;;  %v5702_v63 = vld [vmem:[#allocation3 + $0x170] sm:$0xff]  ;;  %6002 = vst.msk [vmem:[#allocation3 + $0x22] sm:$0xff] %vm553_vm1, %v5970_v52  ;;  %v12107_v7 = vld [vmem:[%s15437_s13] sm:$0x3f]  }
 0x5fa   : > { %5765 = vst.msk [vmem:[#allocation3 + $0x168] sm:$0xff] %vm553_vm1, %v5733_v55  ;;  %v5734_v43 = vadd.f32 %v5702_v63, %v5661_v34  ;;  %6000 = vst.msk [vmem:[#allocation3 + $0xa] sm:$0xff] %vm553_vm1, %v5968_v27  ;;  %12053 = vmatprep.subr.msk.bf16.mxu0 %vm6969_vm6, %v12107_v7  ;;  %v6971_v33 = vsel %vm6969_vm6, %v12107_v7, 0  ;;  %v5949_v10 = vld [vmem:[#allocation3 + $0xaa] sm:$0xff]  ;;  %v5947_v55 = vld [vmem:[#allocation3 + $0x92] sm:$0xff] }
 0x5fb   : > { %5768 = vst.msk [vmem:[#allocation3 + $0x188] sm:$0xff] %vm553_vm1, %v5736_v24  ;;  %11694 = vmatpush3.bf16.msra.mxu0 %v6971_v33 }
 0x5fc   : > { %5766 = vst.msk [vmem:[#allocation3 + $0x170] sm:$0xff] %vm553_vm1, %v5734_v43  ;;  %v11599_v20 = vpop.f32.mrb[4].mxu1  ;;  %v11633_v1 = vpop.f32.mrb[36].mxu0  ;;  %v5950_v43 = vld [vmem:[#allocation3 + $0xb2] sm:$0xff] }
 0x5fd   : > { %v5973_v58 = vadd.f32 %v11599_v20, %v5941_v0  ;;  %v5824_v2 = vpop.f32.mrb[5].mxu1  ;;  %v6086_v39 = vpop.f32.mrb[37].mxu0 }
 0x5fe   : > { %v6199_v3 = vld [vmem:[#allocation3 + $0x19] sm:$0xff]  ;;  %v5971_v9 = vadd.f32 %v5939_v61, %v5824_v2  ;;  %v11600_v4 = vpop.f32.mrb[6].mxu1  ;;  %v11634_v21 = vpop.f32.mrb[38].mxu0 }
 0x5ff   : > { %v6231_v13 = vadd.f32 %v11629_v54, %v6199_v3  ;;  %v6197_v15 = vld [vmem:[#allocation3 + $0x1] sm:$0xff]  ;;  %6005 = vst.msk [vmem:[#allocation3 + $0x4a] sm:$0xff] %vm553_vm1, %v5973_v58  ;;  %v5974_v26 = vadd.f32 %v11600_v4, %v5942_v11  ;;  %v5827_v8 = vpop.f32.mrb[7].mxu1  ;;  %v6089_v31 = vpop.f32.mrb[39].mxu0 }
 0x600   : > { %v6229_v16 = vadd.f32 %v6197_v15, %v6070_v46  ;;  %v6200_v17 = vld [vmem:[#allocation3 + $0x21] sm:$0xff]  ;;  %6003 = vst.msk [vmem:[#allocation3 + $0x32] sm:$0xff] %vm553_vm1, %v5971_v9  ;;  %v5972_v42 = vadd.f32 %v5940_v30, %v5827_v8 }
 0x601   : > { %6263 = vst.msk [vmem:[#allocation3 + $0x19] sm:$0xff] %vm553_vm1, %v6231_v13  ;;  %v6232_v18 = vadd.f32 %v11630_v49, %v6200_v17  ;;  %v6198_v22 = vld [vmem:[#allocation3 + $0x9] sm:$0xff]  ;;  %6006 = vst.msk [vmem:[#allocation3 + $0x52] sm:$0xff] %vm553_vm1, %v5974_v26  ;;  %v5948_v61 = vld [vmem:[#allocation3 + $0x9a] sm:$0xff] }
 0x602   : > { %v14184_v23 = vld [vmem:[#allocation3 + $0x181] sm:$0xff]  ;;  %v14186_v38 = vld [vmem:[#allocation3 + $0x189] sm:$0xff]  ;;  %6261 = vst.msk [vmem:[#allocation3 + $0x1] sm:$0xff] %vm553_vm1, %v6229_v16  ;;  %v6230_v45 = vadd.f32 %v6198_v22, %v6073_v12  ;;  %6004 = vst.msk [vmem:[#allocation3 + $0x3a] sm:$0xff] %vm553_vm1, %v5972_v42 }
 0x603   : > { %7231 = vst.msk [vmem:[#allocation3 + $0x188] sm:$0xff] %vm553_vm1, %v12172_v19  ;;  %7230 = vst.msk [vmem:[#allocation3 + $0x180] sm:$0xff] %vm553_vm1, %v12172_v19  ;;  %v5953_v26 = vld [vmem:[#allocation3 + $0xda] sm:$0xff]  ;;  %v5951_v16 = vld [vmem:[#allocation3 + $0xc2] sm:$0xff] }
 0x604   : > { %7232 = vst.msk [vmem:[#allocation3 + $0x190] sm:$0x3] %vm1015_vm4, %v12172_v19  ;;  %v11603_v25 = vpop.f32.mrb[8].mxu1  ;;  %v11637_v32 = vpop.f32.mrb[40].mxu0 }
 0x605   : > { %6264 = vst.msk [vmem:[#allocation3 + $0x21] sm:$0xff] %vm553_vm1, %v6232_v18  ;;  %6262 = vst.msk [vmem:[#allocation3 + $0x9] sm:$0xff] %vm553_vm1, %v6230_v45  ;;  %v5977_v60 = vadd.f32 %v11603_v25, %v5945_v28  ;;  %v5840_v34 = vpop.f32.mrb[9].mxu1  ;;  %v6102_v50 = vpop.f32.mrb[41].mxu0  ;;  %v5954_v45 = vld [vmem:[#allocation3 + $0xe2] sm:$0xff] }
 0x606   : > { %7184 = vst.msk [vmem:[#allocation3 + $0x10] sm:$0x3] %vm1015_vm4, %v12172_v19  ;;  %v6203_v51 = vld [vmem:[#allocation3 + $0x49] sm:$0xff]  ;;  %v5975_v35 = vadd.f32 %v5943_v5, %v5840_v34  ;;  %v11604_v56 = vpop.f32.mrb[10].mxu1  ;;  %v11638_v36 = vpop.f32.mrb[42].mxu0 }
 0x607   : > { %v6235_v40 = vadd.f32 %v11633_v1, %v6203_v51  ;;  %v6201_v37 = vld [vmem:[#allocation3 + $0x31] sm:$0xff]  ;;  %6009 = vst.msk [vmem:[#allocation3 + $0x7a] sm:$0xff] %vm553_vm1, %v5977_v60  ;;  %v5978_v54 = vadd.f32 %v11604_v56, %v5946_v6  ;;  %v5843_v29 = vpop.f32.mrb[11].mxu1  ;;  %v6105_v46 = vpop.f32.mrb[43].mxu0 }
 0x608   : > { %v6233_v47 = vadd.f32 %v6201_v37, %v6086_v39  ;;  %v6204_v48 = vld [vmem:[#allocation3 + $0x51] sm:$0xff]  ;;  %6007 = vst.msk [vmem:[#allocation3 + $0x62] sm:$0xff] %vm553_vm1, %v5975_v35  ;;  %v5976_v44 = vadd.f32 %v5944_v41, %v5843_v29 }
 0x609   : > { %6267 = vst.msk [vmem:[#allocation3 + $0x49] sm:$0xff] %vm553_vm1, %v6235_v40  ;;  %v6236_v57 = vadd.f32 %v11634_v21, %v6204_v48  ;;  %v6202_v62 = vld [vmem:[#allocation3 + $0x39] sm:$0xff]  ;;  %6010 = vst.msk [vmem:[#allocation3 + $0x82] sm:$0xff] %vm553_vm1, %v5978_v54  ;;  %v5952_v60 = vld [vmem:[#allocation3 + $0xca] sm:$0xff] }
 0x60a   : > { %6265 = vst.msk [vmem:[#allocation3 + $0x31] sm:$0xff] %vm553_vm1, %v6233_v47  ;;  %v6234_v49 = vadd.f32 %v6202_v62, %v6089_v31  ;;  %6008 = vst.msk [vmem:[#allocation3 + $0x6a] sm:$0xff] %vm553_vm1, %v5976_v44  ;;  %v5957_v40 = vld [vmem:[#allocation3 + $0x10a] sm:$0xff]  ;;  %v5955_v41 = vld [vmem:[#allocation3 + $0xf2] sm:$0xff] }
 0x60b   : > { %6268 = vst.msk [vmem:[#allocation3 + $0x51] sm:$0xff] %vm553_vm1, %v6236_v57  ;;  %v5958_v57 = vld [vmem:[#allocation3 + $0x112] sm:$0xff] }
 0x60c   : > { %6266 = vst.msk [vmem:[#allocation3 + $0x39] sm:$0xff] %vm553_vm1, %v6234_v49  ;;  %v11607_v59 = vpop.f32.mrb[12].mxu1  ;;  %v11641_v52 = vpop.f32.mrb[44].mxu0 }
 0x60d   : > { %v5981_v53 = vadd.f32 %v11607_v59, %v5949_v10  ;;  %v5856_v12 = vpop.f32.mrb[13].mxu1  ;;  %v6118_v14 = vpop.f32.mrb[45].mxu0 }
 0x60e   : > { %v6207_v27 = vld [vmem:[#allocation3 + $0x79] sm:$0xff]  ;;  %v5979_v24 = vadd.f32 %v5947_v55, %v5856_v12  ;;  %v11608_v63 = vpop.f32.mrb[14].mxu1  ;;  %v11642_v20 = vpop.f32.mrb[46].mxu0 }
 0x60f   : > { %v6239_v0 = vadd.f32 %v11637_v32, %v6207_v27  ;;  %v6205_v1 = vld [vmem:[#allocation3 + $0x61] sm:$0xff]  ;;  %6013 = vst.msk [vmem:[#allocation3 + $0xaa] sm:$0xff] %vm553_vm1, %v5981_v53  ;;  %v5982_v58 = vadd.f32 %v11608_v63, %v5950_v43  ;;  %v5859_v2 = vpop.f32.mrb[15].mxu1  ;;  %v6121_v39 = vpop.f32.mrb[47].mxu0 }
 0x610   : > { %v6237_v3 = vadd.f32 %v6205_v1, %v6102_v50  ;;  %v6208_v9 = vld [vmem:[#allocation3 + $0x81] sm:$0xff]  ;;  %6011 = vst.msk [vmem:[#allocation3 + $0x92] sm:$0xff] %vm553_vm1, %v5979_v24  ;;  %v5980_v4 = vadd.f32 %v5948_v61, %v5859_v2 }
 0x611   : > { %6271 = vst.msk [vmem:[#allocation3 + $0x79] sm:$0xff] %vm553_vm1, %v6239_v0  ;;  %v6240_v11 = vadd.f32 %v11638_v36, %v6208_v9  ;;  %v6206_v21 = vld [vmem:[#allocation3 + $0x69] sm:$0xff]  ;;  %6014 = vst.msk [vmem:[#allocation3 + $0xb2] sm:$0xff] %vm553_vm1, %v5982_v58  ;;  %v5956_v53 = vld [vmem:[#allocation3 + $0xfa] sm:$0xff] }
 0x612   : > { %6269 = vst.msk [vmem:[#allocation3 + $0x61] sm:$0xff] %vm553_vm1, %v6237_v3  ;;  %v6238_v13 = vadd.f32 %v6206_v21, %v6105_v46  ;;  %6012 = vst.msk [vmem:[#allocation3 + $0x9a] sm:$0xff] %vm553_vm1, %v5980_v4  ;;  %v5961_v0 = vld [vmem:[#allocation3 + $0x13a] sm:$0xff]  ;;  %v5959_v61 = vld [vmem:[#allocation3 + $0x122] sm:$0xff] }
 0x613   : > { %6272 = vst.msk [vmem:[#allocation3 + $0x81] sm:$0xff] %vm553_vm1, %v6240_v11  ;;  %v5962_v11 = vld [vmem:[#allocation3 + $0x142] sm:$0xff] }
 0x614   : > { %6270 = vst.msk [vmem:[#allocation3 + $0x69] sm:$0xff] %vm553_vm1, %v6238_v13  ;;  %v11611_v15 = vpop.f32.mrb[16].mxu1  ;;  %v11645_v8 = vpop.f32.mrb[48].mxu0 }
 0x615   : > { %v5985_v30 = vadd.f32 %v11611_v15, %v5953_v26  ;;  %v5872_v31 = vpop.f32.mrb[17].mxu1  ;;  %v6134_v17 = vpop.f32.mrb[49].mxu0 }
 0x616   : > { %v6211_v42 = vld [vmem:[#allocation3 + $0xa9] sm:$0xff]  ;;  %v5983_v18 = vadd.f32 %v5951_v16, %v5872_v31  ;;  %v11612_v22 = vpop.f32.mrb[18].mxu1  ;;  %v11646_v7 = vpop.f32.mrb[50].mxu0 }
 0x617   : > { %v6243_v25 = vadd.f32 %v11641_v52, %v6211_v42  ;;  %v6209_v28 = vld [vmem:[#allocation3 + $0x91] sm:$0xff]  ;;  %6017 = vst.msk [vmem:[#allocation3 + $0xda] sm:$0xff] %vm553_vm1, %v5985_v30  ;;  %v5986_v32 = vadd.f32 %v11612_v22, %v5954_v45  ;;  %v5875_v33 = vpop.f32.mrb[19].mxu1  ;;  %v6137_v34 = vpop.f32.mrb[51].mxu0 }
 0x618   : > { %v6241_v5 = vadd.f32 %v6209_v28, %v6118_v14  ;;  %v6212_v50 = vld [vmem:[#allocation3 + $0xb1] sm:$0xff]  ;;  %6015 = vst.msk [vmem:[#allocation3 + $0xc2] sm:$0xff] %vm553_vm1, %v5983_v18  ;;  %v5984_v51 = vadd.f32 %v5952_v60, %v5875_v33 }
 0x619   : > { %6275 = vst.msk [vmem:[#allocation3 + $0xa9] sm:$0xff] %vm553_vm1, %v6243_v25  ;;  %v6244_v35 = vadd.f32 %v11642_v20, %v6212_v50  ;;  %v6210_v56 = vld [vmem:[#allocation3 + $0x99] sm:$0xff]  ;;  %6018 = vst.msk [vmem:[#allocation3 + $0xe2] sm:$0xff] %vm553_vm1, %v5986_v32  ;;  %v5960_v30 = vld [vmem:[#allocation3 + $0x12a] sm:$0xff] }
 0x61a   : > { %6273 = vst.msk [vmem:[#allocation3 + $0x91] sm:$0xff] %vm553_vm1, %v6241_v5  ;;  %v6242_v6 = vadd.f32 %v6210_v56, %v6121_v39  ;;  %6016 = vst.msk [vmem:[#allocation3 + $0xca] sm:$0xff] %vm553_vm1, %v5984_v51  ;;  %v5965_v25 = vld [vmem:[#allocation3 + $0x16a] sm:$0xff]  ;;  %v5963_v60 = vld [vmem:[#allocation3 + $0x152] sm:$0xff] }
 0x61b   : > { %6276 = vst.msk [vmem:[#allocation3 + $0xb1] sm:$0xff] %vm553_vm1, %v6244_v35  ;;  %v5966_v35 = vld [vmem:[#allocation3 + $0x172] sm:$0xff] }
 0x61c   : > { %6274 = vst.msk [vmem:[#allocation3 + $0x99] sm:$0xff] %vm553_vm1, %v6242_v6  ;;  %v11615_v36 = vpop.f32.mrb[20].mxu1  ;;  %v11649_v37 = vpop.f32.mrb[52].mxu0 }
 0x61d   : > { %v5989_v54 = vadd.f32 %v11615_v36, %v5957_v40  ;;  %v5888_v29 = vpop.f32.mrb[21].mxu1  ;;  %v6150_v46 = vpop.f32.mrb[53].mxu0 }
 0x61e   : > { %v6215_v47 = vld [vmem:[#allocation3 + $0xd9] sm:$0xff]  ;;  %v5987_v48 = vadd.f32 %v5955_v41, %v5888_v29  ;;  %v11616_v44 = vpop.f32.mrb[22].mxu1  ;;  %v11650_v62 = vpop.f32.mrb[54].mxu0 }
 0x61f   : > { %v6247_v49 = vadd.f32 %v11645_v8, %v6215_v47  ;;  %v6213_v59 = vld [vmem:[#allocation3 + $0xc1] sm:$0xff]  ;;  %6021 = vst.msk [vmem:[#allocation3 + $0x10a] sm:$0xff] %vm553_vm1, %v5989_v54  ;;  %v5990_v10 = vadd.f32 %v11616_v44, %v5958_v57  ;;  %v5891_v52 = vpop.f32.mrb[23].mxu1  ;;  %v6153_v12 = vpop.f32.mrb[55].mxu0 }
 0x620   : > { %v6245_v55 = vadd.f32 %v6213_v59, %v6134_v17  ;;  %v6216_v14 = vld [vmem:[#allocation3 + $0xe1] sm:$0xff]  ;;  %6019 = vst.msk [vmem:[#allocation3 + $0xf2] sm:$0xff] %vm553_vm1, %v5987_v48  ;;  %v5988_v27 = vadd.f32 %v5956_v53, %v5891_v52 }
 0x621   : > { %6279 = vst.msk [vmem:[#allocation3 + $0xd9] sm:$0xff] %vm553_vm1, %v6247_v49  ;;  %v6248_v24 = vadd.f32 %v11646_v7, %v6216_v14  ;;  %v6214_v63 = vld [vmem:[#allocation3 + $0xc9] sm:$0xff]  ;;  %6022 = vst.msk [vmem:[#allocation3 + $0x112] sm:$0xff] %vm553_vm1, %v5990_v10  ;;  %v5964_v54 = vld [vmem:[#allocation3 + $0x15a] sm:$0xff] }
 0x622   : > { %6277 = vst.msk [vmem:[#allocation3 + $0xc1] sm:$0xff] %vm553_vm1, %v6245_v55  ;;  %v6246_v43 = vadd.f32 %v6214_v63, %v6137_v34  ;;  %6020 = vst.msk [vmem:[#allocation3 + $0xfa] sm:$0xff] %vm553_vm1, %v5988_v27  ;;  %v6461_v49 = vld [vmem:[#allocation3 + $0x18] sm:$0xff]  ;;  %v6459_v52 = vld [vmem:[#allocation3] sm:$0xff] }
 0x623   : > { %6280 = vst.msk [vmem:[#allocation3 + $0xe1] sm:$0xff] %vm553_vm1, %v6248_v24  ;;  %v6462_v14 = vld [vmem:[#allocation3 + $0x20] sm:$0xff] }
 0x624   : > { %6278 = vst.msk [vmem:[#allocation3 + $0xc9] sm:$0xff] %vm553_vm1, %v6246_v43  ;;  %v11619_v20 = vpop.f32.mrb[24].mxu1  ;;  %v11653_v1 = vpop.f32.mrb[56].mxu0 }
 0x625   : > { %v5993_v58 = vadd.f32 %v11619_v20, %v5961_v0  ;;  %v5904_v2 = vpop.f32.mrb[25].mxu1  ;;  %v6166_v39 = vpop.f32.mrb[57].mxu0  ;;  %v6460_v20 = vld [vmem:[#allocation3 + $0x8] sm:$0xff] }
 0x626   : > { %v6219_v3 = vld [vmem:[#allocation3 + $0x109] sm:$0xff]  ;;  %v5991_v9 = vadd.f32 %v5959_v61, %v5904_v2  ;;  %v11620_v4 = vpop.f32.mrb[26].mxu1  ;;  %v11654_v21 = vpop.f32.mrb[58].mxu0 }
 0x627   : > { %v6251_v13 = vadd.f32 %v11649_v37, %v6219_v3  ;;  %v6217_v15 = vld [vmem:[#allocation3 + $0xf1] sm:$0xff]  ;;  %6025 = vst.msk [vmem:[#allocation3 + $0x13a] sm:$0xff] %vm553_vm1, %v5993_v58  ;;  %v5994_v26 = vadd.f32 %v11620_v4, %v5962_v11  ;;  %v5907_v8 = vpop.f32.mrb[27].mxu1  ;;  %v6169_v31 = vpop.f32.mrb[59].mxu0 }
 0x628   : > { %v6249_v16 = vadd.f32 %v6217_v15, %v6150_v46  ;;  %v6220_v17 = vld [vmem:[#allocation3 + $0x111] sm:$0xff]  ;;  %6023 = vst.msk [vmem:[#allocation3 + $0x122] sm:$0xff] %vm553_vm1, %v5991_v9  ;;  %v5992_v42 = vadd.f32 %v5960_v30, %v5907_v8  ;;  %v6465_v9 = vld [vmem:[#allocation3 + $0x48] sm:$0xff] }
 0x629   : > { %6283 = vst.msk [vmem:[#allocation3 + $0x109] sm:$0xff] %vm553_vm1, %v6251_v13  ;;  %v6252_v18 = vadd.f32 %v11650_v62, %v6220_v17  ;;  %v6218_v22 = vld [vmem:[#allocation3 + $0xf9] sm:$0xff]  ;;  %6026 = vst.msk [vmem:[#allocation3 + $0x142] sm:$0xff] %vm553_vm1, %v5994_v26  ;;  %v6466_v26 = vld [vmem:[#allocation3 + $0x50] sm:$0xff] }
 0x62a   : > { %6281 = vst.msk [vmem:[#allocation3 + $0xf1] sm:$0xff] %vm553_vm1, %v6249_v16  ;;  %v6250_v45 = vadd.f32 %v6218_v22, %v6153_v12  ;;  %6024 = vst.msk [vmem:[#allocation3 + $0x12a] sm:$0xff] %vm553_vm1, %v5992_v42  ;;  %v6469_v22 = vld [vmem:[#allocation3 + $0x78] sm:$0xff] }
 0x62b   : > { %6284 = vst.msk [vmem:[#allocation3 + $0x111] sm:$0xff] %vm553_vm1, %v6252_v18 }
 0x62c   : > { %6282 = vst.msk [vmem:[#allocation3 + $0xf9] sm:$0xff] %vm553_vm1, %v6250_v45  ;;  %v11623_v7 = vpop.f32.mrb[28].mxu1  ;;  %v11657_v28 = vpop.f32.mrb[60].mxu0 }
 0x62d   : > { %v5997_v32 = vadd.f32 %v11623_v7, %v5965_v25  ;;  %v5920_v33 = vpop.f32.mrb[29].mxu1  ;;  %v6182_v34 = vpop.f32.mrb[61].mxu0  ;;  %v6467_v25 = vld [vmem:[#allocation3 + $0x60] sm:$0xff] }
 0x62e   : > { %v6223_v5 = vld [vmem:[#allocation3 + $0x139] sm:$0xff]  ;;  %v5995_v50 = vadd.f32 %v5963_v60, %v5920_v33  ;;  %v11624_v51 = vpop.f32.mrb[30].mxu1  ;;  %v11658_v56 = vpop.f32.mrb[62].mxu0 }
 0x62f   : > { %v6255_v6 = vadd.f32 %v11653_v1, %v6223_v5  ;;  %v6221_v36 = vld [vmem:[#allocation3 + $0x121] sm:$0xff]  ;;  %6029 = vst.msk [vmem:[#allocation3 + $0x16a] sm:$0xff] %vm553_vm1, %v5997_v32  ;;  %v5998_v40 = vadd.f32 %v11624_v51, %v5966_v35  ;;  %v5923_v37 = vpop.f32.mrb[31].mxu1  ;;  %v6185_v29 = vpop.f32.mrb[63].mxu0 }
 0x630   : > { %v6253_v41 = vadd.f32 %v6221_v36, %v6166_v39  ;;  %v6224_v46 = vld [vmem:[#allocation3 + $0x141] sm:$0xff]  ;;  %6027 = vst.msk [vmem:[#allocation3 + $0x152] sm:$0xff] %vm553_vm1, %v5995_v50  ;;  %v5996_v47 = vadd.f32 %v5964_v54, %v5923_v37 }
 0x631   : > { %6287 = vst.msk [vmem:[#allocation3 + $0x139] sm:$0xff] %vm553_vm1, %v6255_v6  ;;  %v6256_v48 = vadd.f32 %v11654_v21, %v6224_v46  ;;  %v6222_v44 = vld [vmem:[#allocation3 + $0x129] sm:$0xff]  ;;  %6030 = vst.msk [vmem:[#allocation3 + $0x172] sm:$0xff] %vm553_vm1, %v5998_v40  ;;  %v6470_v33 = vld [vmem:[#allocation3 + $0x80] sm:$0xff] }
 0x632   : > { %6285 = vst.msk [vmem:[#allocation3 + $0x121] sm:$0xff] %vm553_vm1, %v6253_v41  ;;  %v6254_v57 = vadd.f32 %v6222_v44, %v6169_v31  ;;  %6028 = vst.msk [vmem:[#allocation3 + $0x15a] sm:$0xff] %vm553_vm1, %v5996_v47  ;;  %v6463_v21 = vld [vmem:[#allocation3 + $0x30] sm:$0xff]  ;;  %v6464_v31 = vld [vmem:[#allocation3 + $0x38] sm:$0xff] }
 0x633   : > { %6288 = vst.msk [vmem:[#allocation3 + $0x141] sm:$0xff] %vm553_vm1, %v6256_v48  ;;  %v6468_v5 = vld [vmem:[#allocation3 + $0x68] sm:$0xff]  ;;  %v6474_v47 = vld [vmem:[#allocation3 + $0xb0] sm:$0xff] }
 0x634   : > { %6286 = vst.msk [vmem:[#allocation3 + $0x129] sm:$0xff] %vm553_vm1, %v6254_v57  ;;  %v11663_v62 = vpop.f32.mrb[32].mxu1  ;;  %v6473_v40 = vld [vmem:[#allocation3 + $0xa8] sm:$0xff]  ;;  %v6472_v57 = vld [vmem:[#allocation3 + $0x98] sm:$0xff] }
 0x635   : > { %v6493_v59 = vadd.f32 %v11663_v62, %v6461_v49  ;;  %v6332_v10 = vpop.f32.mrb[33].mxu1 }
 0x636   : > { %v6227_v53 = vld [vmem:[#allocation3 + $0x169] sm:$0xff]  ;;  %v6491_v12 = vadd.f32 %v6459_v52, %v6332_v10  ;;  %v11664_v55 = vpop.f32.mrb[34].mxu1 }
 0x637   : > { %v6259_v27 = vadd.f32 %v11657_v28, %v6227_v53  ;;  %v6225_v24 = vld [vmem:[#allocation3 + $0x151] sm:$0xff]  ;;  %6525 = vst.msk [vmem:[#allocation3 + $0x18] sm:$0xff] %vm553_vm1, %v6493_v59  ;;  %v6494_v63 = vadd.f32 %v11664_v55, %v6462_v14  ;;  %v6335_v43 = vpop.f32.mrb[35].mxu1 }
 0x638   : > { %v6257_v0 = vadd.f32 %v6225_v24, %v6182_v34  ;;  %v6228_v1 = vld [vmem:[#allocation3 + $0x171] sm:$0xff]  ;;  %6523 = vst.msk [vmem:[#allocation3] sm:$0xff] %vm553_vm1, %v6491_v12  ;;  %v6492_v58 = vadd.f32 %v6460_v20, %v6335_v43  ;;  %v6478_v43 = vld [vmem:[#allocation3 + $0xe0] sm:$0xff] }
 0x639   : > { %6291 = vst.msk [vmem:[#allocation3 + $0x169] sm:$0xff] %vm553_vm1, %v6259_v27  ;;  %v6260_v2 = vadd.f32 %v11658_v56, %v6228_v1  ;;  %v6226_v61 = vld [vmem:[#allocation3 + $0x159] sm:$0xff]  ;;  %7182 = vst.msk [vmem:[#allocation3] sm:$0xff] %vm553_vm1, %v12172_v19  ;;  %v6476_v1 = vld [vmem:[#allocation3 + $0xc8] sm:$0xff] }
 0x63a   : > { %6526 = vst.msk [vmem:[#allocation3 + $0x20] sm:$0xff] %vm553_vm1, %v6494_v63  ;;  %6289 = vst.msk [vmem:[#allocation3 + $0x151] sm:$0xff] %vm553_vm1, %v6257_v0  ;;  %v6258_v39 = vadd.f32 %v6226_v61, %v6185_v29  ;;  %v6471_v29 = vld [vmem:[#allocation3 + $0x90] sm:$0xff]  ;;  %v6477_v12 = vld [vmem:[#allocation3 + $0xd8] sm:$0xff] }
 0x63b   : > { %6524 = vst.msk [vmem:[#allocation3 + $0x8] sm:$0xff] %vm553_vm1, %v6492_v58  ;;  %6292 = vst.msk [vmem:[#allocation3 + $0x171] sm:$0xff] %vm553_vm1, %v6260_v2  ;;  %v6475_v27 = vld [vmem:[#allocation3 + $0xc0] sm:$0xff] }
 0x63c   : > { %7183 = vst.msk [vmem:[#allocation3 + $0x8] sm:$0xff] %vm553_vm1, %v12172_v19  ;;  %6290 = vst.msk [vmem:[#allocation3 + $0x159] sm:$0xff] %vm553_vm1, %v6258_v39  ;;  %v11667_v3 = vpop.f32.mrb[36].mxu1 }
 0x63d   : > { %v6497_v4 = vadd.f32 %v11667_v3, %v6465_v9  ;;  %v6348_v11 = vpop.f32.mrb[37].mxu1 }
 0x63e   : > { %v6495_v13 = vadd.f32 %v6463_v21, %v6348_v11  ;;  %v11668_v15 = vpop.f32.mrb[38].mxu1 }
 0x63f   : > { %6529 = vst.msk [vmem:[#allocation3 + $0x48] sm:$0xff] %vm553_vm1, %v6497_v4  ;;  %v6498_v8 = vadd.f32 %v11668_v15, %v6466_v26  ;;  %v6351_v30 = vpop.f32.mrb[39].mxu1  ;;  %v6481_v4 = vld [vmem:[#allocation3 + $0x108] sm:$0xff] }
 0x640   : > { %6527 = vst.msk [vmem:[#allocation3 + $0x30] sm:$0xff] %vm553_vm1, %v6495_v13  ;;  %v6496_v42 = vadd.f32 %v6464_v31, %v6351_v30  ;;  %v6479_v13 = vld [vmem:[#allocation3 + $0xf0] sm:$0xff] }
 0x641   : > { %v6555_v16 = vld [vmem:[#allocation3 + $0x19] sm:$0xff]  ;;  %v6556_v17 = vld [vmem:[#allocation3 + $0x21] sm:$0xff]  ;;  %6530 = vst.msk [vmem:[#allocation3 + $0x50] sm:$0xff] %vm553_vm1, %v6498_v8  ;;  %v6482_v8 = vld [vmem:[#allocation3 + $0x110] sm:$0xff] }
 0x642   : > { %7186 = vst.msk [vmem:[#allocation3 + $0x20] sm:$0xff] %vm553_vm1, %v12172_v19  ;;  %7185 = vst.msk [vmem:[#allocation3 + $0x18] sm:$0xff] %vm553_vm1, %v12172_v19  ;;  %6621 = vrot.lane.b32.xlu1 %v6556_v17, %s15442_s26  ;;  %6619 = vrot.lane.b32.xlu0 %v6555_v16, %s15442_s26  ;;  %v6480_v16 = vld [vmem:[#allocation3 + $0xf8] sm:$0xff] }
 0x643   : > { %7187 = vst.msk [vmem:[#allocation3 + $0x28] sm:$0x3] %vm1015_vm4, %v12172_v19 }
 0x644   : > { %6528 = vst.msk [vmem:[#allocation3 + $0x38] sm:$0xff] %vm553_vm1, %v6496_v42  ;;  %v11671_v18 = vpop.f32.mrb[40].mxu1 }
 0x645   : > { %v6501_v45 = vadd.f32 %v11671_v18, %v6469_v22  ;;  %v6364_v7 = vpop.f32.mrb[41].mxu1 }
 0x646   : > { %v6499_v28 = vadd.f32 %v6467_v25, %v6364_v7  ;;  %v11672_v32 = vpop.f32.mrb[42].mxu1  ;;  %v6485_v25 = vld [vmem:[#allocation3 + $0x138] sm:$0xff] }
 0x647   : > { %6533 = vst.msk [vmem:[#allocation3 + $0x78] sm:$0xff] %vm553_vm1, %v6501_v45  ;;  %v6502_v60 = vadd.f32 %v11672_v32, %v6470_v33  ;;  %v6367_v34 = vpop.f32.mrb[43].mxu1  ;;  %v6483_v33 = vld [vmem:[#allocation3 + $0x120] sm:$0xff] }
 0x648   : > { %v6559_v50 = vld [vmem:[#allocation3 + $0x49] sm:$0xff]  ;;  %v6560_v51 = vld [vmem:[#allocation3 + $0x51] sm:$0xff]  ;;  %6531 = vst.msk [vmem:[#allocation3 + $0x60] sm:$0xff] %vm553_vm1, %v6499_v28  ;;  %v6500_v35 = vadd.f32 %v6468_v5, %v6367_v34  ;;  %v6486_v5 = vld [vmem:[#allocation3 + $0x140] sm:$0xff] }
 0x649   : > { %7192 = vst.msk [vmem:[#allocation3 + $0x50] sm:$0xff] %vm553_vm1, %v12172_v19  ;;  %7191 = vst.msk [vmem:[#allocation3 + $0x48] sm:$0xff] %vm553_vm1, %v12172_v19 }
 0x64a   : > { %7193 = vst.msk [vmem:[#allocation3 + $0x58] sm:$0x3] %vm1015_vm4, %v12172_v19 }
 0x64b   : > { %v6557_v56 = vld [vmem:[#allocation3 + $0x31] sm:$0xff]  ;;  %v6558_v6 = vld [vmem:[#allocation3 + $0x39] sm:$0xff]  ;;  %6534 = vst.msk [vmem:[#allocation3 + $0x80] sm:$0xff] %vm553_vm1, %v6502_v60  ;;  %6532 = vst.msk [vmem:[#allocation3 + $0x68] sm:$0xff] %vm553_vm1, %v6500_v35 }
 0x64c   : > { %7189 = vst.msk [vmem:[#allocation3 + $0x38] sm:$0xff] %vm553_vm1, %v12172_v19  ;;  %7188 = vst.msk [vmem:[#allocation3 + $0x30] sm:$0xff] %vm553_vm1, %v12172_v19  ;;  %6625 = vrot.lane.b32.xlu1 %v6558_v6, %s15442_s26  ;;  %6623 = vrot.lane.b32.xlu0 %v6557_v56, %s15442_s26  ;;  %v11675_v36 = vpop.f32.mrb[44].mxu1  ;;  %v6484_v35 = vld [vmem:[#allocation3 + $0x128] sm:$0xff] }
 0x64d   : > { %7190 = vst.msk [vmem:[#allocation3 + $0x40] sm:$0x3] %vm1015_vm4, %v12172_v19  ;;  %v6505_v37 = vadd.f32 %v11675_v36, %v6473_v40  ;;  %v6380_v54 = vpop.f32.mrb[45].mxu1 }
 0x64e   : > { %v6503_v41 = vadd.f32 %v6471_v29, %v6380_v54  ;;  %v11676_v46 = vpop.f32.mrb[46].mxu1  ;;  %v6489_v29 = vld [vmem:[#allocation3 + $0x168] sm:$0xff] }
 0x64f   : > { %6537 = vst.msk [vmem:[#allocation3 + $0xa8] sm:$0xff] %vm553_vm1, %v6505_v37  ;;  %v6506_v48 = vadd.f32 %v11676_v46, %v6474_v47  ;;  %v6383_v44 = vpop.f32.mrb[47].mxu1  ;;  %v6487_v47 = vld [vmem:[#allocation3 + $0x150] sm:$0xff] }
 0x650   : > { %6629 = vrot.lane.b32.xlu1 %v6560_v51, %s15442_s26  ;;  %6627 = vrot.lane.b32.xlu0 %v6559_v50, %s15442_s26  ;;  %6535 = vst.msk [vmem:[#allocation3 + $0x90] sm:$0xff] %vm553_vm1, %v6503_v41  ;;  %v6504_v59 = vadd.f32 %v6472_v57, %v6383_v44  ;;  %v6490_v57 = vld [vmem:[#allocation3 + $0x170] sm:$0xff] }
 0x651   : > { %6538 = vst.msk [vmem:[#allocation3 + $0xb0] sm:$0xff] %vm553_vm1, %v6506_v48 }
 0x652   : > { %v6563_v62 = vld [vmem:[#allocation3 + $0x79] sm:$0xff]  ;;  %v6564_v49 = vld [vmem:[#allocation3 + $0x81] sm:$0xff]  ;;  %v6562_v52 = vld [vmem:[#allocation3 + $0x69] sm:$0xff]  ;;  %6536 = vst.msk [vmem:[#allocation3 + $0x98] sm:$0xff] %vm553_vm1, %v6504_v59 }
 0x653   : > { %7198 = vst.msk [vmem:[#allocation3 + $0x80] sm:$0xff] %vm553_vm1, %v12172_v19  ;;  %7197 = vst.msk [vmem:[#allocation3 + $0x78] sm:$0xff] %vm553_vm1, %v12172_v19  ;;  %v6561_v10 = vld [vmem:[#allocation3 + $0x61] sm:$0xff]  ;;  %v6488_v59 = vld [vmem:[#allocation3 + $0x158] sm:$0xff] }
 0x654   : > { %7199 = vst.msk [vmem:[#allocation3 + $0x88] sm:$0x3] %vm1015_vm4, %v12172_v19  ;;  %7196 = vst.msk [vmem:[#allocation3 + $0x70] sm:$0x3] %vm1015_vm4, %v12172_v19  ;;  %6633 = vrot.lane.b32.xlu1 %v6562_v52, %s15442_s26  ;;  %6631 = vrot.lane.b32.xlu0 %v6561_v10, %s15442_s26  ;;  %v11679_v53 = vpop.f32.mrb[48].mxu1 }
 0x655   : > { %7195 = vst.msk [vmem:[#allocation3 + $0x68] sm:$0xff] %vm553_vm1, %v12172_v19  ;;  %7194 = vst.msk [vmem:[#allocation3 + $0x60] sm:$0xff] %vm553_vm1, %v12172_v19  ;;  %v6509_v55 = vadd.f32 %v11679_v53, %v6477_v12  ;;  %v6396_v14 = vpop.f32.mrb[49].mxu1 }
 0x656   : > { %v6507_v24 = vadd.f32 %v6475_v27, %v6396_v14  ;;  %v11680_v63 = vpop.f32.mrb[50].mxu1 }
 0x657   : > { %6541 = vst.msk [vmem:[#allocation3 + $0xd8] sm:$0xff] %vm553_vm1, %v6509_v55  ;;  %v6510_v20 = vadd.f32 %v11680_v63, %v6478_v43  ;;  %v6399_v0 = vpop.f32.mrb[51].mxu1  ;;  %v7236_v43 = vld [vmem:[%s15439_s15] sm:$0xf] }
 0x658   : > { %6637 = vrot.lane.b32.xlu1 %v6564_v49, %s15442_s26  ;;  %6635 = vrot.lane.b32.xlu0 %v6563_v62, %s15442_s26  ;;  %v6567_v58 = vld [vmem:[#allocation3 + $0xa9] sm:$0xff]  ;;  %v6568_v2 = vld [vmem:[#allocation3 + $0xb1] sm:$0xff]  ;;  %6539 = vst.msk [vmem:[#allocation3 + $0xc0] sm:$0xff] %vm553_vm1, %v6507_v24  ;;  %v6508_v61 = vadd.f32 %v6476_v1, %v6399_v0 }
 0x659   : > { %7204 = vst.msk [vmem:[#allocation3 + $0xb0] sm:$0xff] %vm553_vm1, %v12172_v19  ;;  %7203 = vst.msk [vmem:[#allocation3 + $0xa8] sm:$0xff] %vm553_vm1, %v12172_v19  ;;  %v6565_v39 = vld [vmem:[#allocation3 + $0x91] sm:$0xff]  ;;  %v6566_v3 = vld [vmem:[#allocation3 + $0x99] sm:$0xff]  ;;  %12054 = vmatprep.subr.msk.bf16.mxu1 %vm1118_vm2, %v7236_v43 }
 0x65a   : > { %7205 = vst.msk [vmem:[#allocation3 + $0xb8] sm:$0x3] %vm1015_vm4, %v12172_v19  ;;  %7202 = vst.msk [vmem:[#allocation3 + $0xa0] sm:$0x3] %vm1015_vm4, %v12172_v19 }
 0x65b   : > { %6542 = vst.msk [vmem:[#allocation3 + $0xe0] sm:$0xff] %vm553_vm1, %v6510_v20  ;;  %7201 = vst.msk [vmem:[#allocation3 + $0x98] sm:$0xff] %vm553_vm1, %v12172_v19 }
 0x65c   : > { %7200 = vst.msk [vmem:[#allocation3 + $0x90] sm:$0xff] %vm553_vm1, %v12172_v19  ;;  %6540 = vst.msk [vmem:[#allocation3 + $0xc8] sm:$0xff] %vm553_vm1, %v6508_v61  ;;  %6641 = vrot.lane.b32.xlu1 %v6566_v3, %s15442_s26  ;;  %6639 = vrot.lane.b32.xlu0 %v6565_v39, %s15442_s26  ;;  %v11683_v9 = vpop.f32.mrb[52].mxu1 }
 0x65d   : > { %v6513_v11 = vadd.f32 %v11683_v9, %v6481_v4  ;;  %v6412_v21 = vpop.f32.mrb[53].mxu1 }
 0x65e   : > { %v6511_v15 = vadd.f32 %v6479_v13, %v6412_v21  ;;  %v11684_v26 = vpop.f32.mrb[54].mxu1 }
 0x65f   : > { %6545 = vst.msk [vmem:[#allocation3 + $0x108] sm:$0xff] %vm553_vm1, %v6513_v11  ;;  %v6514_v30 = vadd.f32 %v11684_v26, %v6482_v8  ;;  %v6415_v31 = vpop.f32.mrb[55].mxu1 }
 0x660   : > { %6645 = vrot.lane.b32.xlu1 %v6568_v2, %s15442_s26  ;;  %6643 = vrot.lane.b32.xlu0 %v6567_v58, %s15442_s26  ;;  %6543 = vst.msk [vmem:[#allocation3 + $0xf0] sm:$0xff] %vm553_vm1, %v6511_v15  ;;  %v6512_v18 = vadd.f32 %v6480_v16, %v6415_v31 }
 0x661   : > { %6546 = vst.msk [vmem:[#allocation3 + $0x110] sm:$0xff] %vm553_vm1, %v6514_v30 }
 0x662   : > { %v6571_v17 = vld [vmem:[#allocation3 + $0xd9] sm:$0xff]  ;;  %v6572_v42 = vld [vmem:[#allocation3 + $0xe1] sm:$0xff]  ;;  %6544 = vst.msk [vmem:[#allocation3 + $0xf8] sm:$0xff] %vm553_vm1, %v6512_v18 }
 0x663   : > { %7210 = vst.msk [vmem:[#allocation3 + $0xe0] sm:$0xff] %vm553_vm1, %v12172_v19  ;;  %7209 = vst.msk [vmem:[#allocation3 + $0xd8] sm:$0xff] %vm553_vm1, %v12172_v19  ;;  %v6569_v22 = vld [vmem:[#allocation3 + $0xc1] sm:$0xff]  ;;  %v6570_v45 = vld [vmem:[#allocation3 + $0xc9] sm:$0xff] }
 0x664   : > { %7211 = vst.msk [vmem:[#allocation3 + $0xe8] sm:$0x3] %vm1015_vm4, %v12172_v19  ;;  %7208 = vst.msk [vmem:[#allocation3 + $0xd0] sm:$0x3] %vm1015_vm4, %v12172_v19  ;;  %6649 = vrot.lane.b32.xlu1 %v6570_v45, %s15442_s26  ;;  %6647 = vrot.lane.b32.xlu0 %v6569_v22, %s15442_s26  ;;  %v11687_v7 = vpop.f32.mrb[56].mxu1 }
 0x665   : > { %7207 = vst.msk [vmem:[#allocation3 + $0xc8] sm:$0xff] %vm553_vm1, %v12172_v19  ;;  %7206 = vst.msk [vmem:[#allocation3 + $0xc0] sm:$0xff] %vm553_vm1, %v12172_v19  ;;  %v6517_v28 = vadd.f32 %v11687_v7, %v6485_v25  ;;  %v6428_v32 = vpop.f32.mrb[57].mxu1 }
 0x666   : > { %v6515_v60 = vadd.f32 %v6483_v33, %v6428_v32  ;;  %v11688_v34 = vpop.f32.mrb[58].mxu1 }
 0x667   : > { %6549 = vst.msk [vmem:[#allocation3 + $0x138] sm:$0xff] %vm553_vm1, %v6517_v28  ;;  %v6518_v50 = vadd.f32 %v11688_v34, %v6486_v5  ;;  %v6431_v51 = vpop.f32.mrb[59].mxu1 }
 0x668   : > { %6653 = vrot.lane.b32.xlu1 %v6572_v42, %s15442_s26  ;;  %6651 = vrot.lane.b32.xlu0 %v6571_v17, %s15442_s26  ;;  %v6575_v56 = vld [vmem:[#allocation3 + $0x109] sm:$0xff]  ;;  %v6576_v6 = vld [vmem:[#allocation3 + $0x111] sm:$0xff]  ;;  %6547 = vst.msk [vmem:[#allocation3 + $0x120] sm:$0xff] %vm553_vm1, %v6515_v60  ;;  %v6516_v36 = vadd.f32 %v6484_v35, %v6431_v51 }
 0x669   : > { %7216 = vst.msk [vmem:[#allocation3 + $0x110] sm:$0xff] %vm553_vm1, %v12172_v19  ;;  %7215 = vst.msk [vmem:[#allocation3 + $0x108] sm:$0xff] %vm553_vm1, %v12172_v19  ;;  %v6573_v40 = vld [vmem:[#allocation3 + $0xf1] sm:$0xff]  ;;  %v6574_v37 = vld [vmem:[#allocation3 + $0xf9] sm:$0xff] }
 0x66a   : > { %7217 = vst.msk [vmem:[#allocation3 + $0x118] sm:$0x3] %vm1015_vm4, %v12172_v19  ;;  %7214 = vst.msk [vmem:[#allocation3 + $0x100] sm:$0x3] %vm1015_vm4, %v12172_v19 }
 0x66b   : > { %6550 = vst.msk [vmem:[#allocation3 + $0x140] sm:$0xff] %vm553_vm1, %v6518_v50  ;;  %7213 = vst.msk [vmem:[#allocation3 + $0xf8] sm:$0xff] %vm553_vm1, %v12172_v19 }
 0x66c   : > { %7212 = vst.msk [vmem:[#allocation3 + $0xf0] sm:$0xff] %vm553_vm1, %v12172_v19  ;;  %6548 = vst.msk [vmem:[#allocation3 + $0x128] sm:$0xff] %vm553_vm1, %v6516_v36  ;;  %6657 = vrot.lane.b32.xlu1 %v6574_v37, %s15442_s26  ;;  %6655 = vrot.lane.b32.xlu0 %v6573_v40, %s15442_s26  ;;  %v11691_v54 = vpop.f32.mrb[60].mxu1 }
 0x66d   : > { %v6521_v41 = vadd.f32 %v11691_v54, %v6489_v29  ;;  %v6444_v46 = vpop.f32.mrb[61].mxu1 }
 0x66e   : > { %v6519_v48 = vadd.f32 %v6487_v47, %v6444_v46  ;;  %v11692_v44 = vpop.f32.mrb[62].mxu1 }
 0x66f   : > { %6553 = vst.msk [vmem:[#allocation3 + $0x168] sm:$0xff] %vm553_vm1, %v6521_v41  ;;  %v6522_v62 = vadd.f32 %v11692_v44, %v6490_v57  ;;  %v6447_v49 = vpop.f32.mrb[63].mxu1 }
 0x670   : > { %6661 = vrot.lane.b32.xlu1 %v6576_v6, %s15442_s26  ;;  %6659 = vrot.lane.b32.xlu0 %v6575_v56, %s15442_s26  ;;  %6551 = vst.msk [vmem:[#allocation3 + $0x150] sm:$0xff] %vm553_vm1, %v6519_v48  ;;  %v6520_v53 = vadd.f32 %v6488_v59, %v6447_v49 }
 0x671   : > { %6554 = vst.msk [vmem:[#allocation3 + $0x170] sm:$0xff] %vm553_vm1, %v6522_v62 }
 0x672   : > { %v6579_v10 = vld [vmem:[#allocation3 + $0x139] sm:$0xff]  ;;  %v6580_v52 = vld [vmem:[#allocation3 + $0x141] sm:$0xff]  ;;  %6552 = vst.msk [vmem:[#allocation3 + $0x158] sm:$0xff] %vm553_vm1, %v6520_v53 }
 0x673   : > { %7222 = vst.msk [vmem:[#allocation3 + $0x140] sm:$0xff] %vm553_vm1, %v12172_v19  ;;  %7221 = vst.msk [vmem:[#allocation3 + $0x138] sm:$0xff] %vm553_vm1, %v12172_v19  ;;  %v6577_v12 = vld [vmem:[#allocation3 + $0x121] sm:$0xff]  ;;  %v6578_v55 = vld [vmem:[#allocation3 + $0x129] sm:$0xff] }
 0x674   : > { %7223 = vst.msk [vmem:[#allocation3 + $0x148] sm:$0x3] %vm1015_vm4, %v12172_v19  ;;  %7220 = vst.msk [vmem:[#allocation3 + $0x130] sm:$0x3] %vm1015_vm4, %v12172_v19  ;;  %6665 = vrot.lane.b32.xlu1 %v6578_v55, %s15442_s26  ;;  %6663 = vrot.lane.b32.xlu0 %v6577_v12, %s15442_s26 }
 0x675   : > { %7219 = vst.msk [vmem:[#allocation3 + $0x128] sm:$0xff] %vm553_vm1, %v12172_v19  ;;  %7218 = vst.msk [vmem:[#allocation3 + $0x120] sm:$0xff] %vm553_vm1, %v12172_v19 }
 0x678   : > { %6669 = vrot.lane.b32.xlu1 %v6580_v52, %s15442_s26  ;;  %6667 = vrot.lane.b32.xlu0 %v6579_v10, %s15442_s26  ;;  %v6583_v14 = vld [vmem:[#allocation3 + $0x169] sm:$0xff]  ;;  %v6584_v27 = vld [vmem:[#allocation3 + $0x171] sm:$0xff] }
 0x679   : > { %7228 = vst.msk [vmem:[#allocation3 + $0x170] sm:$0xff] %vm553_vm1, %v12172_v19  ;;  %7227 = vst.msk [vmem:[#allocation3 + $0x168] sm:$0xff] %vm553_vm1, %v12172_v19  ;;  %v6581_v24 = vld [vmem:[#allocation3 + $0x151] sm:$0xff]  ;;  %v6582_v63 = vld [vmem:[#allocation3 + $0x159] sm:$0xff] }
 0x67a   : > { %7229 = vst.msk [vmem:[#allocation3 + $0x178] sm:$0x3] %vm1015_vm4, %v12172_v19  ;;  %7226 = vst.msk [vmem:[#allocation3 + $0x160] sm:$0x3] %vm1015_vm4, %v12172_v19 }
 0x67b   : > { %7225 = vst.msk [vmem:[#allocation3 + $0x158] sm:$0xff] %vm553_vm1, %v12172_v19  ;;  %7224 = vst.msk [vmem:[#allocation3 + $0x150] sm:$0xff] %vm553_vm1, %v12172_v19  ;;  %v7286_v19 = vsel %vm1118_vm2, %v7236_v43, 0 }
 0x67c   : > { %6673 = vrot.lane.b32.xlu1 %v6582_v63, %s15442_s26  ;;  %6671 = vrot.lane.b32.xlu0 %v6581_v24, %s15442_s26 }
 0x67d   : > { %11728 = vmatpush3.bf16.msra.mxu1 %v7286_v19 }
 0x680   : > { %6677 = vrot.lane.b32.xlu1 %v6584_v27, %s15442_s26  ;;  %6675 = vrot.lane.b32.xlu0 %v6583_v14, %s15442_s26 }
 0x684   : > { %6681 = vrot.lane.b32.xlu1 %v14186_v38, %s15442_s26  ;;  %6679 = vrot.lane.b32.xlu0 %v14184_v23, %s15442_s26  ;;  %v14425_v23 = vld [vmem:[%s15435_s11] ss:$0 sm:$0xff]  ;;  %s12108_s26 = scalar_lea.vmem %s15374_s29, 4096 }
 0x685   : > { %v14430_v38 = vld [vmem:[%s15436_s12] ss:$0 sm:$0xff]  ;;  %p12109_p11 = scmp.ne.s32.totalorder %s15374_s29, %s12108_s26 }
 0x687   : > { %p12110_p12 = pnand %p12109_p11, %p12301_p5 }
 0x689   : > { %p12111_p13 = pneg %p12110_p12 }
 0x6b4   : > { %v6622_v20 = vpop.permute.xlu1 %6621  ;;  %v6620_v0 = vpop.permute.xlu0 %6619 }
 0x6b5   : > { %6717 = vst.msk [vmem:[#allocation2 + $0x8] sm:$0xff] %vm6715_vm7, %v6622_v20  ;;  %6716 = vst.msk [vmem:[#allocation2] sm:$0xff] %vm6715_vm7, %v6620_v0 }
 0x6bc   : > { %v6748_v1 = vld [vmem:[#allocation2] sm:$0xff]  ;;  %v6749_v58 = vld [vmem:[#allocation2 + $0x8] sm:$0xff] }
 0x6bd   : > { %v6787_v39 = vmul.f32 %v14425_v23, %v6748_v1  ;;  %v6788_v3 = vmul.f32 %v14425_v23, %v6749_v58 }
 0x6be   : > { %v6626_v2 = vpop.permute.xlu1 %6625  ;;  %v6624_v61 = vpop.permute.xlu0 %6623 }
 0x6bf   : > { %6719 = vst.msk [vmem:[#allocation2 + $0x18] sm:$0xff] %vm6715_vm7, %v6626_v2  ;;  %6718 = vst.msk [vmem:[#allocation2 + $0x10] sm:$0xff] %vm6715_vm7, %v6624_v61  ;;  %v6826_v9 = vadd.f32 %v14430_v38, %v6787_v39  ;;  %v6827_v4 = vadd.f32 %v14430_v38, %v6788_v3 }
 0x6c1   : > { %v6858_v13 = vmax.f32 %v6826_v9, 0.0  ;;  %v6859_v15 = vmax.f32 %v6827_v4, 0.0 }
 0x6c2   : > { %v6630_v11 = vpop.permute.xlu1 %6629  ;;  %v6628_v21 = vpop.permute.xlu0 %6627 }
 0x6c3   : > { %6721 = vst.msk [vmem:[#allocation2 + $0x28] sm:$0xff] %vm6715_vm7, %v6630_v11  ;;  %6720 = vst.msk [vmem:[#allocation2 + $0x20] sm:$0xff] %vm6715_vm7, %v6628_v21  ;;  %v6890_v26 = vpack.c.bf16 %v6859_v15, %v6858_v13 }
 0x6c5   : > { %11695 = vmatprep.mubr.msk.bf16.mxu0 %vm6920_vm8, %v6890_v26 }
 0x6c6   : > { %v6751_v8 = vld [vmem:[#allocation2 + $0x18] sm:$0xff]  ;;  %v6750_v30 = vld [vmem:[#allocation2 + $0x10] sm:$0xff]  ;;  %v6634_v31 = vpop.permute.xlu1 %6633  ;;  %v6632_v16 = vpop.permute.xlu0 %6631 }
 0x6c7   : > { %v6790_v17 = vmul.f32 %v14425_v23, %v6751_v8  ;;  %v6789_v42 = vmul.f32 %v14425_v23, %v6750_v30  ;;  %6723 = vst.msk [vmem:[#allocation2 + $0x38] sm:$0xff] %vm6715_vm7, %v6634_v31  ;;  %6722 = vst.msk [vmem:[#allocation2 + $0x30] sm:$0xff] %vm6715_vm7, %v6632_v16 }
 0x6c9   : > { %v6829_v18 = vadd.f32 %v14430_v38, %v6790_v17  ;;  %v6828_v22 = vadd.f32 %v14430_v38, %v6789_v42 }
 0x6ca   : > { %v6638_v45 = vpop.permute.xlu1 %6637  ;;  %v6636_v7 = vpop.permute.xlu0 %6635  ;;  %v6752_v25 = vld [vmem:[#allocation2 + $0x20] sm:$0xff]  ;;  %v6753_v28 = vld [vmem:[#allocation2 + $0x28] sm:$0xff] }
 0x6cb   : > { %v6861_v32 = vmax.f32 %v6829_v18, 0.0  ;;  %v6860_v33 = vmax.f32 %v6828_v22, 0.0  ;;  %6725 = vst.msk [vmem:[#allocation2 + $0x48] sm:$0xff] %vm6715_vm7, %v6638_v45  ;;  %6724 = vst.msk [vmem:[#allocation2 + $0x40] sm:$0xff] %vm6715_vm7, %v6636_v7  ;;  %v6791_v60 = vmul.f32 %v14425_v23, %v6752_v25  ;;  %v6792_v34 = vmul.f32 %v14425_v23, %v6753_v28 }
 0x6cd   : > { %v6891_v5 = vpack.c.bf16 %v6861_v32, %v6860_v33  ;;  %v6830_v50 = vadd.f32 %v14430_v38, %v6791_v60  ;;  %v6831_v51 = vadd.f32 %v14430_v38, %v6792_v34 }
 0x6ce   : > { %v6755_v35 = vld [vmem:[#allocation2 + $0x38] sm:$0xff]  ;;  %v6754_v56 = vld [vmem:[#allocation2 + $0x30] sm:$0xff]  ;;  %v6642_v6 = vpop.permute.xlu1 %6641  ;;  %v6640_v36 = vpop.permute.xlu0 %6639 }
 0x6cf   : > { %6727 = vst.msk [vmem:[#allocation2 + $0x58] sm:$0xff] %vm6715_vm7, %v6642_v6  ;;  %6726 = vst.msk [vmem:[#allocation2 + $0x50] sm:$0xff] %vm6715_vm7, %v6640_v36  ;;  %11696 = vmatmul.mubr.msk.bf16.vlgmr.msra.gmra.mrb[64].mxu0 %vm6920_vm8, %v6891_v5  ;;  %v6862_v40 = vmax.f32 %v6830_v50, 0.0  ;;  %v6863_v37 = vmax.f32 %v6831_v51, 0.0  ;;  %v6793_v54 = vmul.f32 %v14425_v23, %v6754_v56  ;;  %v6794_v29 = vmul.f32 %v14425_v23, %v6755_v35 }
 0x6d1   : > { %v6892_v41 = vpack.c.bf16 %v6863_v37, %v6862_v40  ;;  %v6832_v46 = vadd.f32 %v14430_v38, %v6793_v54  ;;  %v6833_v47 = vadd.f32 %v14430_v38, %v6794_v29 }
 0x6d2   : > { %v6646_v48 = vpop.permute.xlu1 %6645  ;;  %v6644_v44 = vpop.permute.xlu0 %6643  ;;  %v6756_v57 = vld [vmem:[#allocation2 + $0x40] sm:$0xff]  ;;  %v6757_v62 = vld [vmem:[#allocation2 + $0x48] sm:$0xff] }
 0x6d3   : > { %6729 = vst.msk [vmem:[#allocation2 + $0x68] sm:$0xff] %vm6715_vm7, %v6646_v48  ;;  %6728 = vst.msk [vmem:[#allocation2 + $0x60] sm:$0xff] %vm6715_vm7, %v6644_v44  ;;  %11699 = vmatprep.mubr.msk.bf16.mxu0 %vm6920_vm8, %v6892_v41  ;;  %v6864_v49 = vmax.f32 %v6832_v46, 0.0  ;;  %v6865_v59 = vmax.f32 %v6833_v47, 0.0  ;;  %v6795_v10 = vmul.f32 %v14425_v23, %v6756_v57  ;;  %v6796_v52 = vmul.f32 %v14425_v23, %v6757_v62 }
 0x6d5   : > { %v6893_v53 = vpack.c.bf16 %v6865_v59, %v6864_v49  ;;  %v6834_v12 = vadd.f32 %v14430_v38, %v6795_v10  ;;  %v6835_v55 = vadd.f32 %v14430_v38, %v6796_v52 }
 0x6d6   : > { %v6759_v14 = vld [vmem:[#allocation2 + $0x58] sm:$0xff]  ;;  %v6758_v27 = vld [vmem:[#allocation2 + $0x50] sm:$0xff]  ;;  %v6650_v24 = vpop.permute.xlu1 %6649  ;;  %v6648_v63 = vpop.permute.xlu0 %6647 }
 0x6d7   : > { %6731 = vst.msk [vmem:[#allocation2 + $0x78] sm:$0xff] %vm6715_vm7, %v6650_v24  ;;  %6730 = vst.msk [vmem:[#allocation2 + $0x70] sm:$0xff] %vm6715_vm7, %v6648_v63  ;;  %11700 = vmatmul.mubr.msk.bf16.gmra.mrb[68].mxu0 %vm6920_vm8, %v6893_v53  ;;  %v6866_v43 = vmax.f32 %v6834_v12, 0.0  ;;  %v6867_v19 = vmax.f32 %v6835_v55, 0.0  ;;  %v6797_v20 = vmul.f32 %v14425_v23, %v6758_v27  ;;  %v6798_v0 = vmul.f32 %v14425_v23, %v6759_v14 }
 0x6d9   : > { %v6894_v1 = vpack.c.bf16 %v6867_v19, %v6866_v43  ;;  %v6836_v58 = vadd.f32 %v14430_v38, %v6797_v20  ;;  %v6837_v2 = vadd.f32 %v14430_v38, %v6798_v0 }
 0x6da   : > { %v6654_v61 = vpop.permute.xlu1 %6653  ;;  %v6652_v39 = vpop.permute.xlu0 %6651  ;;  %v6760_v3 = vld [vmem:[#allocation2 + $0x60] sm:$0xff]  ;;  %v6761_v9 = vld [vmem:[#allocation2 + $0x68] sm:$0xff] }
 0x6db   : > { %6733 = vst.msk [vmem:[#allocation2 + $0x88] sm:$0xff] %vm6715_vm7, %v6654_v61  ;;  %6732 = vst.msk [vmem:[#allocation2 + $0x80] sm:$0xff] %vm6715_vm7, %v6652_v39  ;;  %11703 = vmatprep.mubr.msk.bf16.mxu0 %vm6920_vm8, %v6894_v1  ;;  %v6868_v4 = vmax.f32 %v6836_v58, 0.0  ;;  %v6869_v11 = vmax.f32 %v6837_v2, 0.0  ;;  %v6799_v21 = vmul.f32 %v14425_v23, %v6760_v3  ;;  %v6800_v13 = vmul.f32 %v14425_v23, %v6761_v9 }
 0x6dd   : > { %v6895_v15 = vpack.c.bf16 %v6869_v11, %v6868_v4  ;;  %v6838_v26 = vadd.f32 %v14430_v38, %v6799_v21  ;;  %v6839_v8 = vadd.f32 %v14430_v38, %v6800_v13 }
 0x6de   : > { %v6763_v30 = vld [vmem:[#allocation2 + $0x78] sm:$0xff]  ;;  %v6762_v31 = vld [vmem:[#allocation2 + $0x70] sm:$0xff]  ;;  %v6658_v16 = vpop.permute.xlu1 %6657  ;;  %v6656_v17 = vpop.permute.xlu0 %6655 }
 0x6df   : > { %6735 = vst.msk [vmem:[#allocation2 + $0x98] sm:$0xff] %vm6715_vm7, %v6658_v16  ;;  %6734 = vst.msk [vmem:[#allocation2 + $0x90] sm:$0xff] %vm6715_vm7, %v6656_v17  ;;  %11704 = vmatmul.mubr.msk.bf16.gmra.mrb[72].mxu0 %vm6920_vm8, %v6895_v15  ;;  %v6870_v42 = vmax.f32 %v6838_v26, 0.0  ;;  %v6871_v18 = vmax.f32 %v6839_v8, 0.0  ;;  %v6801_v22 = vmul.f32 %v14425_v23, %v6762_v31  ;;  %v6802_v45 = vmul.f32 %v14425_v23, %v6763_v30 }
 0x6e1   : > { %v6896_v7 = vpack.c.bf16 %v6871_v18, %v6870_v42  ;;  %v6840_v25 = vadd.f32 %v14430_v38, %v6801_v22  ;;  %v6841_v28 = vadd.f32 %v14430_v38, %v6802_v45 }
 0x6e2   : > { %v6662_v32 = vpop.permute.xlu1 %6661  ;;  %v6660_v33 = vpop.permute.xlu0 %6659  ;;  %v6764_v60 = vld [vmem:[#allocation2 + $0x80] sm:$0xff]  ;;  %v6765_v34 = vld [vmem:[#allocation2 + $0x88] sm:$0xff] }
 0x6e3   : > { %6737 = vst.msk [vmem:[#allocation2 + $0xa8] sm:$0xff] %vm6715_vm7, %v6662_v32  ;;  %6736 = vst.msk [vmem:[#allocation2 + $0xa0] sm:$0xff] %vm6715_vm7, %v6660_v33  ;;  %11707 = vmatprep.mubr.msk.bf16.mxu0 %vm6920_vm8, %v6896_v7  ;;  %v6872_v5 = vmax.f32 %v6840_v25, 0.0  ;;  %v6873_v50 = vmax.f32 %v6841_v28, 0.0  ;;  %v6803_v51 = vmul.f32 %v14425_v23, %v6764_v60  ;;  %v6804_v35 = vmul.f32 %v14425_v23, %v6765_v34 }
 0x6e5   : > { %v6897_v56 = vpack.c.bf16 %v6873_v50, %v6872_v5  ;;  %v6842_v6 = vadd.f32 %v14430_v38, %v6803_v51  ;;  %v6843_v36 = vadd.f32 %v14430_v38, %v6804_v35 }
 0x6e6   : > { %v6767_v40 = vld [vmem:[#allocation2 + $0x98] sm:$0xff]  ;;  %v6766_v37 = vld [vmem:[#allocation2 + $0x90] sm:$0xff]  ;;  %v6666_v54 = vpop.permute.xlu1 %6665  ;;  %v6664_v29 = vpop.permute.xlu0 %6663 }
 0x6e7   : > { %6739 = vst.msk [vmem:[#allocation2 + $0xb8] sm:$0xff] %vm6715_vm7, %v6666_v54  ;;  %6738 = vst.msk [vmem:[#allocation2 + $0xb0] sm:$0xff] %vm6715_vm7, %v6664_v29  ;;  %11708 = vmatmul.mubr.msk.bf16.gmra.mrb[76].mxu0 %vm6920_vm8, %v6897_v56  ;;  %v6874_v41 = vmax.f32 %v6842_v6, 0.0  ;;  %v6875_v46 = vmax.f32 %v6843_v36, 0.0  ;;  %v6805_v47 = vmul.f32 %v14425_v23, %v6766_v37  ;;  %v6806_v48 = vmul.f32 %v14425_v23, %v6767_v40 }
 0x6e9   : > { %v6898_v44 = vpack.c.bf16 %v6875_v46, %v6874_v41  ;;  %v6844_v57 = vadd.f32 %v14430_v38, %v6805_v47  ;;  %v6845_v62 = vadd.f32 %v14430_v38, %v6806_v48 }
 0x6ea   : > { %v6670_v49 = vpop.permute.xlu1 %6669  ;;  %v6668_v59 = vpop.permute.xlu0 %6667  ;;  %v6768_v10 = vld [vmem:[#allocation2 + $0xa0] sm:$0xff]  ;;  %v6769_v52 = vld [vmem:[#allocation2 + $0xa8] sm:$0xff] }
 0x6eb   : > { %6741 = vst.msk [vmem:[#allocation2 + $0xc8] sm:$0xff] %vm6715_vm7, %v6670_v49  ;;  %6740 = vst.msk [vmem:[#allocation2 + $0xc0] sm:$0xff] %vm6715_vm7, %v6668_v59  ;;  %11711 = vmatprep.mubr.msk.bf16.mxu0 %vm6920_vm8, %v6898_v44  ;;  %v6876_v53 = vmax.f32 %v6844_v57, 0.0  ;;  %v6877_v12 = vmax.f32 %v6845_v62, 0.0  ;;  %v6807_v55 = vmul.f32 %v14425_v23, %v6768_v10  ;;  %v6808_v14 = vmul.f32 %v14425_v23, %v6769_v52  ;;  %v10360_v52 = vld [vmem:[%s15439_s15 + $0x4] sm:$0xf] }
 0x6ec   : > { %12055 = vmatprep.subr.msk.bf16.mxu0 %vm1118_vm2, %v10360_v52 }
 0x6ed   : > { %v6899_v27 = vpack.c.bf16 %v6877_v12, %v6876_v53  ;;  %v6846_v24 = vadd.f32 %v14430_v38, %v6807_v55  ;;  %v6847_v63 = vadd.f32 %v14430_v38, %v6808_v14  ;;  %v10394_v53 = vld [vmem:[%s15439_s15 + $0xc] sm:$0xf]  ;;  %v14558_v12 = vld [vmem:[%s15438_s14] ss:$0 sm:$0xff] }
 0x6ee   : > { %v6771_v43 = vld [vmem:[#allocation2 + $0xb8] sm:$0xff]  ;;  %v6770_v19 = vld [vmem:[#allocation2 + $0xb0] sm:$0xff]  ;;  %v6674_v20 = vpop.permute.xlu1 %6673  ;;  %v6672_v0 = vpop.permute.xlu0 %6671 }
 0x6ef   : > { %6743 = vst.msk [vmem:[#allocation2 + $0xd8] sm:$0xff] %vm6715_vm7, %v6674_v20  ;;  %6742 = vst.msk [vmem:[#allocation2 + $0xd0] sm:$0xff] %vm6715_vm7, %v6672_v0  ;;  %11712 = vmatmul.mubr.msk.bf16.gmra.mrb[80].mxu0 %vm6920_vm8, %v6899_v27  ;;  %v6878_v1 = vmax.f32 %v6846_v24, 0.0  ;;  %v6879_v58 = vmax.f32 %v6847_v63, 0.0  ;;  %v6809_v2 = vmul.f32 %v14425_v23, %v6770_v19  ;;  %v6810_v61 = vmul.f32 %v14425_v23, %v6771_v43 }
 0x6f1   : > { %v6900_v39 = vpack.c.bf16 %v6879_v58, %v6878_v1  ;;  %v6848_v3 = vadd.f32 %v14430_v38, %v6809_v2  ;;  %v6849_v9 = vadd.f32 %v14430_v38, %v6810_v61 }
 0x6f2   : > { %v6678_v4 = vpop.permute.xlu1 %6677  ;;  %v6676_v11 = vpop.permute.xlu0 %6675  ;;  %v6772_v21 = vld [vmem:[#allocation2 + $0xc0] sm:$0xff]  ;;  %v6773_v13 = vld [vmem:[#allocation2 + $0xc8] sm:$0xff] }
 0x6f3   : > { %6745 = vst.msk [vmem:[#allocation2 + $0xe8] sm:$0xff] %vm6715_vm7, %v6678_v4  ;;  %6744 = vst.msk [vmem:[#allocation2 + $0xe0] sm:$0xff] %vm6715_vm7, %v6676_v11  ;;  %11715 = vmatprep.mubr.msk.bf16.mxu0 %vm6920_vm8, %v6900_v39  ;;  %v6880_v15 = vmax.f32 %v6848_v3, 0.0  ;;  %v6881_v26 = vmax.f32 %v6849_v9, 0.0  ;;  %v6811_v8 = vmul.f32 %v14425_v23, %v6772_v21  ;;  %v6812_v30 = vmul.f32 %v14425_v23, %v6773_v13 }
 0x6f4   : > { %v8072_v21 = vsel %vm1118_vm2, %v10394_v53, 0 }
 0x6f5   : > { %v6901_v31 = vpack.c.bf16 %v6881_v26, %v6880_v15  ;;  %v6850_v16 = vadd.f32 %v14430_v38, %v6811_v8  ;;  %v6851_v17 = vadd.f32 %v14430_v38, %v6812_v30  ;;  %v14579_v26 = vld [vmem:[%s15439_s15 + $0x10] sm:$0xf]  ;;  %v14584_v8 = vld [vmem:[%s15439_s15 + $0x14] sm:$0xf] }
 0x6f6   : > { %v6775_v42 = vld [vmem:[#allocation2 + $0xd8] sm:$0xff]  ;;  %v6774_v18 = vld [vmem:[#allocation2 + $0xd0] sm:$0xff]  ;;  %v6682_v22 = vpop.permute.xlu1 %6681  ;;  %v6680_v45 = vpop.permute.xlu0 %6679 }
 0x6f7   : > { %6747 = vst.msk [vmem:[#allocation2 + $0xf8] sm:$0xff] %vm6715_vm7, %v6682_v22  ;;  %6746 = vst.msk [vmem:[#allocation2 + $0xf0] sm:$0xff] %vm6715_vm7, %v6680_v45  ;;  %11716 = vmatmul.mubr.msk.bf16.gmra.mrb[84].mxu0 %vm6920_vm8, %v6901_v31  ;;  %v6882_v7 = vmax.f32 %v6850_v16, 0.0  ;;  %v6883_v25 = vmax.f32 %v6851_v17, 0.0  ;;  %v6813_v28 = vmul.f32 %v14425_v23, %v6774_v18  ;;  %v6814_v32 = vmul.f32 %v14425_v23, %v6775_v42 }
 0x6f9   : > { %v6902_v33 = vpack.c.bf16 %v6883_v25, %v6882_v7  ;;  %v6852_v60 = vadd.f32 %v14430_v38, %v6813_v28  ;;  %v6853_v34 = vadd.f32 %v14430_v38, %v6814_v32 }
 0x6fa   : > { %v6776_v5 = vld [vmem:[#allocation2 + $0xe0] sm:$0xff]  ;;  %v6777_v50 = vld [vmem:[#allocation2 + $0xe8] sm:$0xff] }
 0x6fb   : > { %11719 = vmatprep.mubr.msk.bf16.mxu0 %vm6920_vm8, %v6902_v33  ;;  %v6884_v51 = vmax.f32 %v6852_v60, 0.0  ;;  %v6885_v35 = vmax.f32 %v6853_v34, 0.0  ;;  %v6815_v56 = vmul.f32 %v14425_v23, %v6776_v5  ;;  %v6816_v6 = vmul.f32 %v14425_v23, %v6777_v50 }
 0x6fd   : > { %v6903_v36 = vpack.c.bf16 %v6885_v35, %v6884_v51  ;;  %v6854_v40 = vadd.f32 %v14430_v38, %v6815_v56  ;;  %v6855_v37 = vadd.f32 %v14430_v38, %v6816_v6 }
 0x6fe   : > { %v6779_v54 = vld [vmem:[#allocation2 + $0xf8] sm:$0xff]  ;;  %v6778_v29 = vld [vmem:[#allocation2 + $0xf0] sm:$0xff] }
 0x6ff   : > { %11720 = vmatmul.mubr.msk.bf16.gmra.mrb[88].mxu0 %vm6920_vm8, %v6903_v36  ;;  %v6886_v41 = vmax.f32 %v6854_v40, 0.0  ;;  %v6887_v46 = vmax.f32 %v6855_v37, 0.0  ;;  %v6817_v47 = vmul.f32 %v14425_v23, %v6778_v29  ;;  %v6818_v48 = vmul.f32 %v14425_v23, %v6779_v54 }
 0x700   : > { %v7548_v23 = vsel %vm1118_vm2, %v10360_v52, 0 }
 0x701   : > { %v6904_v44 = vpack.c.bf16 %v6887_v46, %v6886_v41  ;;  %v6856_v57 = vadd.f32 %v14430_v38, %v6817_v47  ;;  %v6857_v62 = vadd.f32 %v14430_v38, %v6818_v48  ;;  %11762 = vmatpush3.bf16.msra.mxu0 %v7548_v23  ;;  %v10377_v38 = vld [vmem:[%s15439_s15 + $0x8] sm:$0xf] }
 0x702   : > { %12056 = vmatprep.subr.msk.bf16.mxu1 %vm1118_vm2, %v10377_v38  ;;  %12057 = vmatprep.subr.msk.bf16.mxu0 %vm1118_vm2, %v10394_v53  ;;  %v7810_v11 = vsel %vm1118_vm2, %v10377_v38, 0 }
 0x703   : > { %11723 = vmatprep.mubr.msk.bf16.mxu0 %vm6920_vm8, %v6904_v44  ;;  %v6888_v49 = vmax.f32 %v6856_v57, 0.0  ;;  %v6889_v59 = vmax.f32 %v6857_v62, 0.0 }
 0x705   : > { %v6905_v10 = vpack.c.bf16 %v6889_v59, %v6888_v49 }
 0x707   : > { %11724 = vmatmul.mubr.msk.bf16.gmra.mrb[92].mxu0 %vm6920_vm8, %v6905_v10 }
 0x7a2   : > { %v11697_v55 = vpop.f32.mrb[64].mxu0 }
 0x7a3   : > { %v7016_v14 = vadd.f32 %v11697_v55, %v14558_v12  ;;  %v7007_v27 = vpop.f32.mrb[65].mxu0 }
 0x7a4   : > { %v7008_v24 = vadd.f32 %v14558_v12, %v7007_v27  ;;  %v11698_v63 = vpop.f32.mrb[66].mxu0 }
 0x7a5   : > { %v7019_v43 = vadd.f32 %v11698_v63, %v14558_v12  ;;  %v7010_v19 = vpop.f32.mrb[67].mxu0  ;;  %v7136_v0 = vmax.f32 %v7016_v14, 0.0 }
 0x7a6   : > { %v7011_v20 = vadd.f32 %v14558_v12, %v7010_v19  ;;  %v7134_v58 = vmax.f32 %v7008_v24, 0.0 }
 0x7a7   : > { %v7137_v1 = vmax.f32 %v7019_v43, 0.0 }
 0x7a8   : > { %v7135_v2 = vmax.f32 %v7011_v20, 0.0 }
 0x7a9   : > { %v14564_v61 = vpack.c.bf16 %v7137_v1, %v7136_v0 }
 0x7aa   : > { %v14566_v39 = vpack.c.bf16 %v7135_v2, %v7134_v58  ;;  %v11701_v3 = vpop.f32.mrb[68].mxu0 }
 0x7ab   : > { %v7032_v9 = vadd.f32 %v11701_v3, %v14558_v12  ;;  %v7023_v4 = vpop.f32.mrb[69].mxu0 }
 0x7ac   : > { %v7024_v13 = vadd.f32 %v14558_v12, %v7023_v4  ;;  %v11702_v15 = vpop.f32.mrb[70].mxu0  ;;  %11729 = vmatprep.mubr.msk.bf16.mxu1 %vm1069_vm3, %v14566_v39  ;;  %11763 = vmatprep.mubr.msk.bf16.mxu0 %vm1069_vm3, %v14566_v39 }
 0x7ad   : > { %v7035_v30 = vadd.f32 %v11702_v15, %v14558_v12  ;;  %v7026_v31 = vpop.f32.mrb[71].mxu0  ;;  %11730 = vmatmul.mubr.msk.bf16.vlgmr.msra.gmra.mrb[64].mxu1 %vm1069_vm3, %v14564_v61  ;;  %11764 = vmatmul.mubr.msk.bf16.vlgmr.msra.gmra.mrb[96].mxu0 %vm1069_vm3, %v14564_v61  ;;  %v7140_v17 = vmax.f32 %v7032_v9, 0.0 }
 0x7ae   : > { %v7027_v16 = vadd.f32 %v14558_v12, %v7026_v31  ;;  %11796 = vmatpush3.bf16.msra.mxu1 %v7810_v11  ;;  %11830 = vmatpush3.bf16.msra.mxu0 %v8072_v21  ;;  %v7138_v18 = vmax.f32 %v7024_v13, 0.0 }
 0x7af   : > { %v7141_v42 = vmax.f32 %v7035_v30, 0.0  ;;  %12058 = vmatprep.subr.msk.bf16.mxu1 %vm1118_vm2, %v14579_v26  ;;  %12059 = vmatprep.subr.msk.bf16.mxu0 %vm1118_vm2, %v14584_v8 }
 0x7b0   : > { %v7139_v22 = vmax.f32 %v7027_v16, 0.0 }
 0x7b1   : > { %v14596_v45 = vpack.c.bf16 %v7141_v42, %v7140_v17 }
 0x7b2   : > { %v14598_v7 = vpack.c.bf16 %v7139_v22, %v7138_v18  ;;  %v11705_v25 = vpop.f32.mrb[72].mxu0 }
 0x7b3   : > { %v7048_v28 = vadd.f32 %v11705_v25, %v14558_v12  ;;  %v7039_v32 = vpop.f32.mrb[73].mxu0 }
 0x7b4   : > { %v7040_v33 = vadd.f32 %v14558_v12, %v7039_v32  ;;  %v11706_v60 = vpop.f32.mrb[74].mxu0  ;;  %11733 = vmatprep.mubr.msk.bf16.mxu1 %vm1069_vm3, %v14598_v7  ;;  %11767 = vmatprep.mubr.msk.bf16.mxu0 %vm1069_vm3, %v14598_v7 }
 0x7b5   : > { %v7051_v34 = vadd.f32 %v11706_v60, %v14558_v12  ;;  %v7042_v5 = vpop.f32.mrb[75].mxu0  ;;  %11734 = vmatmul.mubr.msk.bf16.gmra.mrb[68].mxu1 %vm1069_vm3, %v14596_v45  ;;  %11768 = vmatmul.mubr.msk.bf16.gmra.mrb[100].mxu0 %vm1069_vm3, %v14596_v45  ;;  %v7144_v51 = vmax.f32 %v7048_v28, 0.0 }
 0x7b6   : > { %v7043_v50 = vadd.f32 %v14558_v12, %v7042_v5  ;;  %v7142_v56 = vmax.f32 %v7040_v33, 0.0 }
 0x7b7   : > { %v7145_v35 = vmax.f32 %v7051_v34, 0.0 }
 0x7b8   : > { %v7143_v6 = vmax.f32 %v7043_v50, 0.0 }
 0x7b9   : > { %v14612_v36 = vpack.c.bf16 %v7145_v35, %v7144_v51 }
 0x7ba   : > { %v14614_v40 = vpack.c.bf16 %v7143_v6, %v7142_v56  ;;  %v11709_v37 = vpop.f32.mrb[76].mxu0 }
 0x7bb   : > { %v7064_v54 = vadd.f32 %v11709_v37, %v14558_v12  ;;  %v7055_v29 = vpop.f32.mrb[77].mxu0 }
 0x7bc   : > { %v7056_v41 = vadd.f32 %v14558_v12, %v7055_v29  ;;  %v11710_v46 = vpop.f32.mrb[78].mxu0  ;;  %11737 = vmatprep.mubr.msk.bf16.mxu1 %vm1069_vm3, %v14614_v40  ;;  %11771 = vmatprep.mubr.msk.bf16.mxu0 %vm1069_vm3, %v14614_v40 }
 0x7bd   : > { %v7067_v47 = vadd.f32 %v11710_v46, %v14558_v12  ;;  %v7058_v48 = vpop.f32.mrb[79].mxu0  ;;  %11738 = vmatmul.mubr.msk.bf16.gmra.mrb[72].mxu1 %vm1069_vm3, %v14612_v36  ;;  %11772 = vmatmul.mubr.msk.bf16.gmra.mrb[104].mxu0 %vm1069_vm3, %v14612_v36  ;;  %v7148_v57 = vmax.f32 %v7064_v54, 0.0 }
 0x7be   : > { %v7059_v44 = vadd.f32 %v14558_v12, %v7058_v48  ;;  %v7146_v49 = vmax.f32 %v7056_v41, 0.0 }
 0x7bf   : > { %v7149_v62 = vmax.f32 %v7067_v47, 0.0 }
 0x7c0   : > { %v7147_v59 = vmax.f32 %v7059_v44, 0.0 }
 0x7c1   : > { %v14628_v10 = vpack.c.bf16 %v7149_v62, %v7148_v57 }
 0x7c2   : > { %v14630_v52 = vpack.c.bf16 %v7147_v59, %v7146_v49  ;;  %v11713_v23 = vpop.f32.mrb[80].mxu0 }
 0x7c3   : > { %v7080_v38 = vadd.f32 %v11713_v23, %v14558_v12  ;;  %v7071_v53 = vpop.f32.mrb[81].mxu0 }
 0x7c4   : > { %v7072_v55 = vadd.f32 %v14558_v12, %v7071_v53  ;;  %v11714_v14 = vpop.f32.mrb[82].mxu0  ;;  %11741 = vmatprep.mubr.msk.bf16.mxu1 %vm1069_vm3, %v14630_v52  ;;  %11775 = vmatprep.mubr.msk.bf16.mxu0 %vm1069_vm3, %v14630_v52 }
 0x7c5   : > { %v7083_v27 = vadd.f32 %v11714_v14, %v14558_v12  ;;  %v7074_v24 = vpop.f32.mrb[83].mxu0  ;;  %11742 = vmatmul.mubr.msk.bf16.gmra.mrb[76].mxu1 %vm1069_vm3, %v14628_v10  ;;  %11776 = vmatmul.mubr.msk.bf16.gmra.mrb[108].mxu0 %vm1069_vm3, %v14628_v10  ;;  %v7152_v43 = vmax.f32 %v7080_v38, 0.0  ;;  %v10445_v14 = vld [vmem:[%s15439_s15 + $0x18] sm:$0xf] }
 0x7c6   : > { %v7075_v63 = vadd.f32 %v14558_v12, %v7074_v24  ;;  %v7150_v20 = vmax.f32 %v7072_v55, 0.0  ;;  %v8596_v55 = vsel %vm1118_vm2, %v14584_v8, 0  ;;  %v10479_v24 = vld [vmem:[%s15439_s15 + $0x20] sm:$0xf] }
 0x7c7   : > { %v7153_v19 = vmax.f32 %v7083_v27, 0.0  ;;  %v10462_v27 = vld [vmem:[%s15439_s15 + $0x1c] sm:$0xf] }
 0x7c8   : > { %v7151_v0 = vmax.f32 %v7075_v63, 0.0  ;;  %v9120_v8 = vsel %vm1118_vm2, %v10462_v27, 0  ;;  %v9382_v63 = vsel %vm1118_vm2, %v10479_v24, 0 }
 0x7c9   : > { %v14644_v1 = vpack.c.bf16 %v7153_v19, %v7152_v43  ;;  %v7451_v43 = vld [vmem:[#allocation3 + $0x4a] sm:$0xff]  ;;  %v7449_v19 = vld [vmem:[#allocation3 + $0x32] sm:$0xff] }
 0x7ca   : > { %v14646_v58 = vpack.c.bf16 %v7151_v0, %v7150_v20  ;;  %v11717_v2 = vpop.f32.mrb[84].mxu0 }
 0x7cb   : > { %v7096_v3 = vadd.f32 %v11717_v2, %v14558_v12  ;;  %v7087_v9 = vpop.f32.mrb[85].mxu0  ;;  %v7452_v2 = vld [vmem:[#allocation3 + $0x52] sm:$0xff] }
 0x7cc   : > { %v7088_v4 = vadd.f32 %v14558_v12, %v7087_v9  ;;  %v11718_v11 = vpop.f32.mrb[86].mxu0  ;;  %11745 = vmatprep.mubr.msk.bf16.mxu1 %vm1069_vm3, %v14646_v58  ;;  %11779 = vmatprep.mubr.msk.bf16.mxu0 %vm1069_vm3, %v14646_v58 }
 0x7cd   : > { %v7099_v21 = vadd.f32 %v11718_v11, %v14558_v12  ;;  %v7090_v13 = vpop.f32.mrb[87].mxu0  ;;  %11746 = vmatmul.mubr.msk.bf16.gmra.mrb[80].mxu1 %vm1069_vm3, %v14644_v1  ;;  %11780 = vmatmul.mubr.msk.bf16.gmra.mrb[112].mxu0 %vm1069_vm3, %v14644_v1  ;;  %v7156_v30 = vmax.f32 %v7096_v3, 0.0  ;;  %v7450_v11 = vld [vmem:[#allocation3 + $0x3a] sm:$0xff] }
 0x7ce   : > { %v7091_v15 = vadd.f32 %v14558_v12, %v7090_v13  ;;  %v7154_v16 = vmax.f32 %v7088_v4, 0.0 }
 0x7cf   : > { %v7157_v31 = vmax.f32 %v7099_v21, 0.0 }
 0x7d0   : > { %v7155_v17 = vmax.f32 %v7091_v15, 0.0 }
 0x7d1   : > { %v14660_v42 = vpack.c.bf16 %v7157_v31, %v7156_v30 }
 0x7d2   : > { %v14662_v18 = vpack.c.bf16 %v7155_v17, %v7154_v16  ;;  %v11721_v22 = vpop.f32.mrb[88].mxu0 }
 0x7d3   : > { %v7112_v25 = vadd.f32 %v11721_v22, %v14558_v12  ;;  %v7103_v28 = vpop.f32.mrb[89].mxu0  ;;  %v7455_v22 = vld [vmem:[#allocation3 + $0x7a] sm:$0xff] }
 0x7d4   : > { %v7104_v32 = vadd.f32 %v14558_v12, %v7103_v28  ;;  %v11722_v33 = vpop.f32.mrb[90].mxu0  ;;  %11749 = vmatprep.mubr.msk.bf16.mxu1 %vm1069_vm3, %v14662_v18  ;;  %11783 = vmatprep.mubr.msk.bf16.mxu0 %vm1069_vm3, %v14662_v18 }
 0x7d5   : > { %v7115_v60 = vadd.f32 %v11722_v33, %v14558_v12  ;;  %v7106_v34 = vpop.f32.mrb[91].mxu0  ;;  %11750 = vmatmul.mubr.msk.bf16.gmra.mrb[84].mxu1 %vm1069_vm3, %v14660_v42  ;;  %11784 = vmatmul.mubr.msk.bf16.gmra.mrb[116].mxu0 %vm1069_vm3, %v14660_v42  ;;  %v7160_v50 = vmax.f32 %v7112_v25, 0.0  ;;  %v7453_v25 = vld [vmem:[#allocation3 + $0x62] sm:$0xff] }
 0x7d6   : > { %v7107_v5 = vadd.f32 %v14558_v12, %v7106_v34  ;;  %v7158_v35 = vmax.f32 %v7104_v32, 0.0  ;;  %v7456_v33 = vld [vmem:[#allocation3 + $0x82] sm:$0xff] }
 0x7d7   : > { %v7161_v51 = vmax.f32 %v7115_v60, 0.0 }
 0x7d8   : > { %v7159_v56 = vmax.f32 %v7107_v5, 0.0 }
 0x7d9   : > { %v14676_v6 = vpack.c.bf16 %v7161_v51, %v7160_v50  ;;  %v7454_v50 = vld [vmem:[#allocation3 + $0x6a] sm:$0xff] }
 0x7da   : > { %v14678_v37 = vpack.c.bf16 %v7159_v56, %v7158_v35  ;;  %v11725_v54 = vpop.f32.mrb[92].mxu0 }
 0x7db   : > { %v7128_v29 = vadd.f32 %v11725_v54, %v14558_v12  ;;  %v7119_v41 = vpop.f32.mrb[93].mxu0 }
 0x7dc   : > { %v7120_v46 = vadd.f32 %v14558_v12, %v7119_v41  ;;  %v11726_v47 = vpop.f32.mrb[94].mxu0  ;;  %11753 = vmatprep.mubr.msk.bf16.mxu1 %vm1069_vm3, %v14678_v37  ;;  %11787 = vmatprep.mubr.msk.bf16.mxu0 %vm1069_vm3, %v14678_v37 }
 0x7dd   : > { %v7131_v48 = vadd.f32 %v11726_v47, %v14558_v12  ;;  %v7122_v44 = vpop.f32.mrb[95].mxu0  ;;  %11754 = vmatmul.mubr.msk.bf16.gmra.mrb[88].mxu1 %vm1069_vm3, %v14676_v6  ;;  %11788 = vmatmul.mubr.msk.bf16.gmra.mrb[120].mxu0 %vm1069_vm3, %v14676_v6  ;;  %v7164_v62 = vmax.f32 %v7128_v29, 0.0 }
 0x7de   : > { %v7123_v57 = vadd.f32 %v14558_v12, %v7122_v44  ;;  %v7162_v59 = vmax.f32 %v7120_v46, 0.0  ;;  %v8334_v12 = vsel %vm1118_vm2, %v14579_v26, 0  ;;  %v8858_v26 = vsel %vm1118_vm2, %v10445_v14, 0 }
 0x7df   : > { %v7165_v49 = vmax.f32 %v7131_v48, 0.0 }
 0x7e0   : > { %v7163_v23 = vmax.f32 %v7123_v57, 0.0 }
 0x7e1   : > { %v14692_v38 = vpack.c.bf16 %v7165_v49, %v7164_v62 }
 0x7e2   : > { %v14694_v53 = vpack.c.bf16 %v7163_v23, %v7162_v59 }
 0x7e4   : > { %11757 = vmatprep.mubr.msk.bf16.mxu1 %vm1069_vm3, %v14694_v53  ;;  %11791 = vmatprep.mubr.msk.bf16.mxu0 %vm1069_vm3, %v14694_v53 }
 0x7e5   : > { %11758 = vmatmul.mubr.msk.bf16.gmra.mrb[92].mxu1 %vm1069_vm3, %v14692_v38  ;;  %11792 = vmatmul.mubr.msk.bf16.gmra.mrb[124].mxu0 %vm1069_vm3, %v14692_v38 }
 0x7e6   : > { %11797 = vmatprep.mubr.msk.bf16.mxu1 %vm1069_vm3, %v14566_v39  ;;  %11831 = vmatprep.mubr.msk.bf16.mxu0 %vm1069_vm3, %v14566_v39 }
 0x7ed   : > { %11798 = vmatmul.mubr.msk.bf16.vlgmr.msra.gmra.mrb[96].mxu1 %vm1069_vm3, %v14564_v61  ;;  %11832 = vmatmul.mubr.msk.bf16.vlgmr.msra.gmra.mrb[128].mxu0 %vm1069_vm3, %v14564_v61 }
 0x7ee   : > { %11864 = vmatpush3.bf16.msra.mxu1 %v8334_v12  ;;  %11801 = vmatprep.mubr.msk.bf16.mxu1 %vm1069_vm3, %v14598_v7  ;;  %v7459_v12 = vld [vmem:[#allocation3 + $0xaa] sm:$0xff] }
 0x7ef   : > { %11835 = vmatprep.mubr.msk.bf16.mxu0 %vm1069_vm3, %v14598_v7  ;;  %11898 = vmatpush3.bf16.msra.mxu0 %v8596_v55  ;;  %v7457_v55 = vld [vmem:[#allocation3 + $0x92] sm:$0xff] }
 0x7f0   : > { %12060 = vmatprep.subr.msk.bf16.mxu1 %vm1118_vm2, %v10445_v14  ;;  %12061 = vmatprep.subr.msk.bf16.mxu0 %vm1118_vm2, %v10462_v27 }
 0x7f5   : > { %11802 = vmatmul.mubr.msk.bf16.gmra.mrb[100].mxu1 %vm1069_vm3, %v14596_v45  ;;  %11836 = vmatmul.mubr.msk.bf16.gmra.mrb[132].mxu0 %vm1069_vm3, %v14596_v45 }
 0x7f6   : > { %11805 = vmatprep.mubr.msk.bf16.mxu1 %vm1069_vm3, %v14614_v40  ;;  %11839 = vmatprep.mubr.msk.bf16.mxu0 %vm1069_vm3, %v14614_v40 }
 0x7fd   : > { %11806 = vmatmul.mubr.msk.bf16.gmra.mrb[104].mxu1 %vm1069_vm3, %v14612_v36  ;;  %11840 = vmatmul.mubr.msk.bf16.gmra.mrb[136].mxu0 %vm1069_vm3, %v14612_v36 }
 0x7fe   : > { %11809 = vmatprep.mubr.msk.bf16.mxu1 %vm1069_vm3, %v14630_v52  ;;  %11843 = vmatprep.mubr.msk.bf16.mxu0 %vm1069_vm3, %v14630_v52 }
 0x805   : > { %11810 = vmatmul.mubr.msk.bf16.gmra.mrb[108].mxu1 %vm1069_vm3, %v14628_v10  ;;  %11844 = vmatmul.mubr.msk.bf16.gmra.mrb[140].mxu0 %vm1069_vm3, %v14628_v10 }
 0x806   : > { %11813 = vmatprep.mubr.msk.bf16.mxu1 %vm1069_vm3, %v14646_v58  ;;  %11847 = vmatprep.mubr.msk.bf16.mxu0 %vm1069_vm3, %v14646_v58 }
 0x80d   : > { %11814 = vmatmul.mubr.msk.bf16.gmra.mrb[112].mxu1 %vm1069_vm3, %v14644_v1  ;;  %11848 = vmatmul.mubr.msk.bf16.gmra.mrb[144].mxu0 %vm1069_vm3, %v14644_v1 }
 0x80e   : > { %11817 = vmatprep.mubr.msk.bf16.mxu1 %vm1069_vm3, %v14662_v18  ;;  %11851 = vmatprep.mubr.msk.bf16.mxu0 %vm1069_vm3, %v14662_v18 }
 0x815   : > { %11818 = vmatmul.mubr.msk.bf16.gmra.mrb[116].mxu1 %vm1069_vm3, %v14660_v42  ;;  %11852 = vmatmul.mubr.msk.bf16.gmra.mrb[148].mxu0 %vm1069_vm3, %v14660_v42 }
 0x816   : > { %11821 = vmatprep.mubr.msk.bf16.mxu1 %vm1069_vm3, %v14678_v37  ;;  %11855 = vmatprep.mubr.msk.bf16.mxu0 %vm1069_vm3, %v14678_v37 }
 0x81d   : > { %11822 = vmatmul.mubr.msk.bf16.gmra.mrb[120].mxu1 %vm1069_vm3, %v14676_v6  ;;  %11856 = vmatmul.mubr.msk.bf16.gmra.mrb[152].mxu0 %vm1069_vm3, %v14676_v6 }
 0x81e   : > { %11825 = vmatprep.mubr.msk.bf16.mxu1 %vm1069_vm3, %v14694_v53  ;;  %11859 = vmatprep.mubr.msk.bf16.mxu0 %vm1069_vm3, %v14694_v53 }
 0x825   : > { %11826 = vmatmul.mubr.msk.bf16.gmra.mrb[124].mxu1 %vm1069_vm3, %v14692_v38  ;;  %11860 = vmatmul.mubr.msk.bf16.gmra.mrb[156].mxu0 %vm1069_vm3, %v14692_v38 }
 0x826   : > { %11865 = vmatprep.mubr.msk.bf16.mxu1 %vm1069_vm3, %v14566_v39  ;;  %11899 = vmatprep.mubr.msk.bf16.mxu0 %vm1069_vm3, %v14566_v39 }
 0x82d   : > { %11866 = vmatmul.mubr.msk.bf16.vlgmr.msra.gmra.mrb[128].mxu1 %vm1069_vm3, %v14564_v61  ;;  %11900 = vmatmul.mubr.msk.bf16.vlgmr.msra.gmra.mrb[160].mxu0 %vm1069_vm3, %v14564_v61 }
 0x82e   : > { %11932 = vmatpush3.bf16.msra.mxu1 %v8858_v26  ;;  %11869 = vmatprep.mubr.msk.bf16.mxu1 %vm1069_vm3, %v14598_v7  ;;  %v7460_v26 = vld [vmem:[#allocation3 + $0xb2] sm:$0xff] }
 0x82f   : > { %11903 = vmatprep.mubr.msk.bf16.mxu0 %vm1069_vm3, %v14598_v7  ;;  %11966 = vmatpush3.bf16.msra.mxu0 %v9120_v8 }
 0x830   : > { %12062 = vmatprep.subr.msk.bf16.mxu1 %vm1118_vm2, %v10479_v24 }
 0x835   : > { %11870 = vmatmul.mubr.msk.bf16.gmra.mrb[132].mxu1 %vm1069_vm3, %v14596_v45  ;;  %11904 = vmatmul.mubr.msk.bf16.gmra.mrb[164].mxu0 %vm1069_vm3, %v14596_v45 }
 0x836   : > { %11873 = vmatprep.mubr.msk.bf16.mxu1 %vm1069_vm3, %v14614_v40  ;;  %11907 = vmatprep.mubr.msk.bf16.mxu0 %vm1069_vm3, %v14614_v40 }
 0x83d   : > { %11874 = vmatmul.mubr.msk.bf16.gmra.mrb[136].mxu1 %vm1069_vm3, %v14612_v36  ;;  %11908 = vmatmul.mubr.msk.bf16.gmra.mrb[168].mxu0 %vm1069_vm3, %v14612_v36 }
 0x83e   : > { %11877 = vmatprep.mubr.msk.bf16.mxu1 %vm1069_vm3, %v14630_v52  ;;  %11911 = vmatprep.mubr.msk.bf16.mxu0 %vm1069_vm3, %v14630_v52 }
 0x845   : > { %11878 = vmatmul.mubr.msk.bf16.gmra.mrb[140].mxu1 %vm1069_vm3, %v14628_v10  ;;  %11912 = vmatmul.mubr.msk.bf16.gmra.mrb[172].mxu0 %vm1069_vm3, %v14628_v10 }
 0x846   : > { %11881 = vmatprep.mubr.msk.bf16.mxu1 %vm1069_vm3, %v14646_v58  ;;  %11915 = vmatprep.mubr.msk.bf16.mxu0 %vm1069_vm3, %v14646_v58 }
 0x84d   : > { %11882 = vmatmul.mubr.msk.bf16.gmra.mrb[144].mxu1 %vm1069_vm3, %v14644_v1  ;;  %11916 = vmatmul.mubr.msk.bf16.gmra.mrb[176].mxu0 %vm1069_vm3, %v14644_v1 }
 0x84e   : > { %11885 = vmatprep.mubr.msk.bf16.mxu1 %vm1069_vm3, %v14662_v18  ;;  %11919 = vmatprep.mubr.msk.bf16.mxu0 %vm1069_vm3, %v14662_v18 }
 0x855   : > { %11886 = vmatmul.mubr.msk.bf16.gmra.mrb[148].mxu1 %vm1069_vm3, %v14660_v42  ;;  %11920 = vmatmul.mubr.msk.bf16.gmra.mrb[180].mxu0 %vm1069_vm3, %v14660_v42 }
 0x856   : > { %11889 = vmatprep.mubr.msk.bf16.mxu1 %vm1069_vm3, %v14678_v37  ;;  %11923 = vmatprep.mubr.msk.bf16.mxu0 %vm1069_vm3, %v14678_v37 }
 0x85d   : > { %11890 = vmatmul.mubr.msk.bf16.gmra.mrb[152].mxu1 %vm1069_vm3, %v14676_v6  ;;  %11924 = vmatmul.mubr.msk.bf16.gmra.mrb[184].mxu0 %vm1069_vm3, %v14676_v6 }
 0x85e   : > { %11893 = vmatprep.mubr.msk.bf16.mxu1 %vm1069_vm3, %v14694_v53  ;;  %11927 = vmatprep.mubr.msk.bf16.mxu0 %vm1069_vm3, %v14694_v53 }
 0x865   : > { %11894 = vmatmul.mubr.msk.bf16.gmra.mrb[156].mxu1 %vm1069_vm3, %v14692_v38  ;;  %11928 = vmatmul.mubr.msk.bf16.gmra.mrb[188].mxu0 %vm1069_vm3, %v14692_v38 }
 0x866   : > { %11933 = vmatprep.mubr.msk.bf16.mxu1 %vm1069_vm3, %v14566_v39  ;;  %11967 = vmatprep.mubr.msk.bf16.mxu0 %vm1069_vm3, %v14566_v39 }
 0x86d   : > { %11934 = vmatmul.mubr.msk.bf16.vlgmr.msra.gmra.mrb[160].mxu1 %vm1069_vm3, %v14564_v61  ;;  %11968 = vmatmul.mubr.msk.bf16.vlgmr.msra.gmra.mrb[192].mxu0 %vm1069_vm3, %v14564_v61 }
 0x86e   : > { %12000 = vmatpush3.bf16.msra.mxu1 %v9382_v63  ;;  %11937 = vmatprep.mubr.msk.bf16.mxu1 %vm1069_vm3, %v14598_v7 }
 0x86f   : > { %11971 = vmatprep.mubr.msk.bf16.mxu0 %vm1069_vm3, %v14598_v7 }
 0x875   : > { %11938 = vmatmul.mubr.msk.bf16.gmra.mrb[164].mxu1 %vm1069_vm3, %v14596_v45  ;;  %11972 = vmatmul.mubr.msk.bf16.gmra.mrb[196].mxu0 %vm1069_vm3, %v14596_v45 }
 0x876   : > { %11941 = vmatprep.mubr.msk.bf16.mxu1 %vm1069_vm3, %v14614_v40  ;;  %11975 = vmatprep.mubr.msk.bf16.mxu0 %vm1069_vm3, %v14614_v40 }
 0x87d   : > { %11942 = vmatmul.mubr.msk.bf16.gmra.mrb[168].mxu1 %vm1069_vm3, %v14612_v36  ;;  %11976 = vmatmul.mubr.msk.bf16.gmra.mrb[200].mxu0 %vm1069_vm3, %v14612_v36 }
 0x87e   : > { %11945 = vmatprep.mubr.msk.bf16.mxu1 %vm1069_vm3, %v14630_v52  ;;  %11979 = vmatprep.mubr.msk.bf16.mxu0 %vm1069_vm3, %v14630_v52 }
 0x880   : > { %v11731_v20 = vpop.f32.mrb[64].mxu1  ;;  %v11765_v0 = vpop.f32.mrb[96].mxu0 }
 0x881   : > { %v7483_v3 = vadd.f32 %v11731_v20, %v7451_v43  ;;  %v7322_v9 = vpop.f32.mrb[65].mxu1  ;;  %v7584_v4 = vpop.f32.mrb[97].mxu0  ;;  %v7458_v43 = vld [vmem:[#allocation3 + $0x9a] sm:$0xff] }
 0x882   : > { %v7481_v21 = vadd.f32 %v7449_v19, %v7322_v9  ;;  %v11732_v13 = vpop.f32.mrb[66].mxu1  ;;  %v11766_v15 = vpop.f32.mrb[98].mxu0 }
 0x883   : > { %7515 = vst.msk [vmem:[#allocation3 + $0x4a] sm:$0xff] %vm553_vm1, %v7483_v3  ;;  %v7484_v30 = vadd.f32 %v11732_v13, %v7452_v2  ;;  %v7325_v31 = vpop.f32.mrb[67].mxu1  ;;  %v7587_v16 = vpop.f32.mrb[99].mxu0 }
 0x884   : > { %7513 = vst.msk [vmem:[#allocation3 + $0x32] sm:$0xff] %vm553_vm1, %v7481_v21  ;;  %v7482_v17 = vadd.f32 %v7450_v11, %v7325_v31 }
 0x885   : > { %7516 = vst.msk [vmem:[#allocation3 + $0x52] sm:$0xff] %vm553_vm1, %v7484_v30  ;;  %11946 = vmatmul.mubr.msk.bf16.gmra.mrb[172].mxu1 %vm1069_vm3, %v14628_v10  ;;  %11980 = vmatmul.mubr.msk.bf16.gmra.mrb[204].mxu0 %vm1069_vm3, %v14628_v10 }
 0x886   : > { %7514 = vst.msk [vmem:[#allocation3 + $0x3a] sm:$0xff] %vm553_vm1, %v7482_v17  ;;  %11949 = vmatprep.mubr.msk.bf16.mxu1 %vm1069_vm3, %v14646_v58  ;;  %11983 = vmatprep.mubr.msk.bf16.mxu0 %vm1069_vm3, %v14646_v58 }
 0x888   : > { %v11735_v28 = vpop.f32.mrb[68].mxu1  ;;  %v11769_v32 = vpop.f32.mrb[100].mxu0 }
 0x889   : > { %v7487_v60 = vadd.f32 %v11735_v28, %v7455_v22  ;;  %v7338_v34 = vpop.f32.mrb[69].mxu1  ;;  %v7600_v5 = vpop.f32.mrb[101].mxu0  ;;  %v7463_v22 = vld [vmem:[#allocation3 + $0xda] sm:$0xff] }
 0x88a   : > { %v7713_v51 = vld [vmem:[#allocation3 + $0x49] sm:$0xff]  ;;  %v7485_v35 = vadd.f32 %v7453_v25, %v7338_v34  ;;  %v11736_v56 = vpop.f32.mrb[70].mxu1  ;;  %v11770_v54 = vpop.f32.mrb[102].mxu0 }
 0x88b   : > { %v7745_v29 = vadd.f32 %v11765_v0, %v7713_v51  ;;  %v7711_v41 = vld [vmem:[#allocation3 + $0x31] sm:$0xff]  ;;  %7519 = vst.msk [vmem:[#allocation3 + $0x7a] sm:$0xff] %vm553_vm1, %v7487_v60  ;;  %v7488_v46 = vadd.f32 %v11736_v56, %v7456_v33  ;;  %v7341_v47 = vpop.f32.mrb[71].mxu1  ;;  %v7603_v48 = vpop.f32.mrb[103].mxu0  ;;  %v7461_v25 = vld [vmem:[#allocation3 + $0xc2] sm:$0xff] }
 0x88c   : > { %v7743_v44 = vadd.f32 %v7711_v41, %v7584_v4  ;;  %v7714_v57 = vld [vmem:[#allocation3 + $0x51] sm:$0xff]  ;;  %7517 = vst.msk [vmem:[#allocation3 + $0x62] sm:$0xff] %vm553_vm1, %v7485_v35  ;;  %v7486_v62 = vadd.f32 %v7454_v50, %v7341_v47  ;;  %v7464_v33 = vld [vmem:[#allocation3 + $0xe2] sm:$0xff] }
 0x88d   : > { %7777 = vst.msk [vmem:[#allocation3 + $0x49] sm:$0xff] %vm553_vm1, %v7745_v29  ;;  %v7746_v49 = vadd.f32 %v11766_v15, %v7714_v57  ;;  %v7712_v59 = vld [vmem:[#allocation3 + $0x39] sm:$0xff]  ;;  %7520 = vst.msk [vmem:[#allocation3 + $0x82] sm:$0xff] %vm553_vm1, %v7488_v46  ;;  %11950 = vmatmul.mubr.msk.bf16.gmra.mrb[176].mxu1 %vm1069_vm3, %v14644_v1  ;;  %11984 = vmatmul.mubr.msk.bf16.gmra.mrb[208].mxu0 %vm1069_vm3, %v14644_v1  ;;  %v7462_v50 = vld [vmem:[#allocation3 + $0xca] sm:$0xff] }
 0x88e   : > { %7775 = vst.msk [vmem:[#allocation3 + $0x31] sm:$0xff] %vm553_vm1, %v7743_v44  ;;  %v7744_v23 = vadd.f32 %v7712_v59, %v7587_v16  ;;  %7518 = vst.msk [vmem:[#allocation3 + $0x6a] sm:$0xff] %vm553_vm1, %v7486_v62  ;;  %11953 = vmatprep.mubr.msk.bf16.mxu1 %vm1069_vm3, %v14662_v18  ;;  %11987 = vmatprep.mubr.msk.bf16.mxu0 %vm1069_vm3, %v14662_v18 }
 0x88f   : > { %7778 = vst.msk [vmem:[#allocation3 + $0x51] sm:$0xff] %vm553_vm1, %v7746_v49 }
 0x890   : > { %7776 = vst.msk [vmem:[#allocation3 + $0x39] sm:$0xff] %vm553_vm1, %v7744_v23  ;;  %v11739_v14 = vpop.f32.mrb[72].mxu1  ;;  %v11773_v27 = vpop.f32.mrb[104].mxu0 }
 0x891   : > { %v7491_v8 = vadd.f32 %v11739_v14, %v7459_v12  ;;  %v7354_v24 = vpop.f32.mrb[73].mxu1  ;;  %v7616_v63 = vpop.f32.mrb[105].mxu0  ;;  %v7467_v12 = vld [vmem:[#allocation3 + $0x10a] sm:$0xff] }
 0x892   : > { %v7717_v19 = vld [vmem:[#allocation3 + $0x79] sm:$0xff]  ;;  %v7489_v20 = vadd.f32 %v7457_v55, %v7354_v24  ;;  %v11740_v0 = vpop.f32.mrb[74].mxu1  ;;  %v11774_v2 = vpop.f32.mrb[106].mxu0 }
 0x893   : > { %v7749_v3 = vadd.f32 %v11769_v32, %v7717_v19  ;;  %v7715_v9 = vld [vmem:[#allocation3 + $0x61] sm:$0xff]  ;;  %7523 = vst.msk [vmem:[#allocation3 + $0xaa] sm:$0xff] %vm553_vm1, %v7491_v8  ;;  %v7492_v4 = vadd.f32 %v11740_v0, %v7460_v26  ;;  %v7357_v11 = vpop.f32.mrb[75].mxu1  ;;  %v7619_v21 = vpop.f32.mrb[107].mxu0  ;;  %v7465_v55 = vld [vmem:[#allocation3 + $0xf2] sm:$0xff] }
 0x894   : > { %v7747_v13 = vadd.f32 %v7715_v9, %v7600_v5  ;;  %v7718_v15 = vld [vmem:[#allocation3 + $0x81] sm:$0xff]  ;;  %7521 = vst.msk [vmem:[#allocation3 + $0x92] sm:$0xff] %vm553_vm1, %v7489_v20  ;;  %v7490_v30 = vadd.f32 %v7458_v43, %v7357_v11  ;;  %v7468_v26 = vld [vmem:[#allocation3 + $0x112] sm:$0xff] }
 0x895   : > { %7781 = vst.msk [vmem:[#allocation3 + $0x79] sm:$0xff] %vm553_vm1, %v7749_v3  ;;  %v7750_v31 = vadd.f32 %v11770_v54, %v7718_v15  ;;  %v7716_v16 = vld [vmem:[#allocation3 + $0x69] sm:$0xff]  ;;  %7524 = vst.msk [vmem:[#allocation3 + $0xb2] sm:$0xff] %vm553_vm1, %v7492_v4  ;;  %11954 = vmatmul.mubr.msk.bf16.gmra.mrb[180].mxu1 %vm1069_vm3, %v14660_v42  ;;  %11988 = vmatmul.mubr.msk.bf16.gmra.mrb[212].mxu0 %vm1069_vm3, %v14660_v42  ;;  %v7466_v43 = vld [vmem:[#allocation3 + $0xfa] sm:$0xff] }
 0x896   : > { %7779 = vst.msk [vmem:[#allocation3 + $0x61] sm:$0xff] %vm553_vm1, %v7747_v13  ;;  %v7748_v17 = vadd.f32 %v7716_v16, %v7603_v48  ;;  %7522 = vst.msk [vmem:[#allocation3 + $0x9a] sm:$0xff] %vm553_vm1, %v7490_v30  ;;  %11957 = vmatprep.mubr.msk.bf16.mxu1 %vm1069_vm3, %v14678_v37  ;;  %11991 = vmatprep.mubr.msk.bf16.mxu0 %vm1069_vm3, %v14678_v37 }
 0x897   : > { %7782 = vst.msk [vmem:[#allocation3 + $0x81] sm:$0xff] %vm553_vm1, %v7750_v31 }
 0x898   : > { %7780 = vst.msk [vmem:[#allocation3 + $0x69] sm:$0xff] %vm553_vm1, %v7748_v17  ;;  %v11743_v28 = vpop.f32.mrb[76].mxu1  ;;  %v11777_v32 = vpop.f32.mrb[108].mxu0 }
 0x899   : > { %v7495_v60 = vadd.f32 %v11743_v28, %v7463_v22  ;;  %v7370_v34 = vpop.f32.mrb[77].mxu1  ;;  %v7632_v5 = vpop.f32.mrb[109].mxu0  ;;  %v7471_v22 = vld [vmem:[#allocation3 + $0x13a] sm:$0xff] }
 0x89a   : > { %v7721_v51 = vld [vmem:[#allocation3 + $0xa9] sm:$0xff]  ;;  %v7493_v35 = vadd.f32 %v7461_v25, %v7370_v34  ;;  %v11744_v56 = vpop.f32.mrb[78].mxu1  ;;  %v11778_v54 = vpop.f32.mrb[110].mxu0 }
 0x89b   : > { %v7753_v29 = vadd.f32 %v11773_v27, %v7721_v51  ;;  %v7719_v41 = vld [vmem:[#allocation3 + $0x91] sm:$0xff]  ;;  %7527 = vst.msk [vmem:[#allocation3 + $0xda] sm:$0xff] %vm553_vm1, %v7495_v60  ;;  %v7496_v46 = vadd.f32 %v11744_v56, %v7464_v33  ;;  %v7373_v47 = vpop.f32.mrb[79].mxu1  ;;  %v7635_v48 = vpop.f32.mrb[111].mxu0  ;;  %v7469_v25 = vld [vmem:[#allocation3 + $0x122] sm:$0xff] }
 0x89c   : > { %v7751_v44 = vadd.f32 %v7719_v41, %v7616_v63  ;;  %v7722_v57 = vld [vmem:[#allocation3 + $0xb1] sm:$0xff]  ;;  %7525 = vst.msk [vmem:[#allocation3 + $0xc2] sm:$0xff] %vm553_vm1, %v7493_v35  ;;  %v7494_v62 = vadd.f32 %v7462_v50, %v7373_v47  ;;  %v7472_v33 = vld [vmem:[#allocation3 + $0x142] sm:$0xff] }
 0x89d   : > { %7785 = vst.msk [vmem:[#allocation3 + $0xa9] sm:$0xff] %vm553_vm1, %v7753_v29  ;;  %v7754_v49 = vadd.f32 %v11774_v2, %v7722_v57  ;;  %v7720_v59 = vld [vmem:[#allocation3 + $0x99] sm:$0xff]  ;;  %7528 = vst.msk [vmem:[#allocation3 + $0xe2] sm:$0xff] %vm553_vm1, %v7496_v46  ;;  %11958 = vmatmul.mubr.msk.bf16.gmra.mrb[184].mxu1 %vm1069_vm3, %v14676_v6  ;;  %11992 = vmatmul.mubr.msk.bf16.gmra.mrb[216].mxu0 %vm1069_vm3, %v14676_v6  ;;  %v7470_v50 = vld [vmem:[#allocation3 + $0x12a] sm:$0xff] }
 0x89e   : > { %7783 = vst.msk [vmem:[#allocation3 + $0x91] sm:$0xff] %vm553_vm1, %v7751_v44  ;;  %v7752_v23 = vadd.f32 %v7720_v59, %v7619_v21  ;;  %7526 = vst.msk [vmem:[#allocation3 + $0xca] sm:$0xff] %vm553_vm1, %v7494_v62  ;;  %11961 = vmatprep.mubr.msk.bf16.mxu1 %vm1069_vm3, %v14694_v53  ;;  %11995 = vmatprep.mubr.msk.bf16.mxu0 %vm1069_vm3, %v14694_v53 }
 0x89f   : > { %7786 = vst.msk [vmem:[#allocation3 + $0xb1] sm:$0xff] %vm553_vm1, %v7754_v49 }
 0x8a0   : > { %7784 = vst.msk [vmem:[#allocation3 + $0x99] sm:$0xff] %vm553_vm1, %v7752_v23  ;;  %v11747_v14 = vpop.f32.mrb[80].mxu1  ;;  %v11781_v27 = vpop.f32.mrb[112].mxu0  ;;  %v7475_v23 = vld [vmem:[#allocation3 + $0x16a] sm:$0xff] }
 0x8a1   : > { %v7499_v8 = vadd.f32 %v11747_v14, %v7467_v12  ;;  %v7386_v24 = vpop.f32.mrb[81].mxu1  ;;  %v7648_v63 = vpop.f32.mrb[113].mxu0  ;;  %v7473_v12 = vld [vmem:[#allocation3 + $0x152] sm:$0xff] }
 0x8a2   : > { %v7725_v19 = vld [vmem:[#allocation3 + $0xd9] sm:$0xff]  ;;  %v7497_v20 = vadd.f32 %v7465_v55, %v7386_v24  ;;  %v11748_v0 = vpop.f32.mrb[82].mxu1  ;;  %v11782_v2 = vpop.f32.mrb[114].mxu0 }
 0x8a3   : > { %v7757_v3 = vadd.f32 %v11777_v32, %v7725_v19  ;;  %v7723_v9 = vld [vmem:[#allocation3 + $0xc1] sm:$0xff]  ;;  %7531 = vst.msk [vmem:[#allocation3 + $0x10a] sm:$0xff] %vm553_vm1, %v7499_v8  ;;  %v7500_v4 = vadd.f32 %v11748_v0, %v7468_v26  ;;  %v7389_v11 = vpop.f32.mrb[83].mxu1  ;;  %v7651_v21 = vpop.f32.mrb[115].mxu0 }
 0x8a4   : > { %v7755_v13 = vadd.f32 %v7723_v9, %v7632_v5  ;;  %v7726_v15 = vld [vmem:[#allocation3 + $0xe1] sm:$0xff]  ;;  %7529 = vst.msk [vmem:[#allocation3 + $0xf2] sm:$0xff] %vm553_vm1, %v7497_v20  ;;  %v7498_v30 = vadd.f32 %v7466_v43, %v7389_v11 }
 0x8a5   : > { %7789 = vst.msk [vmem:[#allocation3 + $0xd9] sm:$0xff] %vm553_vm1, %v7757_v3  ;;  %v7758_v31 = vadd.f32 %v11778_v54, %v7726_v15  ;;  %v7724_v16 = vld [vmem:[#allocation3 + $0xc9] sm:$0xff]  ;;  %7532 = vst.msk [vmem:[#allocation3 + $0x112] sm:$0xff] %vm553_vm1, %v7500_v4  ;;  %11962 = vmatmul.mubr.msk.bf16.gmra.mrb[188].mxu1 %vm1069_vm3, %v14692_v38  ;;  %11996 = vmatmul.mubr.msk.bf16.gmra.mrb[220].mxu0 %vm1069_vm3, %v14692_v38  ;;  %v7474_v24 = vld [vmem:[#allocation3 + $0x15a] sm:$0xff] }
 0x8a6   : > { %7787 = vst.msk [vmem:[#allocation3 + $0xc1] sm:$0xff] %vm553_vm1, %v7755_v13  ;;  %v7756_v17 = vadd.f32 %v7724_v16, %v7635_v48  ;;  %7530 = vst.msk [vmem:[#allocation3 + $0xfa] sm:$0xff] %vm553_vm1, %v7498_v30  ;;  %12001 = vmatprep.mubr.msk.bf16.mxu1 %vm1069_vm3, %v14566_v39  ;;  %v7477_v16 = vld [vmem:[#allocation3 + $0x182] sm:$0xff] }
 0x8a7   : > { %7790 = vst.msk [vmem:[#allocation3 + $0xe1] sm:$0xff] %vm553_vm1, %v7758_v31  ;;  %v7479_v31 = vld [vmem:[#allocation3 + $0x19a] sm:$0xff] }
 0x8a8   : > { %7788 = vst.msk [vmem:[#allocation3 + $0xc9] sm:$0xff] %vm553_vm1, %v7756_v17  ;;  %v11751_v28 = vpop.f32.mrb[84].mxu1  ;;  %v11785_v32 = vpop.f32.mrb[116].mxu0 }
 0x8a9   : > { %v7503_v60 = vadd.f32 %v11751_v28, %v7471_v22  ;;  %v7402_v34 = vpop.f32.mrb[85].mxu1  ;;  %v7664_v5 = vpop.f32.mrb[117].mxu0 }
 0x8aa   : > { %v7729_v51 = vld [vmem:[#allocation3 + $0x109] sm:$0xff]  ;;  %v7501_v35 = vadd.f32 %v7469_v25, %v7402_v34  ;;  %v11752_v56 = vpop.f32.mrb[86].mxu1  ;;  %v11786_v54 = vpop.f32.mrb[118].mxu0 }
 0x8ab   : > { %v7761_v29 = vadd.f32 %v11781_v27, %v7729_v51  ;;  %v7727_v41 = vld [vmem:[#allocation3 + $0xf1] sm:$0xff]  ;;  %7535 = vst.msk [vmem:[#allocation3 + $0x13a] sm:$0xff] %vm553_vm1, %v7503_v60  ;;  %v7504_v39 = vadd.f32 %v11752_v56, %v7472_v33  ;;  %v7405_v46 = vpop.f32.mrb[87].mxu1  ;;  %v7667_v47 = vpop.f32.mrb[119].mxu0  ;;  %v7480_v25 = vld [vmem:[#allocation3 + $0x1a2] sm:$0xff] }
 0x8ac   : > { %v7759_v48 = vadd.f32 %v7727_v41, %v7648_v63  ;;  %v7730_v44 = vld [vmem:[#allocation3 + $0x111] sm:$0xff]  ;;  %7533 = vst.msk [vmem:[#allocation3 + $0x122] sm:$0xff] %vm553_vm1, %v7501_v35  ;;  %v7502_v57 = vadd.f32 %v7470_v50, %v7405_v46 }
 0x8ad   : > { %7793 = vst.msk [vmem:[#allocation3 + $0x109] sm:$0xff] %vm553_vm1, %v7761_v29  ;;  %v7762_v62 = vadd.f32 %v11782_v2, %v7730_v44  ;;  %v7728_v49 = vld [vmem:[#allocation3 + $0xf9] sm:$0xff]  ;;  %7536 = vst.msk [vmem:[#allocation3 + $0x142] sm:$0xff] %vm553_vm1, %v7504_v39  ;;  %12002 = vmatmul.mubr.msk.bf16.vlgmr.msra.gmra.mrb[192].mxu1 %vm1069_vm3, %v14564_v61  ;;  %v7478_v33 = vld [vmem:[#allocation3 + $0x18a] sm:$0xff] }
 0x8ae   : > { %7791 = vst.msk [vmem:[#allocation3 + $0xf1] sm:$0xff] %vm553_vm1, %v7759_v48  ;;  %v7760_v59 = vadd.f32 %v7728_v49, %v7651_v21  ;;  %7534 = vst.msk [vmem:[#allocation3 + $0x12a] sm:$0xff] %vm553_vm1, %v7502_v57  ;;  %12005 = vmatprep.mubr.msk.bf16.mxu1 %vm1069_vm3, %v14598_v7  ;;  %v7476_v27 = vld [vmem:[#allocation3 + $0x172] sm:$0xff]  ;;  %v8235_v44 = vld [vmem:[#allocation3 + $0x1a] sm:$0xff] }
 0x8af   : > { %7794 = vst.msk [vmem:[#allocation3 + $0x111] sm:$0xff] %vm553_vm1, %v7762_v62  ;;  %v7975_v62 = vld [vmem:[#allocation3 + $0x48] sm:$0xff] }
 0x8b0   : > { %7792 = vst.msk [vmem:[#allocation3 + $0xf9] sm:$0xff] %vm553_vm1, %v7760_v59  ;;  %v11755_v55 = vpop.f32.mrb[88].mxu1  ;;  %v11789_v14 = vpop.f32.mrb[120].mxu0 }
 0x8b1   : > { %v7507_v26 = vadd.f32 %v11755_v55, %v7475_v23  ;;  %v7418_v8 = vpop.f32.mrb[89].mxu1  ;;  %v7680_v61 = vpop.f32.mrb[121].mxu0  ;;  %v8236_v55 = vld [vmem:[#allocation3 + $0x22] sm:$0xff] }
 0x8b2   : > { %v7733_v63 = vld [vmem:[#allocation3 + $0x139] sm:$0xff]  ;;  %v7505_v43 = vadd.f32 %v7473_v12, %v7418_v8  ;;  %v11756_v19 = vpop.f32.mrb[90].mxu1  ;;  %v11790_v20 = vpop.f32.mrb[122].mxu0 }
 0x8b3   : > { %v7765_v0 = vadd.f32 %v11785_v32, %v7733_v63  ;;  %v7731_v2 = vld [vmem:[#allocation3 + $0x121] sm:$0xff]  ;;  %7539 = vst.msk [vmem:[#allocation3 + $0x16a] sm:$0xff] %vm553_vm1, %v7507_v26  ;;  %v7508_v7 = vadd.f32 %v11756_v19, %v7476_v27  ;;  %v7421_v3 = vpop.f32.mrb[91].mxu1  ;;  %v7683_v9 = vpop.f32.mrb[123].mxu0 }
 0x8b4   : > { %v7763_v4 = vadd.f32 %v7731_v2, %v7664_v5  ;;  %v7734_v11 = vld [vmem:[#allocation3 + $0x141] sm:$0xff]  ;;  %7537 = vst.msk [vmem:[#allocation3 + $0x152] sm:$0xff] %vm553_vm1, %v7505_v43  ;;  %v7506_v21 = vadd.f32 %v7474_v24, %v7421_v3 }
 0x8b5   : > { %7797 = vst.msk [vmem:[#allocation3 + $0x139] sm:$0xff] %vm553_vm1, %v7765_v0  ;;  %v7766_v13 = vadd.f32 %v11786_v54, %v7734_v11  ;;  %v7732_v15 = vld [vmem:[#allocation3 + $0x129] sm:$0xff]  ;;  %7540 = vst.msk [vmem:[#allocation3 + $0x172] sm:$0xff] %vm553_vm1, %v7508_v7  ;;  %12006 = vmatmul.mubr.msk.bf16.gmra.mrb[196].mxu1 %vm1069_vm3, %v14596_v45 }
 0x8b6   : > { %7795 = vst.msk [vmem:[#allocation3 + $0x121] sm:$0xff] %vm553_vm1, %v7763_v4  ;;  %v7764_v30 = vadd.f32 %v7732_v15, %v7667_v47  ;;  %7538 = vst.msk [vmem:[#allocation3 + $0x15a] sm:$0xff] %vm553_vm1, %v7506_v21  ;;  %12009 = vmatprep.mubr.msk.bf16.mxu1 %vm1069_vm3, %v14614_v40  ;;  %v7979_v15 = vld [vmem:[#allocation3 + $0x78] sm:$0xff] }
 0x8b7   : > { %7798 = vst.msk [vmem:[#allocation3 + $0x141] sm:$0xff] %vm553_vm1, %v7766_v13 }
 0x8b8   : > { %7796 = vst.msk [vmem:[#allocation3 + $0x129] sm:$0xff] %vm553_vm1, %v7764_v30  ;;  %v11759_v17 = vpop.f32.mrb[92].mxu1  ;;  %v11793_v22 = vpop.f32.mrb[124].mxu0 }
 0x8b9   : > { %v7511_v28 = vadd.f32 %v11759_v17, %v7479_v31  ;;  %v7434_v32 = vpop.f32.mrb[93].mxu1  ;;  %v7696_v45 = vpop.f32.mrb[125].mxu0 }
 0x8ba   : > { %v7737_v60 = vld [vmem:[#allocation3 + $0x169] sm:$0xff]  ;;  %v7509_v34 = vadd.f32 %v7477_v16, %v7434_v32  ;;  %v11760_v5 = vpop.f32.mrb[94].mxu1  ;;  %v11794_v50 = vpop.f32.mrb[126].mxu0 }
 0x8bb   : > { %v7769_v51 = vadd.f32 %v11789_v14, %v7737_v60  ;;  %v7735_v35 = vld [vmem:[#allocation3 + $0x151] sm:$0xff]  ;;  %7543 = vst.msk [vmem:[#allocation3 + $0x19a] sm:$0xff] %vm553_vm1, %v7511_v28  ;;  %v7512_v40 = vadd.f32 %v11760_v5, %v7480_v25  ;;  %v7437_v56 = vpop.f32.mrb[95].mxu1  ;;  %v7699_v54 = vpop.f32.mrb[127].mxu0  ;;  %v7980_v28 = vld [vmem:[#allocation3 + $0x80] sm:$0xff] }
 0x8bc   : > { %v7767_v29 = vadd.f32 %v7735_v35, %v7680_v61  ;;  %v7738_v41 = vld [vmem:[#allocation3 + $0x171] sm:$0xff]  ;;  %7541 = vst.msk [vmem:[#allocation3 + $0x182] sm:$0xff] %vm553_vm1, %v7509_v34  ;;  %v7510_v39 = vadd.f32 %v7478_v33, %v7437_v56 }
 0x8bd   : > { %7801 = vst.msk [vmem:[#allocation3 + $0x169] sm:$0xff] %vm553_vm1, %v7769_v51  ;;  %v7770_v46 = vadd.f32 %v11790_v20, %v7738_v41  ;;  %v7736_v47 = vld [vmem:[#allocation3 + $0x159] sm:$0xff]  ;;  %7544 = vst.msk [vmem:[#allocation3 + $0x1a2] sm:$0xff] %vm553_vm1, %v7512_v40  ;;  %12010 = vmatmul.mubr.msk.bf16.gmra.mrb[200].mxu1 %vm1069_vm3, %v14612_v36  ;;  %v7973_v36 = vld [vmem:[#allocation3 + $0x30] sm:$0xff] }
 0x8be   : > { %7799 = vst.msk [vmem:[#allocation3 + $0x151] sm:$0xff] %vm553_vm1, %v7767_v29  ;;  %v7768_v48 = vadd.f32 %v7736_v47, %v7683_v9  ;;  %7542 = vst.msk [vmem:[#allocation3 + $0x18a] sm:$0xff] %vm553_vm1, %v7510_v39  ;;  %12013 = vmatprep.mubr.msk.bf16.mxu1 %vm1069_vm3, %v14630_v52  ;;  %v7976_v61 = vld [vmem:[#allocation3 + $0x50] sm:$0xff]  ;;  %v7974_v20 = vld [vmem:[#allocation3 + $0x38] sm:$0xff] }
 0x8bf   : > { %7802 = vst.msk [vmem:[#allocation3 + $0x171] sm:$0xff] %vm553_vm1, %v7770_v46  ;;  %v7983_v39 = vld [vmem:[#allocation3 + $0xa8] sm:$0xff] }
 0x8c0   : > { %7800 = vst.msk [vmem:[#allocation3 + $0x159] sm:$0xff] %vm553_vm1, %v7768_v48  ;;  %v11799_v57 = vpop.f32.mrb[96].mxu1  ;;  %v14989_v49 = vpop.f32.mrb[128].mxu0  ;;  %v7981_v48 = vld [vmem:[#allocation3 + $0x90] sm:$0xff] }
 0x8c1   : > { %v8007_v59 = vadd.f32 %v11799_v57, %v7975_v62  ;;  %v7846_v23 = vpop.f32.mrb[97].mxu1  ;;  %v8108_v12 = vpop.f32.mrb[129].mxu0 }
 0x8c2   : > { %v7741_v14 = vld [vmem:[#allocation3 + $0x199] sm:$0xff]  ;;  %v8005_v27 = vadd.f32 %v7973_v36, %v7846_v23  ;;  %v8267_v26 = vadd.f32 %v8235_v44, %v8108_v12  ;;  %v11800_v8 = vpop.f32.mrb[98].mxu1  ;;  %v11834_v52 = vpop.f32.mrb[130].mxu0 }
 0x8c3   : > { %v7773_v24 = vadd.f32 %v11793_v22, %v7741_v14  ;;  %v7739_v63 = vld [vmem:[#allocation3 + $0x181] sm:$0xff]  ;;  %8039 = vst.msk [vmem:[#allocation3 + $0x48] sm:$0xff] %vm553_vm1, %v8007_v59  ;;  %v8008_v43 = vadd.f32 %v11800_v8, %v7976_v61  ;;  %v7849_v19 = vpop.f32.mrb[99].mxu1  ;;  %v8111_v0 = vpop.f32.mrb[131].mxu0  ;;  %v7982_v36 = vld [vmem:[#allocation3 + $0x98] sm:$0xff] }
 0x8c4   : > { %v7771_v2 = vadd.f32 %v7739_v63, %v7696_v45  ;;  %v7742_v7 = vld [vmem:[#allocation3 + $0x1a1] sm:$0xff]  ;;  %8037 = vst.msk [vmem:[#allocation3 + $0x30] sm:$0xff] %vm553_vm1, %v8005_v27  ;;  %8299 = vst.msk [vmem:[#allocation3 + $0x1a] sm:$0xff] %vm553_vm1, %v8267_v26  ;;  %v8006_v3 = vadd.f32 %v7974_v20, %v7849_v19  ;;  %v8268_v9 = vadd.f32 %v8236_v55, %v8111_v0  ;;  %v7987_v19 = vld [vmem:[#allocation3 + $0xd8] sm:$0xff] }
 0x8c5   : > { %7805 = vst.msk [vmem:[#allocation3 + $0x199] sm:$0xff] %vm553_vm1, %v7773_v24  ;;  %v7774_v4 = vadd.f32 %v11794_v50, %v7742_v7  ;;  %v7740_v11 = vld [vmem:[#allocation3 + $0x189] sm:$0xff]  ;;  %8040 = vst.msk [vmem:[#allocation3 + $0x50] sm:$0xff] %vm553_vm1, %v8008_v43  ;;  %12014 = vmatmul.mubr.msk.bf16.gmra.mrb[204].mxu1 %vm1069_vm3, %v14628_v10  ;;  %v7977_v10 = vld [vmem:[#allocation3 + $0x60] sm:$0xff] }
 0x8c6   : > { %7803 = vst.msk [vmem:[#allocation3 + $0x181] sm:$0xff] %vm553_vm1, %v7771_v2  ;;  %v7772_v21 = vadd.f32 %v7740_v11, %v7699_v54  ;;  %8038 = vst.msk [vmem:[#allocation3 + $0x38] sm:$0xff] %vm553_vm1, %v8006_v3  ;;  %12017 = vmatprep.mubr.msk.bf16.mxu1 %vm1069_vm3, %v14646_v58  ;;  %v7978_v58 = vld [vmem:[#allocation3 + $0x68] sm:$0xff]  ;;  %v7985_v2 = vld [vmem:[#allocation3 + $0xc0] sm:$0xff] }
 0x8c7   : > { %8300 = vst.msk [vmem:[#allocation3 + $0x22] sm:$0xff] %vm553_vm1, %v8268_v9  ;;  %7806 = vst.msk [vmem:[#allocation3 + $0x1a1] sm:$0xff] %vm553_vm1, %v7774_v4  ;;  %v7988_v4 = vld [vmem:[#allocation3 + $0xe0] sm:$0xff] }
 0x8c8   : > { %7804 = vst.msk [vmem:[#allocation3 + $0x189] sm:$0xff] %vm553_vm1, %v7772_v21  ;;  %v11803_v13 = vpop.f32.mrb[100].mxu1  ;;  %v11837_v30 = vpop.f32.mrb[132].mxu0 }
 0x8c9   : > { %v8011_v31 = vadd.f32 %v11803_v13, %v7979_v15  ;;  %v7862_v16 = vpop.f32.mrb[101].mxu1  ;;  %v8124_v17 = vpop.f32.mrb[133].mxu0  ;;  %v7986_v13 = vld [vmem:[#allocation3 + $0xc8] sm:$0xff] }
 0x8ca   : > { %v8009_v22 = vadd.f32 %v7977_v10, %v7862_v16  ;;  %v11804_v25 = vpop.f32.mrb[102].mxu1  ;;  %v11838_v32 = vpop.f32.mrb[134].mxu0 }
 0x8cb   : > { %8043 = vst.msk [vmem:[#allocation3 + $0x78] sm:$0xff] %vm553_vm1, %v8011_v31  ;;  %v8012_v45 = vadd.f32 %v11804_v25, %v7980_v28  ;;  %v7865_v33 = vpop.f32.mrb[103].mxu1  ;;  %v8127_v60 = vpop.f32.mrb[135].mxu0 }
 0x8cc   : > { %8041 = vst.msk [vmem:[#allocation3 + $0x60] sm:$0xff] %vm553_vm1, %v8009_v22  ;;  %v8239_v34 = vld [vmem:[#allocation3 + $0x4a] sm:$0xff]  ;;  %v8010_v5 = vadd.f32 %v7978_v58, %v7865_v33  ;;  %v8240_v50 = vld [vmem:[#allocation3 + $0x52] sm:$0xff] }
 0x8cd   : > { %v8237_v51 = vld [vmem:[#allocation3 + $0x32] sm:$0xff]  ;;  %v8271_v35 = vadd.f32 %v8239_v34, %v8124_v17  ;;  %8044 = vst.msk [vmem:[#allocation3 + $0x80] sm:$0xff] %vm553_vm1, %v8012_v45  ;;  %v8272_v40 = vadd.f32 %v8240_v50, %v8127_v60  ;;  %12018 = vmatmul.mubr.msk.bf16.gmra.mrb[208].mxu1 %vm1069_vm3, %v14644_v1  ;;  %v8238_v56 = vld [vmem:[#allocation3 + $0x3a] sm:$0xff]  ;;  %v7991_v33 = vld [vmem:[#allocation3 + $0x108] sm:$0xff] }
 0x8ce   : > { %v8269_v54 = vadd.f32 %v14989_v49, %v8237_v51  ;;  %8042 = vst.msk [vmem:[#allocation3 + $0x68] sm:$0xff] %vm553_vm1, %v8010_v5  ;;  %12021 = vmatprep.mubr.msk.bf16.mxu1 %vm1069_vm3, %v14662_v18  ;;  %v8270_v29 = vadd.f32 %v11834_v52, %v8238_v56  ;;  %v7984_v49 = vld [vmem:[#allocation3 + $0xb0] sm:$0xff] }
 0x8cf   : > { %8303 = vst.msk [vmem:[#allocation3 + $0x4a] sm:$0xff] %vm553_vm1, %v8271_v35  ;;  %8304 = vst.msk [vmem:[#allocation3 + $0x52] sm:$0xff] %vm553_vm1, %v8272_v40  ;;  %v7989_v34 = vld [vmem:[#allocation3 + $0xf0] sm:$0xff] }
 0x8d0   : > { %8301 = vst.msk [vmem:[#allocation3 + $0x32] sm:$0xff] %vm553_vm1, %v8269_v54  ;;  %v11807_v41 = vpop.f32.mrb[104].mxu1  ;;  %v11841_v46 = vpop.f32.mrb[136].mxu0  ;;  %8302 = vst.msk [vmem:[#allocation3 + $0x3a] sm:$0xff] %vm553_vm1, %v8270_v29  ;;  %v7992_v35 = vld [vmem:[#allocation3 + $0x110] sm:$0xff]  ;;  %v7990_v54 = vld [vmem:[#allocation3 + $0xf8] sm:$0xff] }
 0x8d1   : > { %v8015_v1 = vadd.f32 %v11807_v41, %v7983_v39  ;;  %v7878_v47 = vpop.f32.mrb[105].mxu1  ;;  %v8140_v44 = vpop.f32.mrb[137].mxu0 }
 0x8d2   : > { %v8013_v57 = vadd.f32 %v7981_v48, %v7878_v47  ;;  %v11808_v62 = vpop.f32.mrb[106].mxu1  ;;  %v11842_v18 = vpop.f32.mrb[138].mxu0 }
 0x8d3   : > { %8047 = vst.msk [vmem:[#allocation3 + $0xa8] sm:$0xff] %vm553_vm1, %v8015_v1  ;;  %v8016_v59 = vadd.f32 %v11808_v62, %v7984_v49  ;;  %v7881_v23 = vpop.f32.mrb[107].mxu1  ;;  %v8143_v12 = vpop.f32.mrb[139].mxu0 }
 0x8d4   : > { %8045 = vst.msk [vmem:[#allocation3 + $0x90] sm:$0xff] %vm553_vm1, %v8013_v57  ;;  %v8243_v55 = vld [vmem:[#allocation3 + $0x7a] sm:$0xff]  ;;  %v8014_v14 = vadd.f32 %v7982_v36, %v7881_v23  ;;  %v8244_v27 = vld [vmem:[#allocation3 + $0x82] sm:$0xff] }
 0x8d5   : > { %v8241_v26 = vld [vmem:[#allocation3 + $0x62] sm:$0xff]  ;;  %v8275_v8 = vadd.f32 %v8243_v55, %v8140_v44  ;;  %8048 = vst.msk [vmem:[#allocation3 + $0xb0] sm:$0xff] %vm553_vm1, %v8016_v59  ;;  %v8276_v61 = vadd.f32 %v8244_v27, %v8143_v12  ;;  %12022 = vmatmul.mubr.msk.bf16.gmra.mrb[212].mxu1 %vm1069_vm3, %v14660_v42  ;;  %v8242_v52 = vld [vmem:[#allocation3 + $0x6a] sm:$0xff] }
 0x8d6   : > { %v8273_v24 = vadd.f32 %v11837_v30, %v8241_v26  ;;  %8046 = vst.msk [vmem:[#allocation3 + $0x98] sm:$0xff] %vm553_vm1, %v8014_v14  ;;  %12025 = vmatprep.mubr.msk.bf16.mxu1 %vm1069_vm3, %v14678_v37  ;;  %v8274_v63 = vadd.f32 %v11838_v32, %v8242_v52  ;;  %v7993_v12 = vld [vmem:[#allocation3 + $0x120] sm:$0xff]  ;;  %v7994_v52 = vld [vmem:[#allocation3 + $0x128] sm:$0xff] }
 0x8d7   : > { %8307 = vst.msk [vmem:[#allocation3 + $0x7a] sm:$0xff] %vm553_vm1, %v8275_v8  ;;  %8308 = vst.msk [vmem:[#allocation3 + $0x82] sm:$0xff] %vm553_vm1, %v8276_v61  ;;  %v7996_v27 = vld [vmem:[#allocation3 + $0x140] sm:$0xff] }
 0x8d8   : > { %8305 = vst.msk [vmem:[#allocation3 + $0x62] sm:$0xff] %vm553_vm1, %v8273_v24  ;;  %v11811_v43 = vpop.f32.mrb[108].mxu1  ;;  %v11845_v20 = vpop.f32.mrb[140].mxu0  ;;  %8306 = vst.msk [vmem:[#allocation3 + $0x6a] sm:$0xff] %vm553_vm1, %v8274_v63 }
 0x8d9   : > { %v8019_v42 = vadd.f32 %v11811_v43, %v7987_v19  ;;  %v7894_v0 = vpop.f32.mrb[109].mxu1  ;;  %v8156_v7 = vpop.f32.mrb[141].mxu0 }
 0x8da   : > { %v8017_v3 = vadd.f32 %v7985_v2, %v7894_v0  ;;  %v11812_v9 = vpop.f32.mrb[110].mxu1  ;;  %v11846_v37 = vpop.f32.mrb[142].mxu0 }
 0x8db   : > { %8051 = vst.msk [vmem:[#allocation3 + $0xd8] sm:$0xff] %vm553_vm1, %v8019_v42  ;;  %v8020_v11 = vadd.f32 %v11812_v9, %v7988_v4  ;;  %v7897_v21 = vpop.f32.mrb[111].mxu1  ;;  %v8159_v15 = vpop.f32.mrb[143].mxu0  ;;  %v7999_v4 = vld [vmem:[#allocation3 + $0x168] sm:$0xff] }
 0x8dc   : > { %8049 = vst.msk [vmem:[#allocation3 + $0xc0] sm:$0xff] %vm553_vm1, %v8017_v3  ;;  %v8247_v30 = vld [vmem:[#allocation3 + $0xaa] sm:$0xff]  ;;  %v8018_v31 = vadd.f32 %v7986_v13, %v7897_v21  ;;  %v8248_v16 = vld [vmem:[#allocation3 + $0xb2] sm:$0xff] }
 0x8dd   : > { %v8245_v10 = vld [vmem:[#allocation3 + $0x92] sm:$0xff]  ;;  %v8279_v17 = vadd.f32 %v8247_v30, %v8156_v7  ;;  %8052 = vst.msk [vmem:[#allocation3 + $0xe0] sm:$0xff] %vm553_vm1, %v8020_v11  ;;  %v8280_v22 = vadd.f32 %v8248_v16, %v8159_v15  ;;  %12026 = vmatmul.mubr.msk.bf16.gmra.mrb[216].mxu1 %vm1069_vm3, %v14676_v6  ;;  %v8246_v25 = vld [vmem:[#allocation3 + $0x9a] sm:$0xff] }
 0x8de   : > { %v8277_v28 = vadd.f32 %v11841_v46, %v8245_v10  ;;  %8050 = vst.msk [vmem:[#allocation3 + $0xc8] sm:$0xff] %vm553_vm1, %v8018_v31  ;;  %12029 = vmatprep.mubr.msk.bf16.mxu1 %vm1069_vm3, %v14694_v53  ;;  %v8278_v32 = vadd.f32 %v11842_v18, %v8246_v25  ;;  %v7995_v18 = vld [vmem:[#allocation3 + $0x138] sm:$0xff]  ;;  %v7997_v13 = vld [vmem:[#allocation3 + $0x150] sm:$0xff] }
 0x8df   : > { %8311 = vst.msk [vmem:[#allocation3 + $0xaa] sm:$0xff] %vm553_vm1, %v8279_v17  ;;  %8312 = vst.msk [vmem:[#allocation3 + $0xb2] sm:$0xff] %vm553_vm1, %v8280_v22  ;;  %v8000_v16 = vld [vmem:[#allocation3 + $0x170] sm:$0xff]  ;;  %v7998_v25 = vld [vmem:[#allocation3 + $0x158] sm:$0xff] }
 0x8e0   : > { %8309 = vst.msk [vmem:[#allocation3 + $0x92] sm:$0xff] %vm553_vm1, %v8277_v28  ;;  %v11815_v45 = vpop.f32.mrb[112].mxu1  ;;  %v11849_v58 = vpop.f32.mrb[144].mxu0  ;;  %8310 = vst.msk [vmem:[#allocation3 + $0x9a] sm:$0xff] %vm553_vm1, %v8278_v32 }
 0x8e1   : > { %v8023_v6 = vadd.f32 %v11815_v45, %v7991_v33  ;;  %v7910_v60 = vpop.f32.mrb[113].mxu1  ;;  %v8172_v5 = vpop.f32.mrb[145].mxu0 }
 0x8e2   : > { %v8021_v50 = vadd.f32 %v7989_v34, %v7910_v60  ;;  %v11816_v51 = vpop.f32.mrb[114].mxu1  ;;  %v11850_v53 = vpop.f32.mrb[146].mxu0 }
 0x8e3   : > { %8055 = vst.msk [vmem:[#allocation3 + $0x108] sm:$0xff] %vm553_vm1, %v8023_v6  ;;  %v8024_v40 = vadd.f32 %v11816_v51, %v7992_v35  ;;  %v7913_v56 = vpop.f32.mrb[115].mxu1  ;;  %v8175_v29 = vpop.f32.mrb[147].mxu0  ;;  %v8003_v35 = vld [vmem:[#allocation3 + $0x198] sm:$0xff] }
 0x8e4   : > { %8053 = vst.msk [vmem:[#allocation3 + $0xf0] sm:$0xff] %vm553_vm1, %v8021_v50  ;;  %v8251_v41 = vld [vmem:[#allocation3 + $0xda] sm:$0xff]  ;;  %v8022_v39 = vadd.f32 %v7990_v54, %v7913_v56  ;;  %v8252_v46 = vld [vmem:[#allocation3 + $0xe2] sm:$0xff] }
 0x8e5   : > { %v8249_v1 = vld [vmem:[#allocation3 + $0xc2] sm:$0xff]  ;;  %v8283_v47 = vadd.f32 %v8251_v41, %v8172_v5  ;;  %8056 = vst.msk [vmem:[#allocation3 + $0x110] sm:$0xff] %vm553_vm1, %v8024_v40  ;;  %v8284_v48 = vadd.f32 %v8252_v46, %v8175_v29  ;;  %12030 = vmatmul.mubr.msk.bf16.gmra.mrb[220].mxu1 %vm1069_vm3, %v14692_v38  ;;  %v8250_v44 = vld [vmem:[#allocation3 + $0xca] sm:$0xff] }
 0x8e6   : > { %v8281_v57 = vadd.f32 %v11845_v20, %v8249_v1  ;;  %8054 = vst.msk [vmem:[#allocation3 + $0xf8] sm:$0xff] %vm553_vm1, %v8022_v39  ;;  %v8282_v62 = vadd.f32 %v11846_v37, %v8250_v44  ;;  %v8001_v54 = vld [vmem:[#allocation3 + $0x180] sm:$0xff]  ;;  %v8002_v44 = vld [vmem:[#allocation3 + $0x188] sm:$0xff] }
 0x8e7   : > { %8315 = vst.msk [vmem:[#allocation3 + $0xda] sm:$0xff] %vm553_vm1, %v8283_v47  ;;  %8316 = vst.msk [vmem:[#allocation3 + $0xe2] sm:$0xff] %vm553_vm1, %v8284_v48  ;;  %v8004_v46 = vld [vmem:[#allocation3 + $0x1a0] sm:$0xff] }
 0x8e8   : > { %8313 = vst.msk [vmem:[#allocation3 + $0xc2] sm:$0xff] %vm553_vm1, %v8281_v57  ;;  %v11819_v49 = vpop.f32.mrb[116].mxu1  ;;  %v11853_v59 = vpop.f32.mrb[148].mxu0  ;;  %8314 = vst.msk [vmem:[#allocation3 + $0xca] sm:$0xff] %vm553_vm1, %v8282_v62 }
 0x8e9   : > { %v8027_v23 = vadd.f32 %v11819_v49, %v7995_v18  ;;  %v7926_v36 = vpop.f32.mrb[117].mxu1  ;;  %v8188_v38 = vpop.f32.mrb[149].mxu0 }
 0x8ea   : > { %v8025_v55 = vadd.f32 %v7993_v12, %v7926_v36  ;;  %v11820_v14 = vpop.f32.mrb[118].mxu1  ;;  %v11854_v26 = vpop.f32.mrb[150].mxu0 }
 0x8eb   : > { %8059 = vst.msk [vmem:[#allocation3 + $0x138] sm:$0xff] %vm553_vm1, %v8027_v23  ;;  %v8028_v8 = vadd.f32 %v11820_v14, %v7996_v27  ;;  %v7929_v61 = vpop.f32.mrb[119].mxu1  ;;  %v8191_v24 = vpop.f32.mrb[151].mxu0  ;;  %v8499_v27 = vld [vmem:[#allocation3 + $0x31] sm:$0xff] }
 0x8ec   : > { %8057 = vst.msk [vmem:[#allocation3 + $0x120] sm:$0xff] %vm553_vm1, %v8025_v55  ;;  %v8255_v63 = vld [vmem:[#allocation3 + $0x10a] sm:$0xff]  ;;  %v8026_v43 = vadd.f32 %v7994_v52, %v7929_v61  ;;  %v8256_v19 = vld [vmem:[#allocation3 + $0x112] sm:$0xff] }
 0x8ed   : > { %v8253_v20 = vld [vmem:[#allocation3 + $0xf2] sm:$0xff]  ;;  %v8287_v42 = vadd.f32 %v8255_v63, %v8188_v38  ;;  %8060 = vst.msk [vmem:[#allocation3 + $0x140] sm:$0xff] %vm553_vm1, %v8028_v8  ;;  %v8288_v0 = vadd.f32 %v8256_v19, %v8191_v24  ;;  %v8254_v2 = vld [vmem:[#allocation3 + $0xfa] sm:$0xff] }
 0x8ee   : > { %v8285_v7 = vadd.f32 %v11849_v58, %v8253_v20  ;;  %8058 = vst.msk [vmem:[#allocation3 + $0x128] sm:$0xff] %vm553_vm1, %v8026_v43  ;;  %v8286_v3 = vadd.f32 %v11850_v53, %v8254_v2  ;;  %v8497_v52 = vld [vmem:[#allocation3 + $0x19] sm:$0xff]  ;;  %v8498_v2 = vld [vmem:[#allocation3 + $0x21] sm:$0xff] }
 0x8ef   : > { %8319 = vst.msk [vmem:[#allocation3 + $0x10a] sm:$0xff] %vm553_vm1, %v8287_v42  ;;  %8320 = vst.msk [vmem:[#allocation3 + $0x112] sm:$0xff] %vm553_vm1, %v8288_v0  ;;  %v8500_v19 = vld [vmem:[#allocation3 + $0x39] sm:$0xff] }
 0x8f0   : > { %8317 = vst.msk [vmem:[#allocation3 + $0xf2] sm:$0xff] %vm553_vm1, %v8285_v7  ;;  %v11823_v9 = vpop.f32.mrb[120].mxu1  ;;  %v11857_v37 = vpop.f32.mrb[152].mxu0  ;;  %8318 = vst.msk [vmem:[#allocation3 + $0xfa] sm:$0xff] %vm553_vm1, %v8286_v3 }
 0x8f1   : > { %v8031_v11 = vadd.f32 %v11823_v9, %v7999_v4  ;;  %v7942_v21 = vpop.f32.mrb[121].mxu1  ;;  %v8204_v15 = vpop.f32.mrb[153].mxu0 }
 0x8f2   : > { %v8029_v30 = vadd.f32 %v7997_v13, %v7942_v21  ;;  %v11824_v31 = vpop.f32.mrb[122].mxu1  ;;  %v11858_v10 = vpop.f32.mrb[154].mxu0  ;;  %v8503_v13 = vld [vmem:[#allocation3 + $0x61] sm:$0xff] }
 0x8f3   : > { %8063 = vst.msk [vmem:[#allocation3 + $0x168] sm:$0xff] %vm553_vm1, %v8031_v11  ;;  %v8032_v17 = vadd.f32 %v11824_v31, %v8000_v16  ;;  %v7945_v22 = vpop.f32.mrb[123].mxu1  ;;  %v8207_v28 = vpop.f32.mrb[155].mxu0  ;;  %v8501_v16 = vld [vmem:[#allocation3 + $0x49] sm:$0xff] }
 0x8f4   : > { %8061 = vst.msk [vmem:[#allocation3 + $0x150] sm:$0xff] %vm553_vm1, %v8029_v30  ;;  %v8259_v32 = vld [vmem:[#allocation3 + $0x13a] sm:$0xff]  ;;  %v8030_v45 = vadd.f32 %v7998_v25, %v7945_v22  ;;  %v8260_v33 = vld [vmem:[#allocation3 + $0x142] sm:$0xff] }
 0x8f5   : > { %v8257_v58 = vld [vmem:[#allocation3 + $0x122] sm:$0xff]  ;;  %v8291_v6 = vadd.f32 %v8259_v32, %v8204_v15  ;;  %8064 = vst.msk [vmem:[#allocation3 + $0x170] sm:$0xff] %vm553_vm1, %v8032_v17  ;;  %v8292_v60 = vadd.f32 %v8260_v33, %v8207_v28  ;;  %v8258_v34 = vld [vmem:[#allocation3 + $0x12a] sm:$0xff] }
 0x8f6   : > { %v8289_v5 = vadd.f32 %v11853_v59, %v8257_v58  ;;  %8062 = vst.msk [vmem:[#allocation3 + $0x158] sm:$0xff] %vm553_vm1, %v8030_v45  ;;  %v8290_v50 = vadd.f32 %v11854_v26, %v8258_v34  ;;  %v8504_v28 = vld [vmem:[#allocation3 + $0x69] sm:$0xff] }
 0x8f7   : > { %8323 = vst.msk [vmem:[#allocation3 + $0x13a] sm:$0xff] %vm553_vm1, %v8291_v6  ;;  %8324 = vst.msk [vmem:[#allocation3 + $0x142] sm:$0xff] %vm553_vm1, %v8292_v60  ;;  %v8502_v60 = vld [vmem:[#allocation3 + $0x51] sm:$0xff] }
 0x8f8   : > { %8321 = vst.msk [vmem:[#allocation3 + $0x122] sm:$0xff] %vm553_vm1, %v8289_v5  ;;  %v11827_v51 = vpop.f32.mrb[124].mxu1  ;;  %v11861_v53 = vpop.f32.mrb[156].mxu0  ;;  %8322 = vst.msk [vmem:[#allocation3 + $0x12a] sm:$0xff] %vm553_vm1, %v8290_v50 }
 0x8f9   : > { %v8035_v40 = vadd.f32 %v11827_v51, %v8003_v35  ;;  %v7958_v56 = vpop.f32.mrb[125].mxu1  ;;  %v8220_v29 = vpop.f32.mrb[157].mxu0 }
 0x8fa   : > { %v8033_v41 = vadd.f32 %v8001_v54, %v7958_v56  ;;  %v11828_v39 = vpop.f32.mrb[126].mxu1  ;;  %v11862_v1 = vpop.f32.mrb[158].mxu0  ;;  %v8507_v54 = vld [vmem:[#allocation3 + $0x91] sm:$0xff] }
 0x8fb   : > { %8067 = vst.msk [vmem:[#allocation3 + $0x198] sm:$0xff] %vm553_vm1, %v8035_v40  ;;  %v8036_v47 = vadd.f32 %v11828_v39, %v8004_v46  ;;  %v7961_v48 = vpop.f32.mrb[127].mxu1  ;;  %v8223_v57 = vpop.f32.mrb[159].mxu0  ;;  %v8505_v46 = vld [vmem:[#allocation3 + $0x79] sm:$0xff] }
 0x8fc   : > { %8065 = vst.msk [vmem:[#allocation3 + $0x180] sm:$0xff] %vm553_vm1, %v8033_v41  ;;  %v8263_v62 = vld [vmem:[#allocation3 + $0x16a] sm:$0xff]  ;;  %v8034_v49 = vadd.f32 %v8002_v44, %v7961_v48  ;;  %v8264_v18 = vld [vmem:[#allocation3 + $0x172] sm:$0xff] }
 0x8fd   : > { %v8261_v59 = vld [vmem:[#allocation3 + $0x152] sm:$0xff]  ;;  %v8295_v23 = vadd.f32 %v8263_v62, %v8220_v29  ;;  %8068 = vst.msk [vmem:[#allocation3 + $0x1a0] sm:$0xff] %vm553_vm1, %v8036_v47  ;;  %v8296_v36 = vadd.f32 %v8264_v18, %v8223_v57  ;;  %v8262_v12 = vld [vmem:[#allocation3 + $0x15a] sm:$0xff] }
 0x8fe   : > { %v8293_v38 = vadd.f32 %v11857_v37, %v8261_v59  ;;  %8066 = vst.msk [vmem:[#allocation3 + $0x188] sm:$0xff] %vm553_vm1, %v8034_v49  ;;  %v8294_v55 = vadd.f32 %v11858_v10, %v8262_v12  ;;  %v8508_v57 = vld [vmem:[#allocation3 + $0x99] sm:$0xff] }
 0x8ff   : > { %8327 = vst.msk [vmem:[#allocation3 + $0x16a] sm:$0xff] %vm553_vm1, %v8295_v23  ;;  %8328 = vst.msk [vmem:[#allocation3 + $0x172] sm:$0xff] %vm553_vm1, %v8296_v36  ;;  %v8506_v36 = vld [vmem:[#allocation3 + $0x81] sm:$0xff] }
 0x900   : > { %8325 = vst.msk [vmem:[#allocation3 + $0x152] sm:$0xff] %vm553_vm1, %v8293_v38  ;;  %v11867_v14 = vpop.f32.mrb[128].mxu1  ;;  %v11901_v26 = vpop.f32.mrb[160].mxu0  ;;  %8326 = vst.msk [vmem:[#allocation3 + $0x15a] sm:$0xff] %vm553_vm1, %v8294_v55 }
 0x901   : > { %v8531_v8 = vadd.f32 %v11867_v14, %v8499_v27  ;;  %v8370_v61 = vpop.f32.mrb[129].mxu1  ;;  %v8632_v24 = vpop.f32.mrb[161].mxu0 }
 0x902   : > { %v8529_v63 = vadd.f32 %v8497_v52, %v8370_v61  ;;  %v11868_v43 = vpop.f32.mrb[130].mxu1  ;;  %v11902_v20 = vpop.f32.mrb[162].mxu0  ;;  %v8511_v52 = vld [vmem:[#allocation3 + $0xc1] sm:$0xff] }
 0x903   : > { %8563 = vst.msk [vmem:[#allocation3 + $0x31] sm:$0xff] %vm553_vm1, %v8531_v8  ;;  %v8532_v42 = vadd.f32 %v11868_v43, %v8500_v19  ;;  %v8373_v0 = vpop.f32.mrb[131].mxu1  ;;  %v8635_v7 = vpop.f32.mrb[163].mxu0  ;;  %v8509_v19 = vld [vmem:[#allocation3 + $0xa9] sm:$0xff] }
 0x904   : > { %8561 = vst.msk [vmem:[#allocation3 + $0x19] sm:$0xff] %vm553_vm1, %v8529_v63  ;;  %v8530_v3 = vadd.f32 %v8498_v2, %v8373_v0 }
 0x905   : > { %8564 = vst.msk [vmem:[#allocation3 + $0x39] sm:$0xff] %vm553_vm1, %v8532_v42  ;;  %v8265_v9 = vld [vmem:[#allocation3 + $0x182] sm:$0xff]  ;;  %v8266_v4 = vld [vmem:[#allocation3 + $0x18a] sm:$0xff] }
 0x906   : > { %8562 = vst.msk [vmem:[#allocation3 + $0x21] sm:$0xff] %vm553_vm1, %v8530_v3  ;;  %v8297_v37 = vadd.f32 %v11861_v53, %v8265_v9  ;;  %v8298_v11 = vadd.f32 %v11862_v1, %v8266_v4 }
 0x908   : > { %v11871_v21 = vpop.f32.mrb[132].mxu1  ;;  %v11905_v15 = vpop.f32.mrb[164].mxu0  ;;  %8329 = vst.msk [vmem:[#allocation3 + $0x182] sm:$0xff] %vm553_vm1, %v8297_v37  ;;  %8330 = vst.msk [vmem:[#allocation3 + $0x18a] sm:$0xff] %vm553_vm1, %v8298_v11 }
 0x909   : > { %v8535_v30 = vadd.f32 %v11871_v21, %v8503_v13  ;;  %v8386_v31 = vpop.f32.mrb[133].mxu1  ;;  %v8648_v10 = vpop.f32.mrb[165].mxu0  ;;  %v8510_v21 = vld [vmem:[#allocation3 + $0xb1] sm:$0xff] }
 0x90a   : > { %v8761_v17 = vld [vmem:[#allocation3 + $0x30] sm:$0xff]  ;;  %v8533_v22 = vadd.f32 %v8501_v16, %v8386_v31  ;;  %v11872_v25 = vpop.f32.mrb[134].mxu1  ;;  %v11906_v32 = vpop.f32.mrb[166].mxu0 }
 0x90b   : > { %v8793_v45 = vadd.f32 %v11901_v26, %v8761_v17  ;;  %v8759_v33 = vld [vmem:[#allocation3 + $0x18] sm:$0xff]  ;;  %8567 = vst.msk [vmem:[#allocation3 + $0x61] sm:$0xff] %vm553_vm1, %v8535_v30  ;;  %v8536_v58 = vadd.f32 %v11872_v25, %v8504_v28  ;;  %v8389_v6 = vpop.f32.mrb[135].mxu1  ;;  %v8651_v34 = vpop.f32.mrb[167].mxu0 }
 0x90c   : > { %v8791_v5 = vadd.f32 %v8759_v33, %v8632_v24  ;;  %v8762_v50 = vld [vmem:[#allocation3 + $0x38] sm:$0xff]  ;;  %8565 = vst.msk [vmem:[#allocation3 + $0x49] sm:$0xff] %vm553_vm1, %v8533_v22  ;;  %v8534_v51 = vadd.f32 %v8502_v60, %v8389_v6 }
 0x90d   : > { %8825 = vst.msk [vmem:[#allocation3 + $0x30] sm:$0xff] %vm553_vm1, %v8793_v45  ;;  %v8794_v35 = vadd.f32 %v11902_v20, %v8762_v50  ;;  %v8760_v53 = vld [vmem:[#allocation3 + $0x20] sm:$0xff]  ;;  %8568 = vst.msk [vmem:[#allocation3 + $0x69] sm:$0xff] %vm553_vm1, %v8536_v58  ;;  %v8515_v25 = vld [vmem:[#allocation3 + $0xf1] sm:$0xff] }
 0x90e   : > { %8823 = vst.msk [vmem:[#allocation3 + $0x18] sm:$0xff] %vm553_vm1, %v8791_v5  ;;  %v8792_v40 = vadd.f32 %v8760_v53, %v8635_v7  ;;  %8566 = vst.msk [vmem:[#allocation3 + $0x51] sm:$0xff] %vm553_vm1, %v8534_v51  ;;  %v8512_v7 = vld [vmem:[#allocation3 + $0xc9] sm:$0xff]  ;;  %v8513_v33 = vld [vmem:[#allocation3 + $0xd9] sm:$0xff] }
 0x90f   : > { %8826 = vst.msk [vmem:[#allocation3 + $0x38] sm:$0xff] %vm553_vm1, %v8794_v35  ;;  %v8516_v5 = vld [vmem:[#allocation3 + $0xf9] sm:$0xff] }
 0x910   : > { %8824 = vst.msk [vmem:[#allocation3 + $0x20] sm:$0xff] %vm553_vm1, %v8792_v40  ;;  %v11875_v56 = vpop.f32.mrb[136].mxu1  ;;  %v11909_v29 = vpop.f32.mrb[168].mxu0 }
 0x911   : > { %v8539_v41 = vadd.f32 %v11875_v56, %v8507_v54  ;;  %v8402_v39 = vpop.f32.mrb[137].mxu1  ;;  %v8664_v1 = vpop.f32.mrb[169].mxu0  ;;  %v8514_v56 = vld [vmem:[#allocation3 + $0xe1] sm:$0xff] }
 0x912   : > { %v8765_v47 = vld [vmem:[#allocation3 + $0x60] sm:$0xff]  ;;  %v8537_v48 = vadd.f32 %v8505_v46, %v8402_v39  ;;  %v11876_v44 = vpop.f32.mrb[138].mxu1  ;;  %v11910_v62 = vpop.f32.mrb[170].mxu0 }
 0x913   : > { %v8797_v49 = vadd.f32 %v11905_v15, %v8765_v47  ;;  %v8763_v18 = vld [vmem:[#allocation3 + $0x48] sm:$0xff]  ;;  %8571 = vst.msk [vmem:[#allocation3 + $0x91] sm:$0xff] %vm553_vm1, %v8539_v41  ;;  %v8540_v59 = vadd.f32 %v11876_v44, %v8508_v57  ;;  %v8405_v23 = vpop.f32.mrb[139].mxu1  ;;  %v8667_v12 = vpop.f32.mrb[171].mxu0 }
 0x914   : > { %v8795_v38 = vadd.f32 %v8763_v18, %v8648_v10  ;;  %v8766_v55 = vld [vmem:[#allocation3 + $0x68] sm:$0xff]  ;;  %8569 = vst.msk [vmem:[#allocation3 + $0x79] sm:$0xff] %vm553_vm1, %v8537_v48  ;;  %v8538_v14 = vadd.f32 %v8506_v36, %v8405_v23 }
 0x915   : > { %8829 = vst.msk [vmem:[#allocation3 + $0x60] sm:$0xff] %vm553_vm1, %v8797_v49  ;;  %v8798_v27 = vadd.f32 %v11906_v32, %v8766_v55  ;;  %v8764_v26 = vld [vmem:[#allocation3 + $0x50] sm:$0xff]  ;;  %8572 = vst.msk [vmem:[#allocation3 + $0x99] sm:$0xff] %vm553_vm1, %v8540_v59  ;;  %v8519_v44 = vld [vmem:[#allocation3 + $0x121] sm:$0xff] }
 0x916   : > { %8827 = vst.msk [vmem:[#allocation3 + $0x48] sm:$0xff] %vm553_vm1, %v8795_v38  ;;  %v8796_v8 = vadd.f32 %v8764_v26, %v8651_v34  ;;  %8570 = vst.msk [vmem:[#allocation3 + $0x81] sm:$0xff] %vm553_vm1, %v8538_v14  ;;  %v8517_v18 = vld [vmem:[#allocation3 + $0x109] sm:$0xff] }
 0x917   : > { %8830 = vst.msk [vmem:[#allocation3 + $0x68] sm:$0xff] %vm553_vm1, %v8798_v27  ;;  %v8520_v38 = vld [vmem:[#allocation3 + $0x129] sm:$0xff] }
 0x918   : > { %8828 = vst.msk [vmem:[#allocation3 + $0x50] sm:$0xff] %vm553_vm1, %v8796_v8  ;;  %v11879_v61 = vpop.f32.mrb[140].mxu1  ;;  %v11913_v24 = vpop.f32.mrb[172].mxu0 }
 0x919   : > { %v8543_v63 = vadd.f32 %v11879_v61, %v8511_v52  ;;  %v8418_v43 = vpop.f32.mrb[141].mxu1  ;;  %v8680_v20 = vpop.f32.mrb[173].mxu0  ;;  %v8518_v61 = vld [vmem:[#allocation3 + $0x111] sm:$0xff] }
 0x91a   : > { %v8769_v42 = vld [vmem:[#allocation3 + $0x90] sm:$0xff]  ;;  %v8541_v0 = vadd.f32 %v8509_v19, %v8418_v43  ;;  %v11880_v2 = vpop.f32.mrb[142].mxu1  ;;  %v11914_v3 = vpop.f32.mrb[174].mxu0 }
 0x91b   : > { %v8801_v9 = vadd.f32 %v11909_v29, %v8769_v42  ;;  %v8767_v4 = vld [vmem:[#allocation3 + $0x78] sm:$0xff]  ;;  %8575 = vst.msk [vmem:[#allocation3 + $0xc1] sm:$0xff] %vm553_vm1, %v8543_v63  ;;  %v8544_v37 = vadd.f32 %v11880_v2, %v8512_v7  ;;  %v8421_v11 = vpop.f32.mrb[143].mxu1  ;;  %v8683_v13 = vpop.f32.mrb[175].mxu0 }
 0x91c   : > { %v8799_v15 = vadd.f32 %v8767_v4, %v8664_v1  ;;  %v8770_v30 = vld [vmem:[#allocation3 + $0x98] sm:$0xff]  ;;  %8573 = vst.msk [vmem:[#allocation3 + $0xa9] sm:$0xff] %vm553_vm1, %v8541_v0  ;;  %v8542_v31 = vadd.f32 %v8510_v21, %v8421_v11 }
 0x91d   : > { %8833 = vst.msk [vmem:[#allocation3 + $0x90] sm:$0xff] %vm553_vm1, %v8801_v9  ;;  %v8802_v16 = vadd.f32 %v11910_v62, %v8770_v30  ;;  %v8768_v10 = vld [vmem:[#allocation3 + $0x80] sm:$0xff]  ;;  %8576 = vst.msk [vmem:[#allocation3 + $0xc9] sm:$0xff] %vm553_vm1, %v8544_v37  ;;  %v8523_v2 = vld [vmem:[#allocation3 + $0x151] sm:$0xff] }
 0x91e   : > { %8831 = vst.msk [vmem:[#allocation3 + $0x78] sm:$0xff] %vm553_vm1, %v8799_v15  ;;  %v8800_v17 = vadd.f32 %v8768_v10, %v8667_v12  ;;  %8574 = vst.msk [vmem:[#allocation3 + $0xb1] sm:$0xff] %vm553_vm1, %v8542_v31  ;;  %v8521_v4 = vld [vmem:[#allocation3 + $0x139] sm:$0xff] }
 0x91f   : > { %8834 = vst.msk [vmem:[#allocation3 + $0x98] sm:$0xff] %vm553_vm1, %v8802_v16  ;;  %v8524_v15 = vld [vmem:[#allocation3 + $0x159] sm:$0xff] }
 0x920   : > { %8832 = vst.msk [vmem:[#allocation3 + $0x80] sm:$0xff] %vm553_vm1, %v8800_v17  ;;  %v11883_v22 = vpop.f32.mrb[144].mxu1  ;;  %v11917_v28 = vpop.f32.mrb[176].mxu0 }
 0x921   : > { %v8547_v32 = vadd.f32 %v11883_v22, %v8515_v25  ;;  %v8434_v45 = vpop.f32.mrb[145].mxu1  ;;  %v8696_v58 = vpop.f32.mrb[177].mxu0  ;;  %v8522_v22 = vld [vmem:[#allocation3 + $0x141] sm:$0xff] }
 0x922   : > { %v8773_v6 = vld [vmem:[#allocation3 + $0xc0] sm:$0xff]  ;;  %v8545_v60 = vadd.f32 %v8513_v33, %v8434_v45  ;;  %v11884_v34 = vpop.f32.mrb[146].mxu1  ;;  %v11918_v50 = vpop.f32.mrb[178].mxu0 }
 0x923   : > { %v8805_v51 = vadd.f32 %v11913_v24, %v8773_v6  ;;  %v8771_v35 = vld [vmem:[#allocation3 + $0xa8] sm:$0xff]  ;;  %8579 = vst.msk [vmem:[#allocation3 + $0xf1] sm:$0xff] %vm553_vm1, %v8547_v32  ;;  %v8548_v53 = vadd.f32 %v11884_v34, %v8516_v5  ;;  %v8437_v40 = vpop.f32.mrb[147].mxu1  ;;  %v8699_v54 = vpop.f32.mrb[179].mxu0 }
 0x924   : > { %v8803_v29 = vadd.f32 %v8771_v35, %v8680_v20  ;;  %v8774_v41 = vld [vmem:[#allocation3 + $0xc8] sm:$0xff]  ;;  %8577 = vst.msk [vmem:[#allocation3 + $0xd9] sm:$0xff] %vm553_vm1, %v8545_v60  ;;  %v8546_v39 = vadd.f32 %v8514_v56, %v8437_v40 }
 0x925   : > { %8837 = vst.msk [vmem:[#allocation3 + $0xc0] sm:$0xff] %vm553_vm1, %v8805_v51  ;;  %v8806_v46 = vadd.f32 %v11914_v3, %v8774_v41  ;;  %v8772_v1 = vld [vmem:[#allocation3 + $0xb0] sm:$0xff]  ;;  %8580 = vst.msk [vmem:[#allocation3 + $0xf9] sm:$0xff] %vm553_vm1, %v8548_v53  ;;  %v8527_v34 = vld [vmem:[#allocation3 + $0x181] sm:$0xff] }
 0x926   : > { %8835 = vst.msk [vmem:[#allocation3 + $0xa8] sm:$0xff] %vm553_vm1, %v8803_v29  ;;  %v8804_v47 = vadd.f32 %v8772_v1, %v8683_v13  ;;  %8578 = vst.msk [vmem:[#allocation3 + $0xe1] sm:$0xff] %vm553_vm1, %v8546_v39  ;;  %v8525_v35 = vld [vmem:[#allocation3 + $0x169] sm:$0xff] }
 0x927   : > { %8838 = vst.msk [vmem:[#allocation3 + $0xc8] sm:$0xff] %vm553_vm1, %v8806_v46  ;;  %v8528_v29 = vld [vmem:[#allocation3 + $0x189] sm:$0xff] }
 0x928   : > { %8836 = vst.msk [vmem:[#allocation3 + $0xb0] sm:$0xff] %vm553_vm1, %v8804_v47  ;;  %v11887_v48 = vpop.f32.mrb[148].mxu1  ;;  %v11921_v57 = vpop.f32.mrb[180].mxu0 }
 0x929   : > { %v8551_v62 = vadd.f32 %v11887_v48, %v8519_v44  ;;  %v8450_v49 = vpop.f32.mrb[149].mxu1  ;;  %v8712_v59 = vpop.f32.mrb[181].mxu0  ;;  %v8526_v48 = vld [vmem:[#allocation3 + $0x171] sm:$0xff] }
 0x92a   : > { %v8777_v23 = vld [vmem:[#allocation3 + $0xf0] sm:$0xff]  ;;  %v8549_v36 = vadd.f32 %v8517_v18, %v8450_v49  ;;  %v11888_v12 = vpop.f32.mrb[150].mxu1  ;;  %v11922_v55 = vpop.f32.mrb[182].mxu0 }
 0x92b   : > { %v8809_v14 = vadd.f32 %v11917_v28, %v8777_v23  ;;  %v8775_v27 = vld [vmem:[#allocation3 + $0xd8] sm:$0xff]  ;;  %8583 = vst.msk [vmem:[#allocation3 + $0x121] sm:$0xff] %vm553_vm1, %v8551_v62  ;;  %v8552_v26 = vadd.f32 %v11888_v12, %v8520_v38  ;;  %v8453_v8 = vpop.f32.mrb[151].mxu1  ;;  %v8715_v52 = vpop.f32.mrb[183].mxu0 }
 0x92c   : > { %v8807_v24 = vadd.f32 %v8775_v27, %v8696_v58  ;;  %v8778_v63 = vld [vmem:[#allocation3 + $0xf8] sm:$0xff]  ;;  %8581 = vst.msk [vmem:[#allocation3 + $0x109] sm:$0xff] %vm553_vm1, %v8549_v36  ;;  %v8550_v43 = vadd.f32 %v8518_v61, %v8453_v8  ;;  %v9021_v36 = vld [vmem:[#allocation3 + $0x2] sm:$0xff]  ;;  %v9022_v8 = vld [vmem:[#allocation3 + $0xa] sm:$0xff] }
 0x92d   : > { %8841 = vst.msk [vmem:[#allocation3 + $0xf0] sm:$0xff] %vm553_vm1, %v8809_v14  ;;  %v8810_v19 = vadd.f32 %v11918_v50, %v8778_v63  ;;  %v8776_v20 = vld [vmem:[#allocation3 + $0xe0] sm:$0xff]  ;;  %8584 = vst.msk [vmem:[#allocation3 + $0x129] sm:$0xff] %vm553_vm1, %v8552_v26 }
 0x92e   : > { %8839 = vst.msk [vmem:[#allocation3 + $0xd8] sm:$0xff] %vm553_vm1, %v8807_v24  ;;  %v8808_v42 = vadd.f32 %v8776_v20, %v8699_v54  ;;  %8582 = vst.msk [vmem:[#allocation3 + $0x111] sm:$0xff] %vm553_vm1, %v8550_v43  ;;  %v9023_v38 = vld [vmem:[#allocation3 + $0x1a] sm:$0xff]  ;;  %v9024_v63 = vld [vmem:[#allocation3 + $0x22] sm:$0xff] }
 0x92f   : > { %8842 = vst.msk [vmem:[#allocation3 + $0xf8] sm:$0xff] %vm553_vm1, %v8810_v19 }
 0x930   : > { %8840 = vst.msk [vmem:[#allocation3 + $0xe0] sm:$0xff] %vm553_vm1, %v8808_v42  ;;  %v11891_v0 = vpop.f32.mrb[152].mxu1  ;;  %v11925_v7 = vpop.f32.mrb[184].mxu0 }
 0x931   : > { %v8555_v3 = vadd.f32 %v11891_v0, %v8523_v2  ;;  %v8466_v9 = vpop.f32.mrb[153].mxu1  ;;  %v8728_v37 = vpop.f32.mrb[185].mxu0 }
 0x932   : > { %v8781_v11 = vld [vmem:[#allocation3 + $0x120] sm:$0xff]  ;;  %v8553_v21 = vadd.f32 %v8521_v4, %v8466_v9  ;;  %v11892_v13 = vpop.f32.mrb[154].mxu1  ;;  %v11926_v30 = vpop.f32.mrb[186].mxu0 }
 0x933   : > { %v8813_v31 = vadd.f32 %v11921_v57, %v8781_v11  ;;  %v8779_v16 = vld [vmem:[#allocation3 + $0x108] sm:$0xff]  ;;  %8587 = vst.msk [vmem:[#allocation3 + $0x151] sm:$0xff] %vm553_vm1, %v8555_v3  ;;  %v8556_v10 = vadd.f32 %v11892_v13, %v8524_v15  ;;  %v8469_v17 = vpop.f32.mrb[155].mxu1  ;;  %v8731_v25 = vpop.f32.mrb[187].mxu0 }
 0x934   : > { %v8811_v28 = vadd.f32 %v8779_v16, %v8712_v59  ;;  %v8782_v32 = vld [vmem:[#allocation3 + $0x128] sm:$0xff]  ;;  %8585 = vst.msk [vmem:[#allocation3 + $0x139] sm:$0xff] %vm553_vm1, %v8553_v21  ;;  %v8554_v45 = vadd.f32 %v8522_v22, %v8469_v17  ;;  %v9025_v16 = vld [vmem:[#allocation3 + $0x32] sm:$0xff] }
 0x935   : > { %8845 = vst.msk [vmem:[#allocation3 + $0x120] sm:$0xff] %vm553_vm1, %v8813_v31  ;;  %v8814_v33 = vadd.f32 %v11922_v55, %v8782_v32  ;;  %v8780_v58 = vld [vmem:[#allocation3 + $0x110] sm:$0xff]  ;;  %8588 = vst.msk [vmem:[#allocation3 + $0x159] sm:$0xff] %vm553_vm1, %v8556_v10 }
 0x936   : > { %8843 = vst.msk [vmem:[#allocation3 + $0x108] sm:$0xff] %vm553_vm1, %v8811_v28  ;;  %v8812_v6 = vadd.f32 %v8780_v58, %v8715_v52  ;;  %8586 = vst.msk [vmem:[#allocation3 + $0x141] sm:$0xff] %vm553_vm1, %v8554_v45  ;;  %v9027_v13 = vld [vmem:[#allocation3 + $0x4a] sm:$0xff]  ;;  %v9028_v28 = vld [vmem:[#allocation3 + $0x52] sm:$0xff] }
 0x937   : > { %8846 = vst.msk [vmem:[#allocation3 + $0x128] sm:$0xff] %vm553_vm1, %v8814_v33 }
 0x938   : > { %8844 = vst.msk [vmem:[#allocation3 + $0x110] sm:$0xff] %vm553_vm1, %v8812_v6  ;;  %v11895_v60 = vpop.f32.mrb[156].mxu1  ;;  %v11929_v5 = vpop.f32.mrb[188].mxu0 }
 0x939   : > { %v8559_v50 = vadd.f32 %v11895_v60, %v8527_v34  ;;  %v8482_v51 = vpop.f32.mrb[157].mxu1  ;;  %v8744_v53 = vpop.f32.mrb[189].mxu0  ;;  %v9026_v60 = vld [vmem:[#allocation3 + $0x3a] sm:$0xff] }
 0x93a   : > { %v8785_v40 = vld [vmem:[#allocation3 + $0x150] sm:$0xff]  ;;  %v8557_v56 = vadd.f32 %v8525_v35, %v8482_v51  ;;  %v11896_v54 = vpop.f32.mrb[158].mxu1  ;;  %v11930_v41 = vpop.f32.mrb[190].mxu0 }
 0x93b   : > { %v8817_v39 = vadd.f32 %v11925_v7, %v8785_v40  ;;  %v8783_v46 = vld [vmem:[#allocation3 + $0x138] sm:$0xff]  ;;  %8591 = vst.msk [vmem:[#allocation3 + $0x181] sm:$0xff] %vm553_vm1, %v8559_v50  ;;  %v8560_v1 = vadd.f32 %v11896_v54, %v8528_v29  ;;  %v8485_v47 = vpop.f32.mrb[159].mxu1  ;;  %v8747_v44 = vpop.f32.mrb[191].mxu0 }
 0x93c   : > { %v8815_v57 = vadd.f32 %v8783_v46, %v8728_v37  ;;  %v8786_v62 = vld [vmem:[#allocation3 + $0x158] sm:$0xff]  ;;  %8589 = vst.msk [vmem:[#allocation3 + $0x169] sm:$0xff] %vm553_vm1, %v8557_v56  ;;  %v8558_v49 = vadd.f32 %v8526_v48, %v8485_v47  ;;  %v9029_v46 = vld [vmem:[#allocation3 + $0x62] sm:$0xff] }
 0x93d   : > { %8849 = vst.msk [vmem:[#allocation3 + $0x150] sm:$0xff] %vm553_vm1, %v8817_v39  ;;  %v8818_v18 = vadd.f32 %v11926_v30, %v8786_v62  ;;  %v8784_v59 = vld [vmem:[#allocation3 + $0x140] sm:$0xff]  ;;  %8592 = vst.msk [vmem:[#allocation3 + $0x189] sm:$0xff] %vm553_vm1, %v8560_v1 }
 0x93e   : > { %8847 = vst.msk [vmem:[#allocation3 + $0x138] sm:$0xff] %vm553_vm1, %v8815_v57  ;;  %v8816_v23 = vadd.f32 %v8784_v59, %v8731_v25  ;;  %8590 = vst.msk [vmem:[#allocation3 + $0x171] sm:$0xff] %vm553_vm1, %v8558_v49  ;;  %v9031_v54 = vld [vmem:[#allocation3 + $0x7a] sm:$0xff]  ;;  %v9032_v57 = vld [vmem:[#allocation3 + $0x82] sm:$0xff] }
 0x93f   : > { %8850 = vst.msk [vmem:[#allocation3 + $0x158] sm:$0xff] %vm553_vm1, %v8818_v18 }
 0x940   : > { %8848 = vst.msk [vmem:[#allocation3 + $0x140] sm:$0xff] %vm553_vm1, %v8816_v23  ;;  %v11935_v12 = vpop.f32.mrb[160].mxu1  ;;  %v11969_v55 = vpop.f32.mrb[192].mxu0 }
 0x941   : > { %v9055_v14 = vadd.f32 %v11935_v12, %v9023_v38  ;;  %v8894_v27 = vpop.f32.mrb[161].mxu1  ;;  %v9156_v26 = vpop.f32.mrb[193].mxu0 }
 0x942   : > { %v8789_v61 = vld [vmem:[#allocation3 + $0x180] sm:$0xff]  ;;  %v9053_v52 = vadd.f32 %v9021_v36, %v8894_v27  ;;  %v11936_v24 = vpop.f32.mrb[162].mxu1  ;;  %v11970_v43 = vpop.f32.mrb[194].mxu0  ;;  %v9030_v36 = vld [vmem:[#allocation3 + $0x6a] sm:$0xff] }
 0x943   : > { %v8821_v19 = vadd.f32 %v11929_v5, %v8789_v61  ;;  %v8787_v20 = vld [vmem:[#allocation3 + $0x168] sm:$0xff]  ;;  %9087 = vst.msk [vmem:[#allocation3 + $0x1a] sm:$0xff] %vm553_vm1, %v9055_v14  ;;  %v9056_v42 = vadd.f32 %v11936_v24, %v9024_v63  ;;  %v8897_v0 = vpop.f32.mrb[163].mxu1  ;;  %v9159_v2 = vpop.f32.mrb[195].mxu0 }
 0x944   : > { %v8819_v7 = vadd.f32 %v8787_v20, %v8744_v53  ;;  %v8790_v3 = vld [vmem:[#allocation3 + $0x188] sm:$0xff]  ;;  %9085 = vst.msk [vmem:[#allocation3 + $0x2] sm:$0xff] %vm553_vm1, %v9053_v52  ;;  %v9054_v9 = vadd.f32 %v9022_v8, %v8897_v0 }
 0x945   : > { %8853 = vst.msk [vmem:[#allocation3 + $0x180] sm:$0xff] %vm553_vm1, %v8821_v19  ;;  %v8822_v4 = vadd.f32 %v11930_v41, %v8790_v3  ;;  %v8788_v37 = vld [vmem:[#allocation3 + $0x170] sm:$0xff]  ;;  %9088 = vst.msk [vmem:[#allocation3 + $0x22] sm:$0xff] %vm553_vm1, %v9056_v42 }
 0x946   : > { %8851 = vst.msk [vmem:[#allocation3 + $0x168] sm:$0xff] %vm553_vm1, %v8819_v7  ;;  %v8820_v11 = vadd.f32 %v8788_v37, %v8747_v44  ;;  %9086 = vst.msk [vmem:[#allocation3 + $0xa] sm:$0xff] %vm553_vm1, %v9054_v9  ;;  %v9035_v52 = vld [vmem:[#allocation3 + $0xaa] sm:$0xff]  ;;  %v9033_v19 = vld [vmem:[#allocation3 + $0x92] sm:$0xff] }
 0x947   : > { %8854 = vst.msk [vmem:[#allocation3 + $0x188] sm:$0xff] %vm553_vm1, %v8822_v4  ;;  %v9036_v7 = vld [vmem:[#allocation3 + $0xb2] sm:$0xff] }
 0x948   : > { %8852 = vst.msk [vmem:[#allocation3 + $0x170] sm:$0xff] %vm553_vm1, %v8820_v11  ;;  %v11939_v21 = vpop.f32.mrb[164].mxu1  ;;  %v11973_v15 = vpop.f32.mrb[196].mxu0 }
 0x949   : > { %v9059_v30 = vadd.f32 %v11939_v21, %v9027_v13  ;;  %v8910_v31 = vpop.f32.mrb[165].mxu1  ;;  %v9172_v10 = vpop.f32.mrb[197].mxu0  ;;  %v9034_v21 = vld [vmem:[#allocation3 + $0x9a] sm:$0xff] }
 0x94a   : > { %v9285_v17 = vld [vmem:[#allocation3 + $0x19] sm:$0xff]  ;;  %v9057_v22 = vadd.f32 %v9025_v16, %v8910_v31  ;;  %v11940_v25 = vpop.f32.mrb[166].mxu1  ;;  %v11974_v32 = vpop.f32.mrb[198].mxu0 }
 0x94b   : > { %v9317_v45 = vadd.f32 %v11969_v55, %v9285_v17  ;;  %v9283_v33 = vld [vmem:[#allocation3 + $0x1] sm:$0xff]  ;;  %9091 = vst.msk [vmem:[#allocation3 + $0x4a] sm:$0xff] %vm553_vm1, %v9059_v30  ;;  %v9060_v58 = vadd.f32 %v11940_v25, %v9028_v28  ;;  %v8913_v6 = vpop.f32.mrb[167].mxu1  ;;  %v9175_v34 = vpop.f32.mrb[199].mxu0 }
 0x94c   : > { %v9315_v5 = vadd.f32 %v9283_v33, %v9156_v26  ;;  %v9286_v50 = vld [vmem:[#allocation3 + $0x21] sm:$0xff]  ;;  %9089 = vst.msk [vmem:[#allocation3 + $0x32] sm:$0xff] %vm553_vm1, %v9057_v22  ;;  %v9058_v51 = vadd.f32 %v9026_v60, %v8913_v6 }
 0x94d   : > { %9349 = vst.msk [vmem:[#allocation3 + $0x19] sm:$0xff] %vm553_vm1, %v9317_v45  ;;  %v9318_v35 = vadd.f32 %v11970_v43, %v9286_v50  ;;  %v9284_v53 = vld [vmem:[#allocation3 + $0x9] sm:$0xff]  ;;  %9092 = vst.msk [vmem:[#allocation3 + $0x52] sm:$0xff] %vm553_vm1, %v9060_v58  ;;  %v9039_v25 = vld [vmem:[#allocation3 + $0xda] sm:$0xff] }
 0x94e   : > { %9347 = vst.msk [vmem:[#allocation3 + $0x1] sm:$0xff] %vm553_vm1, %v9315_v5  ;;  %v9316_v40 = vadd.f32 %v9284_v53, %v9159_v2  ;;  %9090 = vst.msk [vmem:[#allocation3 + $0x3a] sm:$0xff] %vm553_vm1, %v9058_v51  ;;  %v9037_v33 = vld [vmem:[#allocation3 + $0xc2] sm:$0xff] }
 0x94f   : > { %9350 = vst.msk [vmem:[#allocation3 + $0x21] sm:$0xff] %vm553_vm1, %v9318_v35  ;;  %v9040_v5 = vld [vmem:[#allocation3 + $0xe2] sm:$0xff] }
 0x950   : > { %9348 = vst.msk [vmem:[#allocation3 + $0x9] sm:$0xff] %vm553_vm1, %v9316_v40  ;;  %v11943_v56 = vpop.f32.mrb[168].mxu1  ;;  %v11977_v29 = vpop.f32.mrb[200].mxu0 }
 0x951   : > { %v9063_v41 = vadd.f32 %v11943_v56, %v9031_v54  ;;  %v8926_v39 = vpop.f32.mrb[169].mxu1  ;;  %v9188_v1 = vpop.f32.mrb[201].mxu0  ;;  %v9038_v56 = vld [vmem:[#allocation3 + $0xca] sm:$0xff] }
 0x952   : > { %v9289_v47 = vld [vmem:[#allocation3 + $0x49] sm:$0xff]  ;;  %v9061_v48 = vadd.f32 %v9029_v46, %v8926_v39  ;;  %v11944_v44 = vpop.f32.mrb[170].mxu1  ;;  %v11978_v62 = vpop.f32.mrb[202].mxu0 }
 0x953   : > { %v9321_v49 = vadd.f32 %v11973_v15, %v9289_v47  ;;  %v9287_v18 = vld [vmem:[#allocation3 + $0x31] sm:$0xff]  ;;  %9095 = vst.msk [vmem:[#allocation3 + $0x7a] sm:$0xff] %vm553_vm1, %v9063_v41  ;;  %v9064_v59 = vadd.f32 %v11944_v44, %v9032_v57  ;;  %v8929_v23 = vpop.f32.mrb[171].mxu1  ;;  %v9191_v12 = vpop.f32.mrb[203].mxu0 }
 0x954   : > { %v9319_v38 = vadd.f32 %v9287_v18, %v9172_v10  ;;  %v9290_v55 = vld [vmem:[#allocation3 + $0x51] sm:$0xff]  ;;  %9093 = vst.msk [vmem:[#allocation3 + $0x62] sm:$0xff] %vm553_vm1, %v9061_v48  ;;  %v9062_v14 = vadd.f32 %v9030_v36, %v8929_v23 }
 0x955   : > { %9353 = vst.msk [vmem:[#allocation3 + $0x49] sm:$0xff] %vm553_vm1, %v9321_v49  ;;  %v9322_v27 = vadd.f32 %v11974_v32, %v9290_v55  ;;  %v9288_v26 = vld [vmem:[#allocation3 + $0x39] sm:$0xff]  ;;  %9096 = vst.msk [vmem:[#allocation3 + $0x82] sm:$0xff] %vm553_vm1, %v9064_v59  ;;  %v9043_v44 = vld [vmem:[#allocation3 + $0x10a] sm:$0xff] }
 0x956   : > { %9351 = vst.msk [vmem:[#allocation3 + $0x31] sm:$0xff] %vm553_vm1, %v9319_v38  ;;  %v9320_v8 = vadd.f32 %v9288_v26, %v9175_v34  ;;  %9094 = vst.msk [vmem:[#allocation3 + $0x6a] sm:$0xff] %vm553_vm1, %v9062_v14  ;;  %v9041_v18 = vld [vmem:[#allocation3 + $0xf2] sm:$0xff] }
 0x957   : > { %9354 = vst.msk [vmem:[#allocation3 + $0x51] sm:$0xff] %vm553_vm1, %v9322_v27  ;;  %v9044_v38 = vld [vmem:[#allocation3 + $0x112] sm:$0xff] }
 0x958   : > { %9352 = vst.msk [vmem:[#allocation3 + $0x39] sm:$0xff] %vm553_vm1, %v9320_v8  ;;  %v11947_v61 = vpop.f32.mrb[172].mxu1  ;;  %v11981_v24 = vpop.f32.mrb[204].mxu0 }
 0x959   : > { %v9067_v63 = vadd.f32 %v11947_v61, %v9035_v52  ;;  %v8942_v43 = vpop.f32.mrb[173].mxu1  ;;  %v9204_v20 = vpop.f32.mrb[205].mxu0  ;;  %v9042_v61 = vld [vmem:[#allocation3 + $0xfa] sm:$0xff] }
 0x95a   : > { %v9293_v42 = vld [vmem:[#allocation3 + $0x79] sm:$0xff]  ;;  %v9065_v0 = vadd.f32 %v9033_v19, %v8942_v43  ;;  %v11948_v2 = vpop.f32.mrb[174].mxu1  ;;  %v11982_v3 = vpop.f32.mrb[206].mxu0 }
 0x95b   : > { %v9325_v9 = vadd.f32 %v11977_v29, %v9293_v42  ;;  %v9291_v4 = vld [vmem:[#allocation3 + $0x61] sm:$0xff]  ;;  %9099 = vst.msk [vmem:[#allocation3 + $0xaa] sm:$0xff] %vm553_vm1, %v9067_v63  ;;  %v9068_v37 = vadd.f32 %v11948_v2, %v9036_v7  ;;  %v8945_v11 = vpop.f32.mrb[175].mxu1  ;;  %v9207_v13 = vpop.f32.mrb[207].mxu0 }
 0x95c   : > { %v9323_v15 = vadd.f32 %v9291_v4, %v9188_v1  ;;  %v9294_v30 = vld [vmem:[#allocation3 + $0x81] sm:$0xff]  ;;  %9097 = vst.msk [vmem:[#allocation3 + $0x92] sm:$0xff] %vm553_vm1, %v9065_v0  ;;  %v9066_v31 = vadd.f32 %v9034_v21, %v8945_v11 }
 0x95d   : > { %9357 = vst.msk [vmem:[#allocation3 + $0x79] sm:$0xff] %vm553_vm1, %v9325_v9  ;;  %v9326_v16 = vadd.f32 %v11978_v62, %v9294_v30  ;;  %v9292_v10 = vld [vmem:[#allocation3 + $0x69] sm:$0xff]  ;;  %9100 = vst.msk [vmem:[#allocation3 + $0xb2] sm:$0xff] %vm553_vm1, %v9068_v37  ;;  %v9047_v2 = vld [vmem:[#allocation3 + $0x13a] sm:$0xff] }
 0x95e   : > { %9355 = vst.msk [vmem:[#allocation3 + $0x61] sm:$0xff] %vm553_vm1, %v9323_v15  ;;  %v9324_v17 = vadd.f32 %v9292_v10, %v9191_v12  ;;  %9098 = vst.msk [vmem:[#allocation3 + $0x9a] sm:$0xff] %vm553_vm1, %v9066_v31  ;;  %v9045_v4 = vld [vmem:[#allocation3 + $0x122] sm:$0xff] }
 0x95f   : > { %9358 = vst.msk [vmem:[#allocation3 + $0x81] sm:$0xff] %vm553_vm1, %v9326_v16  ;;  %v9048_v15 = vld [vmem:[#allocation3 + $0x142] sm:$0xff] }
 0x960   : > { %9356 = vst.msk [vmem:[#allocation3 + $0x69] sm:$0xff] %vm553_vm1, %v9324_v17  ;;  %v11951_v22 = vpop.f32.mrb[176].mxu1  ;;  %v11985_v28 = vpop.f32.mrb[208].mxu0 }
 0x961   : > { %v9071_v32 = vadd.f32 %v11951_v22, %v9039_v25  ;;  %v8958_v45 = vpop.f32.mrb[177].mxu1  ;;  %v9220_v58 = vpop.f32.mrb[209].mxu0  ;;  %v9046_v22 = vld [vmem:[#allocation3 + $0x12a] sm:$0xff] }
 0x962   : > { %v9297_v6 = vld [vmem:[#allocation3 + $0xa9] sm:$0xff]  ;;  %v9069_v60 = vadd.f32 %v9037_v33, %v8958_v45  ;;  %v11952_v34 = vpop.f32.mrb[178].mxu1  ;;  %v11986_v50 = vpop.f32.mrb[210].mxu0 }
 0x963   : > { %v9329_v51 = vadd.f32 %v11981_v24, %v9297_v6  ;;  %v9295_v35 = vld [vmem:[#allocation3 + $0x91] sm:$0xff]  ;;  %9103 = vst.msk [vmem:[#allocation3 + $0xda] sm:$0xff] %vm553_vm1, %v9071_v32  ;;  %v9072_v53 = vadd.f32 %v11952_v34, %v9040_v5  ;;  %v8961_v40 = vpop.f32.mrb[179].mxu1  ;;  %v9223_v54 = vpop.f32.mrb[211].mxu0 }
 0x964   : > { %v9327_v29 = vadd.f32 %v9295_v35, %v9204_v20  ;;  %v9298_v41 = vld [vmem:[#allocation3 + $0xb1] sm:$0xff]  ;;  %9101 = vst.msk [vmem:[#allocation3 + $0xc2] sm:$0xff] %vm553_vm1, %v9069_v60  ;;  %v9070_v39 = vadd.f32 %v9038_v56, %v8961_v40 }
 0x965   : > { %9361 = vst.msk [vmem:[#allocation3 + $0xa9] sm:$0xff] %vm553_vm1, %v9329_v51  ;;  %v9330_v46 = vadd.f32 %v11982_v3, %v9298_v41  ;;  %v9296_v1 = vld [vmem:[#allocation3 + $0x99] sm:$0xff]  ;;  %9104 = vst.msk [vmem:[#allocation3 + $0xe2] sm:$0xff] %vm553_vm1, %v9072_v53  ;;  %v9051_v34 = vld [vmem:[#allocation3 + $0x16a] sm:$0xff] }
 0x966   : > { %9359 = vst.msk [vmem:[#allocation3 + $0x91] sm:$0xff] %vm553_vm1, %v9327_v29  ;;  %v9328_v47 = vadd.f32 %v9296_v1, %v9207_v13  ;;  %9102 = vst.msk [vmem:[#allocation3 + $0xca] sm:$0xff] %vm553_vm1, %v9070_v39  ;;  %v9049_v35 = vld [vmem:[#allocation3 + $0x152] sm:$0xff] }
 0x967   : > { %9362 = vst.msk [vmem:[#allocation3 + $0xb1] sm:$0xff] %vm553_vm1, %v9330_v46  ;;  %v9052_v29 = vld [vmem:[#allocation3 + $0x172] sm:$0xff] }
 0x968   : > { %9360 = vst.msk [vmem:[#allocation3 + $0x99] sm:$0xff] %vm553_vm1, %v9328_v47  ;;  %v11955_v48 = vpop.f32.mrb[180].mxu1  ;;  %v11989_v57 = vpop.f32.mrb[212].mxu0 }
 0x969   : > { %v9075_v62 = vadd.f32 %v11955_v48, %v9043_v44  ;;  %v8974_v49 = vpop.f32.mrb[181].mxu1  ;;  %v9236_v59 = vpop.f32.mrb[213].mxu0  ;;  %v9050_v48 = vld [vmem:[#allocation3 + $0x15a] sm:$0xff] }
 0x96a   : > { %v9301_v23 = vld [vmem:[#allocation3 + $0xd9] sm:$0xff]  ;;  %v9073_v36 = vadd.f32 %v9041_v18, %v8974_v49  ;;  %v11956_v12 = vpop.f32.mrb[182].mxu1  ;;  %v11990_v55 = vpop.f32.mrb[214].mxu0 }
 0x96b   : > { %v9333_v14 = vadd.f32 %v11985_v28, %v9301_v23  ;;  %v9299_v27 = vld [vmem:[#allocation3 + $0xc1] sm:$0xff]  ;;  %9107 = vst.msk [vmem:[#allocation3 + $0x10a] sm:$0xff] %vm553_vm1, %v9075_v62  ;;  %v9076_v26 = vadd.f32 %v11956_v12, %v9044_v38  ;;  %v8977_v8 = vpop.f32.mrb[183].mxu1  ;;  %v9239_v52 = vpop.f32.mrb[215].mxu0  ;;  %v9547_v12 = vld [vmem:[#allocation3 + $0x18] sm:$0xff] }
 0x96c   : > { %v9331_v24 = vadd.f32 %v9299_v27, %v9220_v58  ;;  %v9302_v63 = vld [vmem:[#allocation3 + $0xe1] sm:$0xff]  ;;  %9105 = vst.msk [vmem:[#allocation3 + $0xf2] sm:$0xff] %vm553_vm1, %v9073_v36  ;;  %v9074_v43 = vadd.f32 %v9042_v61, %v8977_v8 }
 0x96d   : > { %9365 = vst.msk [vmem:[#allocation3 + $0xd9] sm:$0xff] %vm553_vm1, %v9333_v14  ;;  %v9334_v19 = vadd.f32 %v11986_v50, %v9302_v63  ;;  %v9300_v20 = vld [vmem:[#allocation3 + $0xc9] sm:$0xff]  ;;  %9108 = vst.msk [vmem:[#allocation3 + $0x112] sm:$0xff] %vm553_vm1, %v9076_v26  ;;  %v9545_v14 = vld [vmem:[#allocation3] sm:$0xff] }
 0x96e   : > { %9363 = vst.msk [vmem:[#allocation3 + $0xc1] sm:$0xff] %vm553_vm1, %v9331_v24  ;;  %v9332_v42 = vadd.f32 %v9300_v20, %v9223_v54  ;;  %9106 = vst.msk [vmem:[#allocation3 + $0xfa] sm:$0xff] %vm553_vm1, %v9074_v43  ;;  %v9548_v61 = vld [vmem:[#allocation3 + $0x20] sm:$0xff] }
 0x96f   : > { %9366 = vst.msk [vmem:[#allocation3 + $0xe1] sm:$0xff] %vm553_vm1, %v9334_v19  ;;  %v9546_v19 = vld [vmem:[#allocation3 + $0x8] sm:$0xff] }
 0x970   : > { %9364 = vst.msk [vmem:[#allocation3 + $0xc9] sm:$0xff] %vm553_vm1, %v9332_v42  ;;  %v11959_v0 = vpop.f32.mrb[184].mxu1  ;;  %v11993_v7 = vpop.f32.mrb[216].mxu0 }
 0x971   : > { %v9079_v3 = vadd.f32 %v11959_v0, %v9047_v2  ;;  %v8990_v9 = vpop.f32.mrb[185].mxu1  ;;  %v9252_v37 = vpop.f32.mrb[217].mxu0 }
 0x972   : > { %v9305_v11 = vld [vmem:[#allocation3 + $0x109] sm:$0xff]  ;;  %v9077_v21 = vadd.f32 %v9045_v4, %v8990_v9  ;;  %v11960_v13 = vpop.f32.mrb[186].mxu1  ;;  %v11994_v30 = vpop.f32.mrb[218].mxu0 }
 0x973   : > { %v9337_v31 = vadd.f32 %v11989_v57, %v9305_v11  ;;  %v9303_v16 = vld [vmem:[#allocation3 + $0xf1] sm:$0xff]  ;;  %9111 = vst.msk [vmem:[#allocation3 + $0x13a] sm:$0xff] %vm553_vm1, %v9079_v3  ;;  %v9080_v10 = vadd.f32 %v11960_v13, %v9048_v15  ;;  %v8993_v17 = vpop.f32.mrb[187].mxu1  ;;  %v9255_v25 = vpop.f32.mrb[219].mxu0  ;;  %v9551_v4 = vld [vmem:[#allocation3 + $0x48] sm:$0xff] }
 0x974   : > { %v9335_v28 = vadd.f32 %v9303_v16, %v9236_v59  ;;  %v9306_v32 = vld [vmem:[#allocation3 + $0x111] sm:$0xff]  ;;  %9109 = vst.msk [vmem:[#allocation3 + $0x122] sm:$0xff] %vm553_vm1, %v9077_v21  ;;  %v9078_v45 = vadd.f32 %v9046_v22, %v8993_v17 }
 0x975   : > { %9369 = vst.msk [vmem:[#allocation3 + $0x109] sm:$0xff] %vm553_vm1, %v9337_v31  ;;  %v9338_v33 = vadd.f32 %v11990_v55, %v9306_v32  ;;  %v9304_v58 = vld [vmem:[#allocation3 + $0xf9] sm:$0xff]  ;;  %9112 = vst.msk [vmem:[#allocation3 + $0x142] sm:$0xff] %vm553_vm1, %v9080_v10  ;;  %v9549_v21 = vld [vmem:[#allocation3 + $0x30] sm:$0xff] }
 0x976   : > { %9367 = vst.msk [vmem:[#allocation3 + $0xf1] sm:$0xff] %vm553_vm1, %v9335_v28  ;;  %v9336_v6 = vadd.f32 %v9304_v58, %v9239_v52  ;;  %9110 = vst.msk [vmem:[#allocation3 + $0x12a] sm:$0xff] %vm553_vm1, %v9078_v45  ;;  %v9550_v10 = vld [vmem:[#allocation3 + $0x38] sm:$0xff]  ;;  %v9553_v58 = vld [vmem:[#allocation3 + $0x60] sm:$0xff] }
 0x977   : > { %9370 = vst.msk [vmem:[#allocation3 + $0x111] sm:$0xff] %vm553_vm1, %v9338_v33  ;;  %v9555_v32 = vld [vmem:[#allocation3 + $0x78] sm:$0xff] }
 0x978   : > { %9368 = vst.msk [vmem:[#allocation3 + $0xf9] sm:$0xff] %vm553_vm1, %v9336_v6  ;;  %v11963_v60 = vpop.f32.mrb[188].mxu1  ;;  %v11997_v5 = vpop.f32.mrb[220].mxu0 }
 0x979   : > { %v9083_v50 = vadd.f32 %v11963_v60, %v9051_v34  ;;  %v9006_v51 = vpop.f32.mrb[189].mxu1  ;;  %v9268_v53 = vpop.f32.mrb[221].mxu0  ;;  %v9556_v34 = vld [vmem:[#allocation3 + $0x80] sm:$0xff] }
 0x97a   : > { %v9309_v40 = vld [vmem:[#allocation3 + $0x139] sm:$0xff]  ;;  %v9081_v56 = vadd.f32 %v9049_v35, %v9006_v51  ;;  %v11964_v54 = vpop.f32.mrb[190].mxu1  ;;  %v11998_v41 = vpop.f32.mrb[222].mxu0  ;;  %v9554_v51 = vld [vmem:[#allocation3 + $0x68] sm:$0xff] }
 0x97b   : > { %v9341_v39 = vadd.f32 %v11993_v7, %v9309_v40  ;;  %v9307_v46 = vld [vmem:[#allocation3 + $0x121] sm:$0xff]  ;;  %9115 = vst.msk [vmem:[#allocation3 + $0x16a] sm:$0xff] %vm553_vm1, %v9083_v50  ;;  %v9084_v1 = vadd.f32 %v11964_v54, %v9052_v29  ;;  %v9009_v47 = vpop.f32.mrb[191].mxu1  ;;  %v9271_v44 = vpop.f32.mrb[223].mxu0 }
 0x97c   : > { %v9339_v57 = vadd.f32 %v9307_v46, %v9252_v37  ;;  %v9310_v62 = vld [vmem:[#allocation3 + $0x141] sm:$0xff]  ;;  %9113 = vst.msk [vmem:[#allocation3 + $0x152] sm:$0xff] %vm553_vm1, %v9081_v56  ;;  %v9082_v49 = vadd.f32 %v9050_v48, %v9009_v47 }
 0x97d   : > { %9373 = vst.msk [vmem:[#allocation3 + $0x139] sm:$0xff] %vm553_vm1, %v9341_v39  ;;  %v9342_v18 = vadd.f32 %v11994_v30, %v9310_v62  ;;  %v9308_v59 = vld [vmem:[#allocation3 + $0x129] sm:$0xff]  ;;  %9116 = vst.msk [vmem:[#allocation3 + $0x172] sm:$0xff] %vm553_vm1, %v9084_v1 }
 0x97e   : > { %9371 = vst.msk [vmem:[#allocation3 + $0x121] sm:$0xff] %vm553_vm1, %v9339_v57  ;;  %v9340_v23 = vadd.f32 %v9308_v59, %v9255_v25  ;;  %9114 = vst.msk [vmem:[#allocation3 + $0x15a] sm:$0xff] %vm553_vm1, %v9082_v49  ;;  %v9552_v30 = vld [vmem:[#allocation3 + $0x50] sm:$0xff]  ;;  %v9559_v54 = vld [vmem:[#allocation3 + $0xa8] sm:$0xff] }
 0x97f   : > { %9374 = vst.msk [vmem:[#allocation3 + $0x141] sm:$0xff] %vm553_vm1, %v9342_v18  ;;  %v9557_v1 = vld [vmem:[#allocation3 + $0x90] sm:$0xff]  ;;  %v9558_v49 = vld [vmem:[#allocation3 + $0x98] sm:$0xff] }
 0x980   : > { %9372 = vst.msk [vmem:[#allocation3 + $0x129] sm:$0xff] %vm553_vm1, %v9340_v23  ;;  %v12003_v36 = vpop.f32.mrb[192].mxu1 }
 0x981   : > { %v9579_v38 = vadd.f32 %v12003_v36, %v9547_v12  ;;  %v9418_v55 = vpop.f32.mrb[193].mxu1  ;;  %v9563_v12 = vld [vmem:[#allocation3 + $0xd8] sm:$0xff] }
 0x982   : > { %v9313_v27 = vld [vmem:[#allocation3 + $0x169] sm:$0xff]  ;;  %v9577_v26 = vadd.f32 %v9545_v14, %v9418_v55  ;;  %v12004_v8 = vpop.f32.mrb[194].mxu1 }
 0x983   : > { %v9345_v52 = vadd.f32 %v11997_v5, %v9313_v27  ;;  %v9311_v24 = vld [vmem:[#allocation3 + $0x151] sm:$0xff]  ;;  %9611 = vst.msk [vmem:[#allocation3 + $0x18] sm:$0xff] %vm553_vm1, %v9579_v38  ;;  %v9580_v63 = vadd.f32 %v12004_v8, %v9548_v61  ;;  %v9421_v43 = vpop.f32.mrb[195].mxu1 }
 0x984   : > { %v9343_v20 = vadd.f32 %v9311_v24, %v9268_v53  ;;  %v9314_v42 = vld [vmem:[#allocation3 + $0x171] sm:$0xff]  ;;  %9609 = vst.msk [vmem:[#allocation3] sm:$0xff] %vm553_vm1, %v9577_v26  ;;  %v9578_v0 = vadd.f32 %v9546_v19, %v9421_v43  ;;  %v9561_v26 = vld [vmem:[#allocation3 + $0xc0] sm:$0xff]  ;;  %v9562_v43 = vld [vmem:[#allocation3 + $0xc8] sm:$0xff] }
 0x985   : > { %9377 = vst.msk [vmem:[#allocation3 + $0x169] sm:$0xff] %vm553_vm1, %v9345_v52  ;;  %v9346_v2 = vadd.f32 %v11998_v41, %v9314_v42  ;;  %v9312_v7 = vld [vmem:[#allocation3 + $0x159] sm:$0xff]  ;;  %9612 = vst.msk [vmem:[#allocation3 + $0x20] sm:$0xff] %vm553_vm1, %v9580_v63 }
 0x986   : > { %9375 = vst.msk [vmem:[#allocation3 + $0x151] sm:$0xff] %vm553_vm1, %v9343_v20  ;;  %v9344_v3 = vadd.f32 %v9312_v7, %v9271_v44  ;;  %9610 = vst.msk [vmem:[#allocation3 + $0x8] sm:$0xff] %vm553_vm1, %v9578_v0  ;;  %v9560_v44 = vld [vmem:[#allocation3 + $0xb0] sm:$0xff]  ;;  %v9564_v52 = vld [vmem:[#allocation3 + $0xe0] sm:$0xff] }
 0x987   : > { %9378 = vst.msk [vmem:[#allocation3 + $0x171] sm:$0xff] %vm553_vm1, %v9346_v2  ;;  %v9567_v2 = vld [vmem:[#allocation3 + $0x108] sm:$0xff] }
 0x988   : > { %9376 = vst.msk [vmem:[#allocation3 + $0x159] sm:$0xff] %vm553_vm1, %v9344_v3  ;;  %v12007_v9 = vpop.f32.mrb[196].mxu1 }
 0x989   : > { %v9583_v37 = vadd.f32 %v12007_v9, %v9551_v4  ;;  %v9434_v11 = vpop.f32.mrb[197].mxu1 }
 0x98a   : > { %v9581_v13 = vadd.f32 %v9549_v21, %v9434_v11  ;;  %v12008_v15 = vpop.f32.mrb[198].mxu1 }
 0x98b   : > { %9615 = vst.msk [vmem:[#allocation3 + $0x48] sm:$0xff] %vm553_vm1, %v9583_v37  ;;  %v9584_v31 = vadd.f32 %v12008_v15, %v9552_v30  ;;  %v9437_v16 = vpop.f32.mrb[199].mxu1  ;;  %v9565_v37 = vld [vmem:[#allocation3 + $0xf0] sm:$0xff] }
 0x98c   : > { %9613 = vst.msk [vmem:[#allocation3 + $0x30] sm:$0xff] %vm553_vm1, %v9581_v13  ;;  %v9582_v17 = vadd.f32 %v9550_v10, %v9437_v16  ;;  %v9642_v22 = vld [vmem:[#allocation3 + $0x21] sm:$0xff]  ;;  %v9641_v25 = vld [vmem:[#allocation3 + $0x19] sm:$0xff]  ;;  %v9568_v13 = vld [vmem:[#allocation3 + $0x110] sm:$0xff] }
 0x98d   : > { %9616 = vst.msk [vmem:[#allocation3 + $0x50] sm:$0xff] %vm553_vm1, %v9584_v31  ;;  %9707 = vrot.lane.b32.xlu1 %v9642_v22, %s12175_s18  ;;  %9705 = vrot.lane.b32.xlu0 %v9641_v25, %s12175_s18  ;;  %v9566_v31 = vld [vmem:[#allocation3 + $0xf8] sm:$0xff] }
 0x98e   : > { %9614 = vst.msk [vmem:[#allocation3 + $0x38] sm:$0xff] %vm553_vm1, %v9582_v17  ;;  %v9571_v25 = vld [vmem:[#allocation3 + $0x138] sm:$0xff] }
 0x990   : > { %v12011_v28 = vpop.f32.mrb[200].mxu1 }
 0x991   : > { %v9587_v45 = vadd.f32 %v12011_v28, %v9555_v32  ;;  %v9450_v33 = vpop.f32.mrb[201].mxu1 }
 0x992   : > { %v9585_v6 = vadd.f32 %v9553_v58, %v9450_v33  ;;  %v12012_v60 = vpop.f32.mrb[202].mxu1  ;;  %v9569_v58 = vld [vmem:[#allocation3 + $0x120] sm:$0xff] }
 0x993   : > { %9619 = vst.msk [vmem:[#allocation3 + $0x78] sm:$0xff] %vm553_vm1, %v9587_v45  ;;  %v9588_v5 = vadd.f32 %v12012_v60, %v9556_v34  ;;  %v9453_v50 = vpop.f32.mrb[203].mxu1  ;;  %v9572_v34 = vld [vmem:[#allocation3 + $0x140] sm:$0xff] }
 0x994   : > { %9617 = vst.msk [vmem:[#allocation3 + $0x60] sm:$0xff] %vm553_vm1, %v9585_v6  ;;  %v9586_v35 = vadd.f32 %v9554_v51, %v9453_v50  ;;  %v9646_v53 = vld [vmem:[#allocation3 + $0x51] sm:$0xff]  ;;  %v9645_v40 = vld [vmem:[#allocation3 + $0x49] sm:$0xff] }
 0x995   : > { %9620 = vst.msk [vmem:[#allocation3 + $0x80] sm:$0xff] %vm553_vm1, %v9588_v5  ;;  %9715 = vrot.lane.b32.xlu1 %v9646_v53, %s12175_s18  ;;  %9713 = vrot.lane.b32.xlu0 %v9645_v40, %s12175_s18  ;;  %v9644_v29 = vld [vmem:[#allocation3 + $0x39] sm:$0xff]  ;;  %v9643_v41 = vld [vmem:[#allocation3 + $0x31] sm:$0xff]  ;;  %v9570_v51 = vld [vmem:[#allocation3 + $0x128] sm:$0xff] }
 0x996   : > { %9618 = vst.msk [vmem:[#allocation3 + $0x68] sm:$0xff] %vm553_vm1, %v9586_v35 }
 0x998   : > { %v12015_v56 = vpop.f32.mrb[204].mxu1 }
 0x999   : > { %v9591_v39 = vadd.f32 %v12015_v56, %v9559_v54  ;;  %9711 = vrot.lane.b32.xlu1 %v9644_v29, %s12175_s18  ;;  %9709 = vrot.lane.b32.xlu0 %v9643_v41, %s12175_s18  ;;  %v9466_v46 = vpop.f32.mrb[205].mxu1  ;;  %v9575_v54 = vld [vmem:[#allocation3 + $0x168] sm:$0xff] }
 0x99a   : > { %v9589_v47 = vadd.f32 %v9557_v1, %v9466_v46  ;;  %v12016_v48 = vpop.f32.mrb[206].mxu1  ;;  %v9573_v1 = vld [vmem:[#allocation3 + $0x150] sm:$0xff] }
 0x99b   : > { %9623 = vst.msk [vmem:[#allocation3 + $0xa8] sm:$0xff] %vm553_vm1, %v9591_v39  ;;  %v9592_v57 = vadd.f32 %v12016_v48, %v9560_v44  ;;  %v9469_v62 = vpop.f32.mrb[207].mxu1  ;;  %v9576_v44 = vld [vmem:[#allocation3 + $0x170] sm:$0xff] }
 0x99c   : > { %9621 = vst.msk [vmem:[#allocation3 + $0x90] sm:$0xff] %vm553_vm1, %v9589_v47  ;;  %v9590_v18 = vadd.f32 %v9558_v49, %v9469_v62  ;;  %v9650_v59 = vld [vmem:[#allocation3 + $0x81] sm:$0xff]  ;;  %v9649_v23 = vld [vmem:[#allocation3 + $0x79] sm:$0xff] }
 0x99d   : > { %9624 = vst.msk [vmem:[#allocation3 + $0xb0] sm:$0xff] %vm553_vm1, %v9592_v57  ;;  %9723 = vrot.lane.b32.xlu1 %v9650_v59, %s12175_s18  ;;  %9721 = vrot.lane.b32.xlu0 %v9649_v23, %s12175_s18  ;;  %v9648_v38 = vld [vmem:[#allocation3 + $0x69] sm:$0xff]  ;;  %v9647_v55 = vld [vmem:[#allocation3 + $0x61] sm:$0xff]  ;;  %v9574_v49 = vld [vmem:[#allocation3 + $0x158] sm:$0xff] }
 0x99e   : > { %9622 = vst.msk [vmem:[#allocation3 + $0x98] sm:$0xff] %vm553_vm1, %v9590_v18 }
 0x9a0   : > { %v12019_v36 = vpop.f32.mrb[208].mxu1 }
 0x9a1   : > { %v9595_v14 = vadd.f32 %v12019_v36, %v9563_v12  ;;  %9719 = vrot.lane.b32.xlu1 %v9648_v38, %s12175_s18  ;;  %9717 = vrot.lane.b32.xlu0 %v9647_v55, %s12175_s18  ;;  %v9482_v27 = vpop.f32.mrb[209].mxu1 }
 0x9a2   : > { %v9593_v8 = vadd.f32 %v9561_v26, %v9482_v27  ;;  %v12020_v61 = vpop.f32.mrb[210].mxu1  ;;  %v9672_v26 = vld [vmem:[#allocation3 + $0x189] sm:$0xff] }
 0x9a3   : > { %9627 = vst.msk [vmem:[#allocation3 + $0xd8] sm:$0xff] %vm553_vm1, %v9595_v14  ;;  %v9596_v24 = vadd.f32 %v12020_v61, %v9564_v52  ;;  %v9485_v63 = vpop.f32.mrb[211].mxu1 }
 0x9a4   : > { %9625 = vst.msk [vmem:[#allocation3 + $0xc0] sm:$0xff] %vm553_vm1, %v9593_v8  ;;  %v9594_v19 = vadd.f32 %v9562_v43, %v9485_v63  ;;  %v9654_v20 = vld [vmem:[#allocation3 + $0xb1] sm:$0xff]  ;;  %v9653_v42 = vld [vmem:[#allocation3 + $0xa9] sm:$0xff]  ;;  %v9671_v8 = vld [vmem:[#allocation3 + $0x181] sm:$0xff] }
 0x9a5   : > { %9628 = vst.msk [vmem:[#allocation3 + $0xe0] sm:$0xff] %vm553_vm1, %v9596_v24  ;;  %9731 = vrot.lane.b32.xlu1 %v9654_v20, %s12175_s18  ;;  %9729 = vrot.lane.b32.xlu0 %v9653_v42, %s12175_s18  ;;  %v9652_v7 = vld [vmem:[#allocation3 + $0x99] sm:$0xff]  ;;  %v9651_v3 = vld [vmem:[#allocation3 + $0x91] sm:$0xff] }
 0x9a6   : > { %9626 = vst.msk [vmem:[#allocation3 + $0xc8] sm:$0xff] %vm553_vm1, %v9594_v19 }
 0x9a8   : > { %v12023_v0 = vpop.f32.mrb[212].mxu1 }
 0x9a9   : > { %v9599_v9 = vadd.f32 %v12023_v0, %v9567_v2  ;;  %9727 = vrot.lane.b32.xlu1 %v9652_v7, %s12175_s18  ;;  %9725 = vrot.lane.b32.xlu0 %v9651_v3, %s12175_s18  ;;  %v9498_v4 = vpop.f32.mrb[213].mxu1 }
 0x9aa   : > { %v9597_v11 = vadd.f32 %v9565_v37, %v9498_v4  ;;  %v12024_v21 = vpop.f32.mrb[214].mxu1 }
 0x9ab   : > { %9631 = vst.msk [vmem:[#allocation3 + $0x108] sm:$0xff] %vm553_vm1, %v9599_v9  ;;  %v9600_v15 = vadd.f32 %v12024_v21, %v9568_v13  ;;  %v9501_v30 = vpop.f32.mrb[215].mxu1 }
 0x9ac   : > { %9629 = vst.msk [vmem:[#allocation3 + $0xf0] sm:$0xff] %vm553_vm1, %v9597_v11  ;;  %v9598_v16 = vadd.f32 %v9566_v31, %v9501_v30  ;;  %v9658_v10 = vld [vmem:[#allocation3 + $0xe1] sm:$0xff]  ;;  %v9657_v17 = vld [vmem:[#allocation3 + $0xd9] sm:$0xff] }
 0x9ad   : > { %9632 = vst.msk [vmem:[#allocation3 + $0x110] sm:$0xff] %vm553_vm1, %v9600_v15  ;;  %9739 = vrot.lane.b32.xlu1 %v9658_v10, %s12175_s18  ;;  %9737 = vrot.lane.b32.xlu0 %v9657_v17, %s12175_s18  ;;  %v9656_v28 = vld [vmem:[#allocation3 + $0xc9] sm:$0xff]  ;;  %v9655_v32 = vld [vmem:[#allocation3 + $0xc1] sm:$0xff] }
 0x9ae   : > { %9630 = vst.msk [vmem:[#allocation3 + $0xf8] sm:$0xff] %vm553_vm1, %v9598_v16 }
 0x9b0   : > { %v12027_v22 = vpop.f32.mrb[216].mxu1 }
 0x9b1   : > { %v9603_v45 = vadd.f32 %v12027_v22, %v9571_v25  ;;  %9735 = vrot.lane.b32.xlu1 %v9656_v28, %s12175_s18  ;;  %9733 = vrot.lane.b32.xlu0 %v9655_v32, %s12175_s18  ;;  %v9514_v33 = vpop.f32.mrb[217].mxu1 }
 0x9b2   : > { %v9601_v6 = vadd.f32 %v9569_v58, %v9514_v33  ;;  %v12028_v60 = vpop.f32.mrb[218].mxu1 }
 0x9b3   : > { %9635 = vst.msk [vmem:[#allocation3 + $0x138] sm:$0xff] %vm553_vm1, %v9603_v45  ;;  %v9604_v5 = vadd.f32 %v12028_v60, %v9572_v34  ;;  %v9517_v50 = vpop.f32.mrb[219].mxu1 }
 0x9b4   : > { %9633 = vst.msk [vmem:[#allocation3 + $0x120] sm:$0xff] %vm553_vm1, %v9601_v6  ;;  %v9602_v35 = vadd.f32 %v9570_v51, %v9517_v50  ;;  %v9662_v53 = vld [vmem:[#allocation3 + $0x111] sm:$0xff]  ;;  %v9661_v40 = vld [vmem:[#allocation3 + $0x109] sm:$0xff] }
 0x9b5   : > { %9636 = vst.msk [vmem:[#allocation3 + $0x140] sm:$0xff] %vm553_vm1, %v9604_v5  ;;  %9747 = vrot.lane.b32.xlu1 %v9662_v53, %s12175_s18  ;;  %9745 = vrot.lane.b32.xlu0 %v9661_v40, %s12175_s18  ;;  %v9660_v29 = vld [vmem:[#allocation3 + $0xf9] sm:$0xff]  ;;  %v9659_v41 = vld [vmem:[#allocation3 + $0xf1] sm:$0xff] }
 0x9b6   : > { %9634 = vst.msk [vmem:[#allocation3 + $0x128] sm:$0xff] %vm553_vm1, %v9602_v35 }
 0x9b8   : > { %v12031_v56 = vpop.f32.mrb[220].mxu1 }
 0x9b9   : > { %v9607_v39 = vadd.f32 %v12031_v56, %v9575_v54  ;;  %9743 = vrot.lane.b32.xlu1 %v9660_v29, %s12175_s18  ;;  %9741 = vrot.lane.b32.xlu0 %v9659_v41, %s12175_s18  ;;  %v9530_v46 = vpop.f32.mrb[221].mxu1 }
 0x9ba   : > { %v9605_v47 = vadd.f32 %v9573_v1, %v9530_v46  ;;  %v12032_v48 = vpop.f32.mrb[222].mxu1 }
 0x9bb   : > { %9639 = vst.msk [vmem:[#allocation3 + $0x168] sm:$0xff] %vm553_vm1, %v9607_v39  ;;  %v9608_v57 = vadd.f32 %v12032_v48, %v9576_v44  ;;  %v9533_v62 = vpop.f32.mrb[223].mxu1 }
 0x9bc   : > { %9637 = vst.msk [vmem:[#allocation3 + $0x150] sm:$0xff] %vm553_vm1, %v9605_v47  ;;  %v9606_v18 = vadd.f32 %v9574_v49, %v9533_v62  ;;  %v9666_v59 = vld [vmem:[#allocation3 + $0x141] sm:$0xff]  ;;  %v9665_v23 = vld [vmem:[#allocation3 + $0x139] sm:$0xff] }
 0x9bd   : > { %9640 = vst.msk [vmem:[#allocation3 + $0x170] sm:$0xff] %vm553_vm1, %v9608_v57  ;;  %9755 = vrot.lane.b32.xlu1 %v9666_v59, %s12175_s18  ;;  %9753 = vrot.lane.b32.xlu0 %v9665_v23, %s12175_s18  ;;  %v9664_v36 = vld [vmem:[#allocation3 + $0x129] sm:$0xff]  ;;  %v9663_v12 = vld [vmem:[#allocation3 + $0x121] sm:$0xff] }
 0x9be   : > { %9638 = vst.msk [vmem:[#allocation3 + $0x158] sm:$0xff] %vm553_vm1, %v9606_v18 }
 0x9c1   : > { %9751 = vrot.lane.b32.xlu1 %v9664_v36, %s12175_s18  ;;  %9749 = vrot.lane.b32.xlu0 %v9663_v12, %s12175_s18 }
 0x9c4   : > { %v9670_v38 = vld [vmem:[#allocation3 + $0x171] sm:$0xff]  ;;  %v9669_v55 = vld [vmem:[#allocation3 + $0x169] sm:$0xff] }
 0x9c5   : > { %9763 = vrot.lane.b32.xlu1 %v9670_v38, %s12175_s18  ;;  %9761 = vrot.lane.b32.xlu0 %v9669_v55, %s12175_s18  ;;  %v9668_v14 = vld [vmem:[#allocation3 + $0x159] sm:$0xff]  ;;  %v9667_v27 = vld [vmem:[#allocation3 + $0x151] sm:$0xff] }
 0x9c9   : > { %9759 = vrot.lane.b32.xlu1 %v9668_v14, %s12175_s18  ;;  %9757 = vrot.lane.b32.xlu0 %v9667_v27, %s12175_s18 }
 0x9cd   : > { %9767 = vrot.lane.b32.xlu1 %v9672_v26, %s12175_s18  ;;  %9765 = vrot.lane.b32.xlu0 %v9671_v8, %s12175_s18  ;;  %s12114_s18 = scalar_lea.vmem %s12113_s30, 8192 }
 0x9ce   : > { %p12116_p1 = scmp.lt.s32.totalorder %s12114_s18, %s12108_s26 }
 0x9d0   : > { %p12117_p2 = por %p12116_p1, %p12115_p0 }
 0x9d2   : > { %p12118_p3 = pnand %p12117_p2, %p12111_p13 }
 0x9ff   : > { %v9708_v61 = vpop.permute.xlu1 %9707  ;;  %v9706_v52 = vpop.permute.xlu0 %9705 }
 0xa00   : > { %9803 = vst.msk [vmem:[#allocation2 + $0x8] sm:$0xff] %vm9801_vm9, %v9708_v61  ;;  %9802 = vst.msk [vmem:[#allocation2] sm:$0xff] %vm9801_vm9, %v9706_v52 }
 0xa07   : > { %v9835_v24 = vld [vmem:[#allocation2 + $0x8] sm:$0xff]  ;;  %v9834_v63 = vld [vmem:[#allocation2] sm:$0xff]  ;;  %v9716_v43 = vpop.permute.xlu1 %9715  ;;  %v9714_v19 = vpop.permute.xlu0 %9713 }
 0xa08   : > { %9868 = vst.msk [vmem:[%s15275_s23 + $0x8] sm:$0xff] %vm9866_vm10, %v9835_v24  ;;  %9867 = vst.msk [vmem:[%s15275_s23] sm:$0xff] %vm9866_vm10, %v9834_v63 }
 0xa09   : > { %9807 = vst.msk [vmem:[#allocation2 + $0x28] sm:$0xff] %vm9801_vm9, %v9716_v43  ;;  %9806 = vst.msk [vmem:[#allocation2 + $0x20] sm:$0xff] %vm9801_vm9, %v9714_v19 }
 0xa0b   : > { %v9712_v20 = vpop.permute.xlu1 %9711  ;;  %v9710_v42 = vpop.permute.xlu0 %9709 }
 0xa0c   : > { %9805 = vst.msk [vmem:[#allocation2 + $0x18] sm:$0xff] %vm9801_vm9, %v9712_v20  ;;  %9804 = vst.msk [vmem:[#allocation2 + $0x10] sm:$0xff] %vm9801_vm9, %v9710_v42 }
 0xa0f   : > { %v9724_v7 = vpop.permute.xlu1 %9723  ;;  %v9722_v3 = vpop.permute.xlu0 %9721 }
 0xa10   : > { %v9839_v0 = vld [vmem:[#allocation2 + $0x28] sm:$0xff]  ;;  %v9838_v2 = vld [vmem:[#allocation2 + $0x20] sm:$0xff]  ;;  %9811 = vst.msk [vmem:[#allocation2 + $0x48] sm:$0xff] %vm9801_vm9, %v9724_v7  ;;  %9810 = vst.msk [vmem:[#allocation2 + $0x40] sm:$0xff] %vm9801_vm9, %v9722_v3 }
 0xa11   : > { %9872 = vst.msk [vmem:[%s15275_s23 + $0x28] sm:$0xff] %vm9866_vm10, %v9839_v0  ;;  %9871 = vst.msk [vmem:[%s15275_s23 + $0x20] sm:$0xff] %vm9866_vm10, %v9838_v2 }
 0xa13   : > { %v9837_v9 = vld [vmem:[#allocation2 + $0x18] sm:$0xff]  ;;  %v9836_v4 = vld [vmem:[#allocation2 + $0x10] sm:$0xff]  ;;  %v9720_v37 = vpop.permute.xlu1 %9719  ;;  %v9718_v11 = vpop.permute.xlu0 %9717 }
 0xa14   : > { %9870 = vst.msk [vmem:[%s15275_s23 + $0x18] sm:$0xff] %vm9866_vm10, %v9837_v9  ;;  %9869 = vst.msk [vmem:[%s15275_s23 + $0x10] sm:$0xff] %vm9866_vm10, %v9836_v4 }
 0xa15   : > { %9809 = vst.msk [vmem:[#allocation2 + $0x38] sm:$0xff] %vm9801_vm9, %v9720_v37  ;;  %9808 = vst.msk [vmem:[#allocation2 + $0x30] sm:$0xff] %vm9801_vm9, %v9718_v11 }
 0xa17   : > { %v9843_v21 = vld [vmem:[#allocation2 + $0x48] sm:$0xff]  ;;  %v9842_v13 = vld [vmem:[#allocation2 + $0x40] sm:$0xff]  ;;  %v9732_v15 = vpop.permute.xlu1 %9731  ;;  %v9730_v30 = vpop.permute.xlu0 %9729 }
 0xa18   : > { %9876 = vst.msk [vmem:[%s15275_s23 + $0x48] sm:$0xff] %vm9866_vm10, %v9843_v21  ;;  %9875 = vst.msk [vmem:[%s15275_s23 + $0x40] sm:$0xff] %vm9866_vm10, %v9842_v13 }
 0xa19   : > { %9815 = vst.msk [vmem:[#allocation2 + $0x68] sm:$0xff] %vm9801_vm9, %v9732_v15  ;;  %9814 = vst.msk [vmem:[#allocation2 + $0x60] sm:$0xff] %vm9801_vm9, %v9730_v30 }
 0xa1b   : > { %v9728_v10 = vpop.permute.xlu1 %9727  ;;  %v9726_v17 = vpop.permute.xlu0 %9725 }
 0xa1c   : > { %v9841_v31 = vld [vmem:[#allocation2 + $0x38] sm:$0xff]  ;;  %v9840_v16 = vld [vmem:[#allocation2 + $0x30] sm:$0xff]  ;;  %9813 = vst.msk [vmem:[#allocation2 + $0x58] sm:$0xff] %vm9801_vm9, %v9728_v10  ;;  %9812 = vst.msk [vmem:[#allocation2 + $0x50] sm:$0xff] %vm9801_vm9, %v9726_v17 }
 0xa1d   : > { %9874 = vst.msk [vmem:[%s15275_s23 + $0x38] sm:$0xff] %vm9866_vm10, %v9841_v31  ;;  %9873 = vst.msk [vmem:[%s15275_s23 + $0x30] sm:$0xff] %vm9866_vm10, %v9840_v16 }
 0xa1f   : > { %v9740_v28 = vpop.permute.xlu1 %9739  ;;  %v9738_v32 = vpop.permute.xlu0 %9737 }
 0xa20   : > { %v9847_v22 = vld [vmem:[#allocation2 + $0x68] sm:$0xff]  ;;  %v9846_v25 = vld [vmem:[#allocation2 + $0x60] sm:$0xff]  ;;  %9819 = vst.msk [vmem:[#allocation2 + $0x88] sm:$0xff] %vm9801_vm9, %v9740_v28  ;;  %9818 = vst.msk [vmem:[#allocation2 + $0x80] sm:$0xff] %vm9801_vm9, %v9738_v32 }
 0xa21   : > { %9880 = vst.msk [vmem:[%s15275_s23 + $0x68] sm:$0xff] %vm9866_vm10, %v9847_v22  ;;  %9879 = vst.msk [vmem:[%s15275_s23 + $0x60] sm:$0xff] %vm9866_vm10, %v9846_v25 }
 0xa23   : > { %v9845_v45 = vld [vmem:[#allocation2 + $0x58] sm:$0xff]  ;;  %v9844_v33 = vld [vmem:[#allocation2 + $0x50] sm:$0xff]  ;;  %v9736_v58 = vpop.permute.xlu1 %9735  ;;  %v9734_v6 = vpop.permute.xlu0 %9733 }
 0xa24   : > { %9878 = vst.msk [vmem:[%s15275_s23 + $0x58] sm:$0xff] %vm9866_vm10, %v9845_v45  ;;  %9877 = vst.msk [vmem:[%s15275_s23 + $0x50] sm:$0xff] %vm9866_vm10, %v9844_v33 }
 0xa25   : > { %9817 = vst.msk [vmem:[#allocation2 + $0x78] sm:$0xff] %vm9801_vm9, %v9736_v58  ;;  %9816 = vst.msk [vmem:[#allocation2 + $0x70] sm:$0xff] %vm9801_vm9, %v9734_v6 }
 0xa27   : > { %v9851_v60 = vld [vmem:[#allocation2 + $0x88] sm:$0xff]  ;;  %v9850_v34 = vld [vmem:[#allocation2 + $0x80] sm:$0xff]  ;;  %v9748_v5 = vpop.permute.xlu1 %9747  ;;  %v9746_v50 = vpop.permute.xlu0 %9745 }
 0xa28   : > { %9884 = vst.msk [vmem:[%s15275_s23 + $0x88] sm:$0xff] %vm9866_vm10, %v9851_v60  ;;  %9883 = vst.msk [vmem:[%s15275_s23 + $0x80] sm:$0xff] %vm9866_vm10, %v9850_v34 }
 0xa29   : > { %9823 = vst.msk [vmem:[#allocation2 + $0xa8] sm:$0xff] %vm9801_vm9, %v9748_v5  ;;  %9822 = vst.msk [vmem:[#allocation2 + $0xa0] sm:$0xff] %vm9801_vm9, %v9746_v50 }
 0xa2b   : > { %v9744_v53 = vpop.permute.xlu1 %9743  ;;  %v9742_v40 = vpop.permute.xlu0 %9741 }
 0xa2c   : > { %v9849_v51 = vld [vmem:[#allocation2 + $0x78] sm:$0xff]  ;;  %v9848_v35 = vld [vmem:[#allocation2 + $0x70] sm:$0xff]  ;;  %9821 = vst.msk [vmem:[#allocation2 + $0x98] sm:$0xff] %vm9801_vm9, %v9744_v53  ;;  %9820 = vst.msk [vmem:[#allocation2 + $0x90] sm:$0xff] %vm9801_vm9, %v9742_v40 }
 0xa2d   : > { %9882 = vst.msk [vmem:[%s15275_s23 + $0x78] sm:$0xff] %vm9866_vm10, %v9849_v51  ;;  %9881 = vst.msk [vmem:[%s15275_s23 + $0x70] sm:$0xff] %vm9866_vm10, %v9848_v35 }
 0xa2f   : > { %v9756_v29 = vpop.permute.xlu1 %9755  ;;  %v9754_v41 = vpop.permute.xlu0 %9753 }
 0xa30   : > { %v9855_v56 = vld [vmem:[#allocation2 + $0xa8] sm:$0xff]  ;;  %v9854_v54 = vld [vmem:[#allocation2 + $0xa0] sm:$0xff]  ;;  %9827 = vst.msk [vmem:[#allocation2 + $0xc8] sm:$0xff] %vm9801_vm9, %v9756_v29  ;;  %9826 = vst.msk [vmem:[#allocation2 + $0xc0] sm:$0xff] %vm9801_vm9, %v9754_v41 }
 0xa31   : > { %9888 = vst.msk [vmem:[%s15275_s23 + $0xa8] sm:$0xff] %vm9866_vm10, %v9855_v56  ;;  %9887 = vst.msk [vmem:[%s15275_s23 + $0xa0] sm:$0xff] %vm9866_vm10, %v9854_v54 }
 0xa33   : > { %v9853_v39 = vld [vmem:[#allocation2 + $0x98] sm:$0xff]  ;;  %v9852_v46 = vld [vmem:[#allocation2 + $0x90] sm:$0xff]  ;;  %v9752_v1 = vpop.permute.xlu1 %9751  ;;  %v9750_v47 = vpop.permute.xlu0 %9749 }
 0xa34   : > { %9886 = vst.msk [vmem:[%s15275_s23 + $0x98] sm:$0xff] %vm9866_vm10, %v9853_v39  ;;  %9885 = vst.msk [vmem:[%s15275_s23 + $0x90] sm:$0xff] %vm9866_vm10, %v9852_v46 }
 0xa35   : > { %9825 = vst.msk [vmem:[#allocation2 + $0xb8] sm:$0xff] %vm9801_vm9, %v9752_v1  ;;  %9824 = vst.msk [vmem:[#allocation2 + $0xb0] sm:$0xff] %vm9801_vm9, %v9750_v47 }
 0xa37   : > { %v9859_v48 = vld [vmem:[#allocation2 + $0xc8] sm:$0xff]  ;;  %v9858_v44 = vld [vmem:[#allocation2 + $0xc0] sm:$0xff]  ;;  %v9764_v57 = vpop.permute.xlu1 %9763  ;;  %v9762_v62 = vpop.permute.xlu0 %9761 }
 0xa38   : > { %9892 = vst.msk [vmem:[%s15275_s23 + $0xc8] sm:$0xff] %vm9866_vm10, %v9859_v48  ;;  %9891 = vst.msk [vmem:[%s15275_s23 + $0xc0] sm:$0xff] %vm9866_vm10, %v9858_v44 }
 0xa39   : > { %9831 = vst.msk [vmem:[#allocation2 + $0xe8] sm:$0xff] %vm9801_vm9, %v9764_v57  ;;  %9830 = vst.msk [vmem:[#allocation2 + $0xe0] sm:$0xff] %vm9801_vm9, %v9762_v62 }
 0xa3b   : > { %v9760_v59 = vpop.permute.xlu1 %9759  ;;  %v9758_v23 = vpop.permute.xlu0 %9757 }
 0xa3c   : > { %v9857_v49 = vld [vmem:[#allocation2 + $0xb8] sm:$0xff]  ;;  %v9856_v18 = vld [vmem:[#allocation2 + $0xb0] sm:$0xff]  ;;  %9829 = vst.msk [vmem:[#allocation2 + $0xd8] sm:$0xff] %vm9801_vm9, %v9760_v59  ;;  %9828 = vst.msk [vmem:[#allocation2 + $0xd0] sm:$0xff] %vm9801_vm9, %v9758_v23 }
 0xa3d   : > { %9890 = vst.msk [vmem:[%s15275_s23 + $0xb8] sm:$0xff] %vm9866_vm10, %v9857_v49  ;;  %9889 = vst.msk [vmem:[%s15275_s23 + $0xb0] sm:$0xff] %vm9866_vm10, %v9856_v18 }
 0xa3f   : > { %v9768_v38 = vpop.permute.xlu1 %9767  ;;  %v9766_v55 = vpop.permute.xlu0 %9765 }
 0xa40   : > { %v9863_v36 = vld [vmem:[#allocation2 + $0xe8] sm:$0xff]  ;;  %v9862_v12 = vld [vmem:[#allocation2 + $0xe0] sm:$0xff]  ;;  %9833 = vst.msk [vmem:[#allocation2 + $0xf8] sm:$0xff] %vm9801_vm9, %v9768_v38  ;;  %9832 = vst.msk [vmem:[#allocation2 + $0xf0] sm:$0xff] %vm9801_vm9, %v9766_v55 }
 0xa41   : > { %9896 = vst.msk [vmem:[%s15275_s23 + $0xe8] sm:$0xff] %vm9866_vm10, %v9863_v36  ;;  %9895 = vst.msk [vmem:[%s15275_s23 + $0xe0] sm:$0xff] %vm9866_vm10, %v9862_v12 }
 0xa43   : > { %v9861_v14 = vld [vmem:[#allocation2 + $0xd8] sm:$0xff]  ;;  %v9860_v27 = vld [vmem:[#allocation2 + $0xd0] sm:$0xff] }
 0xa44   : > { %9894 = vst.msk [vmem:[%s15275_s23 + $0xd8] sm:$0xff] %vm9866_vm10, %v9861_v14  ;;  %9893 = vst.msk [vmem:[%s15275_s23 + $0xd0] sm:$0xff] %vm9866_vm10, %v9860_v27 }
 0xa47   : > { %v9865_v26 = vld [vmem:[#allocation2 + $0xf8] sm:$0xff]  ;;  %v9864_v8 = vld [vmem:[#allocation2 + $0xf0] sm:$0xff] }
 0xa48   : > { %9898 = vst.msk [vmem:[%s15275_s23 + $0xf8] sm:$0xff] %vm9866_vm10, %v9865_v26  ;;  %9897 = vst.msk [vmem:[%s15275_s23 + $0xf0] sm:$0xff] %vm9866_vm10, %v9864_v8 }
 0xa49   : > { %12121 = shalt.err (!%p12118_p3)
}
 0xa4a   : > { %s12122_s19 = scalar_lea.hbm %s15372_s20, 4096  ;;  %s12126_s28 = scalar_lea.hbm %s15440_s16, 8192 }
 0xa4b   : > { %p12123_p4 = scmp.ne.s32.totalorder %s15372_s20, %s12122_s19  ;;  %p12127_p9 = scmp.lt.u32.totalorder %s15372_s20, %s15440_s16 }
 0xa4c   : > { %p12128_p10 = scmp.lt.u32.totalorder %s12126_s28, %s12122_s19  ;;  %p12130_p12 = scmp.lt.u32.totalorder %s12122_s19, %s15372_s20 }
 0xa4d   : > { %p12124_p7 = pnand %p12123_p4, %p12301_p5 }
 0xa4e   : > { %p12129_p11 = por %p12128_p10, %p12127_p9 }
 0xa4f   : > { %p12125_p8 = pneg %p12124_p7 }
 0xa50   : > { %p12131_p13 = por %p12130_p12, %p12129_p11 }
 0xa52   : > { %p12132_p0 = pnand %p12131_p13, %p12125_p8 }
 0xa54   : > { %12135 = shalt.err (!%p12132_p0)
}
 0xa55   : > { %s12177_s26 = smov 128   ;;  %s15453_s18 = smov 8  }
 0xa56   : > { %12063 = dma.vmem_to_hbm [thread:$0]  (%p12301_p5), %s15374_s29, 4096, %s15372_s20, %s15382_s25, %s12177_s26, %s12177_s26, %s15453_s18  }
 0xa57 PF: > { %p12069_p1 = scmp.ge.s32.totalorder %s12170_s24, 2  ;;  %s9928_s1 = sand.u32 1, %s12158_s21  }
 0xa58   : > { %s9929_s2 = scalar_lea.sflag [#allocation5], %s9928_s1 }
 0xa59   : > { %p12066_p2 = pnand %p12069_p1, %p12305_p6 }
 0xa5b   : > { %12153 = dma.done.wait (!%p12066_p2), %s9929_s2, 4096  }
 0xa5c   : > { %12155 = vsyncadd (!%p12066_p2), %s9929_s2, 4294963200  ;;  %s15454_s19 = sld [smem:[#allocation7_spill]]  ;;  %s15455_s23 = sld [smem:[#allocation8_spill]] }
 0xa5d   : > { %p26_p3 = scmp.ge.s32.totalorder %s12288_s27, 4   ;;  %s15456_s21 = smov %s12162_s22 }
 0xa5e   : > { %s15458_s24 = smov %s12288_s27 }
 0xa5f   :  { %28 = sbr.rel (!%p26_p3) target bundleno = 7 (0x7), region = 145 }
 0xa62   : > { %s15457_s22 = smov %s15454_s19 }
 0xa66   :  { %9934 = vsyncpa [#allocation5], 1 }
 0xa67   :  { %9936 = vsyncpa [#allocation5 + $0x1], 1 }

</bundles_post_ra>
